<compile_context>
chip_gen: v6e
topology: v6e:2x2x1
jax: 0.10.0
libtpu: 0.0.40
codegen_flags: <defaults>
</compile_context>

<pallas_src>
import functools

import jax
import jax.numpy as jnp
from jax.experimental import pallas as pl
from jax.experimental.pallas import tpu as pltpu


# ----------------------------------------------------------------------------
# Generation-aware VMEM limit
# ----------------------------------------------------------------------------
def _default_vmem_limit():
    try:
        kind = jax.devices()[0].device_kind.lower()
    except Exception:
        kind = ""
    if "v7" in kind or "7x" in kind:
        # v7x: only 64 MiB physical VMEM per TensorCore -> leave headroom for
        # double-buffering and compiler scratch.
        return 40 * 1024 * 1024
    # v5e / v6e: 128 MiB physical.
    return 64 * 1024 * 1024


_VMEM_LIMIT = _default_vmem_limit()


def _round_up(x, m):
    return ((x + m - 1) // m) * m


def _choose_tile(dim, target, align):
    """Pick a tile size (multiple of `align`, <= target) minimizing padding."""
    dp = _round_up(dim, align)
    if dp <= target:
        return dp
    best_key, best_t = None, align
    for t in range(target, align - 1, -align):
        padded = _round_up(dim, t)
        key = (padded, -t)  # minimize padded size, then prefer larger tiles
        if best_key is None or key < best_key:
            best_key, best_t = key, t
    return best_t


# ----------------------------------------------------------------------------
# Pallas kernels: tiled matmul with fused BN affine (+residual) (+ReLU)
# ----------------------------------------------------------------------------
def _mm_kernel(x_ref, w_ref, s_ref, b_ref, o_ref, acc_ref, *, relu):
    k = pl.program_id(2)

    @pl.when(k == 0)
    def _():
        acc_ref[...] = jnp.zeros_like(acc_ref)

    acc_ref[...] += jnp.dot(x_ref[...], w_ref[...], preferred_element_type=jnp.float32)

    @pl.when(k == pl.num_programs(2) - 1)
    def _():
        out = acc_ref[...] * s_ref[...] + b_ref[...]
        if relu:
            out = jnp.maximum(out, 0.0)
        o_ref[...] = out.astype(o_ref.dtype)


def _mm_res_kernel(x_ref, w_ref, s_ref, b_ref, r_ref, o_ref, acc_ref, *, relu):
    k = pl.program_id(2)

    @pl.when(k == 0)
    def _():
        acc_ref[...] = jnp.zeros_like(acc_ref)

    acc_ref[...] += jnp.dot(x_ref[...], w_ref[...], preferred_element_type=jnp.float32)

    @pl.when(k == pl.num_programs(2) - 1)
    def _():
        out = acc_ref[...] * s_ref[...] + b_ref[...] + r_ref[...]
        if relu:
            out = jnp.maximum(out, 0.0)
        o_ref[...] = out.astype(o_ref.dtype)


def pallas_matmul_affine(x, w, scale, bias, residual=None, relu=False):
    """out = relu( (x @ w) * scale + bias [+ residual] ).

    x: (M, K), w: (K, N) -> cast to bf16 for the MXU; f32 accumulation/epilogue.
    """
    M, K = x.shape
    N = w.shape[1]

    tm = _choose_tile(M, 512, 16)    # 16: bf16 sublane packing of x tiles
    tn = _choose_tile(N, 256, 128)   # 128: lane width
    tk = _choose_tile(K, 1024, 128)  # keep K tiles large to amortize per-step cost

    Mp, Kp, Np = _round_up(M, tm), _round_up(K, tk), _round_up(N, tn)
    gm, gn, gk = Mp // tm, Np // tn, Kp // tk

    xb = jnp.pad(x.astype(jnp.bfloat16), ((0, Mp - M), (0, Kp - K)))
    wb = jnp.pad(w.astype(jnp.bfloat16), ((0, Kp - K), (0, Np - N)))
    s2 = jnp.pad(scale.reshape(1, N).astype(jnp.float32), ((0, 0), (0, Np - N)))
    b2 = jnp.pad(bias.reshape(1, N).astype(jnp.float32), ((0, 0), (0, Np - N)))

    in_specs = [
        pl.BlockSpec((tm, tk), lambda i, j, k: (i, k)),
        pl.BlockSpec((tk, tn), lambda i, j, k: (k, j)),
        pl.BlockSpec((1, tn), lambda i, j, k: (0, j)),
        pl.BlockSpec((1, tn), lambda i, j, k: (0, j)),
    ]
    args = [xb, wb, s2, b2]

    if residual is None:
        kernel = functools.partial(_mm_kernel, relu=relu)
        res_bytes = 0
    else:
        rp = jnp.pad(residual.astype(jnp.float32), ((0, Mp - M), (0, Np - N)))
        in_specs.append(pl.BlockSpec((tm, tn), lambda i, j, k: (i, j)))
        args.append(rp)
        kernel = functools.partial(_mm_res_kernel, relu=relu)
        res_bytes = Mp * Np * 4

    cost = pl.CostEstimate(
        flops=2 * Mp * Np * Kp,
        transcendentals=0,
        bytes_accessed=Mp * Kp * 2 + Kp * Np * 2 + Mp * Np * 4 + res_bytes,
    )

    out = pl.pallas_call(
        kernel,
        out_shape=jax.ShapeDtypeStruct((Mp, Np), jnp.float32),
        grid_spec=pltpu.PrefetchScalarGridSpec(
            num_scalar_prefetch=0,
            grid=(gm, gn, gk),
            in_specs=in_specs,
            out_specs=pl.BlockSpec((tm, tn), lambda i, j, k: (i, j)),
            scratch_shapes=[pltpu.VMEM((tm, tn), jnp.float32)],
        ),
        compiler_params=pltpu.CompilerParams(
            dimension_semantics=("parallel", "parallel", "arbitrary"),
            vmem_limit_bytes=_VMEM_LIMIT,
        ),
        cost_estimate=cost,
    )(*args)

    if Mp != M or Np != N:
        out = out[:M, :N]
    return out


# ----------------------------------------------------------------------------
# Conv / pooling glue (plain JAX around the Pallas matmul)
# ----------------------------------------------------------------------------
def _extract_patches(x_nhwc, kh, kw, stride, pad):
    """Gather kh*kw shifted taps (bf16) -> (N*Ho*Wo, kh*kw*Cin), tap order (kh, kw, c)."""
    n, h, w, c = x_nhwc.shape
    xp = jnp.pad(x_nhwc, ((0, 0), (pad, pad), (pad, pad), (0, 0)))
    ho = (h + 2 * pad - kh) // stride + 1
    wo = (w + 2 * pad - kw) // stride + 1
    cols = []
    for i in range(kh):
        for j in range(kw):
            cols.append(
                xp[
                    :,
                    i : i + (ho - 1) * stride + 1 : stride,
                    j : j + (wo - 1) * stride + 1 : stride,
                    :,
                ]
            )
    patches = jnp.concatenate(cols, axis=-1)
    return patches.reshape(n * ho * wo, kh * kw * c), (n, ho, wo)


def conv_bn(x_nhwc, w_pt, bn_scale, bn_bias, stride, pad, relu=True, residual=None):
    """Conv2d (no bias) + folded BatchNorm affine (+ residual) (+ ReLU)."""
    cout, cin, kh, kw = w_pt.shape
    if kh == 1 and kw == 1:
        # 1x1 conv: no patch extraction, just a strided spatial subsample.
        xs = x_nhwc[:, ::stride, ::stride, :]
        n, ho, wo, _ = xs.shape
        patches = xs.reshape(n * ho * wo, cin).astype(jnp.bfloat16)
    else:
        patches, (n, ho, wo) = _extract_patches(
            x_nhwc.astype(jnp.bfloat16), kh, kw, stride, pad
        )
    # weight (Cout, Cin, kh, kw) -> rows ordered (kh, kw, Cin) to match the taps
    w_mat = jnp.transpose(w_pt, (2, 3, 1, 0)).reshape(kh * kw * cin, cout)
    res_flat = None
    if residual is not None:
        res_flat = residual.reshape(n * ho * wo, cout)
    out = pallas_matmul_affine(
        patches, w_mat, bn_scale, bn_bias, residual=res_flat, relu=relu
    )
    return out.reshape(n, ho, wo, cout)


def maxpool2d(x_nhwc, k=3, stride=2, pad=1):
    """Plain-JAX reduction tree (XLA fuses it); avoids the 9x HBM tap stack."""
    n, h, w, c = x_nhwc.shape
    xp = jnp.pad(
        x_nhwc, ((0, 0), (pad, pad), (pad, pad), (0, 0)), constant_values=-jnp.inf
    )
    ho = (h + 2 * pad - k) // stride + 1
    wo = (w + 2 * pad - k) // stride + 1
    out = None
    for i in range(k):
        for j in range(k):
            tap = xp[
                :,
                i : i + (ho - 1) * stride + 1 : stride,
                j : j + (wo - 1) * stride + 1 : stride,
                :,
            ]
            out = tap if out is None else jnp.maximum(out, tap)
    return out


def avgpool_flatten(x_nhwc):
    n, h, w, c = x_nhwc.shape
    # Trivial VPU reduction; leave to XLA (fuses with surrounding reshapes).
    return jnp.mean(x_nhwc.reshape(n, h * w, c), axis=1)


# ----------------------------------------------------------------------------
# ResNet18 BasicBlock + model forward
# ----------------------------------------------------------------------------
def basic_block(x, p, stride):
    out = conv_bn(x, p["conv1_w"], p["bn1_s"], p["bn1_b"], stride, 1, relu=True)
    if "down_w" in p:
        identity = conv_bn(
            x, p["down_w"], p["dbn_s"], p["dbn_b"], stride, 0, relu=False
        )
    else:
        identity = x
    out = conv_bn(
        out, p["conv2_w"], p["bn2_s"], p["bn2_b"], 1, 1, relu=True, residual=identity
    )
    return out


@functools.partial(jax.jit, static_argnames=("return_type",))
def multitask_resnet_forward(params, x_nchw, return_type="both"):
    x = jnp.transpose(x_nchw, (0, 2, 3, 1)).astype(jnp.float32)  # NCHW -> NHWC

    # first_layer conv (7x7 s2) + bn1 + relu + maxpool (3x3 s2)
    x = conv_bn(x, params["conv1_w"], params["bn1_s"], params["bn1_b"], 2, 3, relu=True)
    x = maxpool2d(x)

    # resnet_features = layer1, layer2, layer3
    first_stride = {"layer1": 1, "layer2": 2, "layer3": 2}
    for name in ("layer1", "layer2", "layer3"):
        x = basic_block(x, params[name][0], first_stride[name])
        x = basic_block(x, params[name][1], 1)

    # layer4 is the SAME nn.Module in both branches (shared weights), so both
    # branches produce identical pooled features; compute it once.
    f = basic_block(x, params["layer4"][0], 2)
    f = basic_block(f, params["layer4"][1], 1)
    feat = avgpool_flatten(f)  # (N, 512)

    # Fused FC heads: one lane-padded matmul, sliced afterwards.
    ns = params["fc_subject_w"].shape[0]
    na = params["fc_activity_w"].shape[0]
    w_heads = jnp.concatenate(
        [params["fc_subject_w"].T, params["fc_activity_w"].T], axis=1
    )  # (512, ns + na)
    b_heads = jnp.concatenate([params["fc_subject_b"], params["fc_activity_b"]])
    ones = jnp.ones_like(b_heads)
    logits = pallas_matmul_affine(feat, w_heads, ones, b_heads, relu=False)
    subject = logits[:, :ns]
    activity = logits[:, ns : ns + na]

    if return_type == "subject":
        return subject
    if return_type == "activity":
        return activity
    return subject, activity


# ----------------------------------------------------------------------------
# Deterministic parameter initialization (shapes follow torchvision resnet18)
# ----------------------------------------------------------------------------
class _KeyGen:
    def __init__(self, key):
        self._key = key

    def __call__(self):
        self._key, sub = jax.random.split(self._key)
        return sub


def _conv_w(kg, cout, cin, k):
    fan_in = cin * k * k
    return jax.random.normal(kg(), (cout, cin, k, k), jnp.float32) * jnp.sqrt(
        2.0 / fan_in
    )


def _bn_fold(kg, c, eps=1e-5):
    gamma = 1.0 + 0.1 * jax.random.normal(kg(), (c,), jnp.float32)
    beta = 0.1 * jax.random.normal(kg(), (c,), jnp.float32)
    mean = 0.1 * jax.random.normal(kg(), (c,), jnp.float32)
    var = 1.0 + 0.1 * jnp.abs(jax.random.normal(kg(), (c,), jnp.float32))
    scale = gamma / jnp.sqrt(var + eps)
    bias = beta - mean * scale
    return scale, bias


def _linear(kg, cout, cin):
    w = jax.random.normal(kg(), (cout, cin), jnp.float32) / jnp.sqrt(float(cin))
    b = 0.01 * jax.random.normal(kg(), (cout,), jnp.float32)
    return w, b


def init_params(key, num_classes_subject, num_classes_activity):
    kg = _KeyGen(key)
    p = {}
    p["conv1_w"] = _conv_w(kg, 64, 1, 7)  # first_layer: Conv2d(1, 64, 7, s2, p3)
    p["bn1_s"], p["bn1_b"] = _bn_fold(kg, 64)

    def block(cin, cout, down):
        bp = {"conv1_w": _conv_w(kg, cout, cin, 3)}
        bp["bn1_s"], bp["bn1_b"] = _bn_fold(kg, cout)
        bp["conv2_w"] = _conv_w(kg, cout, cout, 3)
        bp["bn2_s"], bp["bn2_b"] = _bn_fold(kg, cout)
        if down:
            bp["down_w"] = _conv_w(kg, cout, cin, 1)
            bp["dbn_s"], bp["dbn_b"] = _bn_fold(kg, cout)
        return bp

    p["layer1"] = [block(64, 64, False), block(64, 64, False)]
    p["layer2"] = [block(64, 128, True), block(128, 128, False)]
    p["layer3"] = [block(128, 256, True), block(256, 256, False)]
    p["layer4"] = [block(256, 512, True), block(512, 512, False)]
    p["fc_subject_w"], p["fc_subject_b"] = _linear(kg, num_classes_subject, 512)
    p["fc_activity_w"], p["fc_activity_b"] = _linear(kg, num_classes_activity, 512)
    return p


# ----------------------------------------------------------------------------
if __name__ == "__main__":
    key = jax.random.PRNGKey(0)
    pkey, xkey = jax.random.split(key)

    num_classes_subject, num_classes_activity = 5, 7
    params = init_params(pkey, num_classes_subject, num_classes_activity)

    # small input consistent with a 1-channel ResNet18: (N=2, C=1, H=32, W=32)
    x = jax.random.normal(xkey, (2, 1, 32, 32), jnp.float32)

    subject, activity = multitask_resnet_forward(params, x, return_type="both")
    jax.block_until_ready((subject, activity))

    assert subject.shape == (2, num_classes_subject)
    assert activity.shape == (2, num_classes_activity)
    assert bool(jnp.all(jnp.isfinite(subject))) and bool(jnp.all(jnp.isfinite(activity)))
    print("KERNEL_OK")
</pallas_src>

<mosaic_0001>
module attributes {stable_mosaic.version = 11 : i64} {
  func.func @_mm_kernel(%arg0: i32, %arg1: i32, %arg2: i32, %arg3: memref<512x128xbf16, #tpu.memory_space<vmem>>, %arg4: memref<128x128xbf16, #tpu.memory_space<vmem>>, %arg5: memref<1x128xf32, #tpu.memory_space<vmem>>, %arg6: memref<1x128xf32, #tpu.memory_space<vmem>>, %arg7: memref<512x128xf32, #tpu.memory_space<vmem>>, %arg8: memref<512x128xf32, #tpu.memory_space<vmem>>) attributes {dimension_semantics = [#tpu.dimension_semantics<parallel>, #tpu.dimension_semantics<parallel>, #tpu.dimension_semantics<arbitrary>], iteration_bounds = array<i64: 1, 1, 1>, scalar_prefetch = 0 : i64, scratch_operands = 1 : i64, tpu.core_type = #tpu.core_type<tc>, window_params = [{transform_indices = @transform_0, window_bounds = array<i64: 512, 128>}, {transform_indices = @transform_1, window_bounds = array<i64: 128, 128>}, {transform_indices = @transform_2, window_bounds = array<i64: 1, 128>}, {transform_indices = @transform_3, window_bounds = array<i64: 1, 128>}, {transform_indices = @transform_4, window_bounds = array<i64: 512, 128>}]} {
    %c0_i32 = arith.constant 0 : i32
    %0 = arith.cmpi eq, %arg2, %c0_i32 : i32
    %1 = arith.extui %0 : i1 to i32
    %c0_i32_0 = arith.constant 0 : i32
    %2 = arith.cmpi ne, %1, %c0_i32_0 : i32
    scf.if %2 {
      %cst_10 = arith.constant 0.000000e+00 : f32
      %12 = vector.broadcast %cst_10 : f32 to vector<512x128xf32>
      %c0_11 = arith.constant 0 : index
      %c0_12 = arith.constant 0 : index
      %13 = vector.load %arg8[%c0_11, %c0_12] : memref<512x128xf32, #tpu.memory_space<vmem>>, vector<512x128xf32>
      tpu.vector_store %arg8[%c0_11, %c0_12], %12 {strides = array<i32>} : memref<512x128xf32, #tpu.memory_space<vmem>>, vector<512x128xf32>,
    } else {
    }
    %c0 = arith.constant 0 : index
    %c0_1 = arith.constant 0 : index
    %3 = vector.load %arg8[%c0, %c0_1] : memref<512x128xf32, #tpu.memory_space<vmem>>, vector<512x128xf32>
    %c0_2 = arith.constant 0 : index
    %c0_3 = arith.constant 0 : index
    %4 = vector.load %arg3[%c0_2, %c0_3] : memref<512x128xbf16, #tpu.memory_space<vmem>>, vector<512x128xbf16>
    %c0_4 = arith.constant 0 : index
    %c0_5 = arith.constant 0 : index
    %5 = vector.load %arg4[%c0_4, %c0_5] : memref<128x128xbf16, #tpu.memory_space<vmem>>, vector<128x128xbf16>
    %cst = arith.constant dense<0.000000e+00> : vector<512x128xf32>
    %6 = tpu.matmul %4, %5, %cst {dimension_numbers = #tpu.dot_dimension_numbers<[1], [0], [0], [1], [0, 0, 1, 1], [], []>} : vector<512x128xbf16>, vector<128x128xbf16>, vector<512x128xf32> -> vector<512x128xf32>
    %7 = arith.addf %3, %6 : vector<512x128xf32>
    %c0_6 = arith.constant 0 : index
    %c0_7 = arith.constant 0 : index
    %8 = vector.load %arg8[%c0_6, %c0_7] : memref<512x128xf32, #tpu.memory_space<vmem>>, vector<512x128xf32>
    tpu.vector_store %arg8[%c0_6, %c0_7], %7 {strides = array<i32>} : memref<512x128xf32, #tpu.memory_space<vmem>>, vector<512x128xf32>,
    %c0_i32_8 = arith.constant 0 : i32
    %9 = arith.cmpi eq, %arg2, %c0_i32_8 : i32
    %10 = arith.extui %9 : i1 to i32
    %c0_i32_9 = arith.constant 0 : i32
    %11 = arith.cmpi ne, %10, %c0_i32_9 : i32
    scf.if %11 {
      %c0_10 = arith.constant 0 : index
      %c0_11 = arith.constant 0 : index
      %12 = vector.load %arg8[%c0_10, %c0_11] : memref<512x128xf32, #tpu.memory_space<vmem>>, vector<512x128xf32>
      %c0_12 = arith.constant 0 : index
      %c0_13 = arith.constant 0 : index
      %13 = vector.load %arg5[%c0_12, %c0_13] : memref<1x128xf32, #tpu.memory_space<vmem>>, vector<1x128xf32>
      %14 = vector.broadcast %13 : vector<1x128xf32> to vector<512x128xf32>
      %15 = arith.mulf %12, %14 : vector<512x128xf32>
      %c0_14 = arith.constant 0 : index
      %c0_15 = arith.constant 0 : index
      %16 = vector.load %arg6[%c0_14, %c0_15] : memref<1x128xf32, #tpu.memory_space<vmem>>, vector<1x128xf32>
      %17 = vector.broadcast %16 : vector<1x128xf32> to vector<512x128xf32>
      %18 = arith.addf %15, %17 : vector<512x128xf32>
      %cst_16 = arith.constant 0.000000e+00 : f32
      %19 = vector.broadcast %cst_16 : f32 to vector<512x128xf32>
      %20 = arith.maximumf %18, %19 : vector<512x128xf32>
      %c0_17 = arith.constant 0 : index
      %c0_18 = arith.constant 0 : index
      %21 = vector.load %arg7[%c0_17, %c0_18] : memref<512x128xf32, #tpu.memory_space<vmem>>, vector<512x128xf32>
      tpu.vector_store %arg7[%c0_17, %c0_18], %20 {strides = array<i32>} : memref<512x128xf32, #tpu.memory_space<vmem>>, vector<512x128xf32>,
    } else {
    }
    return
  }
  func.func @transform_0(%arg0: i32, %arg1: i32, %arg2: i32) -> (i32, i32) {
    %c0_i32 = arith.constant 0 : i32
    return %arg0, %arg2 : i32, i32
  }
  func.func @transform_1(%arg0: i32, %arg1: i32, %arg2: i32) -> (i32, i32) {
    %c0_i32 = arith.constant 0 : i32
    return %arg2, %arg1 : i32, i32
  }
  func.func @transform_2(%arg0: i32, %arg1: i32, %arg2: i32) -> (i32, i32) {
    %c0_i32 = arith.constant 0 : i32
    %c0_i32_0 = arith.constant 0 : i32
    return %c0_i32, %arg1 : i32, i32
  }
  func.func @transform_3(%arg0: i32, %arg1: i32, %arg2: i32) -> (i32, i32) {
    %c0_i32 = arith.constant 0 : i32
    %c0_i32_0 = arith.constant 0 : i32
    return %c0_i32, %arg1 : i32, i32
  }
  func.func @transform_4(%arg0: i32, %arg1: i32, %arg2: i32) -> (i32, i32) {
    %c0_i32 = arith.constant 0 : i32
    return %arg0, %arg1 : i32, i32
  }
}

module attributes {stable_mosaic.version = 11 : i64} {
  func.func @_mm_kernel(%arg0: i32, %arg1: i32, %arg2: i32, %arg3: memref<128x640xbf16, #tpu.memory_space<vmem>>, %arg4: memref<640x128xbf16, #tpu.memory_space<vmem>>, %arg5: memref<1x128xf32, #tpu.memory_space<vmem>>, %arg6: memref<1x128xf32, #tpu.memory_space<vmem>>, %arg7: memref<128x128xf32, #tpu.memory_space<vmem>>, %arg8: memref<128x128xf32, #tpu.memory_space<vmem>>) attributes {dimension_semantics = [#tpu.dimension_semantics<parallel>, #tpu.dimension_semantics<parallel>, #tpu.dimension_semantics<arbitrary>], iteration_bounds = array<i64: 1, 1, 1>, scalar_prefetch = 0 : i64, scratch_operands = 1 : i64, tpu.core_type = #tpu.core_type<tc>, window_params = [{transform_indices = @transform_0, window_bounds = array<i64: 128, 640>}, {transform_indices = @transform_1, window_bounds = array<i64: 640, 128>}, {transform_indices = @transform_2, window_bounds = array<i64: 1, 128>}, {transform_indices = @transform_3, window_bounds = array<i64: 1, 128>}, {transform_indices = @transform_4, window_bounds = array<i64: 128, 128>}]} {
    %c0_i32 = arith.constant 0 : i32
    %0 = arith.cmpi eq, %arg2, %c0_i32 : i32
    %1 = arith.extui %0 : i1 to i32
    %c0_i32_0 = arith.constant 0 : i32
    %2 = arith.cmpi ne, %1, %c0_i32_0 : i32
    scf.if %2 {
      %cst_10 = arith.constant 0.000000e+00 : f32
      %12 = vector.broadcast %cst_10 : f32 to vector<128x128xf32>
      %c0_11 = arith.constant 0 : index
      %c0_12 = arith.constant 0 : index
      %13 = vector.load %arg8[%c0_11, %c0_12] : memref<128x128xf32, #tpu.memory_space<vmem>>, vector<128x128xf32>
      tpu.vector_store %arg8[%c0_11, %c0_12], %12 {strides = array<i32>} : memref<128x128xf32, #tpu.memory_space<vmem>>, vector<128x128xf32>,
    } else {
    }
    %c0 = arith.constant 0 : index
    %c0_1 = arith.constant 0 : index
    %3 = vector.load %arg8[%c0, %c0_1] : memref<128x128xf32, #tpu.memory_space<vmem>>, vector<128x128xf32>
    %c0_2 = arith.constant 0 : index
    %c0_3 = arith.constant 0 : index
    %4 = vector.load %arg3[%c0_2, %c0_3] : memref<128x640xbf16, #tpu.memory_space<vmem>>, vector<128x640xbf16>
    %c0_4 = arith.constant 0 : index
    %c0_5 = arith.constant 0 : index
    %5 = vector.load %arg4[%c0_4, %c0_5] : memref<640x128xbf16, #tpu.memory_space<vmem>>, vector<640x128xbf16>
    %cst = arith.constant dense<0.000000e+00> : vector<128x128xf32>
    %6 = tpu.matmul %4, %5, %cst {dimension_numbers = #tpu.dot_dimension_numbers<[1], [0], [0], [1], [0, 0, 1, 1], [], []>} : vector<128x640xbf16>, vector<640x128xbf16>, vector<128x128xf32> -> vector<128x128xf32>
    %7 = arith.addf %3, %6 : vector<128x128xf32>
    %c0_6 = arith.constant 0 : index
    %c0_7 = arith.constant 0 : index
    %8 = vector.load %arg8[%c0_6, %c0_7] : memref<128x128xf32, #tpu.memory_space<vmem>>, vector<128x128xf32>
    tpu.vector_store %arg8[%c0_6, %c0_7], %7 {strides = array<i32>} : memref<128x128xf32, #tpu.memory_space<vmem>>, vector<128x128xf32>,
    %c0_i32_8 = arith.constant 0 : i32
    %9 = arith.cmpi eq, %arg2, %c0_i32_8 : i32
    %10 = arith.extui %9 : i1 to i32
    %c0_i32_9 = arith.constant 0 : i32
    %11 = arith.cmpi ne, %10, %c0_i32_9 : i32
    scf.if %11 {
      %c0_10 = arith.constant 0 : index
      %c0_11 = arith.constant 0 : index
      %12 = vector.load %arg8[%c0_10, %c0_11] : memref<128x128xf32, #tpu.memory_space<vmem>>, vector<128x128xf32>
      %c0_12 = arith.constant 0 : index
      %c0_13 = arith.constant 0 : index
      %13 = vector.load %arg5[%c0_12, %c0_13] : memref<1x128xf32, #tpu.memory_space<vmem>>, vector<1x128xf32>
      %14 = vector.broadcast %13 : vector<1x128xf32> to vector<128x128xf32>
      %15 = arith.mulf %12, %14 : vector<128x128xf32>
      %c0_14 = arith.constant 0 : index
      %c0_15 = arith.constant 0 : index
      %16 = vector.load %arg6[%c0_14, %c0_15] : memref<1x128xf32, #tpu.memory_space<vmem>>, vector<1x128xf32>
      %17 = vector.broadcast %16 : vector<1x128xf32> to vector<128x128xf32>
      %18 = arith.addf %15, %17 : vector<128x128xf32>
      %cst_16 = arith.constant 0.000000e+00 : f32
      %19 = vector.broadcast %cst_16 : f32 to vector<128x128xf32>
      %20 = arith.maximumf %18, %19 : vector<128x128xf32>
      %c0_17 = arith.constant 0 : index
      %c0_18 = arith.constant 0 : index
      %21 = vector.load %arg7[%c0_17, %c0_18] : memref<128x128xf32, #tpu.memory_space<vmem>>, vector<128x128xf32>
      tpu.vector_store %arg7[%c0_17, %c0_18], %20 {strides = array<i32>} : memref<128x128xf32, #tpu.memory_space<vmem>>, vector<128x128xf32>,
    } else {
    }
    return
  }
  func.func @transform_0(%arg0: i32, %arg1: i32, %arg2: i32) -> (i32, i32) {
    %c0_i32 = arith.constant 0 : i32
    return %arg0, %arg2 : i32, i32
  }
  func.func @transform_1(%arg0: i32, %arg1: i32, %arg2: i32) -> (i32, i32) {
    %c0_i32 = arith.constant 0 : i32
    return %arg2, %arg1 : i32, i32
  }
  func.func @transform_2(%arg0: i32, %arg1: i32, %arg2: i32) -> (i32, i32) {
    %c0_i32 = arith.constant 0 : i32
    %c0_i32_0 = arith.constant 0 : i32
    return %c0_i32, %arg1 : i32, i32
  }
  func.func @transform_3(%arg0: i32, %arg1: i32, %arg2: i32) -> (i32, i32) {
    %c0_i32 = arith.constant 0 : i32
    %c0_i32_0 = arith.constant 0 : i32
    return %c0_i32, %arg1 : i32, i32
  }
  func.func @transform_4(%arg0: i32, %arg1: i32, %arg2: i32) -> (i32, i32) {
    %c0_i32 = arith.constant 0 : i32
    return %arg0, %arg1 : i32, i32
  }
}

module attributes {stable_mosaic.version = 11 : i64} {
  func.func @_mm_res_kernel(%arg0: i32, %arg1: i32, %arg2: i32, %arg3: memref<128x640xbf16, #tpu.memory_space<vmem>>, %arg4: memref<640x128xbf16, #tpu.memory_space<vmem>>, %arg5: memref<1x128xf32, #tpu.memory_space<vmem>>, %arg6: memref<1x128xf32, #tpu.memory_space<vmem>>, %arg7: memref<128x128xf32, #tpu.memory_space<vmem>>, %arg8: memref<128x128xf32, #tpu.memory_space<vmem>>, %arg9: memref<128x128xf32, #tpu.memory_space<vmem>>) attributes {dimension_semantics = [#tpu.dimension_semantics<parallel>, #tpu.dimension_semantics<parallel>, #tpu.dimension_semantics<arbitrary>], iteration_bounds = array<i64: 1, 1, 1>, scalar_prefetch = 0 : i64, scratch_operands = 1 : i64, tpu.core_type = #tpu.core_type<tc>, window_params = [{transform_indices = @transform_0, window_bounds = array<i64: 128, 640>}, {transform_indices = @transform_1, window_bounds = array<i64: 640, 128>}, {transform_indices = @transform_2, window_bounds = array<i64: 1, 128>}, {transform_indices = @transform_3, window_bounds = array<i64: 1, 128>}, {transform_indices = @transform_4, window_bounds = array<i64: 128, 128>}, {transform_indices = @transform_5, window_bounds = array<i64: 128, 128>}]} {
    %c0_i32 = arith.constant 0 : i32
    %0 = arith.cmpi eq, %arg2, %c0_i32 : i32
    %1 = arith.extui %0 : i1 to i32
    %c0_i32_0 = arith.constant 0 : i32
    %2 = arith.cmpi ne, %1, %c0_i32_0 : i32
    scf.if %2 {
      %cst_10 = arith.constant 0.000000e+00 : f32
      %12 = vector.broadcast %cst_10 : f32 to vector<128x128xf32>
      %c0_11 = arith.constant 0 : index
      %c0_12 = arith.constant 0 : index
      %13 = vector.load %arg9[%c0_11, %c0_12] : memref<128x128xf32, #tpu.memory_space<vmem>>, vector<128x128xf32>
      tpu.vector_store %arg9[%c0_11, %c0_12], %12 {strides = array<i32>} : memref<128x128xf32, #tpu.memory_space<vmem>>, vector<128x128xf32>,
    } else {
    }
    %c0 = arith.constant 0 : index
    %c0_1 = arith.constant 0 : index
    %3 = vector.load %arg9[%c0, %c0_1] : memref<128x128xf32, #tpu.memory_space<vmem>>, vector<128x128xf32>
    %c0_2 = arith.constant 0 : index
    %c0_3 = arith.constant 0 : index
    %4 = vector.load %arg3[%c0_2, %c0_3] : memref<128x640xbf16, #tpu.memory_space<vmem>>, vector<128x640xbf16>
    %c0_4 = arith.constant 0 : index
    %c0_5 = arith.constant 0 : index
    %5 = vector.load %arg4[%c0_4, %c0_5] : memref<640x128xbf16, #tpu.memory_space<vmem>>, vector<640x128xbf16>
    %cst = arith.constant dense<0.000000e+00> : vector<128x128xf32>
    %6 = tpu.matmul %4, %5, %cst {dimension_numbers = #tpu.dot_dimension_numbers<[1], [0], [0], [1], [0, 0, 1, 1], [], []>} : vector<128x640xbf16>, vector<640x128xbf16>, vector<128x128xf32> -> vector<128x128xf32>
    %7 = arith.addf %3, %6 : vector<128x128xf32>
    %c0_6 = arith.constant 0 : index
    %c0_7 = arith.constant 0 : index
    %8 = vector.load %arg9[%c0_6, %c0_7] : memref<128x128xf32, #tpu.memory_space<vmem>>, vector<128x128xf32>
    tpu.vector_store %arg9[%c0_6, %c0_7], %7 {strides = array<i32>} : memref<128x128xf32, #tpu.memory_space<vmem>>, vector<128x128xf32>,
    %c0_i32_8 = arith.constant 0 : i32
    %9 = arith.cmpi eq, %arg2, %c0_i32_8 : i32
    %10 = arith.extui %9 : i1 to i32
    %c0_i32_9 = arith.constant 0 : i32
    %11 = arith.cmpi ne, %10, %c0_i32_9 : i32
    scf.if %11 {
      %c0_10 = arith.constant 0 : index
      %c0_11 = arith.constant 0 : index
      %12 = vector.load %arg9[%c0_10, %c0_11] : memref<128x128xf32, #tpu.memory_space<vmem>>, vector<128x128xf32>
      %c0_12 = arith.constant 0 : index
      %c0_13 = arith.constant 0 : index
      %13 = vector.load %arg5[%c0_12, %c0_13] : memref<1x128xf32, #tpu.memory_space<vmem>>, vector<1x128xf32>
      %14 = vector.broadcast %13 : vector<1x128xf32> to vector<128x128xf32>
      %15 = arith.mulf %12, %14 : vector<128x128xf32>
      %c0_14 = arith.constant 0 : index
      %c0_15 = arith.constant 0 : index
      %16 = vector.load %arg6[%c0_14, %c0_15] : memref<1x128xf32, #tpu.memory_space<vmem>>, vector<1x128xf32>
      %17 = vector.broadcast %16 : vector<1x128xf32> to vector<128x128xf32>
      %18 = arith.addf %15, %17 : vector<128x128xf32>
      %c0_16 = arith.constant 0 : index
      %c0_17 = arith.constant 0 : index
      %19 = vector.load %arg7[%c0_16, %c0_17] : memref<128x128xf32, #tpu.memory_space<vmem>>, vector<128x128xf32>
      %20 = arith.addf %18, %19 : vector<128x128xf32>
      %cst_18 = arith.constant 0.000000e+00 : f32
      %21 = vector.broadcast %cst_18 : f32 to vector<128x128xf32>
      %22 = arith.maximumf %20, %21 : vector<128x128xf32>
      %c0_19 = arith.constant 0 : index
      %c0_20 = arith.constant 0 : index
      %23 = vector.load %arg8[%c0_19, %c0_20] : memref<128x128xf32, #tpu.memory_space<vmem>>, vector<128x128xf32>
      tpu.vector_store %arg8[%c0_19, %c0_20], %22 {strides = array<i32>} : memref<128x128xf32, #tpu.memory_space<vmem>>, vector<128x128xf32>,
    } else {
    }
    return
  }
  func.func @transform_0(%arg0: i32, %arg1: i32, %arg2: i32) -> (i32, i32) {
    %c0_i32 = arith.constant 0 : i32
    return %arg0, %arg2 : i32, i32
  }
  func.func @transform_1(%arg0: i32, %arg1: i32, %arg2: i32) -> (i32, i32) {
    %c0_i32 = arith.constant 0 : i32
    return %arg2, %arg1 : i32, i32
  }
  func.func @transform_2(%arg0: i32, %arg1: i32, %arg2: i32) -> (i32, i32) {
    %c0_i32 = arith.constant 0 : i32
    %c0_i32_0 = arith.constant 0 : i32
    return %c0_i32, %arg1 : i32, i32
  }
  func.func @transform_3(%arg0: i32, %arg1: i32, %arg2: i32) -> (i32, i32) {
    %c0_i32 = arith.constant 0 : i32
    %c0_i32_0 = arith.constant 0 : i32
    return %c0_i32, %arg1 : i32, i32
  }
  func.func @transform_4(%arg0: i32, %arg1: i32, %arg2: i32) -> (i32, i32) {
    %c0_i32 = arith.constant 0 : i32
    return %arg0, %arg1 : i32, i32
  }
  func.func @transform_5(%arg0: i32, %arg1: i32, %arg2: i32) -> (i32, i32) {
    %c0_i32 = arith.constant 0 : i32
    return %arg0, %arg1 : i32, i32
  }
}

module attributes {stable_mosaic.version = 11 : i64} {
  func.func @_mm_kernel(%arg0: i32, %arg1: i32, %arg2: i32, %arg3: memref<32x640xbf16, #tpu.memory_space<vmem>>, %arg4: memref<640x128xbf16, #tpu.memory_space<vmem>>, %arg5: memref<1x128xf32, #tpu.memory_space<vmem>>, %arg6: memref<1x128xf32, #tpu.memory_space<vmem>>, %arg7: memref<32x128xf32, #tpu.memory_space<vmem>>, %arg8: memref<32x128xf32, #tpu.memory_space<vmem>>) attributes {dimension_semantics = [#tpu.dimension_semantics<parallel>, #tpu.dimension_semantics<parallel>, #tpu.dimension_semantics<arbitrary>], iteration_bounds = array<i64: 1, 1, 1>, scalar_prefetch = 0 : i64, scratch_operands = 1 : i64, tpu.core_type = #tpu.core_type<tc>, window_params = [{transform_indices = @transform_0, window_bounds = array<i64: 32, 640>}, {transform_indices = @transform_1, window_bounds = array<i64: 640, 128>}, {transform_indices = @transform_2, window_bounds = array<i64: 1, 128>}, {transform_indices = @transform_3, window_bounds = array<i64: 1, 128>}, {transform_indices = @transform_4, window_bounds = array<i64: 32, 128>}]} {
    %c0_i32 = arith.constant 0 : i32
    %0 = arith.cmpi eq, %arg2, %c0_i32 : i32
    %1 = arith.extui %0 : i1 to i32
    %c0_i32_0 = arith.constant 0 : i32
    %2 = arith.cmpi ne, %1, %c0_i32_0 : i32
    scf.if %2 {
      %cst_10 = arith.constant 0.000000e+00 : f32
      %12 = vector.broadcast %cst_10 : f32 to vector<32x128xf32>
      %c0_11 = arith.constant 0 : index
      %c0_12 = arith.constant 0 : index
      %13 = vector.load %arg8[%c0_11, %c0_12] : memref<32x128xf32, #tpu.memory_space<vmem>>, vector<32x128xf32>
      tpu.vector_store %arg8[%c0_11, %c0_12], %12 {strides = array<i32>} : memref<32x128xf32, #tpu.memory_space<vmem>>, vector<32x128xf32>,
    } else {
    }
    %c0 = arith.constant 0 : index
    %c0_1 = arith.constant 0 : index
    %3 = vector.load %arg8[%c0, %c0_1] : memref<32x128xf32, #tpu.memory_space<vmem>>, vector<32x128xf32>
    %c0_2 = arith.constant 0 : index
    %c0_3 = arith.constant 0 : index
    %4 = vector.load %arg3[%c0_2, %c0_3] : memref<32x640xbf16, #tpu.memory_space<vmem>>, vector<32x640xbf16>
    %c0_4 = arith.constant 0 : index
    %c0_5 = arith.constant 0 : index
    %5 = vector.load %arg4[%c0_4, %c0_5] : memref<640x128xbf16, #tpu.memory_space<vmem>>, vector<640x128xbf16>
    %cst = arith.constant dense<0.000000e+00> : vector<32x128xf32>
    %6 = tpu.matmul %4, %5, %cst {dimension_numbers = #tpu.dot_dimension_numbers<[1], [0], [0], [1], [0, 0, 1, 1], [], []>} : vector<32x640xbf16>, vector<640x128xbf16>, vector<32x128xf32> -> vector<32x128xf32>
    %7 = arith.addf %3, %6 : vector<32x128xf32>
    %c0_6 = arith.constant 0 : index
    %c0_7 = arith.constant 0 : index
    %8 = vector.load %arg8[%c0_6, %c0_7] : memref<32x128xf32, #tpu.memory_space<vmem>>, vector<32x128xf32>
    tpu.vector_store %arg8[%c0_6, %c0_7], %7 {strides = array<i32>} : memref<32x128xf32, #tpu.memory_space<vmem>>, vector<32x128xf32>,
    %c0_i32_8 = arith.constant 0 : i32
    %9 = arith.cmpi eq, %arg2, %c0_i32_8 : i32
    %10 = arith.extui %9 : i1 to i32
    %c0_i32_9 = arith.constant 0 : i32
    %11 = arith.cmpi ne, %10, %c0_i32_9 : i32
    scf.if %11 {
      %c0_10 = arith.constant 0 : index
      %c0_11 = arith.constant 0 : index
      %12 = vector.load %arg8[%c0_10, %c0_11] : memref<32x128xf32, #tpu.memory_space<vmem>>, vector<32x128xf32>
      %c0_12 = arith.constant 0 : index
      %c0_13 = arith.constant 0 : index
      %13 = vector.load %arg5[%c0_12, %c0_13] : memref<1x128xf32, #tpu.memory_space<vmem>>, vector<1x128xf32>
      %14 = vector.broadcast %13 : vector<1x128xf32> to vector<32x128xf32>
      %15 = arith.mulf %12, %14 : vector<32x128xf32>
      %c0_14 = arith.constant 0 : index
      %c0_15 = arith.constant 0 : index
      %16 = vector.load %arg6[%c0_14, %c0_15] : memref<1x128xf32, #tpu.memory_space<vmem>>, vector<1x128xf32>
      %17 = vector.broadcast %16 : vector<1x128xf32> to vector<32x128xf32>
      %18 = arith.addf %15, %17 : vector<32x128xf32>
      %cst_16 = arith.constant 0.000000e+00 : f32
      %19 = vector.broadcast %cst_16 : f32 to vector<32x128xf32>
      %20 = arith.maximumf %18, %19 : vector<32x128xf32>
      %c0_17 = arith.constant 0 : index
      %c0_18 = arith.constant 0 : index
      %21 = vector.load %arg7[%c0_17, %c0_18] : memref<32x128xf32, #tpu.memory_space<vmem>>, vector<32x128xf32>
      tpu.vector_store %arg7[%c0_17, %c0_18], %20 {strides = array<i32>} : memref<32x128xf32, #tpu.memory_space<vmem>>, vector<32x128xf32>,
    } else {
    }
    return
  }
  func.func @transform_0(%arg0: i32, %arg1: i32, %arg2: i32) -> (i32, i32) {
    %c0_i32 = arith.constant 0 : i32
    return %arg0, %arg2 : i32, i32
  }
  func.func @transform_1(%arg0: i32, %arg1: i32, %arg2: i32) -> (i32, i32) {
    %c0_i32 = arith.constant 0 : i32
    return %arg2, %arg1 : i32, i32
  }
  func.func @transform_2(%arg0: i32, %arg1: i32, %arg2: i32) -> (i32, i32) {
    %c0_i32 = arith.constant 0 : i32
    %c0_i32_0 = arith.constant 0 : i32
    return %c0_i32, %arg1 : i32, i32
  }
  func.func @transform_3(%arg0: i32, %arg1: i32, %arg2: i32) -> (i32, i32) {
    %c0_i32 = arith.constant 0 : i32
    %c0_i32_0 = arith.constant 0 : i32
    return %c0_i32, %arg1 : i32, i32
  }
  func.func @transform_4(%arg0: i32, %arg1: i32, %arg2: i32) -> (i32, i32) {
    %c0_i32 = arith.constant 0 : i32
    return %arg0, %arg1 : i32, i32
  }
}

module attributes {stable_mosaic.version = 11 : i64} {
  func.func @_mm_kernel(%arg0: i32, %arg1: i32, %arg2: i32, %arg3: memref<32x128xbf16, #tpu.memory_space<vmem>>, %arg4: memref<128x128xbf16, #tpu.memory_space<vmem>>, %arg5: memref<1x128xf32, #tpu.memory_space<vmem>>, %arg6: memref<1x128xf32, #tpu.memory_space<vmem>>, %arg7: memref<32x128xf32, #tpu.memory_space<vmem>>, %arg8: memref<32x128xf32, #tpu.memory_space<vmem>>) attributes {dimension_semantics = [#tpu.dimension_semantics<parallel>, #tpu.dimension_semantics<parallel>, #tpu.dimension_semantics<arbitrary>], iteration_bounds = array<i64: 1, 1, 1>, scalar_prefetch = 0 : i64, scratch_operands = 1 : i64, tpu.core_type = #tpu.core_type<tc>, window_params = [{transform_indices = @transform_0, window_bounds = array<i64: 32, 128>}, {transform_indices = @transform_1, window_bounds = array<i64: 128, 128>}, {transform_indices = @transform_2, window_bounds = array<i64: 1, 128>}, {transform_indices = @transform_3, window_bounds = array<i64: 1, 128>}, {transform_indices = @transform_4, window_bounds = array<i64: 32, 128>}]} {
    %c0_i32 = arith.constant 0 : i32
    %0 = arith.cmpi eq, %arg2, %c0_i32 : i32
    %1 = arith.extui %0 : i1 to i32
    %c0_i32_0 = arith.constant 0 : i32
    %2 = arith.cmpi ne, %1, %c0_i32_0 : i32
    scf.if %2 {
      %cst_10 = arith.constant 0.000000e+00 : f32
      %12 = vector.broadcast %cst_10 : f32 to vector<32x128xf32>
      %c0_11 = arith.constant 0 : index
      %c0_12 = arith.constant 0 : index
      %13 = vector.load %arg8[%c0_11, %c0_12] : memref<32x128xf32, #tpu.memory_space<vmem>>, vector<32x128xf32>
      tpu.vector_store %arg8[%c0_11, %c0_12], %12 {strides = array<i32>} : memref<32x128xf32, #tpu.memory_space<vmem>>, vector<32x128xf32>,
    } else {
    }
    %c0 = arith.constant 0 : index
    %c0_1 = arith.constant 0 : index
    %3 = vector.load %arg8[%c0, %c0_1] : memref<32x128xf32, #tpu.memory_space<vmem>>, vector<32x128xf32>
    %c0_2 = arith.constant 0 : index
    %c0_3 = arith.constant 0 : index
    %4 = vector.load %arg3[%c0_2, %c0_3] : memref<32x128xbf16, #tpu.memory_space<vmem>>, vector<32x128xbf16>
    %c0_4 = arith.constant 0 : index
    %c0_5 = arith.constant 0 : index
    %5 = vector.load %arg4[%c0_4, %c0_5] : memref<128x128xbf16, #tpu.memory_space<vmem>>, vector<128x128xbf16>
    %cst = arith.constant dense<0.000000e+00> : vector<32x128xf32>
    %6 = tpu.matmul %4, %5, %cst {dimension_numbers = #tpu.dot_dimension_numbers<[1], [0], [0], [1], [0, 0, 1, 1], [], []>} : vector<32x128xbf16>, vector<128x128xbf16>, vector<32x128xf32> -> vector<32x128xf32>
    %7 = arith.addf %3, %6 : vector<32x128xf32>
    %c0_6 = arith.constant 0 : index
    %c0_7 = arith.constant 0 : index
    %8 = vector.load %arg8[%c0_6, %c0_7] : memref<32x128xf32, #tpu.memory_space<vmem>>, vector<32x128xf32>
    tpu.vector_store %arg8[%c0_6, %c0_7], %7 {strides = array<i32>} : memref<32x128xf32, #tpu.memory_space<vmem>>, vector<32x128xf32>,
    %c0_i32_8 = arith.constant 0 : i32
    %9 = arith.cmpi eq, %arg2, %c0_i32_8 : i32
    %10 = arith.extui %9 : i1 to i32
    %c0_i32_9 = arith.constant 0 : i32
    %11 = arith.cmpi ne, %10, %c0_i32_9 : i32
    scf.if %11 {
      %c0_10 = arith.constant 0 : index
      %c0_11 = arith.constant 0 : index
      %12 = vector.load %arg8[%c0_10, %c0_11] : memref<32x128xf32, #tpu.memory_space<vmem>>, vector<32x128xf32>
      %c0_12 = arith.constant 0 : index
      %c0_13 = arith.constant 0 : index
      %13 = vector.load %arg5[%c0_12, %c0_13] : memref<1x128xf32, #tpu.memory_space<vmem>>, vector<1x128xf32>
      %14 = vector.broadcast %13 : vector<1x128xf32> to vector<32x128xf32>
      %15 = arith.mulf %12, %14 : vector<32x128xf32>
      %c0_14 = arith.constant 0 : index
      %c0_15 = arith.constant 0 : index
      %16 = vector.load %arg6[%c0_14, %c0_15] : memref<1x128xf32, #tpu.memory_space<vmem>>, vector<1x128xf32>
      %17 = vector.broadcast %16 : vector<1x128xf32> to vector<32x128xf32>
      %18 = arith.addf %15, %17 : vector<32x128xf32>
      %c0_16 = arith.constant 0 : index
      %c0_17 = arith.constant 0 : index
      %19 = vector.load %arg7[%c0_16, %c0_17] : memref<32x128xf32, #tpu.memory_space<vmem>>, vector<32x128xf32>
      tpu.vector_store %arg7[%c0_16, %c0_17], %18 {strides = array<i32>} : memref<32x128xf32, #tpu.memory_space<vmem>>, vector<32x128xf32>,
    } else {
    }
    return
  }
  func.func @transform_0(%arg0: i32, %arg1: i32, %arg2: i32) -> (i32, i32) {
    %c0_i32 = arith.constant 0 : i32
    return %arg0, %arg2 : i32, i32
  }
  func.func @transform_1(%arg0: i32, %arg1: i32, %arg2: i32) -> (i32, i32) {
    %c0_i32 = arith.constant 0 : i32
    return %arg2, %arg1 : i32, i32
  }
  func.func @transform_2(%arg0: i32, %arg1: i32, %arg2: i32) -> (i32, i32) {
    %c0_i32 = arith.constant 0 : i32
    %c0_i32_0 = arith.constant 0 : i32
    return %c0_i32, %arg1 : i32, i32
  }
  func.func @transform_3(%arg0: i32, %arg1: i32, %arg2: i32) -> (i32, i32) {
    %c0_i32 = arith.constant 0 : i32
    %c0_i32_0 = arith.constant 0 : i32
    return %c0_i32, %arg1 : i32, i32
  }
  func.func @transform_4(%arg0: i32, %arg1: i32, %arg2: i32) -> (i32, i32) {
    %c0_i32 = arith.constant 0 : i32
    return %arg0, %arg1 : i32, i32
  }
}

module attributes {stable_mosaic.version = 11 : i64} {
  func.func @_mm_res_kernel(%arg0: i32, %arg1: i32, %arg2: i32, %arg3: memref<32x384xbf16, #tpu.memory_space<vmem>>, %arg4: memref<384x128xbf16, #tpu.memory_space<vmem>>, %arg5: memref<1x128xf32, #tpu.memory_space<vmem>>, %arg6: memref<1x128xf32, #tpu.memory_space<vmem>>, %arg7: memref<32x128xf32, #tpu.memory_space<vmem>>, %arg8: memref<32x128xf32, #tpu.memory_space<vmem>>, %arg9: memref<32x128xf32, #tpu.memory_space<vmem>>) attributes {dimension_semantics = [#tpu.dimension_semantics<parallel>, #tpu.dimension_semantics<parallel>, #tpu.dimension_semantics<arbitrary>], iteration_bounds = array<i64: 1, 1, 3>, scalar_prefetch = 0 : i64, scratch_operands = 1 : i64, tpu.core_type = #tpu.core_type<tc>, window_params = [{transform_indices = @transform_0, window_bounds = array<i64: 32, 384>}, {transform_indices = @transform_1, window_bounds = array<i64: 384, 128>}, {transform_indices = @transform_2, window_bounds = array<i64: 1, 128>}, {transform_indices = @transform_3, window_bounds = array<i64: 1, 128>}, {transform_indices = @transform_4, window_bounds = array<i64: 32, 128>}, {transform_indices = @transform_5, window_bounds = array<i64: 32, 128>}]} {
    %c0_i32 = arith.constant 0 : i32
    %0 = arith.cmpi eq, %arg2, %c0_i32 : i32
    %1 = arith.extui %0 : i1 to i32
    %c0_i32_0 = arith.constant 0 : i32
    %2 = arith.cmpi ne, %1, %c0_i32_0 : i32
    scf.if %2 {
      %cst_9 = arith.constant 0.000000e+00 : f32
      %12 = vector.broadcast %cst_9 : f32 to vector<32x128xf32>
      %c0_10 = arith.constant 0 : index
      %c0_11 = arith.constant 0 : index
      %13 = vector.load %arg9[%c0_10, %c0_11] : memref<32x128xf32, #tpu.memory_space<vmem>>, vector<32x128xf32>
      tpu.vector_store %arg9[%c0_10, %c0_11], %12 {strides = array<i32>} : memref<32x128xf32, #tpu.memory_space<vmem>>, vector<32x128xf32>,
    } else {
    }
    %c0 = arith.constant 0 : index
    %c0_1 = arith.constant 0 : index
    %3 = vector.load %arg9[%c0, %c0_1] : memref<32x128xf32, #tpu.memory_space<vmem>>, vector<32x128xf32>
    %c0_2 = arith.constant 0 : index
    %c0_3 = arith.constant 0 : index
    %4 = vector.load %arg3[%c0_2, %c0_3] : memref<32x384xbf16, #tpu.memory_space<vmem>>, vector<32x384xbf16>
    %c0_4 = arith.constant 0 : index
    %c0_5 = arith.constant 0 : index
    %5 = vector.load %arg4[%c0_4, %c0_5] : memref<384x128xbf16, #tpu.memory_space<vmem>>, vector<384x128xbf16>
    %cst = arith.constant dense<0.000000e+00> : vector<32x128xf32>
    %6 = tpu.matmul %4, %5, %cst {dimension_numbers = #tpu.dot_dimension_numbers<[1], [0], [0], [1], [0, 0, 1, 1], [], []>} : vector<32x384xbf16>, vector<384x128xbf16>, vector<32x128xf32> -> vector<32x128xf32>
    %7 = arith.addf %3, %6 : vector<32x128xf32>
    %c0_6 = arith.constant 0 : index
    %c0_7 = arith.constant 0 : index
    %8 = vector.load %arg9[%c0_6, %c0_7] : memref<32x128xf32, #tpu.memory_space<vmem>>, vector<32x128xf32>
    tpu.vector_store %arg9[%c0_6, %c0_7], %7 {strides = array<i32>} : memref<32x128xf32, #tpu.memory_space<vmem>>, vector<32x128xf32>,
    %c2_i32 = arith.constant 2 : i32
    %9 = arith.cmpi eq, %arg2, %c2_i32 : i32
    %10 = arith.extui %9 : i1 to i32
    %c0_i32_8 = arith.constant 0 : i32
    %11 = arith.cmpi ne, %10, %c0_i32_8 : i32
    scf.if %11 {
      %c0_9 = arith.constant 0 : index
      %c0_10 = arith.constant 0 : index
      %12 = vector.load %arg9[%c0_9, %c0_10] : memref<32x128xf32, #tpu.memory_space<vmem>>, vector<32x128xf32>
      %c0_11 = arith.constant 0 : index
      %c0_12 = arith.constant 0 : index
      %13 = vector.load %arg5[%c0_11, %c0_12] : memref<1x128xf32, #tpu.memory_space<vmem>>, vector<1x128xf32>
      %14 = vector.broadcast %13 : vector<1x128xf32> to vector<32x128xf32>
      %15 = arith.mulf %12, %14 : vector<32x128xf32>
      %c0_13 = arith.constant 0 : index
      %c0_14 = arith.constant 0 : index
      %16 = vector.load %arg6[%c0_13, %c0_14] : memref<1x128xf32, #tpu.memory_space<vmem>>, vector<1x128xf32>
      %17 = vector.broadcast %16 : vector<1x128xf32> to vector<32x128xf32>
      %18 = arith.addf %15, %17 : vector<32x128xf32>
      %c0_15 = arith.constant 0 : index
      %c0_16 = arith.constant 0 : index
      %19 = vector.load %arg7[%c0_15, %c0_16] : memref<32x128xf32, #tpu.memory_space<vmem>>, vector<32x128xf32>
      %20 = arith.addf %18, %19 : vector<32x128xf32>
      %cst_17 = arith.constant 0.000000e+00 : f32
      %21 = vector.broadcast %cst_17 : f32 to vector<32x128xf32>
      %22 = arith.maximumf %20, %21 : vector<32x128xf32>
      %c0_18 = arith.constant 0 : index
      %c0_19 = arith.constant 0 : index
      %23 = vector.load %arg8[%c0_18, %c0_19] : memref<32x128xf32, #tpu.memory_space<vmem>>, vector<32x128xf32>
      tpu.vector_store %arg8[%c0_18, %c0_19], %22 {strides = array<i32>} : memref<32x128xf32, #tpu.memory_space<vmem>>, vector<32x128xf32>,
    } else {
    }
    return
  }
  func.func @transform_0(%arg0: i32, %arg1: i32, %arg2: i32) -> (i32, i32) {
    %c0_i32 = arith.constant 0 : i32
    return %arg0, %arg2 : i32, i32
  }
  func.func @transform_1(%arg0: i32, %arg1: i32, %arg2: i32) -> (i32, i32) {
    %c0_i32 = arith.constant 0 : i32
    return %arg2, %arg1 : i32, i32
  }
  func.func @transform_2(%arg0: i32, %arg1: i32, %arg2: i32) -> (i32, i32) {
    %c0_i32 = arith.constant 0 : i32
    %c0_i32_0 = arith.constant 0 : i32
    return %c0_i32, %arg1 : i32, i32
  }
  func.func @transform_3(%arg0: i32, %arg1: i32, %arg2: i32) -> (i32, i32) {
    %c0_i32 = arith.constant 0 : i32
    %c0_i32_0 = arith.constant 0 : i32
    return %c0_i32, %arg1 : i32, i32
  }
  func.func @transform_4(%arg0: i32, %arg1: i32, %arg2: i32) -> (i32, i32) {
    %c0_i32 = arith.constant 0 : i32
    return %arg0, %arg1 : i32, i32
  }
  func.func @transform_5(%arg0: i32, %arg1: i32, %arg2: i32) -> (i32, i32) {
    %c0_i32 = arith.constant 0 : i32
    return %arg0, %arg1 : i32, i32
  }
}

module attributes {stable_mosaic.version = 11 : i64} {
  func.func @_mm_kernel(%arg0: i32, %arg1: i32, %arg2: i32, %arg3: memref<32x384xbf16, #tpu.memory_space<vmem>>, %arg4: memref<384x128xbf16, #tpu.memory_space<vmem>>, %arg5: memref<1x128xf32, #tpu.memory_space<vmem>>, %arg6: memref<1x128xf32, #tpu.memory_space<vmem>>, %arg7: memref<32x128xf32, #tpu.memory_space<vmem>>, %arg8: memref<32x128xf32, #tpu.memory_space<vmem>>) attributes {dimension_semantics = [#tpu.dimension_semantics<parallel>, #tpu.dimension_semantics<parallel>, #tpu.dimension_semantics<arbitrary>], iteration_bounds = array<i64: 1, 1, 3>, scalar_prefetch = 0 : i64, scratch_operands = 1 : i64, tpu.core_type = #tpu.core_type<tc>, window_params = [{transform_indices = @transform_0, window_bounds = array<i64: 32, 384>}, {transform_indices = @transform_1, window_bounds = array<i64: 384, 128>}, {transform_indices = @transform_2, window_bounds = array<i64: 1, 128>}, {transform_indices = @transform_3, window_bounds = array<i64: 1, 128>}, {transform_indices = @transform_4, window_bounds = array<i64: 32, 128>}]} {
    %c0_i32 = arith.constant 0 : i32
    %0 = arith.cmpi eq, %arg2, %c0_i32 : i32
    %1 = arith.extui %0 : i1 to i32
    %c0_i32_0 = arith.constant 0 : i32
    %2 = arith.cmpi ne, %1, %c0_i32_0 : i32
    scf.if %2 {
      %cst_9 = arith.constant 0.000000e+00 : f32
      %12 = vector.broadcast %cst_9 : f32 to vector<32x128xf32>
      %c0_10 = arith.constant 0 : index
      %c0_11 = arith.constant 0 : index
      %13 = vector.load %arg8[%c0_10, %c0_11] : memref<32x128xf32, #tpu.memory_space<vmem>>, vector<32x128xf32>
      tpu.vector_store %arg8[%c0_10, %c0_11], %12 {strides = array<i32>} : memref<32x128xf32, #tpu.memory_space<vmem>>, vector<32x128xf32>,
    } else {
    }
    %c0 = arith.constant 0 : index
    %c0_1 = arith.constant 0 : index
    %3 = vector.load %arg8[%c0, %c0_1] : memref<32x128xf32, #tpu.memory_space<vmem>>, vector<32x128xf32>
    %c0_2 = arith.constant 0 : index
    %c0_3 = arith.constant 0 : index
    %4 = vector.load %arg3[%c0_2, %c0_3] : memref<32x384xbf16, #tpu.memory_space<vmem>>, vector<32x384xbf16>
    %c0_4 = arith.constant 0 : index
    %c0_5 = arith.constant 0 : index
    %5 = vector.load %arg4[%c0_4, %c0_5] : memref<384x128xbf16, #tpu.memory_space<vmem>>, vector<384x128xbf16>
    %cst = arith.constant dense<0.000000e+00> : vector<32x128xf32>
    %6 = tpu.matmul %4, %5, %cst {dimension_numbers = #tpu.dot_dimension_numbers<[1], [0], [0], [1], [0, 0, 1, 1], [], []>} : vector<32x384xbf16>, vector<384x128xbf16>, vector<32x128xf32> -> vector<32x128xf32>
    %7 = arith.addf %3, %6 : vector<32x128xf32>
    %c0_6 = arith.constant 0 : index
    %c0_7 = arith.constant 0 : index
    %8 = vector.load %arg8[%c0_6, %c0_7] : memref<32x128xf32, #tpu.memory_space<vmem>>, vector<32x128xf32>
    tpu.vector_store %arg8[%c0_6, %c0_7], %7 {strides = array<i32>} : memref<32x128xf32, #tpu.memory_space<vmem>>, vector<32x128xf32>,
    %c2_i32 = arith.constant 2 : i32
    %9 = arith.cmpi eq, %arg2, %c2_i32 : i32
    %10 = arith.extui %9 : i1 to i32
    %c0_i32_8 = arith.constant 0 : i32
    %11 = arith.cmpi ne, %10, %c0_i32_8 : i32
    scf.if %11 {
      %c0_9 = arith.constant 0 : index
      %c0_10 = arith.constant 0 : index
      %12 = vector.load %arg8[%c0_9, %c0_10] : memref<32x128xf32, #tpu.memory_space<vmem>>, vector<32x128xf32>
      %c0_11 = arith.constant 0 : index
      %c0_12 = arith.constant 0 : index
      %13 = vector.load %arg5[%c0_11, %c0_12] : memref<1x128xf32, #tpu.memory_space<vmem>>, vector<1x128xf32>
      %14 = vector.broadcast %13 : vector<1x128xf32> to vector<32x128xf32>
      %15 = arith.mulf %12, %14 : vector<32x128xf32>
      %c0_13 = arith.constant 0 : index
      %c0_14 = arith.constant 0 : index
      %16 = vector.load %arg6[%c0_13, %c0_14] : memref<1x128xf32, #tpu.memory_space<vmem>>, vector<1x128xf32>
      %17 = vector.broadcast %16 : vector<1x128xf32> to vector<32x128xf32>
      %18 = arith.addf %15, %17 : vector<32x128xf32>
      %cst_15 = arith.constant 0.000000e+00 : f32
      %19 = vector.broadcast %cst_15 : f32 to vector<32x128xf32>
      %20 = arith.maximumf %18, %19 : vector<32x128xf32>
      %c0_16 = arith.constant 0 : index
      %c0_17 = arith.constant 0 : index
      %21 = vector.load %arg7[%c0_16, %c0_17] : memref<32x128xf32, #tpu.memory_space<vmem>>, vector<32x128xf32>
      tpu.vector_store %arg7[%c0_16, %c0_17], %20 {strides = array<i32>} : memref<32x128xf32, #tpu.memory_space<vmem>>, vector<32x128xf32>,
    } else {
    }
    return
  }
  func.func @transform_0(%arg0: i32, %arg1: i32, %arg2: i32) -> (i32, i32) {
    %c0_i32 = arith.constant 0 : i32
    return %arg0, %arg2 : i32, i32
  }
  func.func @transform_1(%arg0: i32, %arg1: i32, %arg2: i32) -> (i32, i32) {
    %c0_i32 = arith.constant 0 : i32
    return %arg2, %arg1 : i32, i32
  }
  func.func @transform_2(%arg0: i32, %arg1: i32, %arg2: i32) -> (i32, i32) {
    %c0_i32 = arith.constant 0 : i32
    %c0_i32_0 = arith.constant 0 : i32
    return %c0_i32, %arg1 : i32, i32
  }
  func.func @transform_3(%arg0: i32, %arg1: i32, %arg2: i32) -> (i32, i32) {
    %c0_i32 = arith.constant 0 : i32
    %c0_i32_0 = arith.constant 0 : i32
    return %c0_i32, %arg1 : i32, i32
  }
  func.func @transform_4(%arg0: i32, %arg1: i32, %arg2: i32) -> (i32, i32) {
    %c0_i32 = arith.constant 0 : i32
    return %arg0, %arg1 : i32, i32
  }
}

module attributes {stable_mosaic.version = 11 : i64} {
  func.func @_mm_kernel(%arg0: i32, %arg1: i32, %arg2: i32, %arg3: memref<16x384xbf16, #tpu.memory_space<vmem>>, %arg4: memref<384x256xbf16, #tpu.memory_space<vmem>>, %arg5: memref<1x256xf32, #tpu.memory_space<vmem>>, %arg6: memref<1x256xf32, #tpu.memory_space<vmem>>, %arg7: memref<16x256xf32, #tpu.memory_space<vmem>>, %arg8: memref<16x256xf32, #tpu.memory_space<vmem>>) attributes {dimension_semantics = [#tpu.dimension_semantics<parallel>, #tpu.dimension_semantics<parallel>, #tpu.dimension_semantics<arbitrary>], iteration_bounds = array<i64: 1, 1, 3>, scalar_prefetch = 0 : i64, scratch_operands = 1 : i64, tpu.core_type = #tpu.core_type<tc>, window_params = [{transform_indices = @transform_0, window_bounds = array<i64: 16, 384>}, {transform_indices = @transform_1, window_bounds = array<i64: 384, 256>}, {transform_indices = @transform_2, window_bounds = array<i64: 1, 256>}, {transform_indices = @transform_3, window_bounds = array<i64: 1, 256>}, {transform_indices = @transform_4, window_bounds = array<i64: 16, 256>}]} {
    %c0_i32 = arith.constant 0 : i32
    %0 = arith.cmpi eq, %arg2, %c0_i32 : i32
    %1 = arith.extui %0 : i1 to i32
    %c0_i32_0 = arith.constant 0 : i32
    %2 = arith.cmpi ne, %1, %c0_i32_0 : i32
    scf.if %2 {
      %cst_9 = arith.constant 0.000000e+00 : f32
      %12 = vector.broadcast %cst_9 : f32 to vector<16x256xf32>
      %c0_10 = arith.constant 0 : index
      %c0_11 = arith.constant 0 : index
      %13 = vector.load %arg8[%c0_10, %c0_11] : memref<16x256xf32, #tpu.memory_space<vmem>>, vector<16x256xf32>
      tpu.vector_store %arg8[%c0_10, %c0_11], %12 {strides = array<i32>} : memref<16x256xf32, #tpu.memory_space<vmem>>, vector<16x256xf32>,
    } else {
    }
    %c0 = arith.constant 0 : index
    %c0_1 = arith.constant 0 : index
    %3 = vector.load %arg8[%c0, %c0_1] : memref<16x256xf32, #tpu.memory_space<vmem>>, vector<16x256xf32>
    %c0_2 = arith.constant 0 : index
    %c0_3 = arith.constant 0 : index
    %4 = vector.load %arg3[%c0_2, %c0_3] : memref<16x384xbf16, #tpu.memory_space<vmem>>, vector<16x384xbf16>
    %c0_4 = arith.constant 0 : index
    %c0_5 = arith.constant 0 : index
    %5 = vector.load %arg4[%c0_4, %c0_5] : memref<384x256xbf16, #tpu.memory_space<vmem>>, vector<384x256xbf16>
    %cst = arith.constant dense<0.000000e+00> : vector<16x256xf32>
    %6 = tpu.matmul %4, %5, %cst {dimension_numbers = #tpu.dot_dimension_numbers<[1], [0], [0], [1], [0, 0, 1, 1], [], []>} : vector<16x384xbf16>, vector<384x256xbf16>, vector<16x256xf32> -> vector<16x256xf32>
    %7 = arith.addf %3, %6 : vector<16x256xf32>
    %c0_6 = arith.constant 0 : index
    %c0_7 = arith.constant 0 : index
    %8 = vector.load %arg8[%c0_6, %c0_7] : memref<16x256xf32, #tpu.memory_space<vmem>>, vector<16x256xf32>
    tpu.vector_store %arg8[%c0_6, %c0_7], %7 {strides = array<i32>} : memref<16x256xf32, #tpu.memory_space<vmem>>, vector<16x256xf32>,
    %c2_i32 = arith.constant 2 : i32
    %9 = arith.cmpi eq, %arg2, %c2_i32 : i32
    %10 = arith.extui %9 : i1 to i32
    %c0_i32_8 = arith.constant 0 : i32
    %11 = arith.cmpi ne, %10, %c0_i32_8 : i32
    scf.if %11 {
      %c0_9 = arith.constant 0 : index
      %c0_10 = arith.constant 0 : index
      %12 = vector.load %arg8[%c0_9, %c0_10] : memref<16x256xf32, #tpu.memory_space<vmem>>, vector<16x256xf32>
      %c0_11 = arith.constant 0 : index
      %c0_12 = arith.constant 0 : index
      %13 = vector.load %arg5[%c0_11, %c0_12] : memref<1x256xf32, #tpu.memory_space<vmem>>, vector<1x256xf32>
      %14 = vector.broadcast %13 : vector<1x256xf32> to vector<16x256xf32>
      %15 = arith.mulf %12, %14 : vector<16x256xf32>
      %c0_13 = arith.constant 0 : index
      %c0_14 = arith.constant 0 : index
      %16 = vector.load %arg6[%c0_13, %c0_14] : memref<1x256xf32, #tpu.memory_space<vmem>>, vector<1x256xf32>
      %17 = vector.broadcast %16 : vector<1x256xf32> to vector<16x256xf32>
      %18 = arith.addf %15, %17 : vector<16x256xf32>
      %cst_15 = arith.constant 0.000000e+00 : f32
      %19 = vector.broadcast %cst_15 : f32 to vector<16x256xf32>
      %20 = arith.maximumf %18, %19 : vector<16x256xf32>
      %c0_16 = arith.constant 0 : index
      %c0_17 = arith.constant 0 : index
      %21 = vector.load %arg7[%c0_16, %c0_17] : memref<16x256xf32, #tpu.memory_space<vmem>>, vector<16x256xf32>
      tpu.vector_store %arg7[%c0_16, %c0_17], %20 {strides = array<i32>} : memref<16x256xf32, #tpu.memory_space<vmem>>, vector<16x256xf32>,
    } else {
    }
    return
  }
  func.func @transform_0(%arg0: i32, %arg1: i32, %arg2: i32) -> (i32, i32) {
    %c0_i32 = arith.constant 0 : i32
    return %arg0, %arg2 : i32, i32
  }
  func.func @transform_1(%arg0: i32, %arg1: i32, %arg2: i32) -> (i32, i32) {
    %c0_i32 = arith.constant 0 : i32
    return %arg2, %arg1 : i32, i32
  }
  func.func @transform_2(%arg0: i32, %arg1: i32, %arg2: i32) -> (i32, i32) {
    %c0_i32 = arith.constant 0 : i32
    %c0_i32_0 = arith.constant 0 : i32
    return %c0_i32, %arg1 : i32, i32
  }
  func.func @transform_3(%arg0: i32, %arg1: i32, %arg2: i32) -> (i32, i32) {
    %c0_i32 = arith.constant 0 : i32
    %c0_i32_0 = arith.constant 0 : i32
    return %c0_i32, %arg1 : i32, i32
  }
  func.func @transform_4(%arg0: i32, %arg1: i32, %arg2: i32) -> (i32, i32) {
    %c0_i32 = arith.constant 0 : i32
    return %arg0, %arg1 : i32, i32
  }
}

module attributes {stable_mosaic.version = 11 : i64} {
  func.func @_mm_kernel(%arg0: i32, %arg1: i32, %arg2: i32, %arg3: memref<16x128xbf16, #tpu.memory_space<vmem>>, %arg4: memref<128x256xbf16, #tpu.memory_space<vmem>>, %arg5: memref<1x256xf32, #tpu.memory_space<vmem>>, %arg6: memref<1x256xf32, #tpu.memory_space<vmem>>, %arg7: memref<16x256xf32, #tpu.memory_space<vmem>>, %arg8: memref<16x256xf32, #tpu.memory_space<vmem>>) attributes {dimension_semantics = [#tpu.dimension_semantics<parallel>, #tpu.dimension_semantics<parallel>, #tpu.dimension_semantics<arbitrary>], iteration_bounds = array<i64: 1, 1, 1>, scalar_prefetch = 0 : i64, scratch_operands = 1 : i64, tpu.core_type = #tpu.core_type<tc>, window_params = [{transform_indices = @transform_0, window_bounds = array<i64: 16, 128>}, {transform_indices = @transform_1, window_bounds = array<i64: 128, 256>}, {transform_indices = @transform_2, window_bounds = array<i64: 1, 256>}, {transform_indices = @transform_3, window_bounds = array<i64: 1, 256>}, {transform_indices = @transform_4, window_bounds = array<i64: 16, 256>}]} {
    %c0_i32 = arith.constant 0 : i32
    %0 = arith.cmpi eq, %arg2, %c0_i32 : i32
    %1 = arith.extui %0 : i1 to i32
    %c0_i32_0 = arith.constant 0 : i32
    %2 = arith.cmpi ne, %1, %c0_i32_0 : i32
    scf.if %2 {
      %cst_10 = arith.constant 0.000000e+00 : f32
      %12 = vector.broadcast %cst_10 : f32 to vector<16x256xf32>
      %c0_11 = arith.constant 0 : index
      %c0_12 = arith.constant 0 : index
      %13 = vector.load %arg8[%c0_11, %c0_12] : memref<16x256xf32, #tpu.memory_space<vmem>>, vector<16x256xf32>
      tpu.vector_store %arg8[%c0_11, %c0_12], %12 {strides = array<i32>} : memref<16x256xf32, #tpu.memory_space<vmem>>, vector<16x256xf32>,
    } else {
    }
    %c0 = arith.constant 0 : index
    %c0_1 = arith.constant 0 : index
    %3 = vector.load %arg8[%c0, %c0_1] : memref<16x256xf32, #tpu.memory_space<vmem>>, vector<16x256xf32>
    %c0_2 = arith.constant 0 : index
    %c0_3 = arith.constant 0 : index
    %4 = vector.load %arg3[%c0_2, %c0_3] : memref<16x128xbf16, #tpu.memory_space<vmem>>, vector<16x128xbf16>
    %c0_4 = arith.constant 0 : index
    %c0_5 = arith.constant 0 : index
    %5 = vector.load %arg4[%c0_4, %c0_5] : memref<128x256xbf16, #tpu.memory_space<vmem>>, vector<128x256xbf16>
    %cst = arith.constant dense<0.000000e+00> : vector<16x256xf32>
    %6 = tpu.matmul %4, %5, %cst {dimension_numbers = #tpu.dot_dimension_numbers<[1], [0], [0], [1], [0, 0, 1, 1], [], []>} : vector<16x128xbf16>, vector<128x256xbf16>, vector<16x256xf32> -> vector<16x256xf32>
    %7 = arith.addf %3, %6 : vector<16x256xf32>
    %c0_6 = arith.constant 0 : index
    %c0_7 = arith.constant 0 : index
    %8 = vector.load %arg8[%c0_6, %c0_7] : memref<16x256xf32, #tpu.memory_space<vmem>>, vector<16x256xf32>
    tpu.vector_store %arg8[%c0_6, %c0_7], %7 {strides = array<i32>} : memref<16x256xf32, #tpu.memory_space<vmem>>, vector<16x256xf32>,
    %c0_i32_8 = arith.constant 0 : i32
    %9 = arith.cmpi eq, %arg2, %c0_i32_8 : i32
    %10 = arith.extui %9 : i1 to i32
    %c0_i32_9 = arith.constant 0 : i32
    %11 = arith.cmpi ne, %10, %c0_i32_9 : i32
    scf.if %11 {
      %c0_10 = arith.constant 0 : index
      %c0_11 = arith.constant 0 : index
      %12 = vector.load %arg8[%c0_10, %c0_11] : memref<16x256xf32, #tpu.memory_space<vmem>>, vector<16x256xf32>
      %c0_12 = arith.constant 0 : index
      %c0_13 = arith.constant 0 : index
      %13 = vector.load %arg5[%c0_12, %c0_13] : memref<1x256xf32, #tpu.memory_space<vmem>>, vector<1x256xf32>
      %14 = vector.broadcast %13 : vector<1x256xf32> to vector<16x256xf32>
      %15 = arith.mulf %12, %14 : vector<16x256xf32>
      %c0_14 = arith.constant 0 : index
      %c0_15 = arith.constant 0 : index
      %16 = vector.load %arg6[%c0_14, %c0_15] : memref<1x256xf32, #tpu.memory_space<vmem>>, vector<1x256xf32>
      %17 = vector.broadcast %16 : vector<1x256xf32> to vector<16x256xf32>
      %18 = arith.addf %15, %17 : vector<16x256xf32>
      %c0_16 = arith.constant 0 : index
      %c0_17 = arith.constant 0 : index
      %19 = vector.load %arg7[%c0_16, %c0_17] : memref<16x256xf32, #tpu.memory_space<vmem>>, vector<16x256xf32>
      tpu.vector_store %arg7[%c0_16, %c0_17], %18 {strides = array<i32>} : memref<16x256xf32, #tpu.memory_space<vmem>>, vector<16x256xf32>,
    } else {
    }
    return
  }
  func.func @transform_0(%arg0: i32, %arg1: i32, %arg2: i32) -> (i32, i32) {
    %c0_i32 = arith.constant 0 : i32
    return %arg0, %arg2 : i32, i32
  }
  func.func @transform_1(%arg0: i32, %arg1: i32, %arg2: i32) -> (i32, i32) {
    %c0_i32 = arith.constant 0 : i32
    return %arg2, %arg1 : i32, i32
  }
  func.func @transform_2(%arg0: i32, %arg1: i32, %arg2: i32) -> (i32, i32) {
    %c0_i32 = arith.constant 0 : i32
    %c0_i32_0 = arith.constant 0 : i32
    return %c0_i32, %arg1 : i32, i32
  }
  func.func @transform_3(%arg0: i32, %arg1: i32, %arg2: i32) -> (i32, i32) {
    %c0_i32 = arith.constant 0 : i32
    %c0_i32_0 = arith.constant 0 : i32
    return %c0_i32, %arg1 : i32, i32
  }
  func.func @transform_4(%arg0: i32, %arg1: i32, %arg2: i32) -> (i32, i32) {
    %c0_i32 = arith.constant 0 : i32
    return %arg0, %arg1 : i32, i32
  }
}

module attributes {stable_mosaic.version = 11 : i64} {
  func.func @_mm_res_kernel(%arg0: i32, %arg1: i32, %arg2: i32, %arg3: memref<16x768xbf16, #tpu.memory_space<vmem>>, %arg4: memref<768x256xbf16, #tpu.memory_space<vmem>>, %arg5: memref<1x256xf32, #tpu.memory_space<vmem>>, %arg6: memref<1x256xf32, #tpu.memory_space<vmem>>, %arg7: memref<16x256xf32, #tpu.memory_space<vmem>>, %arg8: memref<16x256xf32, #tpu.memory_space<vmem>>, %arg9: memref<16x256xf32, #tpu.memory_space<vmem>>) attributes {dimension_semantics = [#tpu.dimension_semantics<parallel>, #tpu.dimension_semantics<parallel>, #tpu.dimension_semantics<arbitrary>], iteration_bounds = array<i64: 1, 1, 3>, scalar_prefetch = 0 : i64, scratch_operands = 1 : i64, tpu.core_type = #tpu.core_type<tc>, window_params = [{transform_indices = @transform_0, window_bounds = array<i64: 16, 768>}, {transform_indices = @transform_1, window_bounds = array<i64: 768, 256>}, {transform_indices = @transform_2, window_bounds = array<i64: 1, 256>}, {transform_indices = @transform_3, window_bounds = array<i64: 1, 256>}, {transform_indices = @transform_4, window_bounds = array<i64: 16, 256>}, {transform_indices = @transform_5, window_bounds = array<i64: 16, 256>}]} {
    %c0_i32 = arith.constant 0 : i32
    %0 = arith.cmpi eq, %arg2, %c0_i32 : i32
    %1 = arith.extui %0 : i1 to i32
    %c0_i32_0 = arith.constant 0 : i32
    %2 = arith.cmpi ne, %1, %c0_i32_0 : i32
    scf.if %2 {
      %cst_9 = arith.constant 0.000000e+00 : f32
      %12 = vector.broadcast %cst_9 : f32 to vector<16x256xf32>
      %c0_10 = arith.constant 0 : index
      %c0_11 = arith.constant 0 : index
      %13 = vector.load %arg9[%c0_10, %c0_11] : memref<16x256xf32, #tpu.memory_space<vmem>>, vector<16x256xf32>
      tpu.vector_store %arg9[%c0_10, %c0_11], %12 {strides = array<i32>} : memref<16x256xf32, #tpu.memory_space<vmem>>, vector<16x256xf32>,
    } else {
    }
    %c0 = arith.constant 0 : index
    %c0_1 = arith.constant 0 : index
    %3 = vector.load %arg9[%c0, %c0_1] : memref<16x256xf32, #tpu.memory_space<vmem>>, vector<16x256xf32>
    %c0_2 = arith.constant 0 : index
    %c0_3 = arith.constant 0 : index
    %4 = vector.load %arg3[%c0_2, %c0_3] : memref<16x768xbf16, #tpu.memory_space<vmem>>, vector<16x768xbf16>
    %c0_4 = arith.constant 0 : index
    %c0_5 = arith.constant 0 : index
    %5 = vector.load %arg4[%c0_4, %c0_5] : memref<768x256xbf16, #tpu.memory_space<vmem>>, vector<768x256xbf16>
    %cst = arith.constant dense<0.000000e+00> : vector<16x256xf32>
    %6 = tpu.matmul %4, %5, %cst {dimension_numbers = #tpu.dot_dimension_numbers<[1], [0], [0], [1], [0, 0, 1, 1], [], []>} : vector<16x768xbf16>, vector<768x256xbf16>, vector<16x256xf32> -> vector<16x256xf32>
    %7 = arith.addf %3, %6 : vector<16x256xf32>
    %c0_6 = arith.constant 0 : index
    %c0_7 = arith.constant 0 : index
    %8 = vector.load %arg9[%c0_6, %c0_7] : memref<16x256xf32, #tpu.memory_space<vmem>>, vector<16x256xf32>
    tpu.vector_store %arg9[%c0_6, %c0_7], %7 {strides = array<i32>} : memref<16x256xf32, #tpu.memory_space<vmem>>, vector<16x256xf32>,
    %c2_i32 = arith.constant 2 : i32
    %9 = arith.cmpi eq, %arg2, %c2_i32 : i32
    %10 = arith.extui %9 : i1 to i32
    %c0_i32_8 = arith.constant 0 : i32
    %11 = arith.cmpi ne, %10, %c0_i32_8 : i32
    scf.if %11 {
      %c0_9 = arith.constant 0 : index
      %c0_10 = arith.constant 0 : index
      %12 = vector.load %arg9[%c0_9, %c0_10] : memref<16x256xf32, #tpu.memory_space<vmem>>, vector<16x256xf32>
      %c0_11 = arith.constant 0 : index
      %c0_12 = arith.constant 0 : index
      %13 = vector.load %arg5[%c0_11, %c0_12] : memref<1x256xf32, #tpu.memory_space<vmem>>, vector<1x256xf32>
      %14 = vector.broadcast %13 : vector<1x256xf32> to vector<16x256xf32>
      %15 = arith.mulf %12, %14 : vector<16x256xf32>
      %c0_13 = arith.constant 0 : index
      %c0_14 = arith.constant 0 : index
      %16 = vector.load %arg6[%c0_13, %c0_14] : memref<1x256xf32, #tpu.memory_space<vmem>>, vector<1x256xf32>
      %17 = vector.broadcast %16 : vector<1x256xf32> to vector<16x256xf32>
      %18 = arith.addf %15, %17 : vector<16x256xf32>
      %c0_15 = arith.constant 0 : index
      %c0_16 = arith.constant 0 : index
      %19 = vector.load %arg7[%c0_15, %c0_16] : memref<16x256xf32, #tpu.memory_space<vmem>>, vector<16x256xf32>
      %20 = arith.addf %18, %19 : vector<16x256xf32>
      %cst_17 = arith.constant 0.000000e+00 : f32
      %21 = vector.broadcast %cst_17 : f32 to vector<16x256xf32>
      %22 = arith.maximumf %20, %21 : vector<16x256xf32>
      %c0_18 = arith.constant 0 : index
      %c0_19 = arith.constant 0 : index
      %23 = vector.load %arg8[%c0_18, %c0_19] : memref<16x256xf32, #tpu.memory_space<vmem>>, vector<16x256xf32>
      tpu.vector_store %arg8[%c0_18, %c0_19], %22 {strides = array<i32>} : memref<16x256xf32, #tpu.memory_space<vmem>>, vector<16x256xf32>,
    } else {
    }
    return
  }
  func.func @transform_0(%arg0: i32, %arg1: i32, %arg2: i32) -> (i32, i32) {
    %c0_i32 = arith.constant 0 : i32
    return %arg0, %arg2 : i32, i32
  }
  func.func @transform_1(%arg0: i32, %arg1: i32, %arg2: i32) -> (i32, i32) {
    %c0_i32 = arith.constant 0 : i32
    return %arg2, %arg1 : i32, i32
  }
  func.func @transform_2(%arg0: i32, %arg1: i32, %arg2: i32) -> (i32, i32) {
    %c0_i32 = arith.constant 0 : i32
    %c0_i32_0 = arith.constant 0 : i32
    return %c0_i32, %arg1 : i32, i32
  }
  func.func @transform_3(%arg0: i32, %arg1: i32, %arg2: i32) -> (i32, i32) {
    %c0_i32 = arith.constant 0 : i32
    %c0_i32_0 = arith.constant 0 : i32
    return %c0_i32, %arg1 : i32, i32
  }
  func.func @transform_4(%arg0: i32, %arg1: i32, %arg2: i32) -> (i32, i32) {
    %c0_i32 = arith.constant 0 : i32
    return %arg0, %arg1 : i32, i32
  }
  func.func @transform_5(%arg0: i32, %arg1: i32, %arg2: i32) -> (i32, i32) {
    %c0_i32 = arith.constant 0 : i32
    return %arg0, %arg1 : i32, i32
  }
}

module attributes {stable_mosaic.version = 11 : i64} {
  func.func @_mm_kernel(%arg0: i32, %arg1: i32, %arg2: i32, %arg3: memref<16x768xbf16, #tpu.memory_space<vmem>>, %arg4: memref<768x256xbf16, #tpu.memory_space<vmem>>, %arg5: memref<1x256xf32, #tpu.memory_space<vmem>>, %arg6: memref<1x256xf32, #tpu.memory_space<vmem>>, %arg7: memref<16x256xf32, #tpu.memory_space<vmem>>, %arg8: memref<16x256xf32, #tpu.memory_space<vmem>>) attributes {dimension_semantics = [#tpu.dimension_semantics<parallel>, #tpu.dimension_semantics<parallel>, #tpu.dimension_semantics<arbitrary>], iteration_bounds = array<i64: 1, 1, 3>, scalar_prefetch = 0 : i64, scratch_operands = 1 : i64, tpu.core_type = #tpu.core_type<tc>, window_params = [{transform_indices = @transform_0, window_bounds = array<i64: 16, 768>}, {transform_indices = @transform_1, window_bounds = array<i64: 768, 256>}, {transform_indices = @transform_2, window_bounds = array<i64: 1, 256>}, {transform_indices = @transform_3, window_bounds = array<i64: 1, 256>}, {transform_indices = @transform_4, window_bounds = array<i64: 16, 256>}]} {
    %c0_i32 = arith.constant 0 : i32
    %0 = arith.cmpi eq, %arg2, %c0_i32 : i32
    %1 = arith.extui %0 : i1 to i32
    %c0_i32_0 = arith.constant 0 : i32
    %2 = arith.cmpi ne, %1, %c0_i32_0 : i32
    scf.if %2 {
      %cst_9 = arith.constant 0.000000e+00 : f32
      %12 = vector.broadcast %cst_9 : f32 to vector<16x256xf32>
      %c0_10 = arith.constant 0 : index
      %c0_11 = arith.constant 0 : index
      %13 = vector.load %arg8[%c0_10, %c0_11] : memref<16x256xf32, #tpu.memory_space<vmem>>, vector<16x256xf32>
      tpu.vector_store %arg8[%c0_10, %c0_11], %12 {strides = array<i32>} : memref<16x256xf32, #tpu.memory_space<vmem>>, vector<16x256xf32>,
    } else {
    }
    %c0 = arith.constant 0 : index
    %c0_1 = arith.constant 0 : index
    %3 = vector.load %arg8[%c0, %c0_1] : memref<16x256xf32, #tpu.memory_space<vmem>>, vector<16x256xf32>
    %c0_2 = arith.constant 0 : index
    %c0_3 = arith.constant 0 : index
    %4 = vector.load %arg3[%c0_2, %c0_3] : memref<16x768xbf16, #tpu.memory_space<vmem>>, vector<16x768xbf16>
    %c0_4 = arith.constant 0 : index
    %c0_5 = arith.constant 0 : index
    %5 = vector.load %arg4[%c0_4, %c0_5] : memref<768x256xbf16, #tpu.memory_space<vmem>>, vector<768x256xbf16>
    %cst = arith.constant dense<0.000000e+00> : vector<16x256xf32>
    %6 = tpu.matmul %4, %5, %cst {dimension_numbers = #tpu.dot_dimension_numbers<[1], [0], [0], [1], [0, 0, 1, 1], [], []>} : vector<16x768xbf16>, vector<768x256xbf16>, vector<16x256xf32> -> vector<16x256xf32>
    %7 = arith.addf %3, %6 : vector<16x256xf32>
    %c0_6 = arith.constant 0 : index
    %c0_7 = arith.constant 0 : index
    %8 = vector.load %arg8[%c0_6, %c0_7] : memref<16x256xf32, #tpu.memory_space<vmem>>, vector<16x256xf32>
    tpu.vector_store %arg8[%c0_6, %c0_7], %7 {strides = array<i32>} : memref<16x256xf32, #tpu.memory_space<vmem>>, vector<16x256xf32>,
    %c2_i32 = arith.constant 2 : i32
    %9 = arith.cmpi eq, %arg2, %c2_i32 : i32
    %10 = arith.extui %9 : i1 to i32
    %c0_i32_8 = arith.constant 0 : i32
    %11 = arith.cmpi ne, %10, %c0_i32_8 : i32
    scf.if %11 {
      %c0_9 = arith.constant 0 : index
      %c0_10 = arith.constant 0 : index
      %12 = vector.load %arg8[%c0_9, %c0_10] : memref<16x256xf32, #tpu.memory_space<vmem>>, vector<16x256xf32>
      %c0_11 = arith.constant 0 : index
      %c0_12 = arith.constant 0 : index
      %13 = vector.load %arg5[%c0_11, %c0_12] : memref<1x256xf32, #tpu.memory_space<vmem>>, vector<1x256xf32>
      %14 = vector.broadcast %13 : vector<1x256xf32> to vector<16x256xf32>
      %15 = arith.mulf %12, %14 : vector<16x256xf32>
      %c0_13 = arith.constant 0 : index
      %c0_14 = arith.constant 0 : index
      %16 = vector.load %arg6[%c0_13, %c0_14] : memref<1x256xf32, #tpu.memory_space<vmem>>, vector<1x256xf32>
      %17 = vector.broadcast %16 : vector<1x256xf32> to vector<16x256xf32>
      %18 = arith.addf %15, %17 : vector<16x256xf32>
      %cst_15 = arith.constant 0.000000e+00 : f32
      %19 = vector.broadcast %cst_15 : f32 to vector<16x256xf32>
      %20 = arith.maximumf %18, %19 : vector<16x256xf32>
      %c0_16 = arith.constant 0 : index
      %c0_17 = arith.constant 0 : index
      %21 = vector.load %arg7[%c0_16, %c0_17] : memref<16x256xf32, #tpu.memory_space<vmem>>, vector<16x256xf32>
      tpu.vector_store %arg7[%c0_16, %c0_17], %20 {strides = array<i32>} : memref<16x256xf32, #tpu.memory_space<vmem>>, vector<16x256xf32>,
    } else {
    }
    return
  }
  func.func @transform_0(%arg0: i32, %arg1: i32, %arg2: i32) -> (i32, i32) {
    %c0_i32 = arith.constant 0 : i32
    return %arg0, %arg2 : i32, i32
  }
  func.func @transform_1(%arg0: i32, %arg1: i32, %arg2: i32) -> (i32, i32) {
    %c0_i32 = arith.constant 0 : i32
    return %arg2, %arg1 : i32, i32
  }
  func.func @transform_2(%arg0: i32, %arg1: i32, %arg2: i32) -> (i32, i32) {
    %c0_i32 = arith.constant 0 : i32
    %c0_i32_0 = arith.constant 0 : i32
    return %c0_i32, %arg1 : i32, i32
  }
  func.func @transform_3(%arg0: i32, %arg1: i32, %arg2: i32) -> (i32, i32) {
    %c0_i32 = arith.constant 0 : i32
    %c0_i32_0 = arith.constant 0 : i32
    return %c0_i32, %arg1 : i32, i32
  }
  func.func @transform_4(%arg0: i32, %arg1: i32, %arg2: i32) -> (i32, i32) {
    %c0_i32 = arith.constant 0 : i32
    return %arg0, %arg1 : i32, i32
  }
}

module attributes {stable_mosaic.version = 11 : i64} {
  func.func @_mm_kernel(%arg0: i32, %arg1: i32, %arg2: i32, %arg3: memref<16x768xbf16, #tpu.memory_space<vmem>>, %arg4: memref<768x256xbf16, #tpu.memory_space<vmem>>, %arg5: memref<1x256xf32, #tpu.memory_space<vmem>>, %arg6: memref<1x256xf32, #tpu.memory_space<vmem>>, %arg7: memref<16x256xf32, #tpu.memory_space<vmem>>, %arg8: memref<16x256xf32, #tpu.memory_space<vmem>>) attributes {dimension_semantics = [#tpu.dimension_semantics<parallel>, #tpu.dimension_semantics<parallel>, #tpu.dimension_semantics<arbitrary>], iteration_bounds = array<i64: 1, 2, 3>, scalar_prefetch = 0 : i64, scratch_operands = 1 : i64, tpu.core_type = #tpu.core_type<tc>, window_params = [{transform_indices = @transform_0, window_bounds = array<i64: 16, 768>}, {transform_indices = @transform_1, window_bounds = array<i64: 768, 256>}, {transform_indices = @transform_2, window_bounds = array<i64: 1, 256>}, {transform_indices = @transform_3, window_bounds = array<i64: 1, 256>}, {transform_indices = @transform_4, window_bounds = array<i64: 16, 256>}]} {
    %c0_i32 = arith.constant 0 : i32
    %0 = arith.cmpi eq, %arg2, %c0_i32 : i32
    %1 = arith.extui %0 : i1 to i32
    %c0_i32_0 = arith.constant 0 : i32
    %2 = arith.cmpi ne, %1, %c0_i32_0 : i32
    scf.if %2 {
      %cst_9 = arith.constant 0.000000e+00 : f32
      %12 = vector.broadcast %cst_9 : f32 to vector<16x256xf32>
      %c0_10 = arith.constant 0 : index
      %c0_11 = arith.constant 0 : index
      %13 = vector.load %arg8[%c0_10, %c0_11] : memref<16x256xf32, #tpu.memory_space<vmem>>, vector<16x256xf32>
      tpu.vector_store %arg8[%c0_10, %c0_11], %12 {strides = array<i32>} : memref<16x256xf32, #tpu.memory_space<vmem>>, vector<16x256xf32>,
    } else {
    }
    %c0 = arith.constant 0 : index
    %c0_1 = arith.constant 0 : index
    %3 = vector.load %arg8[%c0, %c0_1] : memref<16x256xf32, #tpu.memory_space<vmem>>, vector<16x256xf32>
    %c0_2 = arith.constant 0 : index
    %c0_3 = arith.constant 0 : index
    %4 = vector.load %arg3[%c0_2, %c0_3] : memref<16x768xbf16, #tpu.memory_space<vmem>>, vector<16x768xbf16>
    %c0_4 = arith.constant 0 : index
    %c0_5 = arith.constant 0 : index
    %5 = vector.load %arg4[%c0_4, %c0_5] : memref<768x256xbf16, #tpu.memory_space<vmem>>, vector<768x256xbf16>
    %cst = arith.constant dense<0.000000e+00> : vector<16x256xf32>
    %6 = tpu.matmul %4, %5, %cst {dimension_numbers = #tpu.dot_dimension_numbers<[1], [0], [0], [1], [0, 0, 1, 1], [], []>} : vector<16x768xbf16>, vector<768x256xbf16>, vector<16x256xf32> -> vector<16x256xf32>
    %7 = arith.addf %3, %6 : vector<16x256xf32>
    %c0_6 = arith.constant 0 : index
    %c0_7 = arith.constant 0 : index
    %8 = vector.load %arg8[%c0_6, %c0_7] : memref<16x256xf32, #tpu.memory_space<vmem>>, vector<16x256xf32>
    tpu.vector_store %arg8[%c0_6, %c0_7], %7 {strides = array<i32>} : memref<16x256xf32, #tpu.memory_space<vmem>>, vector<16x256xf32>,
    %c2_i32 = arith.constant 2 : i32
    %9 = arith.cmpi eq, %arg2, %c2_i32 : i32
    %10 = arith.extui %9 : i1 to i32
    %c0_i32_8 = arith.constant 0 : i32
    %11 = arith.cmpi ne, %10, %c0_i32_8 : i32
    scf.if %11 {
      %c0_9 = arith.constant 0 : index
      %c0_10 = arith.constant 0 : index
      %12 = vector.load %arg8[%c0_9, %c0_10] : memref<16x256xf32, #tpu.memory_space<vmem>>, vector<16x256xf32>
      %c0_11 = arith.constant 0 : index
      %c0_12 = arith.constant 0 : index
      %13 = vector.load %arg5[%c0_11, %c0_12] : memref<1x256xf32, #tpu.memory_space<vmem>>, vector<1x256xf32>
      %14 = vector.broadcast %13 : vector<1x256xf32> to vector<16x256xf32>
      %15 = arith.mulf %12, %14 : vector<16x256xf32>
      %c0_13 = arith.constant 0 : index
      %c0_14 = arith.constant 0 : index
      %16 = vector.load %arg6[%c0_13, %c0_14] : memref<1x256xf32, #tpu.memory_space<vmem>>, vector<1x256xf32>
      %17 = vector.broadcast %16 : vector<1x256xf32> to vector<16x256xf32>
      %18 = arith.addf %15, %17 : vector<16x256xf32>
      %cst_15 = arith.constant 0.000000e+00 : f32
      %19 = vector.broadcast %cst_15 : f32 to vector<16x256xf32>
      %20 = arith.maximumf %18, %19 : vector<16x256xf32>
      %c0_16 = arith.constant 0 : index
      %c0_17 = arith.constant 0 : index
      %21 = vector.load %arg7[%c0_16, %c0_17] : memref<16x256xf32, #tpu.memory_space<vmem>>, vector<16x256xf32>
      tpu.vector_store %arg7[%c0_16, %c0_17], %20 {strides = array<i32>} : memref<16x256xf32, #tpu.memory_space<vmem>>, vector<16x256xf32>,
    } else {
    }
    return
  }
  func.func @transform_0(%arg0: i32, %arg1: i32, %arg2: i32) -> (i32, i32) {
    %c0_i32 = arith.constant 0 : i32
    return %arg0, %arg2 : i32, i32
  }
  func.func @transform_1(%arg0: i32, %arg1: i32, %arg2: i32) -> (i32, i32) {
    %c0_i32 = arith.constant 0 : i32
    return %arg2, %arg1 : i32, i32
  }
  func.func @transform_2(%arg0: i32, %arg1: i32, %arg2: i32) -> (i32, i32) {
    %c0_i32 = arith.constant 0 : i32
    %c0_i32_0 = arith.constant 0 : i32
    return %c0_i32, %arg1 : i32, i32
  }
  func.func @transform_3(%arg0: i32, %arg1: i32, %arg2: i32) -> (i32, i32) {
    %c0_i32 = arith.constant 0 : i32
    %c0_i32_0 = arith.constant 0 : i32
    return %c0_i32, %arg1 : i32, i32
  }
  func.func @transform_4(%arg0: i32, %arg1: i32, %arg2: i32) -> (i32, i32) {
    %c0_i32 = arith.constant 0 : i32
    return %arg0, %arg1 : i32, i32
  }
}

module attributes {stable_mosaic.version = 11 : i64} {
  func.func @_mm_kernel(%arg0: i32, %arg1: i32, %arg2: i32, %arg3: memref<16x256xbf16, #tpu.memory_space<vmem>>, %arg4: memref<256x256xbf16, #tpu.memory_space<vmem>>, %arg5: memref<1x256xf32, #tpu.memory_space<vmem>>, %arg6: memref<1x256xf32, #tpu.memory_space<vmem>>, %arg7: memref<16x256xf32, #tpu.memory_space<vmem>>, %arg8: memref<16x256xf32, #tpu.memory_space<vmem>>) attributes {dimension_semantics = [#tpu.dimension_semantics<parallel>, #tpu.dimension_semantics<parallel>, #tpu.dimension_semantics<arbitrary>], iteration_bounds = array<i64: 1, 2, 1>, scalar_prefetch = 0 : i64, scratch_operands = 1 : i64, tpu.core_type = #tpu.core_type<tc>, window_params = [{transform_indices = @transform_0, window_bounds = array<i64: 16, 256>}, {transform_indices = @transform_1, window_bounds = array<i64: 256, 256>}, {transform_indices = @transform_2, window_bounds = array<i64: 1, 256>}, {transform_indices = @transform_3, window_bounds = array<i64: 1, 256>}, {transform_indices = @transform_4, window_bounds = array<i64: 16, 256>}]} {
    %c0_i32 = arith.constant 0 : i32
    %0 = arith.cmpi eq, %arg2, %c0_i32 : i32
    %1 = arith.extui %0 : i1 to i32
    %c0_i32_0 = arith.constant 0 : i32
    %2 = arith.cmpi ne, %1, %c0_i32_0 : i32
    scf.if %2 {
      %cst_10 = arith.constant 0.000000e+00 : f32
      %12 = vector.broadcast %cst_10 : f32 to vector<16x256xf32>
      %c0_11 = arith.constant 0 : index
      %c0_12 = arith.constant 0 : index
      %13 = vector.load %arg8[%c0_11, %c0_12] : memref<16x256xf32, #tpu.memory_space<vmem>>, vector<16x256xf32>
      tpu.vector_store %arg8[%c0_11, %c0_12], %12 {strides = array<i32>} : memref<16x256xf32, #tpu.memory_space<vmem>>, vector<16x256xf32>,
    } else {
    }
    %c0 = arith.constant 0 : index
    %c0_1 = arith.constant 0 : index
    %3 = vector.load %arg8[%c0, %c0_1] : memref<16x256xf32, #tpu.memory_space<vmem>>, vector<16x256xf32>
    %c0_2 = arith.constant 0 : index
    %c0_3 = arith.constant 0 : index
    %4 = vector.load %arg3[%c0_2, %c0_3] : memref<16x256xbf16, #tpu.memory_space<vmem>>, vector<16x256xbf16>
    %c0_4 = arith.constant 0 : index
    %c0_5 = arith.constant 0 : index
    %5 = vector.load %arg4[%c0_4, %c0_5] : memref<256x256xbf16, #tpu.memory_space<vmem>>, vector<256x256xbf16>
    %cst = arith.constant dense<0.000000e+00> : vector<16x256xf32>
    %6 = tpu.matmul %4, %5, %cst {dimension_numbers = #tpu.dot_dimension_numbers<[1], [0], [0], [1], [0, 0, 1, 1], [], []>} : vector<16x256xbf16>, vector<256x256xbf16>, vector<16x256xf32> -> vector<16x256xf32>
    %7 = arith.addf %3, %6 : vector<16x256xf32>
    %c0_6 = arith.constant 0 : index
    %c0_7 = arith.constant 0 : index
    %8 = vector.load %arg8[%c0_6, %c0_7] : memref<16x256xf32, #tpu.memory_space<vmem>>, vector<16x256xf32>
    tpu.vector_store %arg8[%c0_6, %c0_7], %7 {strides = array<i32>} : memref<16x256xf32, #tpu.memory_space<vmem>>, vector<16x256xf32>,
    %c0_i32_8 = arith.constant 0 : i32
    %9 = arith.cmpi eq, %arg2, %c0_i32_8 : i32
    %10 = arith.extui %9 : i1 to i32
    %c0_i32_9 = arith.constant 0 : i32
    %11 = arith.cmpi ne, %10, %c0_i32_9 : i32
    scf.if %11 {
      %c0_10 = arith.constant 0 : index
      %c0_11 = arith.constant 0 : index
      %12 = vector.load %arg8[%c0_10, %c0_11] : memref<16x256xf32, #tpu.memory_space<vmem>>, vector<16x256xf32>
      %c0_12 = arith.constant 0 : index
      %c0_13 = arith.constant 0 : index
      %13 = vector.load %arg5[%c0_12, %c0_13] : memref<1x256xf32, #tpu.memory_space<vmem>>, vector<1x256xf32>
      %14 = vector.broadcast %13 : vector<1x256xf32> to vector<16x256xf32>
      %15 = arith.mulf %12, %14 : vector<16x256xf32>
      %c0_14 = arith.constant 0 : index
      %c0_15 = arith.constant 0 : index
      %16 = vector.load %arg6[%c0_14, %c0_15] : memref<1x256xf32, #tpu.memory_space<vmem>>, vector<1x256xf32>
      %17 = vector.broadcast %16 : vector<1x256xf32> to vector<16x256xf32>
      %18 = arith.addf %15, %17 : vector<16x256xf32>
      %c0_16 = arith.constant 0 : index
      %c0_17 = arith.constant 0 : index
      %19 = vector.load %arg7[%c0_16, %c0_17] : memref<16x256xf32, #tpu.memory_space<vmem>>, vector<16x256xf32>
      tpu.vector_store %arg7[%c0_16, %c0_17], %18 {strides = array<i32>} : memref<16x256xf32, #tpu.memory_space<vmem>>, vector<16x256xf32>,
    } else {
    }
    return
  }
  func.func @transform_0(%arg0: i32, %arg1: i32, %arg2: i32) -> (i32, i32) {
    %c0_i32 = arith.constant 0 : i32
    return %arg0, %arg2 : i32, i32
  }
  func.func @transform_1(%arg0: i32, %arg1: i32, %arg2: i32) -> (i32, i32) {
    %c0_i32 = arith.constant 0 : i32
    return %arg2, %arg1 : i32, i32
  }
  func.func @transform_2(%arg0: i32, %arg1: i32, %arg2: i32) -> (i32, i32) {
    %c0_i32 = arith.constant 0 : i32
    %c0_i32_0 = arith.constant 0 : i32
    return %c0_i32, %arg1 : i32, i32
  }
  func.func @transform_3(%arg0: i32, %arg1: i32, %arg2: i32) -> (i32, i32) {
    %c0_i32 = arith.constant 0 : i32
    %c0_i32_0 = arith.constant 0 : i32
    return %c0_i32, %arg1 : i32, i32
  }
  func.func @transform_4(%arg0: i32, %arg1: i32, %arg2: i32) -> (i32, i32) {
    %c0_i32 = arith.constant 0 : i32
    return %arg0, %arg1 : i32, i32
  }
}

module attributes {stable_mosaic.version = 11 : i64} {
  func.func @_mm_res_kernel(%arg0: i32, %arg1: i32, %arg2: i32, %arg3: memref<16x768xbf16, #tpu.memory_space<vmem>>, %arg4: memref<768x256xbf16, #tpu.memory_space<vmem>>, %arg5: memref<1x256xf32, #tpu.memory_space<vmem>>, %arg6: memref<1x256xf32, #tpu.memory_space<vmem>>, %arg7: memref<16x256xf32, #tpu.memory_space<vmem>>, %arg8: memref<16x256xf32, #tpu.memory_space<vmem>>, %arg9: memref<16x256xf32, #tpu.memory_space<vmem>>) attributes {dimension_semantics = [#tpu.dimension_semantics<parallel>, #tpu.dimension_semantics<parallel>, #tpu.dimension_semantics<arbitrary>], iteration_bounds = array<i64: 1, 2, 6>, scalar_prefetch = 0 : i64, scratch_operands = 1 : i64, tpu.core_type = #tpu.core_type<tc>, window_params = [{transform_indices = @transform_0, window_bounds = array<i64: 16, 768>}, {transform_indices = @transform_1, window_bounds = array<i64: 768, 256>}, {transform_indices = @transform_2, window_bounds = array<i64: 1, 256>}, {transform_indices = @transform_3, window_bounds = array<i64: 1, 256>}, {transform_indices = @transform_4, window_bounds = array<i64: 16, 256>}, {transform_indices = @transform_5, window_bounds = array<i64: 16, 256>}]} {
    %c0_i32 = arith.constant 0 : i32
    %0 = arith.cmpi eq, %arg2, %c0_i32 : i32
    %1 = arith.extui %0 : i1 to i32
    %c0_i32_0 = arith.constant 0 : i32
    %2 = arith.cmpi ne, %1, %c0_i32_0 : i32
    scf.if %2 {
      %cst_9 = arith.constant 0.000000e+00 : f32
      %12 = vector.broadcast %cst_9 : f32 to vector<16x256xf32>
      %c0_10 = arith.constant 0 : index
      %c0_11 = arith.constant 0 : index
      %13 = vector.load %arg9[%c0_10, %c0_11] : memref<16x256xf32, #tpu.memory_space<vmem>>, vector<16x256xf32>
      tpu.vector_store %arg9[%c0_10, %c0_11], %12 {strides = array<i32>} : memref<16x256xf32, #tpu.memory_space<vmem>>, vector<16x256xf32>,
    } else {
    }
    %c0 = arith.constant 0 : index
    %c0_1 = arith.constant 0 : index
    %3 = vector.load %arg9[%c0, %c0_1] : memref<16x256xf32, #tpu.memory_space<vmem>>, vector<16x256xf32>
    %c0_2 = arith.constant 0 : index
    %c0_3 = arith.constant 0 : index
    %4 = vector.load %arg3[%c0_2, %c0_3] : memref<16x768xbf16, #tpu.memory_space<vmem>>, vector<16x768xbf16>
    %c0_4 = arith.constant 0 : index
    %c0_5 = arith.constant 0 : index
    %5 = vector.load %arg4[%c0_4, %c0_5] : memref<768x256xbf16, #tpu.memory_space<vmem>>, vector<768x256xbf16>
    %cst = arith.constant dense<0.000000e+00> : vector<16x256xf32>
    %6 = tpu.matmul %4, %5, %cst {dimension_numbers = #tpu.dot_dimension_numbers<[1], [0], [0], [1], [0, 0, 1, 1], [], []>} : vector<16x768xbf16>, vector<768x256xbf16>, vector<16x256xf32> -> vector<16x256xf32>
    %7 = arith.addf %3, %6 : vector<16x256xf32>
    %c0_6 = arith.constant 0 : index
    %c0_7 = arith.constant 0 : index
    %8 = vector.load %arg9[%c0_6, %c0_7] : memref<16x256xf32, #tpu.memory_space<vmem>>, vector<16x256xf32>
    tpu.vector_store %arg9[%c0_6, %c0_7], %7 {strides = array<i32>} : memref<16x256xf32, #tpu.memory_space<vmem>>, vector<16x256xf32>,
    %c5_i32 = arith.constant 5 : i32
    %9 = arith.cmpi eq, %arg2, %c5_i32 : i32
    %10 = arith.extui %9 : i1 to i32
    %c0_i32_8 = arith.constant 0 : i32
    %11 = arith.cmpi ne, %10, %c0_i32_8 : i32
    scf.if %11 {
      %c0_9 = arith.constant 0 : index
      %c0_10 = arith.constant 0 : index
      %12 = vector.load %arg9[%c0_9, %c0_10] : memref<16x256xf32, #tpu.memory_space<vmem>>, vector<16x256xf32>
      %c0_11 = arith.constant 0 : index
      %c0_12 = arith.constant 0 : index
      %13 = vector.load %arg5[%c0_11, %c0_12] : memref<1x256xf32, #tpu.memory_space<vmem>>, vector<1x256xf32>
      %14 = vector.broadcast %13 : vector<1x256xf32> to vector<16x256xf32>
      %15 = arith.mulf %12, %14 : vector<16x256xf32>
      %c0_13 = arith.constant 0 : index
      %c0_14 = arith.constant 0 : index
      %16 = vector.load %arg6[%c0_13, %c0_14] : memref<1x256xf32, #tpu.memory_space<vmem>>, vector<1x256xf32>
      %17 = vector.broadcast %16 : vector<1x256xf32> to vector<16x256xf32>
      %18 = arith.addf %15, %17 : vector<16x256xf32>
      %c0_15 = arith.constant 0 : index
      %c0_16 = arith.constant 0 : index
      %19 = vector.load %arg7[%c0_15, %c0_16] : memref<16x256xf32, #tpu.memory_space<vmem>>, vector<16x256xf32>
      %20 = arith.addf %18, %19 : vector<16x256xf32>
      %cst_17 = arith.constant 0.000000e+00 : f32
      %21 = vector.broadcast %cst_17 : f32 to vector<16x256xf32>
      %22 = arith.maximumf %20, %21 : vector<16x256xf32>
      %c0_18 = arith.constant 0 : index
      %c0_19 = arith.constant 0 : index
      %23 = vector.load %arg8[%c0_18, %c0_19] : memref<16x256xf32, #tpu.memory_space<vmem>>, vector<16x256xf32>
      tpu.vector_store %arg8[%c0_18, %c0_19], %22 {strides = array<i32>} : memref<16x256xf32, #tpu.memory_space<vmem>>, vector<16x256xf32>,
    } else {
    }
    return
  }
  func.func @transform_0(%arg0: i32, %arg1: i32, %arg2: i32) -> (i32, i32) {
    %c0_i32 = arith.constant 0 : i32
    return %arg0, %arg2 : i32, i32
  }
  func.func @transform_1(%arg0: i32, %arg1: i32, %arg2: i32) -> (i32, i32) {
    %c0_i32 = arith.constant 0 : i32
    return %arg2, %arg1 : i32, i32
  }
  func.func @transform_2(%arg0: i32, %arg1: i32, %arg2: i32) -> (i32, i32) {
    %c0_i32 = arith.constant 0 : i32
    %c0_i32_0 = arith.constant 0 : i32
    return %c0_i32, %arg1 : i32, i32
  }
  func.func @transform_3(%arg0: i32, %arg1: i32, %arg2: i32) -> (i32, i32) {
    %c0_i32 = arith.constant 0 : i32
    %c0_i32_0 = arith.constant 0 : i32
    return %c0_i32, %arg1 : i32, i32
  }
  func.func @transform_4(%arg0: i32, %arg1: i32, %arg2: i32) -> (i32, i32) {
    %c0_i32 = arith.constant 0 : i32
    return %arg0, %arg1 : i32, i32
  }
  func.func @transform_5(%arg0: i32, %arg1: i32, %arg2: i32) -> (i32, i32) {
    %c0_i32 = arith.constant 0 : i32
    return %arg0, %arg1 : i32, i32
  }
}

module attributes {stable_mosaic.version = 11 : i64} {
  func.func @_mm_kernel(%arg0: i32, %arg1: i32, %arg2: i32, %arg3: memref<16x768xbf16, #tpu.memory_space<vmem>>, %arg4: memref<768x256xbf16, #tpu.memory_space<vmem>>, %arg5: memref<1x256xf32, #tpu.memory_space<vmem>>, %arg6: memref<1x256xf32, #tpu.memory_space<vmem>>, %arg7: memref<16x256xf32, #tpu.memory_space<vmem>>, %arg8: memref<16x256xf32, #tpu.memory_space<vmem>>) attributes {dimension_semantics = [#tpu.dimension_semantics<parallel>, #tpu.dimension_semantics<parallel>, #tpu.dimension_semantics<arbitrary>], iteration_bounds = array<i64: 1, 2, 6>, scalar_prefetch = 0 : i64, scratch_operands = 1 : i64, tpu.core_type = #tpu.core_type<tc>, window_params = [{transform_indices = @transform_0, window_bounds = array<i64: 16, 768>}, {transform_indices = @transform_1, window_bounds = array<i64: 768, 256>}, {transform_indices = @transform_2, window_bounds = array<i64: 1, 256>}, {transform_indices = @transform_3, window_bounds = array<i64: 1, 256>}, {transform_indices = @transform_4, window_bounds = array<i64: 16, 256>}]} {
    %c0_i32 = arith.constant 0 : i32
    %0 = arith.cmpi eq, %arg2, %c0_i32 : i32
    %1 = arith.extui %0 : i1 to i32
    %c0_i32_0 = arith.constant 0 : i32
    %2 = arith.cmpi ne, %1, %c0_i32_0 : i32
    scf.if %2 {
      %cst_9 = arith.constant 0.000000e+00 : f32
      %12 = vector.broadcast %cst_9 : f32 to vector<16x256xf32>
      %c0_10 = arith.constant 0 : index
      %c0_11 = arith.constant 0 : index
      %13 = vector.load %arg8[%c0_10, %c0_11] : memref<16x256xf32, #tpu.memory_space<vmem>>, vector<16x256xf32>
      tpu.vector_store %arg8[%c0_10, %c0_11], %12 {strides = array<i32>} : memref<16x256xf32, #tpu.memory_space<vmem>>, vector<16x256xf32>,
    } else {
    }
    %c0 = arith.constant 0 : index
    %c0_1 = arith.constant 0 : index
    %3 = vector.load %arg8[%c0, %c0_1] : memref<16x256xf32, #tpu.memory_space<vmem>>, vector<16x256xf32>
    %c0_2 = arith.constant 0 : index
    %c0_3 = arith.constant 0 : index
    %4 = vector.load %arg3[%c0_2, %c0_3] : memref<16x768xbf16, #tpu.memory_space<vmem>>, vector<16x768xbf16>
    %c0_4 = arith.constant 0 : index
    %c0_5 = arith.constant 0 : index
    %5 = vector.load %arg4[%c0_4, %c0_5] : memref<768x256xbf16, #tpu.memory_space<vmem>>, vector<768x256xbf16>
    %cst = arith.constant dense<0.000000e+00> : vector<16x256xf32>
    %6 = tpu.matmul %4, %5, %cst {dimension_numbers = #tpu.dot_dimension_numbers<[1], [0], [0], [1], [0, 0, 1, 1], [], []>} : vector<16x768xbf16>, vector<768x256xbf16>, vector<16x256xf32> -> vector<16x256xf32>
    %7 = arith.addf %3, %6 : vector<16x256xf32>
    %c0_6 = arith.constant 0 : index
    %c0_7 = arith.constant 0 : index
    %8 = vector.load %arg8[%c0_6, %c0_7] : memref<16x256xf32, #tpu.memory_space<vmem>>, vector<16x256xf32>
    tpu.vector_store %arg8[%c0_6, %c0_7], %7 {strides = array<i32>} : memref<16x256xf32, #tpu.memory_space<vmem>>, vector<16x256xf32>,
    %c5_i32 = arith.constant 5 : i32
    %9 = arith.cmpi eq, %arg2, %c5_i32 : i32
    %10 = arith.extui %9 : i1 to i32
    %c0_i32_8 = arith.constant 0 : i32
    %11 = arith.cmpi ne, %10, %c0_i32_8 : i32
    scf.if %11 {
      %c0_9 = arith.constant 0 : index
      %c0_10 = arith.constant 0 : index
      %12 = vector.load %arg8[%c0_9, %c0_10] : memref<16x256xf32, #tpu.memory_space<vmem>>, vector<16x256xf32>
      %c0_11 = arith.constant 0 : index
      %c0_12 = arith.constant 0 : index
      %13 = vector.load %arg5[%c0_11, %c0_12] : memref<1x256xf32, #tpu.memory_space<vmem>>, vector<1x256xf32>
      %14 = vector.broadcast %13 : vector<1x256xf32> to vector<16x256xf32>
      %15 = arith.mulf %12, %14 : vector<16x256xf32>
      %c0_13 = arith.constant 0 : index
      %c0_14 = arith.constant 0 : index
      %16 = vector.load %arg6[%c0_13, %c0_14] : memref<1x256xf32, #tpu.memory_space<vmem>>, vector<1x256xf32>
      %17 = vector.broadcast %16 : vector<1x256xf32> to vector<16x256xf32>
      %18 = arith.addf %15, %17 : vector<16x256xf32>
      %cst_15 = arith.constant 0.000000e+00 : f32
      %19 = vector.broadcast %cst_15 : f32 to vector<16x256xf32>
      %20 = arith.maximumf %18, %19 : vector<16x256xf32>
      %c0_16 = arith.constant 0 : index
      %c0_17 = arith.constant 0 : index
      %21 = vector.load %arg7[%c0_16, %c0_17] : memref<16x256xf32, #tpu.memory_space<vmem>>, vector<16x256xf32>
      tpu.vector_store %arg7[%c0_16, %c0_17], %20 {strides = array<i32>} : memref<16x256xf32, #tpu.memory_space<vmem>>, vector<16x256xf32>,
    } else {
    }
    return
  }
  func.func @transform_0(%arg0: i32, %arg1: i32, %arg2: i32) -> (i32, i32) {
    %c0_i32 = arith.constant 0 : i32
    return %arg0, %arg2 : i32, i32
  }
  func.func @transform_1(%arg0: i32, %arg1: i32, %arg2: i32) -> (i32, i32) {
    %c0_i32 = arith.constant 0 : i32
    return %arg2, %arg1 : i32, i32
  }
  func.func @transform_2(%arg0: i32, %arg1: i32, %arg2: i32) -> (i32, i32) {
    %c0_i32 = arith.constant 0 : i32
    %c0_i32_0 = arith.constant 0 : i32
    return %c0_i32, %arg1 : i32, i32
  }
  func.func @transform_3(%arg0: i32, %arg1: i32, %arg2: i32) -> (i32, i32) {
    %c0_i32 = arith.constant 0 : i32
    %c0_i32_0 = arith.constant 0 : i32
    return %c0_i32, %arg1 : i32, i32
  }
  func.func @transform_4(%arg0: i32, %arg1: i32, %arg2: i32) -> (i32, i32) {
    %c0_i32 = arith.constant 0 : i32
    return %arg0, %arg1 : i32, i32
  }
}

module attributes {stable_mosaic.version = 11 : i64} {
  func.func @_mm_kernel(%arg0: i32, %arg1: i32, %arg2: i32, %arg3: memref<16x512xbf16, #tpu.memory_space<vmem>>, %arg4: memref<512x128xbf16, #tpu.memory_space<vmem>>, %arg5: memref<1x128xf32, #tpu.memory_space<vmem>>, %arg6: memref<1x128xf32, #tpu.memory_space<vmem>>, %arg7: memref<16x128xf32, #tpu.memory_space<vmem>>, %arg8: memref<16x128xf32, #tpu.memory_space<vmem>>) attributes {dimension_semantics = [#tpu.dimension_semantics<parallel>, #tpu.dimension_semantics<parallel>, #tpu.dimension_semantics<arbitrary>], iteration_bounds = array<i64: 1, 1, 1>, scalar_prefetch = 0 : i64, scratch_operands = 1 : i64, tpu.core_type = #tpu.core_type<tc>, window_params = [{transform_indices = @transform_0, window_bounds = array<i64: 16, 512>}, {transform_indices = @transform_1, window_bounds = array<i64: 512, 128>}, {transform_indices = @transform_2, window_bounds = array<i64: 1, 128>}, {transform_indices = @transform_3, window_bounds = array<i64: 1, 128>}, {transform_indices = @transform_4, window_bounds = array<i64: 16, 128>}]} {
    %c0_i32 = arith.constant 0 : i32
    %0 = arith.cmpi eq, %arg2, %c0_i32 : i32
    %1 = arith.extui %0 : i1 to i32
    %c0_i32_0 = arith.constant 0 : i32
    %2 = arith.cmpi ne, %1, %c0_i32_0 : i32
    scf.if %2 {
      %cst_10 = arith.constant 0.000000e+00 : f32
      %12 = vector.broadcast %cst_10 : f32 to vector<16x128xf32>
      %c0_11 = arith.constant 0 : index
      %c0_12 = arith.constant 0 : index
      %13 = vector.load %arg8[%c0_11, %c0_12] : memref<16x128xf32, #tpu.memory_space<vmem>>, vector<16x128xf32>
      tpu.vector_store %arg8[%c0_11, %c0_12], %12 {strides = array<i32>} : memref<16x128xf32, #tpu.memory_space<vmem>>, vector<16x128xf32>,
    } else {
    }
    %c0 = arith.constant 0 : index
    %c0_1 = arith.constant 0 : index
    %3 = vector.load %arg8[%c0, %c0_1] : memref<16x128xf32, #tpu.memory_space<vmem>>, vector<16x128xf32>
    %c0_2 = arith.constant 0 : index
    %c0_3 = arith.constant 0 : index
    %4 = vector.load %arg3[%c0_2, %c0_3] : memref<16x512xbf16, #tpu.memory_space<vmem>>, vector<16x512xbf16>
    %c0_4 = arith.constant 0 : index
    %c0_5 = arith.constant 0 : index
    %5 = vector.load %arg4[%c0_4, %c0_5] : memref<512x128xbf16, #tpu.memory_space<vmem>>, vector<512x128xbf16>
    %cst = arith.constant dense<0.000000e+00> : vector<16x128xf32>
    %6 = tpu.matmul %4, %5, %cst {dimension_numbers = #tpu.dot_dimension_numbers<[1], [0], [0], [1], [0, 0, 1, 1], [], []>} : vector<16x512xbf16>, vector<512x128xbf16>, vector<16x128xf32> -> vector<16x128xf32>
    %7 = arith.addf %3, %6 : vector<16x128xf32>
    %c0_6 = arith.constant 0 : index
    %c0_7 = arith.constant 0 : index
    %8 = vector.load %arg8[%c0_6, %c0_7] : memref<16x128xf32, #tpu.memory_space<vmem>>, vector<16x128xf32>
    tpu.vector_store %arg8[%c0_6, %c0_7], %7 {strides = array<i32>} : memref<16x128xf32, #tpu.memory_space<vmem>>, vector<16x128xf32>,
    %c0_i32_8 = arith.constant 0 : i32
    %9 = arith.cmpi eq, %arg2, %c0_i32_8 : i32
    %10 = arith.extui %9 : i1 to i32
    %c0_i32_9 = arith.constant 0 : i32
    %11 = arith.cmpi ne, %10, %c0_i32_9 : i32
    scf.if %11 {
      %c0_10 = arith.constant 0 : index
      %c0_11 = arith.constant 0 : index
      %12 = vector.load %arg8[%c0_10, %c0_11] : memref<16x128xf32, #tpu.memory_space<vmem>>, vector<16x128xf32>
      %c0_12 = arith.constant 0 : index
      %c0_13 = arith.constant 0 : index
      %13 = vector.load %arg5[%c0_12, %c0_13] : memref<1x128xf32, #tpu.memory_space<vmem>>, vector<1x128xf32>
      %14 = vector.broadcast %13 : vector<1x128xf32> to vector<16x128xf32>
      %15 = arith.mulf %12, %14 : vector<16x128xf32>
      %c0_14 = arith.constant 0 : index
      %c0_15 = arith.constant 0 : index
      %16 = vector.load %arg6[%c0_14, %c0_15] : memref<1x128xf32, #tpu.memory_space<vmem>>, vector<1x128xf32>
      %17 = vector.broadcast %16 : vector<1x128xf32> to vector<16x128xf32>
      %18 = arith.addf %15, %17 : vector<16x128xf32>
      %c0_16 = arith.constant 0 : index
      %c0_17 = arith.constant 0 : index
      %19 = vector.load %arg7[%c0_16, %c0_17] : memref<16x128xf32, #tpu.memory_space<vmem>>, vector<16x128xf32>
      tpu.vector_store %arg7[%c0_16, %c0_17], %18 {strides = array<i32>} : memref<16x128xf32, #tpu.memory_space<vmem>>, vector<16x128xf32>,
    } else {
    }
    return
  }
  func.func @transform_0(%arg0: i32, %arg1: i32, %arg2: i32) -> (i32, i32) {
    %c0_i32 = arith.constant 0 : i32
    return %arg0, %arg2 : i32, i32
  }
  func.func @transform_1(%arg0: i32, %arg1: i32, %arg2: i32) -> (i32, i32) {
    %c0_i32 = arith.constant 0 : i32
    return %arg2, %arg1 : i32, i32
  }
  func.func @transform_2(%arg0: i32, %arg1: i32, %arg2: i32) -> (i32, i32) {
    %c0_i32 = arith.constant 0 : i32
    %c0_i32_0 = arith.constant 0 : i32
    return %c0_i32, %arg1 : i32, i32
  }
  func.func @transform_3(%arg0: i32, %arg1: i32, %arg2: i32) -> (i32, i32) {
    %c0_i32 = arith.constant 0 : i32
    %c0_i32_0 = arith.constant 0 : i32
    return %c0_i32, %arg1 : i32, i32
  }
  func.func @transform_4(%arg0: i32, %arg1: i32, %arg2: i32) -> (i32, i32) {
    %c0_i32 = arith.constant 0 : i32
    return %arg0, %arg1 : i32, i32
  }
}

</mosaic_0001>

<bundles_post_ra>
// kernel: multitask_resnet_forward.21
= control target key start
LH: loop header
LB: loop body
LE: loop exit
PB: predicated region body
PF: predicated region fallthrough
CT: control target
= control target key end

     0   :  { %s1921_s1 = inlined_call_operand.vmem [shape: bf16[128,128], index: 1, kind: input, shape index: {}]   ;;  %s1922_s0 = inlined_call_operand.vmem [shape: bf16[512,128], index: 0, kind: input, shape index: {}]   ;;  %s1923_s2 = inlined_call_operand.vmem [shape: f32[1,128], index: 2, kind: input, shape index: {}]   ;;  %s1924_s3 = inlined_call_operand.vmem [shape: f32[1,128], index: 3, kind: input, shape index: {}]   ;;  %s1925_s4 = inlined_call_operand.vmem [shape: f32[512,128], index: 4, kind: output, shape index: {}]  }
   0x1   :  { %v1406_v0 = vld [vmem:[%s1921_s1 + $0x38] sm:$0xff]   ;;  %v1407_v1 = vld [vmem:[%s1921_s1 + $0x30] sm:$0xff]   ;;  %v1408_v2 = vld [vmem:[%s1921_s1 + $0x28] sm:$0xff]  }
   0x2   :  { %1310 = vmatprep.subr.bf16.mxu0 %v1406_v0  ;;  %1390 = vmatprep.subr.bf16.mxu1 %v1406_v0  ;;  %v1409_v3 = vld [vmem:[%s1921_s1 + $0x20] sm:$0xff]   ;;  %v1410_v6 = vld [vmem:[%s1921_s1 + $0x18] sm:$0xff]   ;;  %v1411_v7 = vld [vmem:[%s1921_s1 + $0x10] sm:$0xff]  }
   0x3   :  { %1311 = vmatpush3.bf16.msra.mxu0 %v1406_v0  ;;  %1398 = vmatpush3.bf16.msra.mxu1 %v1406_v0  ;;  %v1414_v4 = vld [vmem:[%s1922_s0] sm:$0xff]   ;;  %v1412_v8 = vld [vmem:[%s1921_s1 + $0x8] sm:$0xff]   ;;  %v1418_v12 = vld [vmem:[%s1922_s0 + $0x10] sm:$0xff]  }
   0x4   :  { %1312 = vmatprep.subr.bf16.mxu0 %v1407_v1  ;;  %1391 = vmatprep.subr.bf16.mxu1 %v1407_v1  ;;  %v1415_v5 = vld [vmem:[%s1922_s0 + $0x80] sm:$0xff]   ;;  %v1416_v10 = vld [vmem:[%s1922_s0 + $0x8] sm:$0xff]   ;;  %v1419_v13 = vld [vmem:[%s1922_s0 + $0x90] sm:$0xff]  }
   0x5   :  { %1326 = vmatprep.mubr.bf16.mxu0 %v1414_v4  ;;  %1358 = vmatprep.mubr.bf16.mxu1 %v1415_v5  ;;  %v1413_v9 = vld [vmem:[%s1921_s1] sm:$0xff]   ;;  %v1417_v11 = vld [vmem:[%s1922_s0 + $0x88] sm:$0xff]   ;;  %v1420_v14 = vld [vmem:[%s1922_s0 + $0x18] sm:$0xff]  }
   0x6   :  { %v1421_v15 = vld [vmem:[%s1922_s0 + $0x98] sm:$0xff]   ;;  %v1422_v16 = vld [vmem:[%s1922_s0 + $0x20] sm:$0xff]   ;;  %v1424_v18 = vld [vmem:[%s1922_s0 + $0x28] sm:$0xff]  }
   0x7   :  { %1313 = vmatpush3.bf16.msra.mxu0 %v1407_v1  ;;  %1399 = vmatpush3.bf16.msra.mxu1 %v1407_v1  ;;  %v1423_v17 = vld [vmem:[%s1922_s0 + $0xa0] sm:$0xff]   ;;  %v1425_v19 = vld [vmem:[%s1922_s0 + $0xa8] sm:$0xff]   ;;  %v1426_v20 = vld [vmem:[%s1922_s0 + $0x30] sm:$0xff]  }
   0x8   :  { %1314 = vmatprep.subr.bf16.mxu0 %v1408_v2  ;;  %1392 = vmatprep.subr.bf16.mxu1 %v1408_v2  ;;  %v1427_v21 = vld [vmem:[%s1922_s0 + $0xb0] sm:$0xff]   ;;  %v1428_v22 = vld [vmem:[%s1922_s0 + $0x38] sm:$0xff]   ;;  %v1430_v24 = vld [vmem:[%s1922_s0 + $0x40] sm:$0xff]  }
   0x9   :  { %v1429_v23 = vld [vmem:[%s1922_s0 + $0xb8] sm:$0xff]   ;;  %v1431_v25 = vld [vmem:[%s1922_s0 + $0xc0] sm:$0xff]   ;;  %v1432_v26 = vld [vmem:[%s1922_s0 + $0x48] sm:$0xff]  }
   0xa   :  { %v1433_v27 = vld [vmem:[%s1922_s0 + $0xc8] sm:$0xff]   ;;  %v1434_v28 = vld [vmem:[%s1922_s0 + $0x50] sm:$0xff]   ;;  %v1436_v30 = vld [vmem:[%s1922_s0 + $0x58] sm:$0xff]  }
   0xb   :  { %1315 = vmatpush3.bf16.msra.mxu0 %v1408_v2  ;;  %1400 = vmatpush3.bf16.msra.mxu1 %v1408_v2  ;;  %v1435_v29 = vld [vmem:[%s1922_s0 + $0xd0] sm:$0xff]   ;;  %v1437_v31 = vld [vmem:[%s1922_s0 + $0xd8] sm:$0xff]   ;;  %v1438_v32 = vld [vmem:[%s1922_s0 + $0x60] sm:$0xff]  }
   0xc   :  { %1316 = vmatprep.subr.bf16.mxu0 %v1409_v3  ;;  %1393 = vmatprep.subr.bf16.mxu1 %v1409_v3  ;;  %v1439_v33 = vld [vmem:[%s1922_s0 + $0xe0] sm:$0xff]   ;;  %v1440_v34 = vld [vmem:[%s1922_s0 + $0x68] sm:$0xff]   ;;  %v1442_v36 = vld [vmem:[%s1922_s0 + $0x70] sm:$0xff]  }
   0xd   :  { %v1441_v35 = vld [vmem:[%s1922_s0 + $0xe8] sm:$0xff]   ;;  %v1443_v37 = vld [vmem:[%s1922_s0 + $0xf0] sm:$0xff]   ;;  %v1444_v38 = vld [vmem:[%s1922_s0 + $0x78] sm:$0xff]  }
   0xe   :  { %v1445_v39 = vld [vmem:[%s1922_s0 + $0xf8] sm:$0xff]   ;;  %v1594_v40 = vld [vmem:[%s1923_s2] ss:$0 sm:$0xff] }
   0xf   :  { %1317 = vmatpush3.bf16.msra.mxu0 %v1409_v3  ;;  %1401 = vmatpush3.bf16.msra.mxu1 %v1409_v3  ;;  %v1599_v42 = vld [vmem:[%s1924_s3] ss:$0 sm:$0xff] }
  0x10   :  { %1318 = vmatprep.subr.bf16.mxu0 %v1410_v6  ;;  %1394 = vmatprep.subr.bf16.mxu1 %v1410_v6 }
  0x13   :  { %1319 = vmatpush3.bf16.msra.mxu0 %v1410_v6  ;;  %1402 = vmatpush3.bf16.msra.mxu1 %v1410_v6 }
  0x14   :  { %1320 = vmatprep.subr.bf16.mxu0 %v1411_v7  ;;  %1395 = vmatprep.subr.bf16.mxu1 %v1411_v7 }
  0x17   :  { %1321 = vmatpush3.bf16.msra.mxu0 %v1411_v7  ;;  %1403 = vmatpush3.bf16.msra.mxu1 %v1411_v7 }
  0x18   :  { %1322 = vmatprep.subr.bf16.mxu0 %v1412_v8  ;;  %1396 = vmatprep.subr.bf16.mxu1 %v1412_v8 }
  0x1b   :  { %1323 = vmatpush3.bf16.msra.mxu0 %v1412_v8  ;;  %1404 = vmatpush3.bf16.msra.mxu1 %v1412_v8 }
  0x1c   :  { %1324 = vmatprep.subr.bf16.mxu0 %v1413_v9  ;;  %1397 = vmatprep.subr.bf16.mxu1 %v1413_v9 }
  0x1f   :  { %1325 = vmatpush3.bf16.msra.mxu0 %v1413_v9  ;;  %1405 = vmatpush3.bf16.msra.mxu1 %v1413_v9 }
  0x22   :  { %1327 = vmatmul.mubr.bf16.vlgmr.msra.gmra.mxu0 %v1416_v10  ;;  %1359 = vmatmul.mubr.bf16.vlgmr.msra.gmra.mxu1 %v1417_v11 }
  0x23   :  { %1330 = vmatprep.mubr.bf16.mxu0 %v1418_v12  ;;  %1362 = vmatprep.mubr.bf16.mxu1 %v1419_v13 }
  0x2a   :  { %1331 = vmatmul.mubr.bf16.gmra.mxu0 %v1420_v14  ;;  %1363 = vmatmul.mubr.bf16.gmra.mxu1 %v1421_v15 }
  0x2b   :  { %1334 = vmatprep.mubr.bf16.mxu0 %v1422_v16  ;;  %1366 = vmatprep.mubr.bf16.mxu1 %v1423_v17 }
  0x32   :  { %1335 = vmatmul.mubr.bf16.gmra.mxu0 %v1424_v18  ;;  %1367 = vmatmul.mubr.bf16.gmra.mxu1 %v1425_v19 }
  0x33   :  { %1338 = vmatprep.mubr.bf16.mxu0 %v1426_v20  ;;  %1370 = vmatprep.mubr.bf16.mxu1 %v1427_v21 }
  0x3a   :  { %1339 = vmatmul.mubr.bf16.gmra.mxu0 %v1428_v22  ;;  %1371 = vmatmul.mubr.bf16.gmra.mxu1 %v1429_v23 }
  0x3b   :  { %1342 = vmatprep.mubr.bf16.mxu0 %v1430_v24  ;;  %1374 = vmatprep.mubr.bf16.mxu1 %v1431_v25 }
  0x42   :  { %1343 = vmatmul.mubr.bf16.gmra.mxu0 %v1432_v26  ;;  %1375 = vmatmul.mubr.bf16.gmra.mxu1 %v1433_v27 }
  0x43   :  { %1346 = vmatprep.mubr.bf16.mxu0 %v1434_v28  ;;  %1378 = vmatprep.mubr.bf16.mxu1 %v1435_v29 }
  0x4a   :  { %1347 = vmatmul.mubr.bf16.gmra.mxu0 %v1436_v30  ;;  %1379 = vmatmul.mubr.bf16.gmra.mxu1 %v1437_v31 }
  0x4b   :  { %1350 = vmatprep.mubr.bf16.mxu0 %v1438_v32  ;;  %1382 = vmatprep.mubr.bf16.mxu1 %v1439_v33 }
  0x52   :  { %1351 = vmatmul.mubr.bf16.gmra.mxu0 %v1440_v34  ;;  %1383 = vmatmul.mubr.bf16.gmra.mxu1 %v1441_v35 }
  0x53   :  { %1354 = vmatprep.mubr.bf16.mxu0 %v1442_v36  ;;  %1386 = vmatprep.mubr.bf16.mxu1 %v1443_v37 }
  0x5a   :  { %1355 = vmatmul.mubr.bf16.gmra.mxu0 %v1444_v38  ;;  %1387 = vmatmul.mubr.bf16.gmra.mxu1 %v1445_v39 }
  0xe2   :  { %v1328_v41 = vpop.f32.mrf.mxu0  ;;  %v1360_v43 = vpop.f32.mrf.mxu1 }
  0xe3   :  { %v963_v44 = vmul.f32 %v1328_v41, %v1594_v40  ;;  %v995_v45 = vmul.f32 %v1360_v43, %v1594_v40 }
  0xe4   :  { %v504_v46 = vpop.f32.mrf.mxu0  ;;  %v632_v47 = vpop.f32.mrf.mxu1 }
  0xe5   :  { %v1034_v48 = vadd.f32 %v1599_v42, %v963_v44  ;;  %v1066_v49 = vadd.f32 %v1599_v42, %v995_v45  ;;  %v961_v50 = vmul.f32 %v1594_v40, %v504_v46  ;;  %v993_v51 = vmul.f32 %v1594_v40, %v632_v47 }
  0xe6   :  { %v1329_v52 = vpop.f32.mrf.mxu0  ;;  %v1361_v53 = vpop.f32.mrf.mxu1 }
  0xe7   :  { %v1098_v54 = vmax.f32 %v1034_v48, 0.0  ;;  %v1130_v55 = vmax.f32 %v1066_v49, 0.0  ;;  %v1032_v56 = vadd.f32 %v1599_v42, %v961_v50  ;;  %v1064_v57 = vadd.f32 %v1599_v42, %v993_v51 }
  0xe8   :  { %v964_v58 = vmul.f32 %v1329_v52, %v1594_v40  ;;  %v996_v59 = vmul.f32 %v1361_v53, %v1594_v40  ;;  %v507_v60 = vpop.f32.mrf.mxu0  ;;  %v635_v61 = vpop.f32.mrf.mxu1 }
  0xe9   :  { %1162 = vst [vmem:[%s1925_s4 + $0x10] sm:$0xff] %v1098_v54  ;;  %1194 = vst [vmem:[%s1925_s4 + $0x110] sm:$0xff] %v1130_v55  ;;  %v1096_v62 = vmax.f32 %v1032_v56, 0.0  ;;  %v1128_v63 = vmax.f32 %v1064_v57, 0.0  ;;  %v962_v0 = vmul.f32 %v1594_v40, %v507_v60  ;;  %v994_v1 = vmul.f32 %v1594_v40, %v635_v61 }
  0xea   :  { %v1035_v2 = vadd.f32 %v1599_v42, %v964_v58  ;;  %v1067_v3 = vadd.f32 %v1599_v42, %v996_v59  ;;  %v1332_v4 = vpop.f32.mrf.mxu0  ;;  %v1364_v5 = vpop.f32.mrf.mxu1 }
  0xeb   :  { %1160 = vst [vmem:[%s1925_s4] sm:$0xff] %v1096_v62  ;;  %1192 = vst [vmem:[%s1925_s4 + $0x100] sm:$0xff] %v1128_v63  ;;  %v1033_v6 = vadd.f32 %v1599_v42, %v962_v0  ;;  %v1065_v7 = vadd.f32 %v1599_v42, %v994_v1  ;;  %v967_v8 = vmul.f32 %v1332_v4, %v1594_v40 }
  0xec   :  { %v999_v9 = vmul.f32 %v1364_v5, %v1594_v40  ;;  %v1099_v10 = vmax.f32 %v1035_v2, 0.0  ;;  %v1131_v11 = vmax.f32 %v1067_v3, 0.0  ;;  %v520_v12 = vpop.f32.mrf.mxu0  ;;  %v648_v13 = vpop.f32.mrf.mxu1 }
  0xed   :  { %v1097_v14 = vmax.f32 %v1033_v6, 0.0  ;;  %v1129_v15 = vmax.f32 %v1065_v7, 0.0  ;;  %v1038_v16 = vadd.f32 %v1599_v42, %v967_v8  ;;  %v965_v18 = vmul.f32 %v1594_v40, %v520_v12 }
  0xee   :  { %v1070_v17 = vadd.f32 %v1599_v42, %v999_v9  ;;  %1163 = vst [vmem:[%s1925_s4 + $0x18] sm:$0xff] %v1099_v10  ;;  %1195 = vst [vmem:[%s1925_s4 + $0x118] sm:$0xff] %v1131_v11  ;;  %v997_v19 = vmul.f32 %v1594_v40, %v648_v13  ;;  %v1333_v20 = vpop.f32.mrf.mxu0  ;;  %v1365_v21 = vpop.f32.mrf.mxu1 }
  0xef   :  { %1161 = vst [vmem:[%s1925_s4 + $0x8] sm:$0xff] %v1097_v14  ;;  %1193 = vst [vmem:[%s1925_s4 + $0x108] sm:$0xff] %v1129_v15  ;;  %v1102_v22 = vmax.f32 %v1038_v16, 0.0  ;;  %v968_v24 = vmul.f32 %v1333_v20, %v1594_v40  ;;  %v1000_v25 = vmul.f32 %v1365_v21, %v1594_v40  ;;  %v1036_v26 = vadd.f32 %v1599_v42, %v965_v18 }
  0xf0   :  { %v1134_v23 = vmax.f32 %v1070_v17, 0.0  ;;  %v1068_v27 = vadd.f32 %v1599_v42, %v997_v19  ;;  %v523_v28 = vpop.f32.mrf.mxu0  ;;  %v651_v29 = vpop.f32.mrf.mxu1 }
  0xf1   :  { %1166 = vst [vmem:[%s1925_s4 + $0x30] sm:$0xff] %v1102_v22  ;;  %v1039_v30 = vadd.f32 %v1599_v42, %v968_v24  ;;  %v1071_v31 = vadd.f32 %v1599_v42, %v1000_v25  ;;  %v966_v32 = vmul.f32 %v1594_v40, %v523_v28  ;;  %v998_v33 = vmul.f32 %v1594_v40, %v651_v29 }
  0xf2   :  { %1198 = vst [vmem:[%s1925_s4 + $0x130] sm:$0xff] %v1134_v23  ;;  %v1100_v34 = vmax.f32 %v1036_v26, 0.0  ;;  %v1132_v35 = vmax.f32 %v1068_v27, 0.0  ;;  %v1336_v36 = vpop.f32.mrf.mxu0  ;;  %v1368_v37 = vpop.f32.mrf.mxu1 }
  0xf3   :  { %v1103_v38 = vmax.f32 %v1039_v30, 0.0  ;;  %v1135_v39 = vmax.f32 %v1071_v31, 0.0  ;;  %v1037_v41 = vadd.f32 %v1599_v42, %v966_v32  ;;  %v1069_v43 = vadd.f32 %v1599_v42, %v998_v33 }
  0xf4   :  { %1164 = vst [vmem:[%s1925_s4 + $0x20] sm:$0xff] %v1100_v34  ;;  %1196 = vst [vmem:[%s1925_s4 + $0x120] sm:$0xff] %v1132_v35  ;;  %v971_v44 = vmul.f32 %v1336_v36, %v1594_v40  ;;  %v1003_v45 = vmul.f32 %v1368_v37, %v1594_v40  ;;  %v536_v46 = vpop.f32.mrf.mxu0  ;;  %v664_v47 = vpop.f32.mrf.mxu1 }
  0xf5   :  { %1167 = vst [vmem:[%s1925_s4 + $0x38] sm:$0xff] %v1103_v38  ;;  %1199 = vst [vmem:[%s1925_s4 + $0x138] sm:$0xff] %v1135_v39  ;;  %v1101_v48 = vmax.f32 %v1037_v41, 0.0  ;;  %v1133_v49 = vmax.f32 %v1069_v43, 0.0  ;;  %v969_v50 = vmul.f32 %v1594_v40, %v536_v46  ;;  %v1001_v51 = vmul.f32 %v1594_v40, %v664_v47 }
  0xf6   :  { %v1042_v52 = vadd.f32 %v1599_v42, %v971_v44  ;;  %v1074_v53 = vadd.f32 %v1599_v42, %v1003_v45  ;;  %v1337_v54 = vpop.f32.mrf.mxu0  ;;  %v1369_v55 = vpop.f32.mrf.mxu1 }
  0xf7   :  { %1165 = vst [vmem:[%s1925_s4 + $0x28] sm:$0xff] %v1101_v48  ;;  %1197 = vst [vmem:[%s1925_s4 + $0x128] sm:$0xff] %v1133_v49  ;;  %v1040_v56 = vadd.f32 %v1599_v42, %v969_v50  ;;  %v1072_v57 = vadd.f32 %v1599_v42, %v1001_v51  ;;  %v972_v58 = vmul.f32 %v1337_v54, %v1594_v40 }
  0xf8   :  { %v1004_v59 = vmul.f32 %v1369_v55, %v1594_v40  ;;  %v1106_v60 = vmax.f32 %v1042_v52, 0.0  ;;  %v1138_v61 = vmax.f32 %v1074_v53, 0.0  ;;  %v539_v62 = vpop.f32.mrf.mxu0  ;;  %v667_v63 = vpop.f32.mrf.mxu1 }
  0xf9   :  { %v1104_v0 = vmax.f32 %v1040_v56, 0.0  ;;  %v1136_v1 = vmax.f32 %v1072_v57, 0.0  ;;  %v1043_v2 = vadd.f32 %v1599_v42, %v972_v58  ;;  %v970_v4 = vmul.f32 %v1594_v40, %v539_v62 }
  0xfa   :  { %v1075_v3 = vadd.f32 %v1599_v42, %v1004_v59  ;;  %1170 = vst [vmem:[%s1925_s4 + $0x50] sm:$0xff] %v1106_v60  ;;  %1202 = vst [vmem:[%s1925_s4 + $0x150] sm:$0xff] %v1138_v61  ;;  %v1002_v5 = vmul.f32 %v1594_v40, %v667_v63  ;;  %v1340_v6 = vpop.f32.mrf.mxu0  ;;  %v1372_v7 = vpop.f32.mrf.mxu1 }
  0xfb   :  { %1168 = vst [vmem:[%s1925_s4 + $0x40] sm:$0xff] %v1104_v0  ;;  %1200 = vst [vmem:[%s1925_s4 + $0x140] sm:$0xff] %v1136_v1  ;;  %v1107_v8 = vmax.f32 %v1043_v2, 0.0  ;;  %v975_v10 = vmul.f32 %v1340_v6, %v1594_v40  ;;  %v1007_v11 = vmul.f32 %v1372_v7, %v1594_v40  ;;  %v1041_v12 = vadd.f32 %v1599_v42, %v970_v4 }
  0xfc   :  { %v1139_v9 = vmax.f32 %v1075_v3, 0.0  ;;  %v1073_v13 = vadd.f32 %v1599_v42, %v1002_v5  ;;  %v552_v14 = vpop.f32.mrf.mxu0  ;;  %v680_v15 = vpop.f32.mrf.mxu1 }
  0xfd   :  { %1171 = vst [vmem:[%s1925_s4 + $0x58] sm:$0xff] %v1107_v8  ;;  %v1046_v16 = vadd.f32 %v1599_v42, %v975_v10  ;;  %v1078_v17 = vadd.f32 %v1599_v42, %v1007_v11  ;;  %v973_v18 = vmul.f32 %v1594_v40, %v552_v14  ;;  %v1005_v19 = vmul.f32 %v1594_v40, %v680_v15 }
  0xfe   :  { %1203 = vst [vmem:[%s1925_s4 + $0x158] sm:$0xff] %v1139_v9  ;;  %v1105_v20 = vmax.f32 %v1041_v12, 0.0  ;;  %v1137_v21 = vmax.f32 %v1073_v13, 0.0  ;;  %v1341_v22 = vpop.f32.mrf.mxu0  ;;  %v1373_v23 = vpop.f32.mrf.mxu1 }
  0xff   :  { %v1110_v24 = vmax.f32 %v1046_v16, 0.0  ;;  %v1142_v25 = vmax.f32 %v1078_v17, 0.0  ;;  %v1044_v26 = vadd.f32 %v1599_v42, %v973_v18  ;;  %v1076_v27 = vadd.f32 %v1599_v42, %v1005_v19 }
 0x100   :  { %1169 = vst [vmem:[%s1925_s4 + $0x48] sm:$0xff] %v1105_v20  ;;  %1201 = vst [vmem:[%s1925_s4 + $0x148] sm:$0xff] %v1137_v21  ;;  %v976_v28 = vmul.f32 %v1341_v22, %v1594_v40  ;;  %v1008_v29 = vmul.f32 %v1373_v23, %v1594_v40  ;;  %v555_v30 = vpop.f32.mrf.mxu0  ;;  %v683_v31 = vpop.f32.mrf.mxu1 }
 0x101   :  { %1174 = vst [vmem:[%s1925_s4 + $0x70] sm:$0xff] %v1110_v24  ;;  %1206 = vst [vmem:[%s1925_s4 + $0x170] sm:$0xff] %v1142_v25  ;;  %v1108_v32 = vmax.f32 %v1044_v26, 0.0  ;;  %v1140_v33 = vmax.f32 %v1076_v27, 0.0  ;;  %v974_v34 = vmul.f32 %v1594_v40, %v555_v30  ;;  %v1006_v35 = vmul.f32 %v1594_v40, %v683_v31 }
 0x102   :  { %v1047_v36 = vadd.f32 %v1599_v42, %v976_v28  ;;  %v1079_v37 = vadd.f32 %v1599_v42, %v1008_v29  ;;  %v1344_v38 = vpop.f32.mrf.mxu0  ;;  %v1376_v39 = vpop.f32.mrf.mxu1 }
 0x103   :  { %1172 = vst [vmem:[%s1925_s4 + $0x60] sm:$0xff] %v1108_v32  ;;  %1204 = vst [vmem:[%s1925_s4 + $0x160] sm:$0xff] %v1140_v33  ;;  %v1045_v41 = vadd.f32 %v1599_v42, %v974_v34  ;;  %v1077_v43 = vadd.f32 %v1599_v42, %v1006_v35  ;;  %v979_v44 = vmul.f32 %v1344_v38, %v1594_v40 }
 0x104   :  { %v1011_v45 = vmul.f32 %v1376_v39, %v1594_v40  ;;  %v1111_v46 = vmax.f32 %v1047_v36, 0.0  ;;  %v1143_v47 = vmax.f32 %v1079_v37, 0.0  ;;  %v568_v48 = vpop.f32.mrf.mxu0  ;;  %v696_v49 = vpop.f32.mrf.mxu1 }
 0x105   :  { %v1109_v50 = vmax.f32 %v1045_v41, 0.0  ;;  %v1141_v51 = vmax.f32 %v1077_v43, 0.0  ;;  %v1050_v52 = vadd.f32 %v1599_v42, %v979_v44  ;;  %v977_v54 = vmul.f32 %v1594_v40, %v568_v48 }
 0x106   :  { %v1082_v53 = vadd.f32 %v1599_v42, %v1011_v45  ;;  %1175 = vst [vmem:[%s1925_s4 + $0x78] sm:$0xff] %v1111_v46  ;;  %1207 = vst [vmem:[%s1925_s4 + $0x178] sm:$0xff] %v1143_v47  ;;  %v1009_v55 = vmul.f32 %v1594_v40, %v696_v49  ;;  %v1345_v56 = vpop.f32.mrf.mxu0  ;;  %v1377_v57 = vpop.f32.mrf.mxu1 }
 0x107   :  { %1173 = vst [vmem:[%s1925_s4 + $0x68] sm:$0xff] %v1109_v50  ;;  %1205 = vst [vmem:[%s1925_s4 + $0x168] sm:$0xff] %v1141_v51  ;;  %v1114_v58 = vmax.f32 %v1050_v52, 0.0  ;;  %v980_v60 = vmul.f32 %v1345_v56, %v1594_v40  ;;  %v1012_v61 = vmul.f32 %v1377_v57, %v1594_v40  ;;  %v1048_v62 = vadd.f32 %v1599_v42, %v977_v54 }
 0x108   :  { %v1146_v59 = vmax.f32 %v1082_v53, 0.0  ;;  %v1080_v63 = vadd.f32 %v1599_v42, %v1009_v55  ;;  %v571_v0 = vpop.f32.mrf.mxu0  ;;  %v699_v1 = vpop.f32.mrf.mxu1 }
 0x109   :  { %1178 = vst [vmem:[%s1925_s4 + $0x90] sm:$0xff] %v1114_v58  ;;  %v1051_v2 = vadd.f32 %v1599_v42, %v980_v60  ;;  %v1083_v3 = vadd.f32 %v1599_v42, %v1012_v61  ;;  %v978_v4 = vmul.f32 %v1594_v40, %v571_v0  ;;  %v1010_v5 = vmul.f32 %v1594_v40, %v699_v1 }
 0x10a   :  { %1210 = vst [vmem:[%s1925_s4 + $0x190] sm:$0xff] %v1146_v59  ;;  %v1112_v6 = vmax.f32 %v1048_v62, 0.0  ;;  %v1144_v7 = vmax.f32 %v1080_v63, 0.0  ;;  %v1348_v8 = vpop.f32.mrf.mxu0  ;;  %v1380_v9 = vpop.f32.mrf.mxu1 }
 0x10b   :  { %v1115_v10 = vmax.f32 %v1051_v2, 0.0  ;;  %v1147_v11 = vmax.f32 %v1083_v3, 0.0  ;;  %v1049_v12 = vadd.f32 %v1599_v42, %v978_v4  ;;  %v1081_v13 = vadd.f32 %v1599_v42, %v1010_v5 }
 0x10c   :  { %1176 = vst [vmem:[%s1925_s4 + $0x80] sm:$0xff] %v1112_v6  ;;  %1208 = vst [vmem:[%s1925_s4 + $0x180] sm:$0xff] %v1144_v7  ;;  %v983_v14 = vmul.f32 %v1348_v8, %v1594_v40  ;;  %v1015_v15 = vmul.f32 %v1380_v9, %v1594_v40  ;;  %v584_v16 = vpop.f32.mrf.mxu0  ;;  %v712_v17 = vpop.f32.mrf.mxu1 }
 0x10d   :  { %1179 = vst [vmem:[%s1925_s4 + $0x98] sm:$0xff] %v1115_v10  ;;  %1211 = vst [vmem:[%s1925_s4 + $0x198] sm:$0xff] %v1147_v11  ;;  %v1113_v18 = vmax.f32 %v1049_v12, 0.0  ;;  %v1145_v19 = vmax.f32 %v1081_v13, 0.0  ;;  %v981_v20 = vmul.f32 %v1594_v40, %v584_v16  ;;  %v1013_v21 = vmul.f32 %v1594_v40, %v712_v17 }
 0x10e   :  { %v1054_v22 = vadd.f32 %v1599_v42, %v983_v14  ;;  %v1086_v23 = vadd.f32 %v1599_v42, %v1015_v15  ;;  %v1349_v24 = vpop.f32.mrf.mxu0  ;;  %v1381_v25 = vpop.f32.mrf.mxu1 }
 0x10f   :  { %1177 = vst [vmem:[%s1925_s4 + $0x88] sm:$0xff] %v1113_v18  ;;  %1209 = vst [vmem:[%s1925_s4 + $0x188] sm:$0xff] %v1145_v19  ;;  %v1052_v26 = vadd.f32 %v1599_v42, %v981_v20  ;;  %v1084_v27 = vadd.f32 %v1599_v42, %v1013_v21  ;;  %v984_v28 = vmul.f32 %v1349_v24, %v1594_v40 }
 0x110   :  { %v1016_v29 = vmul.f32 %v1381_v25, %v1594_v40  ;;  %v1118_v30 = vmax.f32 %v1054_v22, 0.0  ;;  %v1150_v31 = vmax.f32 %v1086_v23, 0.0  ;;  %v587_v32 = vpop.f32.mrf.mxu0  ;;  %v715_v33 = vpop.f32.mrf.mxu1 }
 0x111   :  { %v1116_v34 = vmax.f32 %v1052_v26, 0.0  ;;  %v1148_v35 = vmax.f32 %v1084_v27, 0.0  ;;  %v1055_v36 = vadd.f32 %v1599_v42, %v984_v28  ;;  %v982_v38 = vmul.f32 %v1594_v40, %v587_v32 }
 0x112   :  { %v1087_v37 = vadd.f32 %v1599_v42, %v1016_v29  ;;  %1182 = vst [vmem:[%s1925_s4 + $0xb0] sm:$0xff] %v1118_v30  ;;  %1214 = vst [vmem:[%s1925_s4 + $0x1b0] sm:$0xff] %v1150_v31  ;;  %v1014_v39 = vmul.f32 %v1594_v40, %v715_v33  ;;  %v1352_v41 = vpop.f32.mrf.mxu0  ;;  %v1384_v43 = vpop.f32.mrf.mxu1 }
 0x113   :  { %1180 = vst [vmem:[%s1925_s4 + $0xa0] sm:$0xff] %v1116_v34  ;;  %1212 = vst [vmem:[%s1925_s4 + $0x1a0] sm:$0xff] %v1148_v35  ;;  %v1119_v44 = vmax.f32 %v1055_v36, 0.0  ;;  %v987_v46 = vmul.f32 %v1352_v41, %v1594_v40  ;;  %v1019_v47 = vmul.f32 %v1384_v43, %v1594_v40  ;;  %v1053_v48 = vadd.f32 %v1599_v42, %v982_v38 }
 0x114   :  { %v1151_v45 = vmax.f32 %v1087_v37, 0.0  ;;  %v1085_v49 = vadd.f32 %v1599_v42, %v1014_v39  ;;  %v600_v50 = vpop.f32.mrf.mxu0  ;;  %v728_v51 = vpop.f32.mrf.mxu1 }
 0x115   :  { %1183 = vst [vmem:[%s1925_s4 + $0xb8] sm:$0xff] %v1119_v44  ;;  %v1058_v52 = vadd.f32 %v1599_v42, %v987_v46  ;;  %v1090_v53 = vadd.f32 %v1599_v42, %v1019_v47  ;;  %v985_v54 = vmul.f32 %v1594_v40, %v600_v50  ;;  %v1017_v55 = vmul.f32 %v1594_v40, %v728_v51 }
 0x116   :  { %1215 = vst [vmem:[%s1925_s4 + $0x1b8] sm:$0xff] %v1151_v45  ;;  %v1117_v56 = vmax.f32 %v1053_v48, 0.0  ;;  %v1149_v57 = vmax.f32 %v1085_v49, 0.0  ;;  %v1353_v58 = vpop.f32.mrf.mxu0  ;;  %v1385_v59 = vpop.f32.mrf.mxu1 }
 0x117   :  { %v1122_v60 = vmax.f32 %v1058_v52, 0.0  ;;  %v1154_v61 = vmax.f32 %v1090_v53, 0.0  ;;  %v1056_v62 = vadd.f32 %v1599_v42, %v985_v54  ;;  %v1088_v63 = vadd.f32 %v1599_v42, %v1017_v55 }
 0x118   :  { %1181 = vst [vmem:[%s1925_s4 + $0xa8] sm:$0xff] %v1117_v56  ;;  %1213 = vst [vmem:[%s1925_s4 + $0x1a8] sm:$0xff] %v1149_v57  ;;  %v988_v0 = vmul.f32 %v1353_v58, %v1594_v40  ;;  %v1020_v1 = vmul.f32 %v1385_v59, %v1594_v40  ;;  %v603_v2 = vpop.f32.mrf.mxu0  ;;  %v731_v3 = vpop.f32.mrf.mxu1 }
 0x119   :  { %1186 = vst [vmem:[%s1925_s4 + $0xd0] sm:$0xff] %v1122_v60  ;;  %1218 = vst [vmem:[%s1925_s4 + $0x1d0] sm:$0xff] %v1154_v61  ;;  %v1120_v4 = vmax.f32 %v1056_v62, 0.0  ;;  %v1152_v5 = vmax.f32 %v1088_v63, 0.0  ;;  %v986_v6 = vmul.f32 %v1594_v40, %v603_v2  ;;  %v1018_v7 = vmul.f32 %v1594_v40, %v731_v3 }
 0x11a   :  { %v1059_v8 = vadd.f32 %v1599_v42, %v988_v0  ;;  %v1091_v9 = vadd.f32 %v1599_v42, %v1020_v1  ;;  %v1356_v10 = vpop.f32.mrf.mxu0  ;;  %v1388_v11 = vpop.f32.mrf.mxu1 }
 0x11b   :  { %1184 = vst [vmem:[%s1925_s4 + $0xc0] sm:$0xff] %v1120_v4  ;;  %1216 = vst [vmem:[%s1925_s4 + $0x1c0] sm:$0xff] %v1152_v5  ;;  %v1057_v12 = vadd.f32 %v1599_v42, %v986_v6  ;;  %v1089_v13 = vadd.f32 %v1599_v42, %v1018_v7  ;;  %v991_v14 = vmul.f32 %v1356_v10, %v1594_v40 }
 0x11c   :  { %v1023_v15 = vmul.f32 %v1388_v11, %v1594_v40  ;;  %v1123_v16 = vmax.f32 %v1059_v8, 0.0  ;;  %v1155_v17 = vmax.f32 %v1091_v9, 0.0  ;;  %v616_v18 = vpop.f32.mrf.mxu0  ;;  %v744_v19 = vpop.f32.mrf.mxu1 }
 0x11d   :  { %v1121_v20 = vmax.f32 %v1057_v12, 0.0  ;;  %v1153_v21 = vmax.f32 %v1089_v13, 0.0  ;;  %v1062_v22 = vadd.f32 %v1599_v42, %v991_v14  ;;  %v989_v24 = vmul.f32 %v1594_v40, %v616_v18 }
 0x11e   :  { %v1094_v23 = vadd.f32 %v1599_v42, %v1023_v15  ;;  %1187 = vst [vmem:[%s1925_s4 + $0xd8] sm:$0xff] %v1123_v16  ;;  %1219 = vst [vmem:[%s1925_s4 + $0x1d8] sm:$0xff] %v1155_v17  ;;  %v1021_v25 = vmul.f32 %v1594_v40, %v744_v19  ;;  %v1357_v26 = vpop.f32.mrf.mxu0  ;;  %v1389_v27 = vpop.f32.mrf.mxu1 }
 0x11f   :  { %1185 = vst [vmem:[%s1925_s4 + $0xc8] sm:$0xff] %v1121_v20  ;;  %1217 = vst [vmem:[%s1925_s4 + $0x1c8] sm:$0xff] %v1153_v21  ;;  %v1126_v28 = vmax.f32 %v1062_v22, 0.0  ;;  %v992_v30 = vmul.f32 %v1357_v26, %v1594_v40  ;;  %v1024_v31 = vmul.f32 %v1389_v27, %v1594_v40  ;;  %v1060_v32 = vadd.f32 %v1599_v42, %v989_v24 }
 0x120   :  { %v1158_v29 = vmax.f32 %v1094_v23, 0.0  ;;  %v1092_v33 = vadd.f32 %v1599_v42, %v1021_v25  ;;  %v619_v34 = vpop.f32.mrf.mxu0  ;;  %v747_v35 = vpop.f32.mrf.mxu1 }
 0x121   :  { %1190 = vst [vmem:[%s1925_s4 + $0xf0] sm:$0xff] %v1126_v28  ;;  %v1063_v36 = vadd.f32 %v1599_v42, %v992_v30  ;;  %v1095_v37 = vadd.f32 %v1599_v42, %v1024_v31  ;;  %v990_v38 = vmul.f32 %v1594_v40, %v619_v34  ;;  %v1022_v39 = vmul.f32 %v1594_v40, %v747_v35 }
 0x122   :  { %1222 = vst [vmem:[%s1925_s4 + $0x1f0] sm:$0xff] %v1158_v29  ;;  %v1124_v41 = vmax.f32 %v1060_v32, 0.0  ;;  %v1156_v43 = vmax.f32 %v1092_v33, 0.0 }
 0x123   :  { %v1127_v44 = vmax.f32 %v1063_v36, 0.0  ;;  %v1159_v45 = vmax.f32 %v1095_v37, 0.0  ;;  %v1061_v46 = vadd.f32 %v1599_v42, %v990_v38  ;;  %v1093_v47 = vadd.f32 %v1599_v42, %v1022_v39 }
 0x124   :  { %1188 = vst [vmem:[%s1925_s4 + $0xe0] sm:$0xff] %v1124_v41  ;;  %1220 = vst [vmem:[%s1925_s4 + $0x1e0] sm:$0xff] %v1156_v43 }
 0x125   :  { %1191 = vst [vmem:[%s1925_s4 + $0xf8] sm:$0xff] %v1127_v44  ;;  %1223 = vst [vmem:[%s1925_s4 + $0x1f8] sm:$0xff] %v1159_v45  ;;  %v1125_v40 = vmax.f32 %v1061_v46, 0.0  ;;  %v1157_v48 = vmax.f32 %v1093_v47, 0.0 }
 0x127   :  { %1189 = vst [vmem:[%s1925_s4 + $0xe8] sm:$0xff] %v1125_v40  ;;  %1221 = vst [vmem:[%s1925_s4 + $0x1e8] sm:$0xff] %v1157_v48 }

// kernel: multitask_resnet_forward.22
= control target key start
LH: loop header
LB: loop body
LE: loop exit
PB: predicated region body
PF: predicated region fallthrough
CT: control target
= control target key end

     0   :  { %s1791_s1 = inlined_call_operand.vmem [shape: bf16[640,128], index: 1, kind: input, shape index: {}]   ;;  %s1792_s0 = inlined_call_operand.vmem [shape: bf16[128,640], index: 0, kind: input, shape index: {}]   ;;  %s1793_s2 = inlined_call_operand.vmem [shape: f32[1,128], index: 2, kind: input, shape index: {}]   ;;  %s1794_s3 = inlined_call_operand.vmem [shape: f32[1,128], index: 3, kind: input, shape index: {}]   ;;  %s1795_s4 = inlined_call_operand.vmem [shape: f32[128,128], index: 4, kind: output, shape index: {}]  }
   0x1   :  { %v1328_v0 = vld [vmem:[%s1791_s1 + $0x78] sm:$0xff]   ;;  %v1332_v4 = vld [vmem:[%s1791_s1 + $0x70] sm:$0xff]   ;;  %v1336_v8 = vld [vmem:[%s1791_s1 + $0x68] sm:$0xff]  }
   0x2   :  { %v1329_v1 = vld [vmem:[%s1791_s1 + $0xf8] sm:$0xff]   ;;  %1136 = vmatprep.subr.bf16.mxu0 %v1328_v0  ;;  %v1333_v5 = vld [vmem:[%s1791_s1 + $0xf0] sm:$0xff]   ;;  %v1337_v9 = vld [vmem:[%s1791_s1 + $0xe8] sm:$0xff]  }
   0x3   :  { %v1330_v2 = vld [vmem:[%s1791_s1 + $0x38] sm:$0xff]   ;;  %1200 = vmatprep.subr.bf16.mxu1 %v1329_v1  ;;  %v1334_v6 = vld [vmem:[%s1791_s1 + $0x30] sm:$0xff]   ;;  %v1338_v10 = vld [vmem:[%s1791_s1 + $0x28] sm:$0xff]  }
   0x4   :  { %v1331_v3 = vld [vmem:[%s1791_s1 + $0xb8] sm:$0xff]   ;;  %1137 = vmatpush3.bf16.msra.mxu0 %v1330_v2  ;;  %v1335_v7 = vld [vmem:[%s1791_s1 + $0xb0] sm:$0xff]   ;;  %v1339_v11 = vld [vmem:[%s1791_s1 + $0xa8] sm:$0xff]  }
   0x5   :  { %1201 = vmatpush3.bf16.msra.mxu1 %v1331_v3  ;;  %1138 = vmatprep.subr.bf16.mxu0 %v1332_v4  ;;  %v1340_v12 = vld [vmem:[%s1791_s1 + $0x60] sm:$0xff]   ;;  %v1344_v16 = vld [vmem:[%s1791_s1 + $0x58] sm:$0xff]   ;;  %v1348_v20 = vld [vmem:[%s1791_s1 + $0x50] sm:$0xff]  }
   0x6   :  { %1202 = vmatprep.subr.bf16.mxu1 %v1333_v5  ;;  %v1341_v13 = vld [vmem:[%s1791_s1 + $0xe0] sm:$0xff]   ;;  %v1345_v17 = vld [vmem:[%s1791_s1 + $0xd8] sm:$0xff]   ;;  %v1349_v21 = vld [vmem:[%s1791_s1 + $0xd0] sm:$0xff]  }
   0x7   :  { %v1342_v14 = vld [vmem:[%s1791_s1 + $0x20] sm:$0xff]   ;;  %v1346_v18 = vld [vmem:[%s1791_s1 + $0x18] sm:$0xff]   ;;  %v1350_v22 = vld [vmem:[%s1791_s1 + $0x10] sm:$0xff]  }
   0x8   :  { %1139 = vmatpush3.bf16.msra.mxu0 %v1334_v6  ;;  %v1343_v15 = vld [vmem:[%s1791_s1 + $0xa0] sm:$0xff]   ;;  %v1347_v19 = vld [vmem:[%s1791_s1 + $0x98] sm:$0xff]   ;;  %v1351_v23 = vld [vmem:[%s1791_s1 + $0x90] sm:$0xff]  }
   0x9   :  { %1203 = vmatpush3.bf16.msra.mxu1 %v1335_v7  ;;  %1140 = vmatprep.subr.bf16.mxu0 %v1336_v8  ;;  %v1352_v24 = vld [vmem:[%s1791_s1 + $0x48] sm:$0xff]   ;;  %v1356_v28 = vld [vmem:[%s1791_s1 + $0x40] sm:$0xff]   ;;  %v1366_v36 = vld [vmem:[%s1791_s1 + $0x138] sm:$0xff]  }
   0xa   :  { %1204 = vmatprep.subr.bf16.mxu1 %v1337_v9  ;;  %v1353_v25 = vld [vmem:[%s1791_s1 + $0xc8] sm:$0xff]   ;;  %v1357_v29 = vld [vmem:[%s1791_s1 + $0xc0] sm:$0xff]   ;;  %v1373_v39 = vld [vmem:[%s1791_s1 + $0x130] sm:$0xff]  }
   0xb   :  { %v1354_v26 = vld [vmem:[%s1791_s1 + $0x8] sm:$0xff]   ;;  %v1358_v30 = vld [vmem:[%s1791_s1] sm:$0xff]   ;;  %v1376_v43 = vld [vmem:[%s1792_s0 + $0x5c] ss:$20 sps:$4 sm:$0xff]  }
   0xc   :  { %1141 = vmatpush3.bf16.msra.mxu0 %v1338_v10  ;;  %v1355_v27 = vld [vmem:[%s1791_s1 + $0x88] sm:$0xff]   ;;  %v1359_v31 = vld [vmem:[%s1791_s1 + $0x80] sm:$0xff]   ;;  %v1381_v48 = vld [vmem:[%s1792_s0 + $0x7c] ss:$20 sps:$4 sm:$0xff]  }
   0xd   :  { %1205 = vmatpush3.bf16.msra.mxu1 %v1339_v11  ;;  %1142 = vmatprep.subr.bf16.mxu0 %v1340_v12  ;;  %v1360_v32 = vld [vmem:[%s1792_s0] ss:$20 sps:$4 sm:$0xff]   ;;  %v1362_v33 = vld [vmem:[%s1792_s0 + $0x4] ss:$20 sps:$4 sm:$0xff]   ;;  %v1363_v34 = vld [vmem:[%s1792_s0 + $0x8] ss:$20 sps:$4 sm:$0xff]  }
   0xe   :  { %1206 = vmatprep.subr.bf16.mxu1 %v1341_v13  ;;  %v1365_v35 = vld [vmem:[%s1792_s0 + $0xc] ss:$20 sps:$4 sm:$0xff]   ;;  %662 = vmatprep.mubr.bf16.mxu0 %v1362_v33  ;;  %v1369_v38 = vld [vmem:[%s1792_s0 + $0x34] ss:$20 sps:$4 sm:$0xff]   ;;  %v1372_v41 = vld [vmem:[%s1792_s0 + $0x30] ss:$20 sps:$4 sm:$0xff]  }
   0xf   :  { %759 = vmatprep.mubr.bf16.mxu1 %v1365_v35  ;;  %v1367_v37 = vld [vmem:[%s1792_s0 + $0x2c] ss:$20 sps:$4 sm:$0xff]   ;;  %v1371_v40 = vld [vmem:[%s1792_s0 + $0x28] ss:$20 sps:$4 sm:$0xff]   ;;  %v1378_v46 = vld [vmem:[%s1792_s0 + $0x50] ss:$20 sps:$4 sm:$0xff]  }
  0x10   :  { %1143 = vmatpush3.bf16.msra.mxu0 %v1342_v14  ;;  %v1374_v42 = vld [vmem:[%s1792_s0 + $0x54] ss:$20 sps:$4 sm:$0xff]   ;;  %v1387_v45 = vld [vmem:[%s1791_s1 + $0x120] sm:$0xff]   ;;  %v1379_v47 = vld [vmem:[%s1792_s0 + $0x58] ss:$20 sps:$4 sm:$0xff]  }
  0x11   :  { %1207 = vmatpush3.bf16.msra.mxu1 %v1343_v15  ;;  %1144 = vmatprep.subr.bf16.mxu0 %v1344_v16  ;;  %v1380_v44 = vld [vmem:[%s1791_s1 + $0x128] sm:$0xff]   ;;  %v1383_v49 = vld [vmem:[%s1792_s0 + $0x84] ss:$20 sps:$4 sm:$0xff]   ;;  %v1401_v51 = vld [vmem:[%s1791_s1 + $0x110] sm:$0xff]  }
  0x12   :  { %1208 = vmatprep.subr.bf16.mxu1 %v1345_v17  ;;  %v1394_v50 = vld [vmem:[%s1791_s1 + $0x118] sm:$0xff]   ;;  %v1386_v53 = vld [vmem:[%s1792_s0 + $0x80] ss:$20 sps:$4 sm:$0xff]   ;;  %v1408_v55 = vld [vmem:[%s1791_s1 + $0x108] sm:$0xff]  }
  0x13   :  { %v1385_v52 = vld [vmem:[%s1792_s0 + $0x78] ss:$20 sps:$4 sm:$0xff]   ;;  %v1415_v57 = vld [vmem:[%s1791_s1 + $0x100] sm:$0xff]   ;;  %v1393_v59 = vld [vmem:[%s1792_s0 + $0xa8] ss:$20 sps:$4 sm:$0xff]  }
  0x14   :  { %1145 = vmatpush3.bf16.msra.mxu0 %v1346_v18  ;;  %v1388_v54 = vld [vmem:[%s1792_s0 + $0xa4] ss:$20 sps:$4 sm:$0xff]   ;;  %v1390_v56 = vld [vmem:[%s1792_s0 + $0xac] ss:$20 sps:$4 sm:$0xff]   ;;  %v1397_v61 = vld [vmem:[%s1792_s0 + $0xd4] ss:$20 sps:$4 sm:$0xff]  }
  0x15   :  { %1209 = vmatpush3.bf16.msra.mxu1 %v1347_v19  ;;  %1146 = vmatprep.subr.bf16.mxu0 %v1348_v20  ;;  %v1392_v58 = vld [vmem:[%s1792_s0 + $0xa0] ss:$20 sps:$4 sm:$0xff]   ;;  %v1399_v62 = vld [vmem:[%s1792_s0 + $0xc8] ss:$20 sps:$4 sm:$0xff]   ;;  %v1400_v63 = vld [vmem:[%s1792_s0 + $0xd0] ss:$20 sps:$4 sm:$0xff]  }
  0x16   :  { %1210 = vmatprep.subr.bf16.mxu1 %v1349_v21  ;;  %v1395_v60 = vld [vmem:[%s1792_s0 + $0xcc] ss:$20 sps:$4 sm:$0xff]   ;;  %v1402_v0 = vld [vmem:[%s1792_s0 + $0xf4] ss:$20 sps:$4 sm:$0xff]   ;;  %v1404_v1 = vld [vmem:[%s1792_s0 + $0xfc] ss:$20 sps:$4 sm:$0xff]  }
  0x17   :  { %v1406_v2 = vld [vmem:[%s1792_s0 + $0xf0] ss:$20 sps:$4 sm:$0xff]   ;;  %v1407_v3 = vld [vmem:[%s1792_s0 + $0xf8] ss:$20 sps:$4 sm:$0xff]   ;;  %v1414_v7 = vld [vmem:[%s1792_s0 + $0x120] ss:$20 sps:$4 sm:$0xff]  }
  0x18   :  { %1147 = vmatpush3.bf16.msra.mxu0 %v1350_v22  ;;  %v1409_v4 = vld [vmem:[%s1792_s0 + $0x11c] ss:$20 sps:$4 sm:$0xff]   ;;  %v1411_v5 = vld [vmem:[%s1792_s0 + $0x124] ss:$20 sps:$4 sm:$0xff]   ;;  %v1420_v12 = vld [vmem:[%s1792_s0 + $0x60] ss:$20 sps:$4 sm:$0xff]  }
  0x19   :  { %1211 = vmatpush3.bf16.msra.mxu1 %v1351_v23  ;;  %1148 = vmatprep.subr.bf16.mxu0 %v1352_v24  ;;  %v1413_v6 = vld [vmem:[%s1792_s0 + $0x118] ss:$20 sps:$4 sm:$0xff]   ;;  %v1416_v8 = vld [vmem:[%s1792_s0 + $0x10] ss:$20 sps:$4 sm:$0xff]   ;;  %v1421_v13 = vld [vmem:[%s1792_s0 + $0x100] ss:$20 sps:$4 sm:$0xff]  }
  0x1a   :  { %1212 = vmatprep.subr.bf16.mxu1 %v1353_v25  ;;  %v1417_v9 = vld [vmem:[%s1792_s0 + $0xb0] ss:$20 sps:$4 sm:$0xff]   ;;  %v1418_v10 = vld [vmem:[%s1792_s0 + $0x38] ss:$20 sps:$4 sm:$0xff]   ;;  %v1422_v14 = vld [vmem:[%s1792_s0 + $0x88] ss:$20 sps:$4 sm:$0xff]  }
  0x1b   :  { %v1419_v11 = vld [vmem:[%s1792_s0 + $0xd8] ss:$20 sps:$4 sm:$0xff]   ;;  %v1423_v15 = vld [vmem:[%s1792_s0 + $0x128] ss:$20 sps:$4 sm:$0xff]  }
  0x1c   :  { %1149 = vmatpush3.bf16.msra.mxu0 %v1354_v26 }
  0x1d   :  { %1213 = vmatpush3.bf16.msra.mxu1 %v1355_v27  ;;  %1150 = vmatprep.subr.bf16.mxu0 %v1356_v28 }
  0x1e   :  { %1214 = vmatprep.subr.bf16.mxu1 %v1357_v29 }
  0x20   :  { %1151 = vmatpush3.bf16.msra.mxu0 %v1358_v30 }
  0x21   :  { %1215 = vmatpush3.bf16.msra.mxu1 %v1359_v31  ;;  %1280 = vmatprep.subr.bf16.mxu0 %v1366_v36 }
  0x22   :  { %1312 = vmatprep.subr.bf16.mxu1 %v1366_v36 }
  0x23   :  { %663 = vmatmul.mubr.bf16.vlgmr.msra.gmra.mxu0 %v1360_v32 }
  0x24   :  { %760 = vmatmul.mubr.bf16.vlgmr.msra.gmra.mxu1 %v1363_v34  ;;  %1281 = vmatpush3.bf16.msra.mxu0 %v1366_v36 }
  0x25   :  { %1320 = vmatpush3.bf16.msra.mxu1 %v1366_v36  ;;  %670 = vmatprep.mubr.bf16.mxu0 %v1367_v37 }
  0x26   :  { %767 = vmatprep.mubr.bf16.mxu1 %v1369_v38  ;;  %1282 = vmatprep.subr.bf16.mxu0 %v1373_v39 }
  0x27   :  { %1313 = vmatprep.subr.bf16.mxu1 %v1373_v39 }
  0x28   :  { %1283 = vmatpush3.bf16.msra.mxu0 %v1373_v39 }
  0x29   :  { %1321 = vmatpush3.bf16.msra.mxu1 %v1373_v39  ;;  %1284 = vmatprep.subr.bf16.mxu0 %v1380_v44 }
  0x2a   :  { %1314 = vmatprep.subr.bf16.mxu1 %v1380_v44 }
  0x2b   :  { %671 = vmatmul.mubr.bf16.gmra.mxu0 %v1371_v40 }
  0x2c   :  { %768 = vmatmul.mubr.bf16.gmra.mxu1 %v1372_v41  ;;  %678 = vmatprep.mubr.bf16.mxu0 %v1374_v42 }
  0x2d   :  { %775 = vmatprep.mubr.bf16.mxu1 %v1376_v43  ;;  %1285 = vmatpush3.bf16.msra.mxu0 %v1380_v44 }
  0x2e   :  { %1322 = vmatpush3.bf16.msra.mxu1 %v1380_v44  ;;  %1286 = vmatprep.subr.bf16.mxu0 %v1387_v45 }
  0x2f   :  { %1315 = vmatprep.subr.bf16.mxu1 %v1387_v45 }
  0x31   :  { %1287 = vmatpush3.bf16.msra.mxu0 %v1387_v45 }
  0x32   :  { %1323 = vmatpush3.bf16.msra.mxu1 %v1387_v45  ;;  %1288 = vmatprep.subr.bf16.mxu0 %v1394_v50 }
  0x33   :  { %679 = vmatmul.mubr.bf16.gmra.mxu0 %v1378_v46  ;;  %1316 = vmatprep.subr.bf16.mxu1 %v1394_v50 }
  0x34   :  { %776 = vmatmul.mubr.bf16.gmra.mxu1 %v1379_v47  ;;  %686 = vmatprep.mubr.bf16.mxu0 %v1381_v48 }
  0x35   :  { %783 = vmatprep.mubr.bf16.mxu1 %v1383_v49  ;;  %1289 = vmatpush3.bf16.msra.mxu0 %v1394_v50 }
  0x36   :  { %1324 = vmatpush3.bf16.msra.mxu1 %v1394_v50  ;;  %1290 = vmatprep.subr.bf16.mxu0 %v1401_v51 }
  0x37   :  { %1317 = vmatprep.subr.bf16.mxu1 %v1401_v51 }
  0x39   :  { %1291 = vmatpush3.bf16.msra.mxu0 %v1401_v51 }
  0x3a   :  { %1325 = vmatpush3.bf16.msra.mxu1 %v1401_v51  ;;  %1292 = vmatprep.subr.bf16.mxu0 %v1408_v55 }
  0x3b   :  { %687 = vmatmul.mubr.bf16.gmra.mxu0 %v1385_v52  ;;  %1318 = vmatprep.subr.bf16.mxu1 %v1408_v55 }
  0x3c   :  { %784 = vmatmul.mubr.bf16.gmra.mxu1 %v1386_v53  ;;  %694 = vmatprep.mubr.bf16.mxu0 %v1388_v54 }
  0x3d   :  { %791 = vmatprep.mubr.bf16.mxu1 %v1390_v56  ;;  %1293 = vmatpush3.bf16.msra.mxu0 %v1408_v55 }
  0x3e   :  { %1326 = vmatpush3.bf16.msra.mxu1 %v1408_v55  ;;  %1294 = vmatprep.subr.bf16.mxu0 %v1415_v57 }
  0x3f   :  { %1319 = vmatprep.subr.bf16.mxu1 %v1415_v57 }
  0x41   :  { %1295 = vmatpush3.bf16.msra.mxu0 %v1415_v57 }
  0x42   :  { %1327 = vmatpush3.bf16.msra.mxu1 %v1415_v57 }
  0x43   :  { %695 = vmatmul.mubr.bf16.gmra.mxu0 %v1392_v58 }
  0x44   :  { %792 = vmatmul.mubr.bf16.gmra.mxu1 %v1393_v59  ;;  %702 = vmatprep.mubr.bf16.mxu0 %v1395_v60 }
  0x45   :  { %799 = vmatprep.mubr.bf16.mxu1 %v1397_v61 }
  0x4b   :  { %703 = vmatmul.mubr.bf16.gmra.mxu0 %v1399_v62 }
  0x4c   :  { %800 = vmatmul.mubr.bf16.gmra.mxu1 %v1400_v63  ;;  %710 = vmatprep.mubr.bf16.mxu0 %v1402_v0 }
  0x4d   :  { %807 = vmatprep.mubr.bf16.mxu1 %v1404_v1 }
  0x53   :  { %711 = vmatmul.mubr.bf16.gmra.mxu0 %v1406_v2 }
  0x54   :  { %808 = vmatmul.mubr.bf16.gmra.mxu1 %v1407_v3  ;;  %718 = vmatprep.mubr.bf16.mxu0 %v1409_v4 }
  0x55   :  { %815 = vmatprep.mubr.bf16.mxu1 %v1411_v5 }
  0x5b   :  { %719 = vmatmul.mubr.bf16.gmra.mxu0 %v1413_v6 }
  0x5c   :  { %816 = vmatmul.mubr.bf16.gmra.mxu1 %v1414_v7  ;;  %1296 = vmatprep.mubr.bf16.mxu0 %v1416_v8 }
  0x5d   :  { %1304 = vmatprep.mubr.bf16.mxu1 %v1417_v9 }
  0x63   :  { %1297 = vmatmul.mubr.bf16.vlgmr.msra.gmra.mxu0 %v1418_v10 }
  0x64   :  { %1305 = vmatmul.mubr.bf16.vlgmr.msra.gmra.mxu1 %v1419_v11  ;;  %1300 = vmatprep.mubr.bf16.mxu0 %v1420_v12 }
  0x65   :  { %1308 = vmatprep.mubr.bf16.mxu1 %v1421_v13 }
  0x6b   :  { %1301 = vmatmul.mubr.bf16.gmra.mxu0 %v1422_v14 }
  0x6c   :  { %1309 = vmatmul.mubr.bf16.gmra.mxu1 %v1423_v15 }
  0xe3   :  { %v1152_v16 = vpop.f32.mrf.mxu0 }
  0xe4   :  { %v1216_v17 = vpop.f32.mrf.mxu1 }
  0xe5   :  { %v1153_v18 = vpop.f32.mrf.mxu0 }
  0xe6   :  { %v1217_v19 = vpop.f32.mrf.mxu1  ;;  %v1154_v7 = vadd.f32 %v1153_v18, %v1152_v16 }
  0xe7   :  { %v1155_v20 = vpop.f32.mrf.mxu0  ;;  %v1218_v8 = vadd.f32 %v1217_v19, %v1216_v17 }
  0xe8   :  { %v1219_v21 = vpop.f32.mrf.mxu1 }
  0xe9   :  { %v1156_v22 = vpop.f32.mrf.mxu0 }
  0xea   :  { %v1220_v23 = vpop.f32.mrf.mxu1  ;;  %v1157_v9 = vadd.f32 %v1156_v22, %v1155_v20 }
  0xeb   :  { %v1158_v24 = vpop.f32.mrf.mxu0  ;;  %v1221_v10 = vadd.f32 %v1220_v23, %v1219_v21 }
  0xec   :  { %v1222_v25 = vpop.f32.mrf.mxu1 }
  0xed   :  { %v1159_v26 = vpop.f32.mrf.mxu0 }
  0xee   :  { %v1223_v27 = vpop.f32.mrf.mxu1  ;;  %v1160_v12 = vadd.f32 %v1159_v26, %v1158_v24 }
  0xef   :  { %v1161_v28 = vpop.f32.mrf.mxu0  ;;  %v1224_v13 = vadd.f32 %v1223_v27, %v1222_v25 }
  0xf0   :  { %v1225_v29 = vpop.f32.mrf.mxu1 }
  0xf1   :  { %v1162_v30 = vpop.f32.mrf.mxu0 }
  0xf2   :  { %v1226_v31 = vpop.f32.mrf.mxu1  ;;  %v1163_v14 = vadd.f32 %v1162_v30, %v1161_v28  ;;  %v770_v30 = vadd.f32 %v1224_v13, %v1160_v12 }
  0xf3   :  { %v1164_v32 = vpop.f32.mrf.mxu0  ;;  %v1227_v15 = vadd.f32 %v1226_v31, %v1225_v29  ;;  %v762_v29 = vadd.f32 %v1218_v8, %v1154_v7 }
  0xf4   :  { %v1228_v33 = vpop.f32.mrf.mxu1 }
  0xf5   :  { %v1165_v34 = vpop.f32.mrf.mxu0  ;;  %v773_v31 = vadd.f32 %v1227_v15, %v1163_v14 }
  0xf6   :  { %v1229_v35 = vpop.f32.mrf.mxu1  ;;  %v1166_v18 = vadd.f32 %v1165_v34, %v1164_v32  ;;  %v765_v32 = vadd.f32 %v1221_v10, %v1157_v9 }
  0xf7   :  { %v1167_v36 = vpop.f32.mrf.mxu0  ;;  %v1230_v17 = vadd.f32 %v1229_v35, %v1228_v33 }
  0xf8   :  { %v1231_v37 = vpop.f32.mrf.mxu1 }
  0xf9   :  { %v1168_v38 = vpop.f32.mrf.mxu0 }
  0xfa   :  { %v1232_v39 = vpop.f32.mrf.mxu1  ;;  %v1169_v19 = vadd.f32 %v1168_v38, %v1167_v36  ;;  %v1689_v36 = vadd.f32 %v1230_v17, %v1166_v18 }
  0xfb   :  { %v1170_v40 = vpop.f32.mrf.mxu0  ;;  %v1233_v20 = vadd.f32 %v1232_v39, %v1231_v37 }
  0xfc   :  { %v1234_v41 = vpop.f32.mrf.mxu1 }
  0xfd   :  { %v1171_v42 = vpop.f32.mrf.mxu0  ;;  %v1691_v38 = vadd.f32 %v1233_v20, %v1169_v19 }
  0xfe   :  { %v1235_v43 = vpop.f32.mrf.mxu1  ;;  %v1172_v21 = vadd.f32 %v1171_v42, %v1170_v40 }
  0xff   :  { %v1173_v44 = vpop.f32.mrf.mxu0  ;;  %v1236_v23 = vadd.f32 %v1235_v43, %v1234_v41 }
 0x100   :  { %v1237_v45 = vpop.f32.mrf.mxu1 }
 0x101   :  { %v1174_v46 = vpop.f32.mrf.mxu0  ;;  %v786_v42 = vadd.f32 %v1236_v23, %v1172_v21 }
 0x102   :  { %v1238_v47 = vpop.f32.mrf.mxu1  ;;  %v1175_v34 = vadd.f32 %v1174_v46, %v1173_v44  ;;  %v1696_v46 = vld [vmem:[%s1793_s2] ss:$0 sm:$0xff] }
 0x103   :  { %v1176_v48 = vpop.f32.mrf.mxu0  ;;  %v1239_v33 = vadd.f32 %v1238_v47, %v1237_v45 }
 0x104   :  { %v1240_v49 = vpop.f32.mrf.mxu1 }
 0x105   :  { %v1177_v50 = vpop.f32.mrf.mxu0 }
 0x106   :  { %v1241_v51 = vpop.f32.mrf.mxu1  ;;  %v1178_v37 = vadd.f32 %v1177_v50, %v1176_v48 }
 0x107   :  { %v1179_v52 = vpop.f32.mrf.mxu0  ;;  %v1242_v39 = vadd.f32 %v1241_v51, %v1240_v49  ;;  %v1698_v51 = vadd.f32 %v1239_v33, %v1175_v34 }
 0x108   :  { %v1243_v53 = vpop.f32.mrf.mxu1 }
 0x109   :  { %v1180_v54 = vpop.f32.mrf.mxu0 }
 0x10a   :  { %v1244_v55 = vpop.f32.mrf.mxu1  ;;  %v1181_v40 = vadd.f32 %v1180_v54, %v1179_v52  ;;  %v1703_v54 = vld [vmem:[%s1794_s3] ss:$0 sm:$0xff] }
 0x10b   :  { %v1182_v56 = vpop.f32.mrf.mxu0  ;;  %v1245_v43 = vadd.f32 %v1244_v55, %v1243_v53 }
 0x10c   :  { %v1246_v57 = vpop.f32.mrf.mxu1 }
 0x10d   :  { %v1183_v58 = vpop.f32.mrf.mxu0 }
 0x10e   :  { %v1247_v59 = vpop.f32.mrf.mxu1  ;;  %v1184_v26 = vadd.f32 %v1183_v58, %v1182_v56 }
 0x10f   :  { %v1185_v60 = vpop.f32.mrf.mxu0  ;;  %v1248_v25 = vadd.f32 %v1247_v59, %v1246_v57 }
 0x110   :  { %v1249_v61 = vpop.f32.mrf.mxu1 }
 0x111   :  { %v1186_v62 = vpop.f32.mrf.mxu0  ;;  %v802_v59 = vadd.f32 %v1248_v25, %v1184_v26 }
 0x112   :  { %v1250_v63 = vpop.f32.mrf.mxu1  ;;  %v1187_v56 = vadd.f32 %v1186_v62, %v1185_v60 }
 0x113   :  { %v1188_v0 = vpop.f32.mrf.mxu0  ;;  %v1251_v57 = vadd.f32 %v1250_v63, %v1249_v61  ;;  %v794_v61 = vadd.f32 %v1242_v39, %v1178_v37 }
 0x114   :  { %v1252_v1 = vpop.f32.mrf.mxu1 }
 0x115   :  { %v1189_v2 = vpop.f32.mrf.mxu0 }
 0x116   :  { %v1253_v3 = vpop.f32.mrf.mxu1  ;;  %v1190_v7 = vadd.f32 %v1189_v2, %v1188_v0  ;;  %v797_v2 = vadd.f32 %v1245_v43, %v1181_v40 }
 0x117   :  { %v1191_v4 = vpop.f32.mrf.mxu0  ;;  %v1254_v8 = vadd.f32 %v1253_v3, %v1252_v1  ;;  %v805_v1 = vadd.f32 %v1251_v57, %v1187_v56 }
 0x118   :  { %v1255_v5 = vpop.f32.mrf.mxu1 }
 0x119   :  { %v1192_v6 = vpop.f32.mrf.mxu0 }
 0x11a   :  { %v1256_v11 = vpop.f32.mrf.mxu1  ;;  %v1193_v9 = vadd.f32 %v1192_v6, %v1191_v4  ;;  %v810_v6 = vadd.f32 %v1254_v8, %v1190_v7 }
 0x11b   :  { %v1194_v16 = vpop.f32.mrf.mxu0  ;;  %v1257_v44 = vadd.f32 %v1256_v11, %v1255_v5 }
 0x11c   :  { %v1258_v22 = vpop.f32.mrf.mxu1 }
 0x11d   :  { %v1195_v24 = vpop.f32.mrf.mxu0  ;;  %v1707_v10 = vadd.f32 %v1257_v44, %v1193_v9 }
 0x11e   :  { %v1259_v27 = vpop.f32.mrf.mxu1  ;;  %v1196_v47 = vadd.f32 %v1195_v24, %v1194_v16 }
 0x11f   :  { %v1197_v28 = vpop.f32.mrf.mxu0  ;;  %v1260_v48 = vadd.f32 %v1259_v27, %v1258_v22 }
 0x120   :  { %v1261_v35 = vpop.f32.mrf.mxu1 }
 0x121   :  { %v1198_v41 = vpop.f32.mrf.mxu0  ;;  %v818_v15 = vadd.f32 %v1260_v48, %v1196_v47 }
 0x122   :  { %v1262_v58 = vpop.f32.mrf.mxu1  ;;  %v1199_v52 = vadd.f32 %v1198_v41, %v1197_v28 }
 0x123   :  { %v1298_v45 = vpop.f32.mrf.mxu0  ;;  %v1263_v53 = vadd.f32 %v1262_v58, %v1261_v35 }
 0x124   :  { %v867_v49 = vadd.f32 %v1298_v45, %v770_v30  ;;  %v1306_v50 = vpop.f32.mrf.mxu1 }
 0x125   :  { %v899_v55 = vadd.f32 %v1306_v50, %v802_v59  ;;  %v858_v60 = vpop.f32.mrf.mxu0  ;;  %v821_v20 = vadd.f32 %v1263_v53, %v1199_v52 }
 0x126   :  { %v981_v62 = vmul.f32 %v1696_v46, %v867_v49  ;;  %v859_v63 = vadd.f32 %v858_v60, %v762_v29  ;;  %v890_v0 = vpop.f32.mrf.mxu1 }
 0x127   :  { %v989_v3 = vmul.f32 %v1696_v46, %v899_v55  ;;  %v891_v4 = vadd.f32 %v890_v0, %v794_v61  ;;  %v1299_v5 = vpop.f32.mrf.mxu0 }
 0x128   :  { %v1004_v11 = vadd.f32 %v1703_v54, %v981_v62  ;;  %v979_v12 = vmul.f32 %v1696_v46, %v859_v63  ;;  %v870_v13 = vadd.f32 %v1299_v5, %v773_v31  ;;  %v1307_v14 = vpop.f32.mrf.mxu1 }
 0x129   :  { %v1012_v16 = vadd.f32 %v1703_v54, %v989_v3  ;;  %v987_v18 = vmul.f32 %v1696_v46, %v891_v4  ;;  %v902_v17 = vadd.f32 %v1307_v14, %v805_v1  ;;  %v861_v19 = vpop.f32.mrf.mxu0 }
 0x12a   :  { %v1020_v22 = vmax.f32 %v1004_v11, 0.0  ;;  %v1002_v21 = vadd.f32 %v1703_v54, %v979_v12  ;;  %v982_v23 = vmul.f32 %v1696_v46, %v870_v13  ;;  %v862_v24 = vadd.f32 %v861_v19, %v765_v32  ;;  %v893_v26 = vpop.f32.mrf.mxu1 }
 0x12b   :  { %v1028_v25 = vmax.f32 %v1012_v16, 0.0  ;;  %v1010_v27 = vadd.f32 %v1703_v54, %v987_v18  ;;  %v990_v28 = vmul.f32 %v1696_v46, %v902_v17  ;;  %v894_v30 = vadd.f32 %v893_v26, %v797_v2  ;;  %v1302_v29 = vpop.f32.mrf.mxu0 }
 0x12c   :  { %1036 = vst [vmem:[%s1795_s4 + $0x10] sm:$0xff] %v1020_v22  ;;  %v1018_v31 = vmax.f32 %v1002_v21, 0.0  ;;  %v1005_v34 = vadd.f32 %v1703_v54, %v982_v23  ;;  %v980_v33 = vmul.f32 %v1696_v46, %v862_v24  ;;  %v883_v35 = vadd.f32 %v1302_v29, %v786_v42  ;;  %v1310_v37 = vpop.f32.mrf.mxu1 }
 0x12d   :  { %1044 = vst [vmem:[%s1795_s4 + $0x50] sm:$0xff] %v1028_v25  ;;  %v1026_v32 = vmax.f32 %v1010_v27, 0.0  ;;  %v1013_v39 = vadd.f32 %v1703_v54, %v990_v28  ;;  %v988_v40 = vmul.f32 %v1696_v46, %v894_v30  ;;  %v915_v41 = vadd.f32 %v1310_v37, %v818_v15  ;;  %v874_v43 = vpop.f32.mrf.mxu0 }
 0x12e   :  { %1034 = vst [vmem:[%s1795_s4] sm:$0xff] %v1018_v31  ;;  %v1021_v56 = vmax.f32 %v1005_v34, 0.0  ;;  %v1003_v57 = vadd.f32 %v1703_v54, %v980_v33  ;;  %v985_v42 = vmul.f32 %v1696_v46, %v883_v35  ;;  %v875_v58 = vadd.f32 %v874_v43, %v1689_v36  ;;  %v906_v59 = vpop.f32.mrf.mxu1 }
 0x12f   :  { %1042 = vst [vmem:[%s1795_s4 + $0x40] sm:$0xff] %v1026_v32  ;;  %v1029_v7 = vmax.f32 %v1013_v39, 0.0  ;;  %v1011_v8 = vadd.f32 %v1703_v54, %v988_v40  ;;  %v993_v9 = vmul.f32 %v1696_v46, %v915_v41  ;;  %v907_v44 = vadd.f32 %v906_v59, %v810_v6  ;;  %v1303_v45 = vpop.f32.mrf.mxu0 }
 0x130   :  { %1037 = vst [vmem:[%s1795_s4 + $0x18] sm:$0xff] %v1021_v56  ;;  %v1019_v47 = vmax.f32 %v1003_v57, 0.0  ;;  %v1008_v48 = vadd.f32 %v1703_v54, %v985_v42  ;;  %v983_v36 = vmul.f32 %v1696_v46, %v875_v58  ;;  %v886_v49 = vadd.f32 %v1303_v45, %v1698_v51  ;;  %v1311_v50 = vpop.f32.mrf.mxu1 }
 0x131   :  { %1045 = vst [vmem:[%s1795_s4 + $0x58] sm:$0xff] %v1029_v7  ;;  %v1027_v52 = vmax.f32 %v1011_v8, 0.0  ;;  %v1016_v53 = vadd.f32 %v1703_v54, %v993_v9  ;;  %v991_v55 = vmul.f32 %v1696_v46, %v907_v44  ;;  %v918_v60 = vadd.f32 %v1311_v50, %v821_v20  ;;  %v877_v61 = vpop.f32.mrf.mxu0 }
 0x132   :  { %1035 = vst [vmem:[%s1795_s4 + $0x8] sm:$0xff] %v1019_v47  ;;  %v1024_v62 = vmax.f32 %v1008_v48, 0.0  ;;  %v1006_v63 = vadd.f32 %v1703_v54, %v983_v36  ;;  %v986_v51 = vmul.f32 %v1696_v46, %v886_v49  ;;  %v878_v0 = vadd.f32 %v877_v61, %v1691_v38  ;;  %v909_v1 = vpop.f32.mrf.mxu1 }
 0x133   :  { %1043 = vst [vmem:[%s1795_s4 + $0x48] sm:$0xff] %v1027_v52  ;;  %v1032_v2 = vmax.f32 %v1016_v53, 0.0  ;;  %v1014_v3 = vadd.f32 %v1703_v54, %v991_v55  ;;  %v994_v4 = vmul.f32 %v1696_v46, %v918_v60  ;;  %v910_v5 = vadd.f32 %v909_v1, %v1707_v10 }
 0x134   :  { %1040 = vst [vmem:[%s1795_s4 + $0x30] sm:$0xff] %v1024_v62  ;;  %v1022_v6 = vmax.f32 %v1006_v63, 0.0  ;;  %v1009_v11 = vadd.f32 %v1703_v54, %v986_v51  ;;  %v984_v38 = vmul.f32 %v1696_v46, %v878_v0 }
 0x135   :  { %1048 = vst [vmem:[%s1795_s4 + $0x70] sm:$0xff] %v1032_v2  ;;  %v1030_v12 = vmax.f32 %v1014_v3, 0.0  ;;  %v1017_v13 = vadd.f32 %v1703_v54, %v994_v4  ;;  %v992_v14 = vmul.f32 %v1696_v46, %v910_v5 }
 0x136   :  { %1038 = vst [vmem:[%s1795_s4 + $0x20] sm:$0xff] %v1022_v6  ;;  %v1025_v10 = vmax.f32 %v1009_v11, 0.0  ;;  %v1007_v15 = vadd.f32 %v1703_v54, %v984_v38 }
 0x137   :  { %1046 = vst [vmem:[%s1795_s4 + $0x60] sm:$0xff] %v1030_v12  ;;  %v1033_v16 = vmax.f32 %v1017_v13, 0.0  ;;  %v1015_v18 = vadd.f32 %v1703_v54, %v992_v14 }
 0x138   :  { %1041 = vst [vmem:[%s1795_s4 + $0x38] sm:$0xff] %v1025_v10  ;;  %v1023_v17 = vmax.f32 %v1007_v15, 0.0 }
 0x139   :  { %1049 = vst [vmem:[%s1795_s4 + $0x78] sm:$0xff] %v1033_v16  ;;  %v1031_v46 = vmax.f32 %v1015_v18, 0.0 }
 0x13a   :  { %1039 = vst [vmem:[%s1795_s4 + $0x28] sm:$0xff] %v1023_v17 }
 0x13b   :  { %1047 = vst [vmem:[%s1795_s4 + $0x68] sm:$0xff] %v1031_v46 }

// kernel: multitask_resnet_forward.23
= control target key start
LH: loop header
LB: loop body
LE: loop exit
PB: predicated region body
PF: predicated region fallthrough
CT: control target
= control target key end

     0   :  { %s1891_s1 = inlined_call_operand.vmem [shape: bf16[640,128], index: 1, kind: input, shape index: {}]   ;;  %s1892_s0 = inlined_call_operand.vmem [shape: bf16[128,640], index: 0, kind: input, shape index: {}]   ;;  %s1893_s2 = inlined_call_operand.vmem [shape: f32[1,128], index: 2, kind: input, shape index: {}]   ;;  %s1894_s3 = inlined_call_operand.vmem [shape: f32[1,128], index: 3, kind: input, shape index: {}]   ;;  %s1895_s4 = inlined_call_operand.vmem [shape: f32[128,128], index: 4, kind: input, shape index: {}]   ;;  %s1896_s5 = inlined_call_operand.vmem [shape: f32[128,128], index: 5, kind: output, shape index: {}]  }
   0x1   :  { %v1363_v0 = vld [vmem:[%s1891_s1 + $0x78] sm:$0xff]   ;;  %v1367_v4 = vld [vmem:[%s1891_s1 + $0x70] sm:$0xff]   ;;  %v1371_v8 = vld [vmem:[%s1891_s1 + $0x68] sm:$0xff]  }
   0x2   :  { %v1364_v1 = vld [vmem:[%s1891_s1 + $0xf8] sm:$0xff]   ;;  %1171 = vmatprep.subr.bf16.mxu0 %v1363_v0  ;;  %v1368_v5 = vld [vmem:[%s1891_s1 + $0xf0] sm:$0xff]   ;;  %v1372_v9 = vld [vmem:[%s1891_s1 + $0xe8] sm:$0xff]  }
   0x3   :  { %v1365_v2 = vld [vmem:[%s1891_s1 + $0x38] sm:$0xff]   ;;  %1235 = vmatprep.subr.bf16.mxu1 %v1364_v1  ;;  %v1369_v6 = vld [vmem:[%s1891_s1 + $0x30] sm:$0xff]   ;;  %v1373_v10 = vld [vmem:[%s1891_s1 + $0x28] sm:$0xff]  }
   0x4   :  { %v1366_v3 = vld [vmem:[%s1891_s1 + $0xb8] sm:$0xff]   ;;  %1172 = vmatpush3.bf16.msra.mxu0 %v1365_v2  ;;  %v1370_v7 = vld [vmem:[%s1891_s1 + $0xb0] sm:$0xff]   ;;  %v1374_v11 = vld [vmem:[%s1891_s1 + $0xa8] sm:$0xff]  }
   0x5   :  { %1236 = vmatpush3.bf16.msra.mxu1 %v1366_v3  ;;  %1173 = vmatprep.subr.bf16.mxu0 %v1367_v4  ;;  %v1375_v12 = vld [vmem:[%s1891_s1 + $0x60] sm:$0xff]   ;;  %v1379_v16 = vld [vmem:[%s1891_s1 + $0x58] sm:$0xff]   ;;  %v1383_v20 = vld [vmem:[%s1891_s1 + $0x50] sm:$0xff]  }
   0x6   :  { %1237 = vmatprep.subr.bf16.mxu1 %v1368_v5  ;;  %v1376_v13 = vld [vmem:[%s1891_s1 + $0xe0] sm:$0xff]   ;;  %v1380_v17 = vld [vmem:[%s1891_s1 + $0xd8] sm:$0xff]   ;;  %v1384_v21 = vld [vmem:[%s1891_s1 + $0xd0] sm:$0xff]  }
   0x7   :  { %v1377_v14 = vld [vmem:[%s1891_s1 + $0x20] sm:$0xff]   ;;  %v1381_v18 = vld [vmem:[%s1891_s1 + $0x18] sm:$0xff]   ;;  %v1385_v22 = vld [vmem:[%s1891_s1 + $0x10] sm:$0xff]  }
   0x8   :  { %1174 = vmatpush3.bf16.msra.mxu0 %v1369_v6  ;;  %v1378_v15 = vld [vmem:[%s1891_s1 + $0xa0] sm:$0xff]   ;;  %v1382_v19 = vld [vmem:[%s1891_s1 + $0x98] sm:$0xff]   ;;  %v1386_v23 = vld [vmem:[%s1891_s1 + $0x90] sm:$0xff]  }
   0x9   :  { %1238 = vmatpush3.bf16.msra.mxu1 %v1370_v7  ;;  %1175 = vmatprep.subr.bf16.mxu0 %v1371_v8  ;;  %v1387_v24 = vld [vmem:[%s1891_s1 + $0x48] sm:$0xff]   ;;  %v1391_v28 = vld [vmem:[%s1891_s1 + $0x40] sm:$0xff]   ;;  %v1401_v36 = vld [vmem:[%s1891_s1 + $0x138] sm:$0xff]  }
   0xa   :  { %1239 = vmatprep.subr.bf16.mxu1 %v1372_v9  ;;  %v1388_v25 = vld [vmem:[%s1891_s1 + $0xc8] sm:$0xff]   ;;  %v1392_v29 = vld [vmem:[%s1891_s1 + $0xc0] sm:$0xff]   ;;  %v1408_v39 = vld [vmem:[%s1891_s1 + $0x130] sm:$0xff]  }
   0xb   :  { %v1389_v26 = vld [vmem:[%s1891_s1 + $0x8] sm:$0xff]   ;;  %v1393_v30 = vld [vmem:[%s1891_s1] sm:$0xff]   ;;  %v1411_v43 = vld [vmem:[%s1892_s0 + $0x5c] ss:$20 sps:$4 sm:$0xff]  }
   0xc   :  { %1176 = vmatpush3.bf16.msra.mxu0 %v1373_v10  ;;  %v1390_v27 = vld [vmem:[%s1891_s1 + $0x88] sm:$0xff]   ;;  %v1394_v31 = vld [vmem:[%s1891_s1 + $0x80] sm:$0xff]   ;;  %v1416_v48 = vld [vmem:[%s1892_s0 + $0x7c] ss:$20 sps:$4 sm:$0xff]  }
   0xd   :  { %1240 = vmatpush3.bf16.msra.mxu1 %v1374_v11  ;;  %1177 = vmatprep.subr.bf16.mxu0 %v1375_v12  ;;  %v1395_v32 = vld [vmem:[%s1892_s0] ss:$20 sps:$4 sm:$0xff]   ;;  %v1397_v33 = vld [vmem:[%s1892_s0 + $0x4] ss:$20 sps:$4 sm:$0xff]   ;;  %v1398_v34 = vld [vmem:[%s1892_s0 + $0x8] ss:$20 sps:$4 sm:$0xff]  }
   0xe   :  { %1241 = vmatprep.subr.bf16.mxu1 %v1376_v13  ;;  %v1400_v35 = vld [vmem:[%s1892_s0 + $0xc] ss:$20 sps:$4 sm:$0xff]   ;;  %665 = vmatprep.mubr.bf16.mxu0 %v1397_v33  ;;  %v1404_v38 = vld [vmem:[%s1892_s0 + $0x34] ss:$20 sps:$4 sm:$0xff]   ;;  %v1407_v41 = vld [vmem:[%s1892_s0 + $0x30] ss:$20 sps:$4 sm:$0xff]  }
   0xf   :  { %762 = vmatprep.mubr.bf16.mxu1 %v1400_v35  ;;  %v1402_v37 = vld [vmem:[%s1892_s0 + $0x2c] ss:$20 sps:$4 sm:$0xff]   ;;  %v1406_v40 = vld [vmem:[%s1892_s0 + $0x28] ss:$20 sps:$4 sm:$0xff]   ;;  %v1413_v46 = vld [vmem:[%s1892_s0 + $0x50] ss:$20 sps:$4 sm:$0xff]  }
  0x10   :  { %1178 = vmatpush3.bf16.msra.mxu0 %v1377_v14  ;;  %v1409_v42 = vld [vmem:[%s1892_s0 + $0x54] ss:$20 sps:$4 sm:$0xff]   ;;  %v1422_v45 = vld [vmem:[%s1891_s1 + $0x120] sm:$0xff]   ;;  %v1414_v47 = vld [vmem:[%s1892_s0 + $0x58] ss:$20 sps:$4 sm:$0xff]  }
  0x11   :  { %1242 = vmatpush3.bf16.msra.mxu1 %v1378_v15  ;;  %1179 = vmatprep.subr.bf16.mxu0 %v1379_v16  ;;  %v1415_v44 = vld [vmem:[%s1891_s1 + $0x128] sm:$0xff]   ;;  %v1418_v49 = vld [vmem:[%s1892_s0 + $0x84] ss:$20 sps:$4 sm:$0xff]   ;;  %v1436_v51 = vld [vmem:[%s1891_s1 + $0x110] sm:$0xff]  }
  0x12   :  { %1243 = vmatprep.subr.bf16.mxu1 %v1380_v17  ;;  %v1429_v50 = vld [vmem:[%s1891_s1 + $0x118] sm:$0xff]   ;;  %v1421_v53 = vld [vmem:[%s1892_s0 + $0x80] ss:$20 sps:$4 sm:$0xff]   ;;  %v1443_v55 = vld [vmem:[%s1891_s1 + $0x108] sm:$0xff]  }
  0x13   :  { %v1420_v52 = vld [vmem:[%s1892_s0 + $0x78] ss:$20 sps:$4 sm:$0xff]   ;;  %v1450_v57 = vld [vmem:[%s1891_s1 + $0x100] sm:$0xff]   ;;  %v1428_v59 = vld [vmem:[%s1892_s0 + $0xa8] ss:$20 sps:$4 sm:$0xff]  }
  0x14   :  { %1180 = vmatpush3.bf16.msra.mxu0 %v1381_v18  ;;  %v1423_v54 = vld [vmem:[%s1892_s0 + $0xa4] ss:$20 sps:$4 sm:$0xff]   ;;  %v1425_v56 = vld [vmem:[%s1892_s0 + $0xac] ss:$20 sps:$4 sm:$0xff]   ;;  %v1432_v61 = vld [vmem:[%s1892_s0 + $0xd4] ss:$20 sps:$4 sm:$0xff]  }
  0x15   :  { %1244 = vmatpush3.bf16.msra.mxu1 %v1382_v19  ;;  %1181 = vmatprep.subr.bf16.mxu0 %v1383_v20  ;;  %v1427_v58 = vld [vmem:[%s1892_s0 + $0xa0] ss:$20 sps:$4 sm:$0xff]   ;;  %v1434_v62 = vld [vmem:[%s1892_s0 + $0xc8] ss:$20 sps:$4 sm:$0xff]   ;;  %v1435_v63 = vld [vmem:[%s1892_s0 + $0xd0] ss:$20 sps:$4 sm:$0xff]  }
  0x16   :  { %1245 = vmatprep.subr.bf16.mxu1 %v1384_v21  ;;  %v1430_v60 = vld [vmem:[%s1892_s0 + $0xcc] ss:$20 sps:$4 sm:$0xff]   ;;  %v1437_v0 = vld [vmem:[%s1892_s0 + $0xf4] ss:$20 sps:$4 sm:$0xff]   ;;  %v1439_v1 = vld [vmem:[%s1892_s0 + $0xfc] ss:$20 sps:$4 sm:$0xff]  }
  0x17   :  { %v1441_v2 = vld [vmem:[%s1892_s0 + $0xf0] ss:$20 sps:$4 sm:$0xff]   ;;  %v1442_v3 = vld [vmem:[%s1892_s0 + $0xf8] ss:$20 sps:$4 sm:$0xff]   ;;  %v1449_v7 = vld [vmem:[%s1892_s0 + $0x120] ss:$20 sps:$4 sm:$0xff]  }
  0x18   :  { %1182 = vmatpush3.bf16.msra.mxu0 %v1385_v22  ;;  %v1444_v4 = vld [vmem:[%s1892_s0 + $0x11c] ss:$20 sps:$4 sm:$0xff]   ;;  %v1446_v5 = vld [vmem:[%s1892_s0 + $0x124] ss:$20 sps:$4 sm:$0xff]   ;;  %v1455_v12 = vld [vmem:[%s1892_s0 + $0x60] ss:$20 sps:$4 sm:$0xff]  }
  0x19   :  { %1246 = vmatpush3.bf16.msra.mxu1 %v1386_v23  ;;  %1183 = vmatprep.subr.bf16.mxu0 %v1387_v24  ;;  %v1448_v6 = vld [vmem:[%s1892_s0 + $0x118] ss:$20 sps:$4 sm:$0xff]   ;;  %v1451_v8 = vld [vmem:[%s1892_s0 + $0x10] ss:$20 sps:$4 sm:$0xff]   ;;  %v1456_v13 = vld [vmem:[%s1892_s0 + $0x100] ss:$20 sps:$4 sm:$0xff]  }
  0x1a   :  { %1247 = vmatprep.subr.bf16.mxu1 %v1388_v25  ;;  %v1452_v9 = vld [vmem:[%s1892_s0 + $0xb0] ss:$20 sps:$4 sm:$0xff]   ;;  %v1453_v10 = vld [vmem:[%s1892_s0 + $0x38] ss:$20 sps:$4 sm:$0xff]   ;;  %v1457_v14 = vld [vmem:[%s1892_s0 + $0x88] ss:$20 sps:$4 sm:$0xff]  }
  0x1b   :  { %v1454_v11 = vld [vmem:[%s1892_s0 + $0xd8] ss:$20 sps:$4 sm:$0xff]   ;;  %v1458_v15 = vld [vmem:[%s1892_s0 + $0x128] ss:$20 sps:$4 sm:$0xff]  }
  0x1c   :  { %1184 = vmatpush3.bf16.msra.mxu0 %v1389_v26 }
  0x1d   :  { %1248 = vmatpush3.bf16.msra.mxu1 %v1390_v27  ;;  %1185 = vmatprep.subr.bf16.mxu0 %v1391_v28 }
  0x1e   :  { %1249 = vmatprep.subr.bf16.mxu1 %v1392_v29 }
  0x20   :  { %1186 = vmatpush3.bf16.msra.mxu0 %v1393_v30 }
  0x21   :  { %1250 = vmatpush3.bf16.msra.mxu1 %v1394_v31  ;;  %1315 = vmatprep.subr.bf16.mxu0 %v1401_v36 }
  0x22   :  { %1347 = vmatprep.subr.bf16.mxu1 %v1401_v36 }
  0x23   :  { %666 = vmatmul.mubr.bf16.vlgmr.msra.gmra.mxu0 %v1395_v32 }
  0x24   :  { %763 = vmatmul.mubr.bf16.vlgmr.msra.gmra.mxu1 %v1398_v34  ;;  %1316 = vmatpush3.bf16.msra.mxu0 %v1401_v36 }
  0x25   :  { %1355 = vmatpush3.bf16.msra.mxu1 %v1401_v36  ;;  %673 = vmatprep.mubr.bf16.mxu0 %v1402_v37 }
  0x26   :  { %770 = vmatprep.mubr.bf16.mxu1 %v1404_v38  ;;  %1317 = vmatprep.subr.bf16.mxu0 %v1408_v39 }
  0x27   :  { %1348 = vmatprep.subr.bf16.mxu1 %v1408_v39 }
  0x28   :  { %1318 = vmatpush3.bf16.msra.mxu0 %v1408_v39 }
  0x29   :  { %1356 = vmatpush3.bf16.msra.mxu1 %v1408_v39  ;;  %1319 = vmatprep.subr.bf16.mxu0 %v1415_v44 }
  0x2a   :  { %1349 = vmatprep.subr.bf16.mxu1 %v1415_v44 }
  0x2b   :  { %674 = vmatmul.mubr.bf16.gmra.mxu0 %v1406_v40 }
  0x2c   :  { %771 = vmatmul.mubr.bf16.gmra.mxu1 %v1407_v41  ;;  %681 = vmatprep.mubr.bf16.mxu0 %v1409_v42 }
  0x2d   :  { %778 = vmatprep.mubr.bf16.mxu1 %v1411_v43  ;;  %1320 = vmatpush3.bf16.msra.mxu0 %v1415_v44 }
  0x2e   :  { %1357 = vmatpush3.bf16.msra.mxu1 %v1415_v44  ;;  %1321 = vmatprep.subr.bf16.mxu0 %v1422_v45 }
  0x2f   :  { %1350 = vmatprep.subr.bf16.mxu1 %v1422_v45 }
  0x31   :  { %1322 = vmatpush3.bf16.msra.mxu0 %v1422_v45 }
  0x32   :  { %1358 = vmatpush3.bf16.msra.mxu1 %v1422_v45  ;;  %1323 = vmatprep.subr.bf16.mxu0 %v1429_v50 }
  0x33   :  { %682 = vmatmul.mubr.bf16.gmra.mxu0 %v1413_v46  ;;  %1351 = vmatprep.subr.bf16.mxu1 %v1429_v50 }
  0x34   :  { %779 = vmatmul.mubr.bf16.gmra.mxu1 %v1414_v47  ;;  %689 = vmatprep.mubr.bf16.mxu0 %v1416_v48 }
  0x35   :  { %786 = vmatprep.mubr.bf16.mxu1 %v1418_v49  ;;  %1324 = vmatpush3.bf16.msra.mxu0 %v1429_v50 }
  0x36   :  { %1359 = vmatpush3.bf16.msra.mxu1 %v1429_v50  ;;  %1325 = vmatprep.subr.bf16.mxu0 %v1436_v51 }
  0x37   :  { %1352 = vmatprep.subr.bf16.mxu1 %v1436_v51 }
  0x39   :  { %1326 = vmatpush3.bf16.msra.mxu0 %v1436_v51 }
  0x3a   :  { %1360 = vmatpush3.bf16.msra.mxu1 %v1436_v51  ;;  %1327 = vmatprep.subr.bf16.mxu0 %v1443_v55 }
  0x3b   :  { %690 = vmatmul.mubr.bf16.gmra.mxu0 %v1420_v52  ;;  %1353 = vmatprep.subr.bf16.mxu1 %v1443_v55 }
  0x3c   :  { %787 = vmatmul.mubr.bf16.gmra.mxu1 %v1421_v53  ;;  %697 = vmatprep.mubr.bf16.mxu0 %v1423_v54 }
  0x3d   :  { %794 = vmatprep.mubr.bf16.mxu1 %v1425_v56  ;;  %1328 = vmatpush3.bf16.msra.mxu0 %v1443_v55 }
  0x3e   :  { %1361 = vmatpush3.bf16.msra.mxu1 %v1443_v55  ;;  %1329 = vmatprep.subr.bf16.mxu0 %v1450_v57 }
  0x3f   :  { %1354 = vmatprep.subr.bf16.mxu1 %v1450_v57 }
  0x41   :  { %1330 = vmatpush3.bf16.msra.mxu0 %v1450_v57 }
  0x42   :  { %1362 = vmatpush3.bf16.msra.mxu1 %v1450_v57 }
  0x43   :  { %698 = vmatmul.mubr.bf16.gmra.mxu0 %v1427_v58 }
  0x44   :  { %795 = vmatmul.mubr.bf16.gmra.mxu1 %v1428_v59  ;;  %705 = vmatprep.mubr.bf16.mxu0 %v1430_v60 }
  0x45   :  { %802 = vmatprep.mubr.bf16.mxu1 %v1432_v61 }
  0x4b   :  { %706 = vmatmul.mubr.bf16.gmra.mxu0 %v1434_v62 }
  0x4c   :  { %803 = vmatmul.mubr.bf16.gmra.mxu1 %v1435_v63  ;;  %713 = vmatprep.mubr.bf16.mxu0 %v1437_v0 }
  0x4d   :  { %810 = vmatprep.mubr.bf16.mxu1 %v1439_v1 }
  0x53   :  { %714 = vmatmul.mubr.bf16.gmra.mxu0 %v1441_v2 }
  0x54   :  { %811 = vmatmul.mubr.bf16.gmra.mxu1 %v1442_v3  ;;  %721 = vmatprep.mubr.bf16.mxu0 %v1444_v4 }
  0x55   :  { %818 = vmatprep.mubr.bf16.mxu1 %v1446_v5 }
  0x5b   :  { %722 = vmatmul.mubr.bf16.gmra.mxu0 %v1448_v6 }
  0x5c   :  { %819 = vmatmul.mubr.bf16.gmra.mxu1 %v1449_v7  ;;  %1331 = vmatprep.mubr.bf16.mxu0 %v1451_v8 }
  0x5d   :  { %1339 = vmatprep.mubr.bf16.mxu1 %v1452_v9 }
  0x63   :  { %1332 = vmatmul.mubr.bf16.vlgmr.msra.gmra.mxu0 %v1453_v10 }
  0x64   :  { %1340 = vmatmul.mubr.bf16.vlgmr.msra.gmra.mxu1 %v1454_v11  ;;  %1335 = vmatprep.mubr.bf16.mxu0 %v1455_v12 }
  0x65   :  { %1343 = vmatprep.mubr.bf16.mxu1 %v1456_v13 }
  0x6b   :  { %1336 = vmatmul.mubr.bf16.gmra.mxu0 %v1457_v14 }
  0x6c   :  { %1344 = vmatmul.mubr.bf16.gmra.mxu1 %v1458_v15 }
  0xe3   :  { %v1187_v16 = vpop.f32.mrf.mxu0 }
  0xe4   :  { %v1251_v17 = vpop.f32.mrf.mxu1 }
  0xe5   :  { %v1188_v18 = vpop.f32.mrf.mxu0 }
  0xe6   :  { %v1252_v19 = vpop.f32.mrf.mxu1  ;;  %v1189_v7 = vadd.f32 %v1188_v18, %v1187_v16 }
  0xe7   :  { %v1190_v20 = vpop.f32.mrf.mxu0  ;;  %v1253_v8 = vadd.f32 %v1252_v19, %v1251_v17 }
  0xe8   :  { %v1254_v21 = vpop.f32.mrf.mxu1 }
  0xe9   :  { %v1191_v22 = vpop.f32.mrf.mxu0 }
  0xea   :  { %v1255_v23 = vpop.f32.mrf.mxu1  ;;  %v1192_v9 = vadd.f32 %v1191_v22, %v1190_v20 }
  0xeb   :  { %v1193_v24 = vpop.f32.mrf.mxu0  ;;  %v1256_v10 = vadd.f32 %v1255_v23, %v1254_v21 }
  0xec   :  { %v1257_v25 = vpop.f32.mrf.mxu1 }
  0xed   :  { %v1194_v26 = vpop.f32.mrf.mxu0 }
  0xee   :  { %v1258_v27 = vpop.f32.mrf.mxu1  ;;  %v1195_v12 = vadd.f32 %v1194_v26, %v1193_v24 }
  0xef   :  { %v1196_v28 = vpop.f32.mrf.mxu0  ;;  %v1259_v13 = vadd.f32 %v1258_v27, %v1257_v25 }
  0xf0   :  { %v1260_v29 = vpop.f32.mrf.mxu1 }
  0xf1   :  { %v1197_v30 = vpop.f32.mrf.mxu0 }
  0xf2   :  { %v1261_v31 = vpop.f32.mrf.mxu1  ;;  %v1198_v14 = vadd.f32 %v1197_v30, %v1196_v28  ;;  %v773_v30 = vadd.f32 %v1259_v13, %v1195_v12  ;;  %v1031_v13 = vld [vmem:[%s1895_s4 + $0x50] sm:$0xff] }
  0xf3   :  { %v1199_v32 = vpop.f32.mrf.mxu0  ;;  %v1262_v15 = vadd.f32 %v1261_v31, %v1260_v29  ;;  %v765_v29 = vadd.f32 %v1253_v8, %v1189_v7 }
  0xf4   :  { %v1263_v33 = vpop.f32.mrf.mxu1 }
  0xf5   :  { %v1200_v34 = vpop.f32.mrf.mxu0  ;;  %v776_v31 = vadd.f32 %v1262_v15, %v1198_v14 }
  0xf6   :  { %v1264_v35 = vpop.f32.mrf.mxu1  ;;  %v1201_v18 = vadd.f32 %v1200_v34, %v1199_v32  ;;  %v1729_v32 = vadd.f32 %v1256_v10, %v1192_v9 }
  0xf7   :  { %v1202_v36 = vpop.f32.mrf.mxu0  ;;  %v1265_v17 = vadd.f32 %v1264_v35, %v1263_v33 }
  0xf8   :  { %v1266_v37 = vpop.f32.mrf.mxu1 }
  0xf9   :  { %v1203_v38 = vpop.f32.mrf.mxu0 }
  0xfa   :  { %v1267_v39 = vpop.f32.mrf.mxu1  ;;  %v1204_v19 = vadd.f32 %v1203_v38, %v1202_v36  ;;  %v1731_v36 = vadd.f32 %v1265_v17, %v1201_v18 }
  0xfb   :  { %v1205_v40 = vpop.f32.mrf.mxu0  ;;  %v1268_v20 = vadd.f32 %v1267_v39, %v1266_v37 }
  0xfc   :  { %v1269_v41 = vpop.f32.mrf.mxu1 }
  0xfd   :  { %v1206_v42 = vpop.f32.mrf.mxu0  ;;  %v1733_v38 = vadd.f32 %v1268_v20, %v1204_v19  ;;  %v1021_v19 = vld [vmem:[%s1895_s4] sm:$0xff] }
  0xfe   :  { %v1270_v43 = vpop.f32.mrf.mxu1  ;;  %v1207_v21 = vadd.f32 %v1206_v42, %v1205_v40 }
  0xff   :  { %v1208_v44 = vpop.f32.mrf.mxu0  ;;  %v1271_v23 = vadd.f32 %v1270_v43, %v1269_v41 }
 0x100   :  { %v1272_v45 = vpop.f32.mrf.mxu1 }
 0x101   :  { %v1209_v46 = vpop.f32.mrf.mxu0  ;;  %v1735_v42 = vadd.f32 %v1271_v23, %v1207_v21 }
 0x102   :  { %v1273_v47 = vpop.f32.mrf.mxu1  ;;  %v1210_v34 = vadd.f32 %v1209_v46, %v1208_v44 }
 0x103   :  { %v1211_v48 = vpop.f32.mrf.mxu0  ;;  %v1274_v33 = vadd.f32 %v1273_v47, %v1272_v45  ;;  %v1740_v47 = vld [vmem:[%s1893_s2] ss:$0 sm:$0xff] }
 0x104   :  { %v1275_v49 = vpop.f32.mrf.mxu1 }
 0x105   :  { %v1212_v50 = vpop.f32.mrf.mxu0 }
 0x106   :  { %v1276_v51 = vpop.f32.mrf.mxu1  ;;  %v1213_v37 = vadd.f32 %v1212_v50, %v1211_v48 }
 0x107   :  { %v1214_v52 = vpop.f32.mrf.mxu0  ;;  %v1277_v39 = vadd.f32 %v1276_v51, %v1275_v49 }
 0x108   :  { %v1278_v53 = vpop.f32.mrf.mxu1 }
 0x109   :  { %v1215_v54 = vpop.f32.mrf.mxu0 }
 0x10a   :  { %v1279_v55 = vpop.f32.mrf.mxu1  ;;  %v1216_v40 = vadd.f32 %v1215_v54, %v1214_v52  ;;  %v1742_v52 = vadd.f32 %v1274_v33, %v1210_v34  ;;  %v1024_v34 = vld [vmem:[%s1895_s4 + $0x18] sm:$0xff] }
 0x10b   :  { %v1217_v56 = vpop.f32.mrf.mxu0  ;;  %v1280_v43 = vadd.f32 %v1279_v55, %v1278_v53  ;;  %v1747_v55 = vld [vmem:[%s1894_s3] ss:$0 sm:$0xff] }
 0x10c   :  { %v1281_v57 = vpop.f32.mrf.mxu1 }
 0x10d   :  { %v1218_v58 = vpop.f32.mrf.mxu0 }
 0x10e   :  { %v1282_v59 = vpop.f32.mrf.mxu1  ;;  %v1219_v26 = vadd.f32 %v1218_v58, %v1217_v56 }
 0x10f   :  { %v1220_v60 = vpop.f32.mrf.mxu0  ;;  %v1283_v25 = vadd.f32 %v1282_v59, %v1281_v57 }
 0x110   :  { %v1284_v61 = vpop.f32.mrf.mxu1 }
 0x111   :  { %v1221_v62 = vpop.f32.mrf.mxu0  ;;  %v805_v59 = vadd.f32 %v1283_v25, %v1219_v26  ;;  %v1029_v25 = vld [vmem:[%s1895_s4 + $0x40] sm:$0xff] }
 0x112   :  { %v1285_v63 = vpop.f32.mrf.mxu1  ;;  %v1222_v56 = vadd.f32 %v1221_v62, %v1220_v60  ;;  %v797_v62 = vadd.f32 %v1277_v39, %v1213_v37 }
 0x113   :  { %v1223_v0 = vpop.f32.mrf.mxu0  ;;  %v1286_v57 = vadd.f32 %v1285_v63, %v1284_v61 }
 0x114   :  { %v1287_v1 = vpop.f32.mrf.mxu1 }
 0x115   :  { %v1224_v2 = vpop.f32.mrf.mxu0 }
 0x116   :  { %v1288_v3 = vpop.f32.mrf.mxu1  ;;  %v1225_v7 = vadd.f32 %v1224_v2, %v1223_v0  ;;  %v808_v2 = vadd.f32 %v1286_v57, %v1222_v56 }
 0x117   :  { %v1226_v4 = vpop.f32.mrf.mxu0  ;;  %v1289_v8 = vadd.f32 %v1288_v3, %v1287_v1  ;;  %v800_v3 = vadd.f32 %v1280_v43, %v1216_v40 }
 0x118   :  { %v1290_v5 = vpop.f32.mrf.mxu1 }
 0x119   :  { %v1227_v6 = vpop.f32.mrf.mxu0  ;;  %v1754_v10 = vadd.f32 %v1289_v8, %v1225_v7  ;;  %v1022_v7 = vld [vmem:[%s1895_s4 + $0x8] sm:$0xff] }
 0x11a   :  { %v1291_v11 = vpop.f32.mrf.mxu1  ;;  %v1228_v44 = vadd.f32 %v1227_v6, %v1226_v4  ;;  %v1023_v4 = vld [vmem:[%s1895_s4 + $0x10] sm:$0xff] }
 0x11b   :  { %v1229_v16 = vpop.f32.mrf.mxu0  ;;  %v1292_v45 = vadd.f32 %v1291_v11, %v1290_v5 }
 0x11c   :  { %v1293_v22 = vpop.f32.mrf.mxu1 }
 0x11d   :  { %v1230_v24 = vpop.f32.mrf.mxu0  ;;  %v1756_v11 = vadd.f32 %v1292_v45, %v1228_v44 }
 0x11e   :  { %v1294_v27 = vpop.f32.mrf.mxu1  ;;  %v1231_v48 = vadd.f32 %v1230_v24, %v1229_v16 }
 0x11f   :  { %v1232_v28 = vpop.f32.mrf.mxu0  ;;  %v1295_v49 = vadd.f32 %v1294_v27, %v1293_v22 }
 0x120   :  { %v1296_v35 = vpop.f32.mrf.mxu1 }
 0x121   :  { %v1233_v41 = vpop.f32.mrf.mxu0  ;;  %v821_v18 = vadd.f32 %v1295_v49, %v1231_v48  ;;  %v1030_v49 = vld [vmem:[%s1895_s4 + $0x48] sm:$0xff] }
 0x122   :  { %v1297_v58 = vpop.f32.mrf.mxu1  ;;  %v1234_v53 = vadd.f32 %v1233_v41, %v1232_v28 }
 0x123   :  { %v1333_v46 = vpop.f32.mrf.mxu0  ;;  %v1298_v54 = vadd.f32 %v1297_v58, %v1296_v35 }
 0x124   :  { %v870_v50 = vadd.f32 %v1333_v46, %v773_v30  ;;  %v1341_v51 = vpop.f32.mrf.mxu1 }
 0x125   :  { %v902_v60 = vadd.f32 %v1341_v51, %v805_v59  ;;  %v861_v61 = vpop.f32.mrf.mxu0  ;;  %v1768_v23 = vadd.f32 %v1298_v54, %v1234_v53 }
 0x126   :  { %v984_v63 = vmul.f32 %v1740_v47, %v870_v50  ;;  %v862_v0 = vadd.f32 %v861_v61, %v765_v29  ;;  %v893_v1 = vpop.f32.mrf.mxu1 }
 0x127   :  { %v992_v5 = vmul.f32 %v1740_v47, %v902_v60  ;;  %v894_v6 = vadd.f32 %v893_v1, %v797_v62  ;;  %v1334_v9 = vpop.f32.mrf.mxu0 }
 0x128   :  { %v1007_v12 = vadd.f32 %v1747_v55, %v984_v63  ;;  %v982_v14 = vmul.f32 %v1740_v47, %v862_v0  ;;  %v873_v15 = vadd.f32 %v1334_v9, %v776_v31  ;;  %v1342_v16 = vpop.f32.mrf.mxu1 }
 0x129   :  { %v1015_v17 = vadd.f32 %v1747_v55, %v992_v5  ;;  %v990_v20 = vmul.f32 %v1740_v47, %v894_v6  ;;  %v905_v22 = vadd.f32 %v1342_v16, %v808_v2  ;;  %v864_v21 = vpop.f32.mrf.mxu0  ;;  %v1027_v5 = vld [vmem:[%s1895_s4 + $0x30] sm:$0xff] }
 0x12a   :  { %v1039_v24 = vadd.f32 %v1023_v4, %v1007_v12  ;;  %v1005_v26 = vadd.f32 %v1747_v55, %v982_v14  ;;  %v985_v27 = vmul.f32 %v1740_v47, %v873_v15  ;;  %v865_v28 = vadd.f32 %v864_v21, %v1729_v32  ;;  %v896_v30 = vpop.f32.mrf.mxu1  ;;  %v1032_v32 = vld [vmem:[%s1895_s4 + $0x58] sm:$0xff]  ;;  %v1035_v14 = vld [vmem:[%s1895_s4 + $0x70] sm:$0xff] }
 0x12b   :  { %v1047_v29 = vadd.f32 %v1031_v13, %v1015_v17  ;;  %v1013_v31 = vadd.f32 %v1747_v55, %v990_v20  ;;  %v993_v33 = vmul.f32 %v1740_v47, %v905_v22  ;;  %v897_v35 = vadd.f32 %v896_v30, %v800_v3  ;;  %v1337_v37 = vpop.f32.mrf.mxu0 }
 0x12c   :  { %v1055_v39 = vmax.f32 %v1039_v24, 0.0  ;;  %v1037_v40 = vadd.f32 %v1021_v19, %v1005_v26  ;;  %v1008_v41 = vadd.f32 %v1747_v55, %v985_v27  ;;  %v983_v43 = vmul.f32 %v1740_v47, %v865_v28  ;;  %v1345_v56 = vpop.f32.mrf.mxu1  ;;  %v1025_v19 = vld [vmem:[%s1895_s4 + $0x20] sm:$0xff]  ;;  %v1028_v28 = vld [vmem:[%s1895_s4 + $0x38] sm:$0xff] }
 0x12d   :  { %v1063_v57 = vmax.f32 %v1047_v29, 0.0  ;;  %v1045_v58 = vadd.f32 %v1029_v25, %v1013_v31  ;;  %v1016_v59 = vadd.f32 %v1747_v55, %v993_v33  ;;  %v991_v8 = vmul.f32 %v1740_v47, %v897_v35  ;;  %v877_v44 = vpop.f32.mrf.mxu0  ;;  %v1033_v24 = vld [vmem:[%s1895_s4 + $0x60] sm:$0xff] }
 0x12e   :  { %1071 = vst [vmem:[%s1896_s5 + $0x10] sm:$0xff] %v1055_v39  ;;  %v1053_v45 = vmax.f32 %v1037_v40, 0.0  ;;  %v1040_v46 = vadd.f32 %v1024_v34, %v1008_v41  ;;  %v1006_v48 = vadd.f32 %v1747_v55, %v983_v43  ;;  %v886_v50 = vadd.f32 %v1337_v37, %v1735_v42  ;;  %v909_v51 = vpop.f32.mrf.mxu1  ;;  %v1026_v41 = vld [vmem:[%s1895_s4 + $0x28] sm:$0xff] }
 0x12f   :  { %1079 = vst [vmem:[%s1896_s5 + $0x50] sm:$0xff] %v1063_v57  ;;  %v1061_v53 = vmax.f32 %v1045_v58, 0.0  ;;  %v1048_v54 = vadd.f32 %v1032_v32, %v1016_v59  ;;  %v1014_v60 = vadd.f32 %v1747_v55, %v991_v8  ;;  %v918_v61 = vadd.f32 %v1345_v56, %v821_v18  ;;  %v1338_v62 = vpop.f32.mrf.mxu0  ;;  %v1034_v57 = vld [vmem:[%s1895_s4 + $0x68] sm:$0xff] }
 0x130   :  { %1069 = vst [vmem:[%s1896_s5] sm:$0xff] %v1053_v45  ;;  %v1056_v63 = vmax.f32 %v1040_v46, 0.0  ;;  %v1038_v0 = vadd.f32 %v1022_v7, %v1006_v48  ;;  %v988_v1 = vmul.f32 %v1740_v47, %v886_v50  ;;  %v878_v42 = vadd.f32 %v877_v44, %v1731_v36  ;;  %v1346_v2 = vpop.f32.mrf.mxu1 }
 0x131   :  { %1077 = vst [vmem:[%s1896_s5 + $0x40] sm:$0xff] %v1061_v53  ;;  %v1064_v3 = vmax.f32 %v1048_v54, 0.0  ;;  %v1046_v4 = vadd.f32 %v1030_v49, %v1014_v60  ;;  %v996_v6 = vmul.f32 %v1740_v47, %v918_v61  ;;  %v910_v9 = vadd.f32 %v909_v51, %v1754_v10  ;;  %v880_v12 = vpop.f32.mrf.mxu0 }
 0x132   :  { %1072 = vst [vmem:[%s1896_s5 + $0x18] sm:$0xff] %v1056_v63  ;;  %v1054_v36 = vmax.f32 %v1038_v0, 0.0  ;;  %v1011_v13 = vadd.f32 %v1747_v55, %v988_v1  ;;  %v986_v15 = vmul.f32 %v1740_v47, %v878_v42  ;;  %v889_v16 = vadd.f32 %v1338_v62, %v1742_v52  ;;  %v912_v18 = vpop.f32.mrf.mxu1 }
 0x133   :  { %1080 = vst [vmem:[%s1896_s5 + $0x58] sm:$0xff] %v1064_v3  ;;  %v1062_v10 = vmax.f32 %v1046_v4, 0.0  ;;  %v1019_v17 = vadd.f32 %v1747_v55, %v996_v6  ;;  %v994_v20 = vmul.f32 %v1740_v47, %v910_v9  ;;  %v921_v22 = vadd.f32 %v1346_v2, %v1768_v23 }
 0x134   :  { %1070 = vst [vmem:[%s1896_s5 + $0x8] sm:$0xff] %v1054_v36  ;;  %v1043_v52 = vadd.f32 %v1027_v5, %v1011_v13  ;;  %v1009_v21 = vadd.f32 %v1747_v55, %v986_v15  ;;  %v989_v26 = vmul.f32 %v1740_v47, %v889_v16  ;;  %v881_v25 = vadd.f32 %v880_v12, %v1733_v38  ;;  %v1036_v38 = vld [vmem:[%s1895_s4 + $0x78] sm:$0xff] }
 0x135   :  { %1078 = vst [vmem:[%s1896_s5 + $0x48] sm:$0xff] %v1062_v10  ;;  %v1051_v23 = vadd.f32 %v1035_v14, %v1019_v17  ;;  %v1017_v27 = vadd.f32 %v1747_v55, %v994_v20  ;;  %v997_v30 = vmul.f32 %v1740_v47, %v921_v22  ;;  %v913_v29 = vadd.f32 %v912_v18, %v1756_v11 }
 0x136   :  { %v1059_v31 = vmax.f32 %v1043_v52, 0.0  ;;  %v1041_v34 = vadd.f32 %v1025_v19, %v1009_v21  ;;  %v1012_v33 = vadd.f32 %v1747_v55, %v989_v26  ;;  %v987_v35 = vmul.f32 %v1740_v47, %v881_v25 }
 0x137   :  { %v1067_v37 = vmax.f32 %v1051_v23, 0.0  ;;  %v1049_v39 = vadd.f32 %v1033_v24, %v1017_v27  ;;  %v1020_v40 = vadd.f32 %v1747_v55, %v997_v30  ;;  %v995_v11 = vmul.f32 %v1740_v47, %v913_v29 }
 0x138   :  { %1075 = vst [vmem:[%s1896_s5 + $0x30] sm:$0xff] %v1059_v31  ;;  %v1057_v32 = vmax.f32 %v1041_v34, 0.0  ;;  %v1044_v43 = vadd.f32 %v1028_v28, %v1012_v33  ;;  %v1010_v56 = vadd.f32 %v1747_v55, %v987_v35 }
 0x139   :  { %1083 = vst [vmem:[%s1896_s5 + $0x70] sm:$0xff] %v1067_v37  ;;  %v1065_v58 = vmax.f32 %v1049_v39, 0.0  ;;  %v1052_v59 = vadd.f32 %v1036_v38, %v1020_v40  ;;  %v1018_v47 = vadd.f32 %v1747_v55, %v995_v11 }
 0x13a   :  { %1073 = vst [vmem:[%s1896_s5 + $0x20] sm:$0xff] %v1057_v32  ;;  %v1060_v7 = vmax.f32 %v1044_v43, 0.0  ;;  %v1042_v8 = vadd.f32 %v1026_v41, %v1010_v56 }
 0x13b   :  { %1081 = vst [vmem:[%s1896_s5 + $0x60] sm:$0xff] %v1065_v58  ;;  %v1068_v44 = vmax.f32 %v1052_v59, 0.0  ;;  %v1050_v45 = vadd.f32 %v1034_v57, %v1018_v47 }
 0x13c   :  { %1076 = vst [vmem:[%s1896_s5 + $0x38] sm:$0xff] %v1060_v7  ;;  %v1058_v46 = vmax.f32 %v1042_v8, 0.0 }
 0x13d   :  { %1084 = vst [vmem:[%s1896_s5 + $0x78] sm:$0xff] %v1068_v44  ;;  %v1066_v55 = vmax.f32 %v1050_v45, 0.0 }
 0x13e   :  { %1074 = vst [vmem:[%s1896_s5 + $0x28] sm:$0xff] %v1058_v46 }
 0x13f   :  { %1082 = vst [vmem:[%s1896_s5 + $0x68] sm:$0xff] %v1066_v55 }

// kernel: multitask_resnet_forward.26
= control target key start
LH: loop header
LB: loop body
LE: loop exit
PB: predicated region body
PF: predicated region fallthrough
CT: control target
= control target key end

     0   :  { %s995_s1 = inlined_call_operand.vmem [shape: bf16[640,128], index: 1, kind: input, shape index: {}]   ;;  %s996_s0 = inlined_call_operand.vmem [shape: bf16[32,640], index: 0, kind: input, shape index: {}]   ;;  %s997_s2 = inlined_call_operand.vmem [shape: f32[1,128], index: 2, kind: input, shape index: {}]   ;;  %s998_s3 = inlined_call_operand.vmem [shape: f32[1,128], index: 3, kind: input, shape index: {}]   ;;  %s999_s4 = inlined_call_operand.vmem [shape: f32[32,128], index: 4, kind: output, shape index: {}]  }
   0x1   :  { %v748_v0 = vld [vmem:[%s995_s1 + $0x78] sm:$0xff]   ;;  %v752_v4 = vld [vmem:[%s995_s1 + $0x70] sm:$0xff]   ;;  %v756_v8 = vld [vmem:[%s995_s1 + $0x68] sm:$0xff]  }
   0x2   :  { %v749_v1 = vld [vmem:[%s995_s1 + $0xf8] sm:$0xff]   ;;  %662 = vmatprep.subr.bf16.mxu0 %v748_v0  ;;  %v753_v5 = vld [vmem:[%s995_s1 + $0xf0] sm:$0xff]   ;;  %v757_v9 = vld [vmem:[%s995_s1 + $0xe8] sm:$0xff]  }
   0x3   :  { %v750_v2 = vld [vmem:[%s995_s1 + $0x38] sm:$0xff]   ;;  %690 = vmatprep.subr.bf16.mxu1 %v749_v1  ;;  %v754_v6 = vld [vmem:[%s995_s1 + $0x30] sm:$0xff]   ;;  %v758_v10 = vld [vmem:[%s995_s1 + $0x28] sm:$0xff]  }
   0x4   :  { %v751_v3 = vld [vmem:[%s995_s1 + $0xb8] sm:$0xff]   ;;  %663 = vmatpush3.bf16.msra.mxu0 %v750_v2  ;;  %v755_v7 = vld [vmem:[%s995_s1 + $0xb0] sm:$0xff]   ;;  %v759_v11 = vld [vmem:[%s995_s1 + $0xa8] sm:$0xff]  }
   0x5   :  { %691 = vmatpush3.bf16.msra.mxu1 %v751_v3  ;;  %664 = vmatprep.subr.bf16.mxu0 %v752_v4  ;;  %v760_v12 = vld [vmem:[%s995_s1 + $0x60] sm:$0xff]   ;;  %v764_v16 = vld [vmem:[%s995_s1 + $0x58] sm:$0xff]   ;;  %v768_v20 = vld [vmem:[%s995_s1 + $0x50] sm:$0xff]  }
   0x6   :  { %692 = vmatprep.subr.bf16.mxu1 %v753_v5  ;;  %v761_v13 = vld [vmem:[%s995_s1 + $0xe0] sm:$0xff]   ;;  %v765_v17 = vld [vmem:[%s995_s1 + $0xd8] sm:$0xff]   ;;  %v769_v21 = vld [vmem:[%s995_s1 + $0xd0] sm:$0xff]  }
   0x7   :  { %v762_v14 = vld [vmem:[%s995_s1 + $0x20] sm:$0xff]   ;;  %v766_v18 = vld [vmem:[%s995_s1 + $0x18] sm:$0xff]   ;;  %v770_v22 = vld [vmem:[%s995_s1 + $0x10] sm:$0xff]  }
   0x8   :  { %665 = vmatpush3.bf16.msra.mxu0 %v754_v6  ;;  %v763_v15 = vld [vmem:[%s995_s1 + $0xa0] sm:$0xff]   ;;  %v767_v19 = vld [vmem:[%s995_s1 + $0x98] sm:$0xff]   ;;  %v771_v23 = vld [vmem:[%s995_s1 + $0x90] sm:$0xff]  }
   0x9   :  { %693 = vmatpush3.bf16.msra.mxu1 %v755_v7  ;;  %666 = vmatprep.subr.bf16.mxu0 %v756_v8  ;;  %v772_v24 = vld [vmem:[%s995_s1 + $0x48] sm:$0xff]   ;;  %v776_v28 = vld [vmem:[%s995_s1 + $0x40] sm:$0xff]   ;;  %v786_v36 = vld [vmem:[%s995_s1 + $0x138] sm:$0xff]  }
   0xa   :  { %694 = vmatprep.subr.bf16.mxu1 %v757_v9  ;;  %v773_v25 = vld [vmem:[%s995_s1 + $0xc8] sm:$0xff]   ;;  %v777_v29 = vld [vmem:[%s995_s1 + $0xc0] sm:$0xff]   ;;  %v787_v37 = vld [vmem:[%s995_s1 + $0x130] sm:$0xff]  }
   0xb   :  { %v774_v26 = vld [vmem:[%s995_s1 + $0x8] sm:$0xff]   ;;  %v778_v30 = vld [vmem:[%s995_s1] sm:$0xff]   ;;  %v790_v45 = vld [vmem:[%s995_s1 + $0x118] sm:$0xff]  }
   0xc   :  { %667 = vmatpush3.bf16.msra.mxu0 %v758_v10  ;;  %v775_v27 = vld [vmem:[%s995_s1 + $0x88] sm:$0xff]   ;;  %v779_v31 = vld [vmem:[%s995_s1 + $0x80] sm:$0xff]   ;;  %v797_v46 = vld [vmem:[%s995_s1 + $0x110] sm:$0xff]  }
   0xd   :  { %695 = vmatpush3.bf16.msra.mxu1 %v759_v11  ;;  %668 = vmatprep.subr.bf16.mxu0 %v760_v12  ;;  %v780_v32 = vld [vmem:[%s996_s0] ss:$20 sps:$4 sm:$0xff]   ;;  %v782_v33 = vld [vmem:[%s996_s0 + $0x4] ss:$20 sps:$4 sm:$0xff]   ;;  %v783_v34 = vld [vmem:[%s996_s0 + $0x8] ss:$20 sps:$4 sm:$0xff]  }
   0xe   :  { %696 = vmatprep.subr.bf16.mxu1 %v761_v13  ;;  %v785_v35 = vld [vmem:[%s996_s0 + $0xc] ss:$20 sps:$4 sm:$0xff]   ;;  %446 = vmatprep.mubr.bf16.mxu0 %v782_v33  ;;  %v793_v40 = vld [vmem:[%s996_s0 + $0x34] ss:$20 sps:$4 sm:$0xff]   ;;  %v796_v42 = vld [vmem:[%s996_s0 + $0x30] ss:$20 sps:$4 sm:$0xff]  }
   0xf   :  { %495 = vmatprep.mubr.bf16.mxu1 %v785_v35  ;;  %v788_v38 = vld [vmem:[%s995_s1 + $0x128] sm:$0xff]   ;;  %v789_v43 = vld [vmem:[%s995_s1 + $0x120] sm:$0xff]  }
  0x10   :  { %669 = vmatpush3.bf16.msra.mxu0 %v762_v14  ;;  %v791_v39 = vld [vmem:[%s996_s0 + $0x2c] ss:$20 sps:$4 sm:$0xff]   ;;  %v795_v41 = vld [vmem:[%s996_s0 + $0x28] ss:$20 sps:$4 sm:$0xff]   ;;  %v800_v44 = vld [vmem:[%s996_s0 + $0x10] ss:$20 sps:$4 sm:$0xff]  }
  0x11   :  { %697 = vmatpush3.bf16.msra.mxu1 %v763_v15  ;;  %670 = vmatprep.subr.bf16.mxu0 %v764_v16  ;;  %v798_v47 = vld [vmem:[%s995_s1 + $0x108] sm:$0xff]   ;;  %v799_v48 = vld [vmem:[%s995_s1 + $0x100] sm:$0xff]  }
  0x12   :  { %698 = vmatprep.subr.bf16.mxu1 %v765_v17  ;;  %v801_v49 = vld [vmem:[%s996_s0 + $0x38] ss:$20 sps:$4 sm:$0xff]   ;;  %v660_v10 = vld [vmem:[%s997_s2] ss:$0 sm:$0xff] }
  0x13   :  { %v661_v15 = vld [vmem:[%s998_s3] ss:$0 sm:$0xff] }
  0x14   :  { %671 = vmatpush3.bf16.msra.mxu0 %v766_v18 }
  0x15   :  { %699 = vmatpush3.bf16.msra.mxu1 %v767_v19  ;;  %672 = vmatprep.subr.bf16.mxu0 %v768_v20 }
  0x16   :  { %700 = vmatprep.subr.bf16.mxu1 %v769_v21 }
  0x18   :  { %673 = vmatpush3.bf16.msra.mxu0 %v770_v22 }
  0x19   :  { %701 = vmatpush3.bf16.msra.mxu1 %v771_v23  ;;  %674 = vmatprep.subr.bf16.mxu0 %v772_v24 }
  0x1a   :  { %702 = vmatprep.subr.bf16.mxu1 %v773_v25 }
  0x1c   :  { %675 = vmatpush3.bf16.msra.mxu0 %v774_v26 }
  0x1d   :  { %703 = vmatpush3.bf16.msra.mxu1 %v775_v27  ;;  %676 = vmatprep.subr.bf16.mxu0 %v776_v28 }
  0x1e   :  { %704 = vmatprep.subr.bf16.mxu1 %v777_v29 }
  0x20   :  { %677 = vmatpush3.bf16.msra.mxu0 %v778_v30 }
  0x21   :  { %705 = vmatpush3.bf16.msra.mxu1 %v779_v31  ;;  %728 = vmatprep.subr.bf16.mxu0 %v786_v36 }
  0x23   :  { %447 = vmatmul.mubr.bf16.vlgmr.msra.gmra.mxu0 %v780_v32 }
  0x24   :  { %496 = vmatmul.mubr.bf16.vlgmr.msra.gmra.mxu1 %v783_v34  ;;  %729 = vmatpush3.bf16.msra.mxu0 %v786_v36 }
  0x25   :  { %730 = vmatprep.subr.bf16.mxu0 %v787_v37  ;;  %454 = vmatprep.mubr.bf16.mxu0 %v791_v39 }
  0x26   :  { %503 = vmatprep.mubr.bf16.mxu1 %v793_v40 }
  0x28   :  { %731 = vmatpush3.bf16.msra.mxu0 %v787_v37 }
  0x29   :  { %732 = vmatprep.subr.bf16.mxu0 %v788_v38 }
  0x2b   :  { %455 = vmatmul.mubr.bf16.gmra.mxu0 %v795_v41 }
  0x2c   :  { %504 = vmatmul.mubr.bf16.gmra.mxu1 %v796_v42  ;;  %733 = vmatpush3.bf16.msra.mxu0 %v788_v38 }
  0x2d   :  { %734 = vmatprep.subr.bf16.mxu0 %v789_v43  ;;  %744 = vmatprep.mubr.bf16.mxu0 %v800_v44 }
  0x30   :  { %735 = vmatpush3.bf16.msra.mxu0 %v789_v43 }
  0x31   :  { %736 = vmatprep.subr.bf16.mxu0 %v790_v45 }
  0x34   :  { %737 = vmatpush3.bf16.msra.mxu0 %v790_v45 }
  0x35   :  { %738 = vmatprep.subr.bf16.mxu0 %v797_v46 }
  0x38   :  { %739 = vmatpush3.bf16.msra.mxu0 %v797_v46 }
  0x39   :  { %740 = vmatprep.subr.bf16.mxu0 %v798_v47 }
  0x3c   :  { %741 = vmatpush3.bf16.msra.mxu0 %v798_v47 }
  0x3d   :  { %742 = vmatprep.subr.bf16.mxu0 %v799_v48 }
  0x40   :  { %743 = vmatpush3.bf16.msra.mxu0 %v799_v48 }
  0x43   :  { %745 = vmatmul.mubr.bf16.vlgmr.msra.gmra.mxu0 %v801_v49 }
  0xe3   :  { %v678_v50 = vpop.f32.mrf.mxu0 }
  0xe4   :  { %v706_v51 = vpop.f32.mrf.mxu1 }
  0xe5   :  { %v679_v52 = vpop.f32.mrf.mxu0 }
  0xe6   :  { %v707_v53 = vpop.f32.mrf.mxu1  ;;  %v680_v4 = vadd.f32 %v679_v52, %v678_v50 }
  0xe7   :  { %v681_v54 = vpop.f32.mrf.mxu0  ;;  %v708_v5 = vadd.f32 %v707_v53, %v706_v51 }
  0xe8   :  { %v709_v55 = vpop.f32.mrf.mxu1 }
  0xe9   :  { %v682_v56 = vpop.f32.mrf.mxu0  ;;  %v498_v14 = vadd.f32 %v708_v5, %v680_v4 }
  0xea   :  { %v710_v57 = vpop.f32.mrf.mxu1  ;;  %v683_v11 = vadd.f32 %v682_v56, %v681_v54 }
  0xeb   :  { %v684_v58 = vpop.f32.mrf.mxu0  ;;  %v711_v12 = vadd.f32 %v710_v57, %v709_v55 }
  0xec   :  { %v712_v59 = vpop.f32.mrf.mxu1 }
  0xed   :  { %v685_v60 = vpop.f32.mrf.mxu0  ;;  %v501_v24 = vadd.f32 %v711_v12, %v683_v11 }
  0xee   :  { %v713_v61 = vpop.f32.mrf.mxu1  ;;  %v686_v0 = vadd.f32 %v685_v60, %v684_v58 }
  0xef   :  { %v687_v62 = vpop.f32.mrf.mxu0  ;;  %v714_v1 = vadd.f32 %v713_v61, %v712_v59 }
  0xf0   :  { %v715_v63 = vpop.f32.mrf.mxu1 }
  0xf1   :  { %v688_v2 = vpop.f32.mrf.mxu0  ;;  %v506_v8 = vadd.f32 %v714_v1, %v686_v0 }
  0xf2   :  { %v716_v3 = vpop.f32.mrf.mxu1  ;;  %v689_v6 = vadd.f32 %v688_v2, %v687_v62 }
  0xf3   :  { %v717_v7 = vadd.f32 %v716_v3, %v715_v63 }
  0xf5   :  { %v509_v19 = vadd.f32 %v717_v7, %v689_v6 }
 0x103   :  { %v746_v9 = vpop.f32.mrf.mxu0 }
 0x104   :  { %v555_v13 = vadd.f32 %v746_v9, %v506_v8 }
 0x105   :  { %v546_v16 = vpop.f32.mrf.mxu0 }
 0x106   :  { %v585_v17 = vmul.f32 %v660_v10, %v555_v13  ;;  %v547_v18 = vadd.f32 %v546_v16, %v498_v14 }
 0x107   :  { %v747_v20 = vpop.f32.mrf.mxu0 }
 0x108   :  { %v596_v21 = vadd.f32 %v661_v15, %v585_v17  ;;  %v583_v22 = vmul.f32 %v660_v10, %v547_v18  ;;  %v558_v23 = vadd.f32 %v747_v20, %v509_v19 }
 0x109   :  { %v549_v25 = vpop.f32.mrf.mxu0 }
 0x10a   :  { %v600_v26 = vmax.f32 %v596_v21, 0.0  ;;  %v594_v27 = vadd.f32 %v661_v15, %v583_v22  ;;  %v586_v28 = vmul.f32 %v660_v10, %v558_v23  ;;  %v550_v29 = vadd.f32 %v549_v25, %v501_v24 }
 0x10c   :  { %604 = vst [vmem:[%s999_s4 + $0x10] sm:$0xff] %v600_v26  ;;  %v598_v30 = vmax.f32 %v594_v27, 0.0  ;;  %v597_v31 = vadd.f32 %v661_v15, %v586_v28  ;;  %v584_v32 = vmul.f32 %v660_v10, %v550_v29 }
 0x10e   :  { %602 = vst [vmem:[%s999_s4] sm:$0xff] %v598_v30  ;;  %v601_v33 = vmax.f32 %v597_v31, 0.0  ;;  %v595_v34 = vadd.f32 %v661_v15, %v584_v32 }
 0x110   :  { %605 = vst [vmem:[%s999_s4 + $0x18] sm:$0xff] %v601_v33  ;;  %v599_v35 = vmax.f32 %v595_v34, 0.0 }
 0x112   :  { %603 = vst [vmem:[%s999_s4 + $0x8] sm:$0xff] %v599_v35 }

// kernel: multitask_resnet_forward.27
= control target key start
LH: loop header
LB: loop body
LE: loop exit
PB: predicated region body
PF: predicated region fallthrough
CT: control target
= control target key end

     0   :  { %s329_s1 = inlined_call_operand.vmem [shape: bf16[128,128], index: 1, kind: input, shape index: {}]   ;;  %s330_s0 = inlined_call_operand.vmem [shape: bf16[32,128], index: 0, kind: input, shape index: {}]   ;;  %s331_s2 = inlined_call_operand.vmem [shape: f32[1,128], index: 2, kind: input, shape index: {}]   ;;  %s332_s3 = inlined_call_operand.vmem [shape: f32[1,128], index: 3, kind: input, shape index: {}]   ;;  %s333_s4 = inlined_call_operand.vmem [shape: f32[32,128], index: 4, kind: output, shape index: {}]  }
   0x1   :  { %v246_v0 = vld [vmem:[%s329_s1 + $0x38] sm:$0xff]   ;;  %v247_v1 = vld [vmem:[%s329_s1 + $0x30] sm:$0xff]   ;;  %v248_v2 = vld [vmem:[%s329_s1 + $0x28] sm:$0xff]  }
   0x2   :  { %226 = vmatprep.subr.bf16.mxu0 %v246_v0  ;;  %v249_v3 = vld [vmem:[%s329_s1 + $0x20] sm:$0xff]   ;;  %v250_v5 = vld [vmem:[%s329_s1 + $0x18] sm:$0xff]   ;;  %v251_v6 = vld [vmem:[%s329_s1 + $0x10] sm:$0xff]  }
   0x3   :  { %227 = vmatpush3.bf16.msra.mxu0 %v246_v0  ;;  %v254_v4 = vld [vmem:[%s330_s0] sm:$0xff]   ;;  %v252_v7 = vld [vmem:[%s329_s1 + $0x8] sm:$0xff]  }
   0x4   :  { %228 = vmatprep.subr.bf16.mxu0 %v247_v1  ;;  %242 = vmatprep.mubr.bf16.mxu0 %v254_v4  ;;  %v253_v8 = vld [vmem:[%s329_s1] sm:$0xff]   ;;  %v255_v9 = vld [vmem:[%s330_s0 + $0x8] sm:$0xff]  }
   0x5   :  { %v214_v10 = vld [vmem:[%s331_s2] ss:$0 sm:$0xff] }
   0x6   :  { %v215_v12 = vld [vmem:[%s332_s3] ss:$0 sm:$0xff] }
   0x7   :  { %229 = vmatpush3.bf16.msra.mxu0 %v247_v1 }
   0x8   :  { %230 = vmatprep.subr.bf16.mxu0 %v248_v2 }
   0xb   :  { %231 = vmatpush3.bf16.msra.mxu0 %v248_v2 }
   0xc   :  { %232 = vmatprep.subr.bf16.mxu0 %v249_v3 }
   0xf   :  { %233 = vmatpush3.bf16.msra.mxu0 %v249_v3 }
  0x10   :  { %234 = vmatprep.subr.bf16.mxu0 %v250_v5 }
  0x13   :  { %235 = vmatpush3.bf16.msra.mxu0 %v250_v5 }
  0x14   :  { %236 = vmatprep.subr.bf16.mxu0 %v251_v6 }
  0x17   :  { %237 = vmatpush3.bf16.msra.mxu0 %v251_v6 }
  0x18   :  { %238 = vmatprep.subr.bf16.mxu0 %v252_v7 }
  0x1b   :  { %239 = vmatpush3.bf16.msra.mxu0 %v252_v7 }
  0x1c   :  { %240 = vmatprep.subr.bf16.mxu0 %v253_v8 }
  0x1f   :  { %241 = vmatpush3.bf16.msra.mxu0 %v253_v8 }
  0x22   :  { %243 = vmatmul.mubr.bf16.vlgmr.msra.gmra.mxu0 %v255_v9 }
  0xe2   :  { %v244_v11 = vpop.f32.mrf.mxu0 }
  0xe3   :  { %v183_v13 = vmul.f32 %v244_v11, %v214_v10 }
  0xe4   :  { %v144_v14 = vpop.f32.mrf.mxu0 }
  0xe5   :  { %v194_v15 = vadd.f32 %v215_v12, %v183_v13  ;;  %v181_v16 = vmul.f32 %v214_v10, %v144_v14 }
  0xe6   :  { %v245_v17 = vpop.f32.mrf.mxu0 }
  0xe7   :  { %198 = vst [vmem:[%s333_s4 + $0x10] sm:$0xff] %v194_v15  ;;  %v192_v18 = vadd.f32 %v215_v12, %v181_v16  ;;  %v184_v19 = vmul.f32 %v245_v17, %v214_v10 }
  0xe8   :  { %v147_v20 = vpop.f32.mrf.mxu0 }
  0xe9   :  { %196 = vst [vmem:[%s333_s4] sm:$0xff] %v192_v18  ;;  %v195_v21 = vadd.f32 %v215_v12, %v184_v19  ;;  %v182_v22 = vmul.f32 %v214_v10, %v147_v20 }
  0xeb   :  { %199 = vst [vmem:[%s333_s4 + $0x18] sm:$0xff] %v195_v21  ;;  %v193_v23 = vadd.f32 %v215_v12, %v182_v22 }
  0xed   :  { %197 = vst [vmem:[%s333_s4 + $0x8] sm:$0xff] %v193_v23 }

// kernel: multitask_resnet_forward.28
= control target key start
LH: loop header
LB: loop body
LE: loop exit
PB: predicated region body
PF: predicated region fallthrough
CT: control target
= control target key end

     0   :  { %s1200_s18 = smov 0   ;;  %s1202_s19 = smov 0   ;;  %s1331_s0 = inlined_call_operand.vmem [shape: bf16[32,1152], index: 0, kind: input, shape index: {}]   ;;  %s1332_s1 = inlined_call_operand.vmem [shape: bf16[1152,128], index: 1, kind: input, shape index: {}]   ;;  %s1333_s2 = inlined_call_operand.vmem [shape: f32[1,128], index: 2, kind: input, shape index: {}]   ;;  %s1334_s3 = inlined_call_operand.vmem [shape: f32[1,128], index: 3, kind: input, shape index: {}]   ;;  %s1335_s4 = inlined_call_operand.vmem [shape: f32[32,128], index: 4, kind: input, shape index: {}]   ;;  %s1336_s5 = inlined_call_operand.vmem [shape: f32[32,128], index: 5, kind: output, shape index: {}]  }
   0x1   :  { %s1204_s20 = smov 0   ;;  %s1206_s21 = smov 0  }
   0x2   :  { %s1208_s22 = smov 0  }
   0x3 LB: > { %s27_s23 = sadd.s32 1, %s1163_s21  ;;  %p50_p1 = scmp.ne.s32.totalorder %s1155_s19, %s1151_s18  ;;  %s1167_s22 = sphi %s1208_s22, %s15_s22   ;;  %s1163_s21 = sphi %s1206_s21, %s1340_s21   ;;  %s1159_s20 = sphi %s1204_s20, %s1339_s20   ;;  %s1155_s19 = sphi %s1202_s19, %s1338_s19   ;;  %s1151_s18 = sphi %s1200_s18, %s1337_s18  }
   0x4   : > { %p28_p0 = scmp.ge.s32.totalorder %s27_s23, 3  ;;  %p51_p2 = scmp.eq.s32.totalorder %s1167_s22, 0 }
   0x5   : > { %s43_s25 = sadd.s32 1, %s1155_s19  ;;  %p945_p5 = scmp.ge.s32.totalorder %s1167_s22, 3 }
   0x6   : > { %s1342_s23 = smov (%p28_p0, %s27_s23), 0  ;;  %p52_p3 = por %p51_p2, %p50_p1 }
   0x7   : > { %s39_s24 = ssub.s32 %s1163_s21, %s1342_s23  ;;  %236 = sbr.rel (%p945_p5) target bundleno = 21 (0x15), region = 28 }
   0x8   : > { %p41_p4 = scmp.eq.s32.totalorder %s39_s24, 0 }
   0xa   : > { %s1235_s26 = scalar_select %p41_p4, %s1155_s19, %s43_s25  }
   0xc   : > { %239 = sbr.rel (!%p52_p3) target bundleno = 21 (0x15), region = 32  ;;  %s241_s27 = sand.u32 (%p52_p3), 1, %s1155_s19  }
   0xd   : > { %s995_s28 = smul.u32 (%p52_p3), 12, %s1163_s21 }
   0xe   : > { %s1054_s29 = smul.u32 (%p52_p3), 48, %s241_s27 }
   0xf   : > { %s249_s7 = scalar_lea.vmem (%p52_p3), %s1331_s0, %s995_s28 }
  0x10   : > { %v264_v0 = vld [vmem:[%s249_s7] sm:$0xff] (%p52_p3)  ;;  %v268_v2 = vld [vmem:[%s249_s7 + $0x48] sm:$0xff] (%p52_p3)  ;;  %s243_s8 = scalar_lea.vmem (%p52_p3), [#allocation3], %s1054_s29  ;;  %v951_v6 = vld [vmem:[%s249_s7 + $0x50] sm:$0xf] (%p52_p3) }
  0x11   : > { %v266_v1 = vld [vmem:[%s249_s7 + $0x24] sm:$0xff]  ;;  %265 = vst [vmem:[%s243_s8] sm:$0xff] %v264_v0  ;;  %269 = vst [vmem:[%s243_s8 + $0x18] sm:$0xff] %v268_v2  ;;  %v270_v3 = vld [vmem:[%s249_s7 + $0x6c] sm:$0xff] }
  0x12   : > { %267 = vst [vmem:[%s243_s8 + $0xc] sm:$0xff] %v266_v1  ;;  %v947_v4 = vld [vmem:[%s249_s7 + $0x8] sm:$0xf]  ;;  %v949_v5 = vld [vmem:[%s249_s7 + $0x2c] sm:$0xf]  ;;  %271 = vst [vmem:[%s243_s8 + $0x24] sm:$0xff] %v270_v3 }
  0x13   : > { %948 = vst [vmem:[%s243_s8 + $0x8] sm:$0xf] %v947_v4  ;;  %950 = vst [vmem:[%s243_s8 + $0x14] sm:$0xf] %v949_v5  ;;  %v953_v7 = vld [vmem:[%s249_s7 + $0x74] sm:$0xf] }
  0x14   : > { %952 = vst [vmem:[%s243_s8 + $0x20] sm:$0xf] %v951_v6  ;;  %954 = vst [vmem:[%s243_s8 + $0x2c] sm:$0xf] %v953_v7 }
  0x15 PF: > { %p955_p6 = scmp.ge.s32.totalorder %s1167_s22, 1  ;;  %p304_p7 = scmp.lt.s32.totalorder %s1167_s22, 4 }
  0x17   : > { %p305_p8 = pnand %p955_p6, %p304_p7 }
  0x18   : > { %s311_s9 = sand.u32 (!%p305_p8), 1, %s1151_s18   ;;  %s365_s10 = smul.u32 (!%p305_p8), 48, %s1159_s20 }
  0x19   : > { %308 = sbr.rel (%p305_p8) target bundleno = 301 (0x12d), region = 62  ;;  %p957_p10 = scmp.ne.s32.totalorder (!%p305_p8), %s1159_s20, 0 }
  0x1a   : > { %s1055_s11 = smul.u32 (!%p305_p8), 48, %s311_s9  ;;  %p366_p9 = scmp.lt.s32.totalorder (!%p305_p8), %s365_s10, 143 }
  0x1c   : > { %s1252_s16 = scalar_lea.vmem (!%p305_p8), [#allocation3], %s1055_s11 }
  0x1e   : > { %s1344_s10 = smov (!%p366_p9, %s365_s10), 143  ;;  %402 = sbr.rel (%p957_p10) target bundleno = 38 (0x26), region = 70 }
  0x1f   : > { %s956_s12 = sshll.u32 %s1344_s10, 2 }
  0x20   : > { %s1250_s15 = scalar_lea.vmem %s1332_s1, %s956_s12 }
  0x23   : > { %v1169_v8 = vmov 0.0  }
  0x24   : > { %403 = vst [vmem:[#allocation2 + $0x10] sm:$0xff] %v1169_v8  ;;  %404 = vst [vmem:[#allocation2] sm:$0xff] %v1169_v8 }
  0x25   : > { %405 = vst [vmem:[#allocation2 + $0x18] sm:$0xff] %v1169_v8  ;;  %406 = vst [vmem:[#allocation2 + $0x8] sm:$0xff] %v1169_v8 }
  0x26 PF: > { %v1097_v9 = vld [vmem:[%s1250_s15 + $0x78] sm:$0xff]   ;;  %v1100_v12 = vld [vmem:[%s1250_s15 + $0x70] sm:$0xff]   ;;  %v1103_v15 = vld [vmem:[%s1250_s15 + $0x68] sm:$0xff]   ;;  %p988_p11 = scmp.ne.s32.totalorder %s1159_s20, 2 }
  0x27   : > { %v1098_v10 = vld [vmem:[%s1250_s15 + $0x38] sm:$0xff]   ;;  %996 = vmatprep.subr.bf16.mxu0 %v1097_v9  ;;  %v1101_v13 = vld [vmem:[%s1250_s15 + $0x30] sm:$0xff]   ;;  %v1104_v16 = vld [vmem:[%s1250_s15 + $0x28] sm:$0xff]  }
  0x28   : > { %v1099_v11 = vld [vmem:[%s1250_s15 + $0xb8] sm:$0xff]   ;;  %997 = vmatpush3.bf16.msra.mxu0 %v1098_v10  ;;  %v1102_v14 = vld [vmem:[%s1250_s15 + $0xb0] sm:$0xff]   ;;  %v1105_v17 = vld [vmem:[%s1250_s15 + $0xa8] sm:$0xff]  }
  0x29   : > { %1034 = vmatprep.subr.bf16.mxu1 %v1099_v11  ;;  %998 = vmatprep.subr.bf16.mxu0 %v1100_v12  ;;  %v1106_v18 = vld [vmem:[%s1250_s15 + $0x60] sm:$0xff]   ;;  %v1109_v21 = vld [vmem:[%s1250_s15 + $0x58] sm:$0xff]   ;;  %v1112_v24 = vld [vmem:[%s1250_s15 + $0x50] sm:$0xff]  }
  0x2a   : > { %1035 = vmatpush3.bf16.msra.mxu1 %v1099_v11  ;;  %v1107_v19 = vld [vmem:[%s1250_s15 + $0x20] sm:$0xff]   ;;  %v1111_v22 = vld [vmem:[%s1250_s15 + $0x98] sm:$0xff]   ;;  %v1114_v25 = vld [vmem:[%s1250_s15 + $0x90] sm:$0xff]  }
  0x2b   : > { %1036 = vmatprep.subr.bf16.mxu1 %v1102_v14  ;;  %v1108_v20 = vld [vmem:[%s1250_s15 + $0xa0] sm:$0xff]   ;;  %v1110_v23 = vld [vmem:[%s1250_s15 + $0x18] sm:$0xff]   ;;  %v1113_v26 = vld [vmem:[%s1250_s15 + $0x10] sm:$0xff]  }
  0x2c   : > { %999 = vmatpush3.bf16.msra.mxu0 %v1101_v13  ;;  %v1115_v27 = vld [vmem:[%s1250_s15 + $0x48] sm:$0xff]   ;;  %v1118_v30 = vld [vmem:[%s1250_s15 + $0x40] sm:$0xff]   ;;  %v407_v44 = vld [vmem:[#allocation2 + $0x10] sm:$0xff] }
  0x2d   : > { %1000 = vmatprep.subr.bf16.mxu0 %v1103_v15  ;;  %v1116_v28 = vld [vmem:[%s1250_s15 + $0x8] sm:$0xff]   ;;  %v1120_v31 = vld [vmem:[%s1250_s15 + $0x80] sm:$0xff]   ;;  %v409_v58 = vld [vmem:[#allocation2 + $0x18] sm:$0xff] }
  0x2e   : > { %1037 = vmatpush3.bf16.msra.mxu1 %v1102_v14  ;;  %v1117_v29 = vld [vmem:[%s1250_s15 + $0x88] sm:$0xff]   ;;  %v1123_v32 = vld [vmem:[%s1252_s16 + $0x4] ss:$12 sps:$4 sm:$0xff]  }
  0x2f   : > { %1038 = vmatprep.subr.bf16.mxu1 %v1105_v17  ;;  %v1124_v33 = vld [vmem:[%s1252_s16 + $0x8] ss:$12 sps:$4 sm:$0xff]   ;;  %675 = vmatprep.mubr.bf16.mxu0 %v1123_v32  ;;  %v1121_v35 = vld [vmem:[%s1252_s16] ss:$12 sps:$4 sm:$0xff]   ;;  %v1128_v38 = vld [vmem:[%s1252_s16 + $0x18] ss:$12 sps:$4 sm:$0xff]  }
  0x30   : > { %1001 = vmatpush3.bf16.msra.mxu0 %v1104_v16  ;;  %v1119_v34 = vld [vmem:[%s1250_s15] sm:$0xff]   ;;  %1050 = vmatprep.mubr.bf16.mxu1 %v1124_v33  ;;  %v1126_v36 = vld [vmem:[%s1252_s16 + $0x1c] ss:$12 sps:$4 sm:$0xff]  }
  0x31   : > { %1002 = vmatprep.subr.bf16.mxu0 %v1106_v18  ;;  %v1125_v37 = vld [vmem:[%s1252_s16 + $0x20] ss:$12 sps:$4 sm:$0xff]  }
  0x32   : > { %1039 = vmatpush3.bf16.msra.mxu1 %v1105_v17  ;;  %v408_v52 = vld [vmem:[#allocation2] sm:$0xff]  ;;  %v410_v0 = vld [vmem:[#allocation2 + $0x8] sm:$0xff] }
  0x33   : > { %1040 = vmatprep.subr.bf16.mxu1 %v1108_v20 }
  0x34   : > { %1003 = vmatpush3.bf16.msra.mxu0 %v1107_v19 }
  0x35   : > { %1004 = vmatprep.subr.bf16.mxu0 %v1109_v21 }
  0x36   : > { %1041 = vmatpush3.bf16.msra.mxu1 %v1108_v20 }
  0x37   : > { %1042 = vmatprep.subr.bf16.mxu1 %v1111_v22 }
  0x38   : > { %1005 = vmatpush3.bf16.msra.mxu0 %v1110_v23 }
  0x39   : > { %1006 = vmatprep.subr.bf16.mxu0 %v1112_v24 }
  0x3a   : > { %1043 = vmatpush3.bf16.msra.mxu1 %v1111_v22 }
  0x3b   : > { %1044 = vmatprep.subr.bf16.mxu1 %v1114_v25 }
  0x3c   : > { %1007 = vmatpush3.bf16.msra.mxu0 %v1113_v26 }
  0x3d   : > { %1008 = vmatprep.subr.bf16.mxu0 %v1115_v27 }
  0x3e   : > { %1045 = vmatpush3.bf16.msra.mxu1 %v1114_v25 }
  0x3f   : > { %1046 = vmatprep.subr.bf16.mxu1 %v1117_v29 }
  0x40   : > { %1009 = vmatpush3.bf16.msra.mxu0 %v1116_v28 }
  0x41   : > { %1010 = vmatprep.subr.bf16.mxu0 %v1118_v30 }
  0x42   : > { %1047 = vmatpush3.bf16.msra.mxu1 %v1117_v29 }
  0x43   : > { %1048 = vmatprep.subr.bf16.mxu1 %v1120_v31 }
  0x44   : > { %1011 = vmatpush3.bf16.msra.mxu0 %v1119_v34 }
  0x46   : > { %1049 = vmatpush3.bf16.msra.mxu1 %v1120_v31 }
  0x47   : > { %676 = vmatmul.mubr.bf16.vlgmr.msra.gmra.mxu0 %v1121_v35 }
  0x48   : > { %683 = vmatprep.mubr.bf16.mxu0 %v1126_v36 }
  0x49   : > { %1051 = vmatmul.mubr.bf16.vlgmr.msra.gmra.mxu1 %v1125_v37 }
  0x4f   : > { %684 = vmatmul.mubr.bf16.gmra.mxu0 %v1128_v38 }
 0x107   : > { %v1012_v39 = vpop.f32.mrf.mxu0 }
 0x109   : > { %v1013_v40 = vpop.f32.mrf.mxu0  ;;  %v1052_v41 = vpop.f32.mrf.mxu1 }
 0x10a   : > { %v1014_v42 = vadd.f32 %v1013_v40, %v1012_v39 }
 0x10b   : > { %v1015_v43 = vpop.f32.mrf.mxu0  ;;  %v726_v45 = vpop.f32.mrf.mxu1 }
 0x10c   : > { %v727_v46 = vadd.f32 %v1014_v42, %v726_v45 }
 0x10d   : > { %v1016_v47 = vpop.f32.mrf.mxu0  ;;  %v1053_v48 = vpop.f32.mrf.mxu1 }
 0x10e   : > { %v741_v49 = vadd.f32 %v727_v46, %v407_v44  ;;  %v1017_v50 = vadd.f32 %v1016_v47, %v1015_v43 }
 0x10f   : > { %v1018_v51 = vpop.f32.mrf.mxu0  ;;  %v729_v53 = vpop.f32.mrf.mxu1 }
 0x110   : > { %745 = vst [vmem:[#allocation2 + $0x10] sm:$0xff] %v741_v49  ;;  %v730_v54 = vadd.f32 %v1017_v50, %v729_v53 }
 0x111   : > { %v1019_v55 = vpop.f32.mrf.mxu0 }
 0x112   : > { %v742_v56 = vadd.f32 %v730_v54, %v408_v52  ;;  %v1020_v57 = vadd.f32 %v1019_v55, %v1018_v51 }
 0x113   : > { %v1021_v59 = vpop.f32.mrf.mxu0 }
 0x114   : > { %746 = vst [vmem:[#allocation2] sm:$0xff] %v742_v56  ;;  %v735_v60 = vadd.f32 %v1052_v41, %v1020_v57 }
 0x115   : > { %v1022_v61 = vpop.f32.mrf.mxu0 }
 0x116   : > { %v743_v62 = vadd.f32 %v735_v60, %v409_v58  ;;  %v1023_v63 = vadd.f32 %v1022_v61, %v1021_v59 }
 0x118   : > { %747 = vst [vmem:[#allocation2 + $0x18] sm:$0xff] %v743_v62  ;;  %v738_v1 = vadd.f32 %v1053_v48, %v1023_v63  ;;  %752 = sbr.rel (%p988_p11) target bundleno = 301 (0x12d), region = 74 }
 0x11a   : > { %v744_v2 = vadd.f32 %v738_v1, %v410_v0 }
 0x11c   : > { %748 = vst [vmem:[#allocation2 + $0x8] sm:$0xff] %v744_v2 }
 0x11d   : > { %v753_v3 = vld [vmem:[#allocation2 + $0x10] sm:$0xff]  ;;  %v989_v4 = vld [vmem:[%s1333_s2] ss:$0 sm:$0xff]  ;;  %v780_v13 = vld [vmem:[%s1335_s4 + $0x8] sm:$0xff] }
 0x11e   : > { %v990_v5 = vld [vmem:[%s1334_s3] ss:$0 sm:$0xff]  ;;  %v764_v6 = vmul.f32 %v989_v4, %v753_v3  ;;  %v781_v17 = vld [vmem:[%s1335_s4 + $0x10] sm:$0xff]  ;;  %v782_v18 = vld [vmem:[%s1335_s4 + $0x18] sm:$0xff] }
 0x11f   : > { %v754_v7 = vld [vmem:[#allocation2] sm:$0xff]  ;;  %v755_v10 = vld [vmem:[#allocation2 + $0x18] sm:$0xff] }
 0x120   : > { %v779_v8 = vld [vmem:[%s1335_s4] sm:$0xff]  ;;  %v765_v9 = vmul.f32 %v989_v4, %v754_v7  ;;  %v775_v12 = vadd.f32 %v990_v5, %v764_v6  ;;  %v766_v14 = vmul.f32 %v989_v4, %v755_v10 }
 0x122   : > { %v776_v16 = vadd.f32 %v990_v5, %v765_v9  ;;  %v783_v19 = vadd.f32 %v779_v8, %v775_v12  ;;  %v777_v20 = vadd.f32 %v990_v5, %v766_v14 }
 0x123   : > { %v756_v11 = vld [vmem:[#allocation2 + $0x8] sm:$0xff] }
 0x124   : > { %v767_v15 = vmul.f32 %v989_v4, %v756_v11  ;;  %v784_v22 = vadd.f32 %v780_v13, %v776_v16  ;;  %v787_v23 = vmax.f32 %v783_v19, 0.0  ;;  %v785_v24 = vadd.f32 %v781_v17, %v777_v20 }
 0x126   : > { %v778_v21 = vadd.f32 %v990_v5, %v767_v15  ;;  %v788_v26 = vmax.f32 %v784_v22, 0.0  ;;  %791 = vst [vmem:[%s1336_s5] sm:$0xff] %v787_v23  ;;  %v789_v27 = vmax.f32 %v785_v24, 0.0 }
 0x128   : > { %v786_v25 = vadd.f32 %v782_v18, %v778_v21  ;;  %792 = vst [vmem:[%s1336_s5 + $0x8] sm:$0xff] %v788_v26  ;;  %793 = vst [vmem:[%s1336_s5 + $0x10] sm:$0xff] %v789_v27 }
 0x12a   : > { %v790_v28 = vmax.f32 %v786_v25, 0.0 }
 0x12c   : > { %794 = vst [vmem:[%s1336_s5 + $0x18] sm:$0xff] %v790_v28 }
 0x12d PF: > { %s15_s22 = sadd.s32 1, %s1167_s22   ;;  %s1337_s18 = smov %s1155_s19 }
 0x12e   : > { %p12_p12 = scmp.ge.s32.totalorder %s15_s22, 5   ;;  %s1338_s19 = smov %s1235_s26 }
 0x12f   : > { %s1339_s20 = smov %s1163_s21  ;;  %s1340_s21 = smov %s1342_s23 }
 0x130   :  { %14 = sbr.rel (!%p12_p12) target bundleno = 3 (0x3), region = 127 }

// kernel: multitask_resnet_forward.29
= control target key start
LH: loop header
LB: loop body
LE: loop exit
PB: predicated region body
PF: predicated region fallthrough
CT: control target
= control target key end

     0   :  { %s1108_s15 = smov 0   ;;  %s1110_s16 = smov 0   ;;  %s1227_s0 = inlined_call_operand.vmem [shape: bf16[32,1152], index: 0, kind: input, shape index: {}]   ;;  %s1228_s1 = inlined_call_operand.vmem [shape: bf16[1152,128], index: 1, kind: input, shape index: {}]   ;;  %s1229_s2 = inlined_call_operand.vmem [shape: f32[1,128], index: 2, kind: input, shape index: {}]   ;;  %s1230_s3 = inlined_call_operand.vmem [shape: f32[1,128], index: 3, kind: input, shape index: {}]   ;;  %s1231_s4 = inlined_call_operand.vmem [shape: f32[32,128], index: 4, kind: output, shape index: {}]  }
   0x1   :  { %s1112_s17 = smov 0   ;;  %s1114_s18 = smov 0  }
   0x2   :  { %s1116_s19 = smov 0  }
   0x3 LB: > { %s26_s20 = sadd.s32 1, %s1076_s18  ;;  %p49_p1 = scmp.ne.s32.totalorder %s1068_s16, %s1064_s15  ;;  %s1080_s19 = sphi %s1116_s19, %s14_s19   ;;  %s1076_s18 = sphi %s1114_s18, %s1235_s18   ;;  %s1072_s17 = sphi %s1112_s17, %s1234_s17   ;;  %s1068_s16 = sphi %s1110_s16, %s1233_s16   ;;  %s1064_s15 = sphi %s1108_s15, %s1232_s15  }
   0x4   : > { %p27_p0 = scmp.ge.s32.totalorder %s26_s20, 3  ;;  %p50_p2 = scmp.eq.s32.totalorder %s1080_s19, 0 }
   0x5   : > { %s42_s22 = sadd.s32 1, %s1068_s16  ;;  %p858_p5 = scmp.ge.s32.totalorder %s1080_s19, 3 }
   0x6   : > { %s1237_s20 = smov (%p27_p0, %s26_s20), 0  ;;  %p51_p3 = por %p50_p2, %p49_p1 }
   0x7   : > { %s38_s21 = ssub.s32 %s1076_s18, %s1237_s20  ;;  %195 = sbr.rel (%p858_p5) target bundleno = 21 (0x15), region = 24 }
   0x8   : > { %p40_p4 = scmp.eq.s32.totalorder %s38_s21, 0 }
   0xa   : > { %s1143_s23 = scalar_select %p40_p4, %s1068_s16, %s42_s22  }
   0xc   : > { %198 = sbr.rel (!%p51_p3) target bundleno = 21 (0x15), region = 28  ;;  %s200_s24 = sand.u32 (%p51_p3), 1, %s1068_s16  }
   0xd   : > { %s908_s25 = smul.u32 (%p51_p3), 12, %s1076_s18 }
   0xe   : > { %s967_s26 = smul.u32 (%p51_p3), 48, %s200_s24 }
   0xf   : > { %s208_s29 = scalar_lea.vmem (%p51_p3), %s1227_s0, %s908_s25 }
  0x10   : > { %v223_v0 = vld [vmem:[%s208_s29] sm:$0xff] (%p51_p3)  ;;  %v227_v2 = vld [vmem:[%s208_s29 + $0x48] sm:$0xff] (%p51_p3)  ;;  %s202_s30 = scalar_lea.vmem (%p51_p3), [#allocation3], %s967_s26  ;;  %v864_v6 = vld [vmem:[%s208_s29 + $0x50] sm:$0xf] (%p51_p3) }
  0x11   : > { %v225_v1 = vld [vmem:[%s208_s29 + $0x24] sm:$0xff]  ;;  %224 = vst [vmem:[%s202_s30] sm:$0xff] %v223_v0  ;;  %228 = vst [vmem:[%s202_s30 + $0x18] sm:$0xff] %v227_v2  ;;  %v229_v3 = vld [vmem:[%s208_s29 + $0x6c] sm:$0xff] }
  0x12   : > { %226 = vst [vmem:[%s202_s30 + $0xc] sm:$0xff] %v225_v1  ;;  %v860_v4 = vld [vmem:[%s208_s29 + $0x8] sm:$0xf]  ;;  %v862_v5 = vld [vmem:[%s208_s29 + $0x2c] sm:$0xf]  ;;  %230 = vst [vmem:[%s202_s30 + $0x24] sm:$0xff] %v229_v3 }
  0x13   : > { %861 = vst [vmem:[%s202_s30 + $0x8] sm:$0xf] %v860_v4  ;;  %863 = vst [vmem:[%s202_s30 + $0x14] sm:$0xf] %v862_v5  ;;  %v866_v7 = vld [vmem:[%s208_s29 + $0x74] sm:$0xf] }
  0x14   : > { %865 = vst [vmem:[%s202_s30 + $0x20] sm:$0xf] %v864_v6  ;;  %867 = vst [vmem:[%s202_s30 + $0x2c] sm:$0xf] %v866_v7 }
  0x15 PF: > { %p868_p6 = scmp.ge.s32.totalorder %s1080_s19, 1  ;;  %p263_p7 = scmp.lt.s32.totalorder %s1080_s19, 4 }
  0x17   : > { %p264_p8 = pnand %p868_p6, %p263_p7 }
  0x18   : > { %s270_s5 = sand.u32 (!%p264_p8), 1, %s1064_s15   ;;  %s314_s6 = smul.u32 (!%p264_p8), 48, %s1072_s17 }
  0x19   : > { %267 = sbr.rel (%p264_p8) target bundleno = 299 (0x12b), region = 58  ;;  %p870_p10 = scmp.ne.s32.totalorder (!%p264_p8), %s1072_s17, 0 }
  0x1a   : > { %s968_s7 = smul.u32 (!%p264_p8), 48, %s270_s5  ;;  %p315_p9 = scmp.lt.s32.totalorder (!%p264_p8), %s314_s6, 143 }
  0x1c   : > { %s1160_s12 = scalar_lea.vmem (!%p264_p8), [#allocation3], %s968_s7 }
  0x1e   : > { %s1239_s6 = smov (!%p315_p9, %s314_s6), 143  ;;  %342 = sbr.rel (%p870_p10) target bundleno = 38 (0x26), region = 66 }
  0x1f   : > { %s869_s8 = sshll.u32 %s1239_s6, 2 }
  0x20   : > { %s1158_s11 = scalar_lea.vmem %s1228_s1, %s869_s8 }
  0x23   : > { %v1082_v8 = vmov 0.0  }
  0x24   : > { %343 = vst [vmem:[#allocation2 + $0x10] sm:$0xff] %v1082_v8  ;;  %344 = vst [vmem:[#allocation2] sm:$0xff] %v1082_v8 }
  0x25   : > { %345 = vst [vmem:[#allocation2 + $0x18] sm:$0xff] %v1082_v8  ;;  %346 = vst [vmem:[#allocation2 + $0x8] sm:$0xff] %v1082_v8 }
  0x26 PF: > { %v1010_v9 = vld [vmem:[%s1158_s11 + $0x78] sm:$0xff]   ;;  %v1013_v12 = vld [vmem:[%s1158_s11 + $0x70] sm:$0xff]   ;;  %v1016_v15 = vld [vmem:[%s1158_s11 + $0x68] sm:$0xff]   ;;  %p901_p11 = scmp.ne.s32.totalorder %s1072_s17, 2 }
  0x27   : > { %v1011_v10 = vld [vmem:[%s1158_s11 + $0x38] sm:$0xff]   ;;  %909 = vmatprep.subr.bf16.mxu0 %v1010_v9  ;;  %v1014_v13 = vld [vmem:[%s1158_s11 + $0x30] sm:$0xff]   ;;  %v1017_v16 = vld [vmem:[%s1158_s11 + $0x28] sm:$0xff]  }
  0x28   : > { %v1012_v11 = vld [vmem:[%s1158_s11 + $0xb8] sm:$0xff]   ;;  %910 = vmatpush3.bf16.msra.mxu0 %v1011_v10  ;;  %v1015_v14 = vld [vmem:[%s1158_s11 + $0xb0] sm:$0xff]   ;;  %v1018_v17 = vld [vmem:[%s1158_s11 + $0xa8] sm:$0xff]  }
  0x29   : > { %947 = vmatprep.subr.bf16.mxu1 %v1012_v11  ;;  %911 = vmatprep.subr.bf16.mxu0 %v1013_v12  ;;  %v1019_v18 = vld [vmem:[%s1158_s11 + $0x60] sm:$0xff]   ;;  %v1022_v21 = vld [vmem:[%s1158_s11 + $0x58] sm:$0xff]   ;;  %v1025_v24 = vld [vmem:[%s1158_s11 + $0x50] sm:$0xff]  }
  0x2a   : > { %948 = vmatpush3.bf16.msra.mxu1 %v1012_v11  ;;  %v1020_v19 = vld [vmem:[%s1158_s11 + $0x20] sm:$0xff]   ;;  %v1024_v22 = vld [vmem:[%s1158_s11 + $0x98] sm:$0xff]   ;;  %v1027_v25 = vld [vmem:[%s1158_s11 + $0x90] sm:$0xff]  }
  0x2b   : > { %949 = vmatprep.subr.bf16.mxu1 %v1015_v14  ;;  %v1021_v20 = vld [vmem:[%s1158_s11 + $0xa0] sm:$0xff]   ;;  %v1023_v23 = vld [vmem:[%s1158_s11 + $0x18] sm:$0xff]   ;;  %v1026_v26 = vld [vmem:[%s1158_s11 + $0x10] sm:$0xff]  }
  0x2c   : > { %912 = vmatpush3.bf16.msra.mxu0 %v1014_v13  ;;  %v1028_v27 = vld [vmem:[%s1158_s11 + $0x48] sm:$0xff]   ;;  %v1031_v30 = vld [vmem:[%s1158_s11 + $0x40] sm:$0xff]   ;;  %v347_v44 = vld [vmem:[#allocation2 + $0x10] sm:$0xff] }
  0x2d   : > { %913 = vmatprep.subr.bf16.mxu0 %v1016_v15  ;;  %v1029_v28 = vld [vmem:[%s1158_s11 + $0x8] sm:$0xff]   ;;  %v1033_v31 = vld [vmem:[%s1158_s11 + $0x80] sm:$0xff]   ;;  %v349_v58 = vld [vmem:[#allocation2 + $0x18] sm:$0xff] }
  0x2e   : > { %950 = vmatpush3.bf16.msra.mxu1 %v1015_v14  ;;  %v1030_v29 = vld [vmem:[%s1158_s11 + $0x88] sm:$0xff]   ;;  %v1036_v32 = vld [vmem:[%s1160_s12 + $0x4] ss:$12 sps:$4 sm:$0xff]  }
  0x2f   : > { %951 = vmatprep.subr.bf16.mxu1 %v1018_v17  ;;  %v1037_v33 = vld [vmem:[%s1160_s12 + $0x8] ss:$12 sps:$4 sm:$0xff]   ;;  %615 = vmatprep.mubr.bf16.mxu0 %v1036_v32  ;;  %v1034_v35 = vld [vmem:[%s1160_s12] ss:$12 sps:$4 sm:$0xff]   ;;  %v1041_v38 = vld [vmem:[%s1160_s12 + $0x18] ss:$12 sps:$4 sm:$0xff]  }
  0x30   : > { %914 = vmatpush3.bf16.msra.mxu0 %v1017_v16  ;;  %v1032_v34 = vld [vmem:[%s1158_s11] sm:$0xff]   ;;  %963 = vmatprep.mubr.bf16.mxu1 %v1037_v33  ;;  %v1039_v36 = vld [vmem:[%s1160_s12 + $0x1c] ss:$12 sps:$4 sm:$0xff]  }
  0x31   : > { %915 = vmatprep.subr.bf16.mxu0 %v1019_v18  ;;  %v1038_v37 = vld [vmem:[%s1160_s12 + $0x20] ss:$12 sps:$4 sm:$0xff]  }
  0x32   : > { %952 = vmatpush3.bf16.msra.mxu1 %v1018_v17  ;;  %v348_v52 = vld [vmem:[#allocation2] sm:$0xff]  ;;  %v350_v0 = vld [vmem:[#allocation2 + $0x8] sm:$0xff] }
  0x33   : > { %953 = vmatprep.subr.bf16.mxu1 %v1021_v20 }
  0x34   : > { %916 = vmatpush3.bf16.msra.mxu0 %v1020_v19 }
  0x35   : > { %917 = vmatprep.subr.bf16.mxu0 %v1022_v21 }
  0x36   : > { %954 = vmatpush3.bf16.msra.mxu1 %v1021_v20 }
  0x37   : > { %955 = vmatprep.subr.bf16.mxu1 %v1024_v22 }
  0x38   : > { %918 = vmatpush3.bf16.msra.mxu0 %v1023_v23 }
  0x39   : > { %919 = vmatprep.subr.bf16.mxu0 %v1025_v24 }
  0x3a   : > { %956 = vmatpush3.bf16.msra.mxu1 %v1024_v22 }
  0x3b   : > { %957 = vmatprep.subr.bf16.mxu1 %v1027_v25 }
  0x3c   : > { %920 = vmatpush3.bf16.msra.mxu0 %v1026_v26 }
  0x3d   : > { %921 = vmatprep.subr.bf16.mxu0 %v1028_v27 }
  0x3e   : > { %958 = vmatpush3.bf16.msra.mxu1 %v1027_v25 }
  0x3f   : > { %959 = vmatprep.subr.bf16.mxu1 %v1030_v29 }
  0x40   : > { %922 = vmatpush3.bf16.msra.mxu0 %v1029_v28 }
  0x41   : > { %923 = vmatprep.subr.bf16.mxu0 %v1031_v30 }
  0x42   : > { %960 = vmatpush3.bf16.msra.mxu1 %v1030_v29 }
  0x43   : > { %961 = vmatprep.subr.bf16.mxu1 %v1033_v31 }
  0x44   : > { %924 = vmatpush3.bf16.msra.mxu0 %v1032_v34 }
  0x46   : > { %962 = vmatpush3.bf16.msra.mxu1 %v1033_v31 }
  0x47   : > { %616 = vmatmul.mubr.bf16.vlgmr.msra.gmra.mxu0 %v1034_v35 }
  0x48   : > { %623 = vmatprep.mubr.bf16.mxu0 %v1039_v36 }
  0x49   : > { %964 = vmatmul.mubr.bf16.vlgmr.msra.gmra.mxu1 %v1038_v37 }
  0x4f   : > { %624 = vmatmul.mubr.bf16.gmra.mxu0 %v1041_v38 }
 0x107   : > { %v925_v39 = vpop.f32.mrf.mxu0 }
 0x109   : > { %v926_v40 = vpop.f32.mrf.mxu0  ;;  %v965_v41 = vpop.f32.mrf.mxu1 }
 0x10a   : > { %v927_v42 = vadd.f32 %v926_v40, %v925_v39 }
 0x10b   : > { %v928_v43 = vpop.f32.mrf.mxu0  ;;  %v666_v45 = vpop.f32.mrf.mxu1 }
 0x10c   : > { %v667_v46 = vadd.f32 %v927_v42, %v666_v45 }
 0x10d   : > { %v929_v47 = vpop.f32.mrf.mxu0  ;;  %v966_v48 = vpop.f32.mrf.mxu1 }
 0x10e   : > { %v681_v49 = vadd.f32 %v667_v46, %v347_v44  ;;  %v930_v50 = vadd.f32 %v929_v47, %v928_v43 }
 0x10f   : > { %v931_v51 = vpop.f32.mrf.mxu0  ;;  %v669_v53 = vpop.f32.mrf.mxu1 }
 0x110   : > { %685 = vst [vmem:[#allocation2 + $0x10] sm:$0xff] %v681_v49  ;;  %v670_v54 = vadd.f32 %v930_v50, %v669_v53 }
 0x111   : > { %v932_v55 = vpop.f32.mrf.mxu0 }
 0x112   : > { %v682_v56 = vadd.f32 %v670_v54, %v348_v52  ;;  %v933_v57 = vadd.f32 %v932_v55, %v931_v51 }
 0x113   : > { %v934_v59 = vpop.f32.mrf.mxu0 }
 0x114   : > { %686 = vst [vmem:[#allocation2] sm:$0xff] %v682_v56  ;;  %v675_v60 = vadd.f32 %v965_v41, %v933_v57 }
 0x115   : > { %v935_v61 = vpop.f32.mrf.mxu0 }
 0x116   : > { %v683_v62 = vadd.f32 %v675_v60, %v349_v58  ;;  %v936_v63 = vadd.f32 %v935_v61, %v934_v59 }
 0x118   : > { %687 = vst [vmem:[#allocation2 + $0x18] sm:$0xff] %v683_v62  ;;  %v678_v1 = vadd.f32 %v966_v48, %v936_v63  ;;  %692 = sbr.rel (%p901_p11) target bundleno = 299 (0x12b), region = 70 }
 0x11a   : > { %v684_v2 = vadd.f32 %v678_v1, %v350_v0 }
 0x11c   : > { %688 = vst [vmem:[#allocation2 + $0x8] sm:$0xff] %v684_v2 }
 0x11d   : > { %v693_v3 = vld [vmem:[#allocation2 + $0x10] sm:$0xff]  ;;  %v902_v4 = vld [vmem:[%s1229_s2] ss:$0 sm:$0xff] }
 0x11e   : > { %v903_v5 = vld [vmem:[%s1230_s3] ss:$0 sm:$0xff]  ;;  %v704_v6 = vmul.f32 %v902_v4, %v693_v3 }
 0x11f   : > { %v694_v7 = vld [vmem:[#allocation2] sm:$0xff]  ;;  %v695_v8 = vld [vmem:[#allocation2 + $0x18] sm:$0xff] }
 0x120   : > { %v705_v10 = vmul.f32 %v902_v4, %v694_v7  ;;  %v706_v11 = vmul.f32 %v902_v4, %v695_v8  ;;  %v715_v13 = vadd.f32 %v903_v5, %v704_v6 }
 0x122   : > { %v716_v14 = vadd.f32 %v903_v5, %v705_v10  ;;  %v717_v15 = vadd.f32 %v903_v5, %v706_v11  ;;  %v719_v17 = vmax.f32 %v715_v13, 0.0 }
 0x123   : > { %v696_v9 = vld [vmem:[#allocation2 + $0x8] sm:$0xff] }
 0x124   : > { %v707_v12 = vmul.f32 %v902_v4, %v696_v9  ;;  %v720_v18 = vmax.f32 %v716_v14, 0.0  ;;  %v721_v19 = vmax.f32 %v717_v15, 0.0  ;;  %723 = vst [vmem:[%s1231_s4] sm:$0xff] %v719_v17 }
 0x126   : > { %v718_v16 = vadd.f32 %v903_v5, %v707_v12  ;;  %724 = vst [vmem:[%s1231_s4 + $0x8] sm:$0xff] %v720_v18  ;;  %725 = vst [vmem:[%s1231_s4 + $0x10] sm:$0xff] %v721_v19 }
 0x128   : > { %v722_v20 = vmax.f32 %v718_v16, 0.0 }
 0x12a   : > { %726 = vst [vmem:[%s1231_s4 + $0x18] sm:$0xff] %v722_v20 }
 0x12b PF: > { %s14_s19 = sadd.s32 1, %s1080_s19   ;;  %s1232_s15 = smov %s1068_s16 }
 0x12c   : > { %p11_p12 = scmp.ge.s32.totalorder %s14_s19, 5   ;;  %s1233_s16 = smov %s1143_s23 }
 0x12d   : > { %s1234_s17 = smov %s1076_s18  ;;  %s1235_s18 = smov %s1237_s20 }
 0x12e   :  { %13 = sbr.rel (!%p11_p12) target bundleno = 3 (0x3), region = 120 }

// kernel: multitask_resnet_forward.31
= control target key start
LH: loop header
LB: loop body
LE: loop exit
PB: predicated region body
PF: predicated region fallthrough
CT: control target
= control target key end

     0   :  { %s1214_s15 = smov 0   ;;  %s1216_s16 = smov 0   ;;  %s1354_s0 = inlined_call_operand.vmem [shape: bf16[16,1152], index: 0, kind: input, shape index: {}]   ;;  %s1355_s1 = inlined_call_operand.vmem [shape: bf16[1152,256], index: 1, kind: input, shape index: {}]   ;;  %s1356_s2 = inlined_call_operand.vmem [shape: f32[1,256], index: 2, kind: input, shape index: {}]   ;;  %s1357_s3 = inlined_call_operand.vmem [shape: f32[1,256], index: 3, kind: input, shape index: {}]   ;;  %s1358_s4 = inlined_call_operand.vmem [shape: f32[16,256], index: 4, kind: output, shape index: {}]  }
   0x1   :  { %s1218_s17 = smov 0   ;;  %s1220_s18 = smov 0  }
   0x2   :  { %s1222_s19 = smov 0  }
   0x3 LB: > { %s26_s20 = sadd.s32 1, %s1181_s18  ;;  %p49_p1 = scmp.ne.s32.totalorder %s1173_s16, %s1169_s15  ;;  %s1185_s19 = sphi %s1222_s19, %s14_s19   ;;  %s1181_s18 = sphi %s1220_s18, %s1362_s18   ;;  %s1177_s17 = sphi %s1218_s17, %s1361_s17   ;;  %s1173_s16 = sphi %s1216_s16, %s1360_s16   ;;  %s1169_s15 = sphi %s1214_s15, %s1359_s15  }
   0x4   : > { %p27_p0 = scmp.ge.s32.totalorder %s26_s20, 3  ;;  %p50_p2 = scmp.eq.s32.totalorder %s1185_s19, 0 }
   0x5   : > { %s42_s22 = sadd.s32 1, %s1173_s16  ;;  %p959_p5 = scmp.ge.s32.totalorder %s1185_s19, 3 }
   0x6   : > { %s1364_s20 = smov (%p27_p0, %s26_s20), 0  ;;  %p51_p3 = por %p50_p2, %p49_p1 }
   0x7   : > { %s38_s21 = ssub.s32 %s1181_s18, %s1364_s20  ;;  %199 = sbr.rel (%p959_p5) target bundleno = 19 (0x13), region = 24 }
   0x8   : > { %p40_p4 = scmp.eq.s32.totalorder %s38_s21, 0 }
   0xa   : > { %s1249_s23 = scalar_select %p40_p4, %s1173_s16, %s42_s22  }
   0xc   : > { %202 = sbr.rel (!%p51_p3) target bundleno = 19 (0x13), region = 28  ;;  %s204_s24 = sand.u32 (%p51_p3), 1, %s1173_s16  }
   0xd   : > { %s1025_s25 = smul.u32 (%p51_p3), 12, %s1181_s18 }
   0xe   : > { %s1027_s26 = smul.u32 (%p51_p3), 24, %s204_s24 }
   0xf   : > { %s212_s29 = scalar_lea.vmem (%p51_p3), %s1354_s0, %s1025_s25 }
  0x10   : > { %v227_v0 = vld [vmem:[%s212_s29] sm:$0xff] (%p51_p3)  ;;  %v961_v2 = vld [vmem:[%s212_s29 + $0x8] sm:$0xf] (%p51_p3)  ;;  %s206_s30 = scalar_lea.vmem (%p51_p3), [#allocation3], %s1027_s26  ;;  %v963_v3 = vld [vmem:[%s212_s29 + $0x2c] sm:$0xf] (%p51_p3) }
  0x11   : > { %v229_v1 = vld [vmem:[%s212_s29 + $0x24] sm:$0xff]  ;;  %228 = vst [vmem:[%s206_s30] sm:$0xff] %v227_v0  ;;  %962 = vst [vmem:[%s206_s30 + $0x8] sm:$0xf] %v961_v2 }
  0x12   : > { %230 = vst [vmem:[%s206_s30 + $0xc] sm:$0xff] %v229_v1  ;;  %964 = vst [vmem:[%s206_s30 + $0x14] sm:$0xf] %v963_v3 }
  0x13 PF: > { %p965_p6 = scmp.ge.s32.totalorder %s1185_s19, 1  ;;  %p262_p7 = scmp.lt.s32.totalorder %s1185_s19, 4 }
  0x15   : > { %p263_p8 = pnand %p965_p6, %p262_p7 }
  0x16   : > { %s269_s5 = sand.u32 (!%p263_p8), 1, %s1169_s15   ;;  %s319_s6 = smul.u32 (!%p263_p8), 48, %s1177_s17 }
  0x17   : > { %266 = sbr.rel (%p263_p8) target bundleno = 321 (0x141), region = 58  ;;  %p968_p10 = scmp.ne.s32.totalorder (!%p263_p8), %s1177_s17, 0 }
  0x18   : > { %s1028_s7 = smul.u32 (!%p263_p8), 24, %s269_s5  ;;  %p321_p9 = scmp.lt.s32.totalorder (!%p263_p8), %s319_s6, 143 }
  0x1a   : > { %s1266_s12 = scalar_lea.vmem (!%p263_p8), [#allocation3], %s1028_s7 }
  0x1c   : > { %s1366_s6 = smov (!%p321_p9, %s319_s6), 143  ;;  %357 = sbr.rel (%p968_p10) target bundleno = 36 (0x24), region = 66 }
  0x1d   : > { %s1026_s8 = sshll.u32 %s1366_s6, 3 }
  0x1e   : > { %s1264_s11 = scalar_lea.vmem %s1355_s1, %s1026_s8 }
  0x21   : > { %v1187_v4 = vmov 0.0  }
  0x22   : > { %358 = vst [vmem:[#allocation2 + $0x10] sm:$0xff] %v1187_v4  ;;  %359 = vst [vmem:[#allocation2] sm:$0xff] %v1187_v4 }
  0x23   : > { %360 = vst [vmem:[#allocation2 + $0x18] sm:$0xff] %v1187_v4  ;;  %361 = vst [vmem:[#allocation2 + $0x8] sm:$0xff] %v1187_v4 }
  0x24 PF: > { %v1071_v5 = vld [vmem:[%s1264_s11 + $0x74] ss:$8 sps:$4 sm:$0xff]   ;;  %v1073_v6 = vld [vmem:[%s1264_s11 + $0x70] ss:$8 sps:$4 sm:$0xff]   ;;  %v1188_v7 = vmov 0   ;;  %p1020_p11 = scmp.ne.s32.totalorder %s1177_s17, 2 }
  0x25   : > { %749 = vmatprep.mubr.bf16.mxu1 %v1188_v7  ;;  %674 = vmatprep.subr.bf16.mxu0 %v1071_v5  ;;  %v1074_v8 = vld [vmem:[%s1264_s11 + $0x64] ss:$8 sps:$4 sm:$0xff]   ;;  %v1076_v9 = vld [vmem:[%s1264_s11 + $0x60] ss:$8 sps:$4 sm:$0xff]   ;;  %v1077_v10 = vld [vmem:[%s1264_s11 + $0x54] ss:$8 sps:$4 sm:$0xff]  }
  0x26   : > { %675 = vmatpush1.bf16.msra.mxu0 %v1073_v6  ;;  %v1079_v11 = vld [vmem:[%s1264_s11 + $0x50] ss:$8 sps:$4 sm:$0xff]   ;;  %v1080_v12 = vld [vmem:[%s1264_s11 + $0x44] ss:$8 sps:$4 sm:$0xff]   ;;  %v1092_v13 = vld [vmem:[%s1264_s11 + $0x174] ss:$8 sps:$4 sm:$0xff]  }
  0x27   : > { %676 = vmatprep.subr.bf16.mxu0 %v1074_v8  ;;  %v1094_v14 = vld [vmem:[%s1264_s11 + $0x170] ss:$8 sps:$4 sm:$0xff]   ;;  %v1082_v15 = vld [vmem:[%s1264_s11 + $0x40] ss:$8 sps:$4 sm:$0xff]   ;;  %v1083_v16 = vld [vmem:[%s1264_s11 + $0x34] ss:$8 sps:$4 sm:$0xff]   ;;  %717 = vmatprep.subr.bf16.mxu1 %v1092_v13 }
  0x28   : > { %v1098_v17 = vld [vmem:[%s1264_s11 + $0x164] ss:$8 sps:$4 sm:$0xff]   ;;  %718 = vmatpush1.bf16.msra.mxu1 %v1094_v14  ;;  %v1100_v18 = vld [vmem:[%s1264_s11 + $0x160] ss:$8 sps:$4 sm:$0xff]   ;;  %v1085_v19 = vld [vmem:[%s1264_s11 + $0x30] ss:$8 sps:$4 sm:$0xff]  }
  0x29   : > { %719 = vmatprep.subr.bf16.mxu1 %v1098_v17  ;;  %v1104_v20 = vld [vmem:[%s1264_s11 + $0x154] ss:$8 sps:$4 sm:$0xff]   ;;  %v1086_v21 = vld [vmem:[%s1264_s11 + $0x24] ss:$8 sps:$4 sm:$0xff]   ;;  %v1106_v22 = vld [vmem:[%s1264_s11 + $0x150] ss:$8 sps:$4 sm:$0xff]  }
  0x2a   : > { %677 = vmatpush1.bf16.msra.mxu0 %v1076_v9  ;;  %v1110_v23 = vld [vmem:[%s1264_s11 + $0x144] ss:$8 sps:$4 sm:$0xff]   ;;  %v1088_v24 = vld [vmem:[%s1264_s11 + $0x20] ss:$8 sps:$4 sm:$0xff]   ;;  %v1089_v25 = vld [vmem:[%s1264_s11 + $0x14] ss:$8 sps:$4 sm:$0xff]  }
  0x2b   : > { %678 = vmatprep.subr.bf16.mxu0 %v1077_v10  ;;  %v1112_v26 = vld [vmem:[%s1264_s11 + $0x140] ss:$8 sps:$4 sm:$0xff]   ;;  %v1116_v27 = vld [vmem:[%s1264_s11 + $0x134] ss:$8 sps:$4 sm:$0xff]   ;;  %v1091_v28 = vld [vmem:[%s1264_s11 + $0x10] ss:$8 sps:$4 sm:$0xff]  }
  0x2c   : > { %720 = vmatpush1.bf16.msra.mxu1 %v1100_v18  ;;  %v1095_v29 = vld [vmem:[%s1264_s11 + $0x4] ss:$8 sps:$4 sm:$0xff]   ;;  %v1118_v30 = vld [vmem:[%s1264_s11 + $0x130] ss:$8 sps:$4 sm:$0xff]   ;;  %v1097_v32 = vld [vmem:[%s1264_s11] ss:$8 sps:$4 sm:$0xff]  }
  0x2d   : > { %721 = vmatprep.subr.bf16.mxu1 %v1104_v20  ;;  %v1122_v31 = vld [vmem:[%s1264_s11 + $0x124] ss:$8 sps:$4 sm:$0xff]   ;;  %v1101_v33 = vld [vmem:[%s1264_s11 + $0xf4] ss:$8 sps:$4 sm:$0xff]   ;;  %v1124_v34 = vld [vmem:[%s1264_s11 + $0x120] ss:$8 sps:$4 sm:$0xff]  }
  0x2e   : > { %679 = vmatpush1.bf16.msra.mxu0 %v1079_v11  ;;  %v1128_v35 = vld [vmem:[%s1264_s11 + $0x114] ss:$8 sps:$4 sm:$0xff]   ;;  %v1103_v36 = vld [vmem:[%s1264_s11 + $0xf0] ss:$8 sps:$4 sm:$0xff]   ;;  %v1107_v37 = vld [vmem:[%s1264_s11 + $0xe4] ss:$8 sps:$4 sm:$0xff]  }
  0x2f   : > { %680 = vmatprep.subr.bf16.mxu0 %v1080_v12  ;;  %v1130_v38 = vld [vmem:[%s1264_s11 + $0x110] ss:$8 sps:$4 sm:$0xff]   ;;  %v1134_v39 = vld [vmem:[%s1264_s11 + $0x104] ss:$8 sps:$4 sm:$0xff]   ;;  %v1109_v41 = vld [vmem:[%s1264_s11 + $0xe0] ss:$8 sps:$4 sm:$0xff]  }
  0x30   : > { %722 = vmatpush1.bf16.msra.mxu1 %v1106_v22  ;;  %v1146_v40 = vld [vmem:[%s1266_s12 + $0x4] ss:$12 sps:$4 sm:$0xff]   ;;  %v1140_v46 = vld [vmem:[%s1266_s12 + $0x8] ss:$12 sps:$4 sm:$0xff]   ;;  %v1144_v56 = vld [vmem:[%s1266_s12] ss:$12 sps:$4 sm:$0xff]  }
  0x31   : > { %723 = vmatprep.subr.bf16.mxu1 %v1110_v23  ;;  %v1113_v42 = vld [vmem:[%s1264_s11 + $0xd4] ss:$8 sps:$4 sm:$0xff]   ;;  %706 = vmatprep.mubr.bf16.mxu0 %v1146_v40  ;;  %v1136_v43 = vld [vmem:[%s1264_s11 + $0x100] ss:$8 sps:$4 sm:$0xff]   ;;  %v1115_v44 = vld [vmem:[%s1264_s11 + $0xd0] ss:$8 sps:$4 sm:$0xff]  }
  0x32   : > { %681 = vmatpush1.bf16.msra.mxu0 %v1082_v15  ;;  %v1119_v45 = vld [vmem:[%s1264_s11 + $0xc4] ss:$8 sps:$4 sm:$0xff]   ;;  %v1121_v47 = vld [vmem:[%s1264_s11 + $0xc0] ss:$8 sps:$4 sm:$0xff]   ;;  %v1125_v48 = vld [vmem:[%s1264_s11 + $0xb4] ss:$8 sps:$4 sm:$0xff]  }
  0x33   : > { %682 = vmatprep.subr.bf16.mxu0 %v1083_v16  ;;  %v1127_v49 = vld [vmem:[%s1264_s11 + $0xb0] ss:$8 sps:$4 sm:$0xff]   ;;  %v1131_v50 = vld [vmem:[%s1264_s11 + $0xa4] ss:$8 sps:$4 sm:$0xff]   ;;  %v1133_v51 = vld [vmem:[%s1264_s11 + $0xa0] ss:$8 sps:$4 sm:$0xff]  }
  0x34   : > { %724 = vmatpush1.bf16.msra.mxu1 %v1112_v26  ;;  %v1137_v52 = vld [vmem:[%s1264_s11 + $0x94] ss:$8 sps:$4 sm:$0xff]   ;;  %v1139_v53 = vld [vmem:[%s1264_s11 + $0x90] ss:$8 sps:$4 sm:$0xff]   ;;  %v1141_v54 = vld [vmem:[%s1264_s11 + $0x84] ss:$8 sps:$4 sm:$0xff]  }
  0x35   : > { %725 = vmatprep.subr.bf16.mxu1 %v1116_v27  ;;  %v1143_v55 = vld [vmem:[%s1264_s11 + $0x80] ss:$8 sps:$4 sm:$0xff]   ;;  %v362_v59 = vld [vmem:[#allocation2 + $0x10] sm:$0xff]  ;;  %v364_v3 = vld [vmem:[#allocation2 + $0x18] sm:$0xff] }
  0x36   : > { %683 = vmatpush1.bf16.msra.mxu0 %v1085_v19  ;;  %v363_v63 = vld [vmem:[#allocation2] sm:$0xff]  ;;  %v365_v8 = vld [vmem:[#allocation2 + $0x8] sm:$0xff] }
  0x37   : > { %684 = vmatprep.subr.bf16.mxu0 %v1086_v21 }
  0x38   : > { %726 = vmatpush1.bf16.msra.mxu1 %v1118_v30 }
  0x39   : > { %727 = vmatprep.subr.bf16.mxu1 %v1122_v31 }
  0x3a   : > { %685 = vmatpush1.bf16.msra.mxu0 %v1088_v24 }
  0x3b   : > { %686 = vmatprep.subr.bf16.mxu0 %v1089_v25 }
  0x3c   : > { %728 = vmatpush1.bf16.msra.mxu1 %v1124_v34 }
  0x3d   : > { %729 = vmatprep.subr.bf16.mxu1 %v1128_v35 }
  0x3e   : > { %687 = vmatpush1.bf16.msra.mxu0 %v1091_v28 }
  0x3f   : > { %688 = vmatprep.subr.bf16.mxu0 %v1095_v29 }
  0x40   : > { %730 = vmatpush1.bf16.msra.mxu1 %v1130_v38 }
  0x41   : > { %731 = vmatprep.subr.bf16.mxu1 %v1134_v39 }
  0x42   : > { %689 = vmatpush1.bf16.msra.mxu0 %v1097_v32 }
  0x43   : > { %690 = vmatprep.subr.bf16.mxu0 %v1101_v33 }
  0x44   : > { %732 = vmatpush1.bf16.msra.mxu1 %v1136_v43 }
  0x46   : > { %691 = vmatpush2.bf16.msra.mxu0 %v1103_v36 }
  0x47   : > { %692 = vmatprep.subr.bf16.mxu0 %v1107_v37  ;;  %750 = vmatmul.mubr.bf16.vlgmr.msra.gmra.mxu1 %v1140_v46 }
  0x4a   : > { %693 = vmatpush2.bf16.msra.mxu0 %v1109_v41 }
  0x4b   : > { %694 = vmatprep.subr.bf16.mxu0 %v1113_v42 }
  0x4e   : > { %695 = vmatpush2.bf16.msra.mxu0 %v1115_v44 }
  0x4f   : > { %696 = vmatprep.subr.bf16.mxu0 %v1119_v45 }
  0x52   : > { %697 = vmatpush2.bf16.msra.mxu0 %v1121_v47 }
  0x53   : > { %698 = vmatprep.subr.bf16.mxu0 %v1125_v48 }
  0x56   : > { %699 = vmatpush2.bf16.msra.mxu0 %v1127_v49 }
  0x57   : > { %700 = vmatprep.subr.bf16.mxu0 %v1131_v50 }
  0x5a   : > { %701 = vmatpush2.bf16.msra.mxu0 %v1133_v51 }
  0x5b   : > { %702 = vmatprep.subr.bf16.mxu0 %v1137_v52 }
  0x5e   : > { %703 = vmatpush2.bf16.msra.mxu0 %v1139_v53 }
  0x5f   : > { %704 = vmatprep.subr.bf16.mxu0 %v1141_v54 }
  0x62   : > { %705 = vmatpush2.bf16.msra.mxu0 %v1143_v55 }
  0x65   : > { %707 = vmatmul.mubr.bf16.vlgmr.msra.gmra.mxu0 %v1144_v56 }
 0x107   : > { %v751_v57 = vpop.f32.mrf.mxu1 }
 0x109   : > { %v753_v58 = vpop.f32.mrf.mxu1 }
 0x10b   : > { %v755_v62 = vpop.f32.mrf.mxu1 }
 0x10d   : > { %v757_v7 = vpop.f32.mrf.mxu1 }
 0x125   : > { %v708_v60 = vpop.f32.mrf.mxu0 }
 0x126   : > { %v752_v61 = vadd.f32 %v751_v57, %v708_v60 }
 0x127   : > { %v710_v0 = vpop.f32.mrf.mxu0 }
 0x128   : > { %v760_v1 = vadd.f32 %v752_v61, %v362_v59  ;;  %v754_v2 = vadd.f32 %v753_v58, %v710_v0 }
 0x129   : > { %v712_v4 = vpop.f32.mrf.mxu0 }
 0x12a   : > { %764 = vst [vmem:[#allocation2 + $0x10] sm:$0xff] %v760_v1  ;;  %v761_v5 = vadd.f32 %v754_v2, %v363_v63  ;;  %v756_v6 = vadd.f32 %v755_v62, %v712_v4 }
 0x12b   : > { %v714_v9 = vpop.f32.mrf.mxu0 }
 0x12c   : > { %765 = vst [vmem:[#allocation2] sm:$0xff] %v761_v5  ;;  %v762_v10 = vadd.f32 %v756_v6, %v364_v3  ;;  %v758_v11 = vadd.f32 %v757_v7, %v714_v9  ;;  %771 = sbr.rel (%p1020_p11) target bundleno = 321 (0x141), region = 70 }
 0x12e   : > { %766 = vst [vmem:[#allocation2 + $0x18] sm:$0xff] %v762_v10  ;;  %v763_v12 = vadd.f32 %v758_v11, %v365_v8 }
 0x130   : > { %767 = vst [vmem:[#allocation2 + $0x8] sm:$0xff] %v763_v12 }
 0x131   : > { %v778_v13 = vlaneseq  ;;  %v776_v15 = vld [vmem:[%s1356_s2] sm:$0x3]  ;;  %v772_v17 = vld [vmem:[#allocation2 + $0x10] sm:$0xff] }
 0x132   : > { %v792_v16 = vld [vmem:[%s1357_s3] sm:$0x3] }
 0x133   : > { %v779_v14 = vshrl.u32 %v778_v13, 7  ;;  %v773_v20 = vld [vmem:[#allocation2] sm:$0xff] }
 0x135   : > { %v780_v18 = vsub.s32 0, %v779_v14  ;;  %v784_v19 = vsub.s32 1, %v779_v14  ;;  %v774_v21 = vld [vmem:[#allocation2 + $0x18] sm:$0xff] }
 0x137   : > { %v775_v22 = vld [vmem:[#allocation2 + $0x8] sm:$0xff]  ;;  %v781_v23 = vrot.slane %v776_v15, %v780_v18  ;;  %v797_v24 = vrot.slane %v792_v16, %v780_v18  ;;  %v785_v25 = vrot.slane %v776_v15, %v784_v19  ;;  %v801_v26 = vrot.slane %v792_v16, %v784_v19 }
 0x139   : > { %v788_v27 = vmul.f32 %v781_v23, %v772_v17  ;;  %v789_v28 = vmul.f32 %v785_v25, %v773_v20  ;;  %v790_v29 = vmul.f32 %v781_v23, %v774_v21  ;;  %v791_v30 = vmul.f32 %v785_v25, %v775_v22 }
 0x13b   : > { %v804_v31 = vadd.f32 %v797_v24, %v788_v27  ;;  %v805_v32 = vadd.f32 %v801_v26, %v789_v28  ;;  %v806_v33 = vadd.f32 %v797_v24, %v790_v29  ;;  %v807_v34 = vadd.f32 %v801_v26, %v791_v30 }
 0x13d   : > { %v808_v35 = vmax.f32 %v804_v31, 0.0  ;;  %v809_v36 = vmax.f32 %v805_v32, 0.0  ;;  %v810_v37 = vmax.f32 %v806_v33, 0.0  ;;  %v811_v38 = vmax.f32 %v807_v34, 0.0 }
 0x13f   : > { %812 = vst [vmem:[%s1358_s4] sm:$0xff] %v808_v35  ;;  %813 = vst [vmem:[%s1358_s4 + $0x8] sm:$0xff] %v809_v36 }
 0x140   : > { %814 = vst [vmem:[%s1358_s4 + $0x10] sm:$0xff] %v810_v37  ;;  %815 = vst [vmem:[%s1358_s4 + $0x18] sm:$0xff] %v811_v38 }
 0x141 PF: > { %s14_s19 = sadd.s32 1, %s1185_s19   ;;  %s1359_s15 = smov %s1173_s16 }
 0x142   : > { %p11_p12 = scmp.ge.s32.totalorder %s14_s19, 5   ;;  %s1360_s16 = smov %s1249_s23 }
 0x143   : > { %s1361_s17 = smov %s1181_s18  ;;  %s1362_s18 = smov %s1364_s20 }
 0x144   :  { %13 = sbr.rel (!%p11_p12) target bundleno = 3 (0x3), region = 120 }

// kernel: multitask_resnet_forward.32
= control target key start
LH: loop header
LB: loop body
LE: loop exit
PB: predicated region body
PF: predicated region fallthrough
CT: control target
= control target key end

     0   :  { %v275_v1 = vmov 0   ;;  %v194_v18 = vlaneseq  ;;  %s370_s1 = inlined_call_operand.vmem [shape: bf16[128,256], index: 1, kind: input, shape index: {}]   ;;  %s371_s0 = inlined_call_operand.vmem [shape: bf16[16,128], index: 0, kind: input, shape index: {}]   ;;  %s372_s2 = inlined_call_operand.vmem [shape: f32[1,256], index: 2, kind: input, shape index: {}]   ;;  %s373_s3 = inlined_call_operand.vmem [shape: f32[1,256], index: 3, kind: input, shape index: {}]   ;;  %s374_s4 = inlined_call_operand.vmem [shape: f32[16,256], index: 4, kind: output, shape index: {}]  }
   0x1   :  { %v250_v0 = vld [vmem:[%s370_s1 + $0x74] ss:$8 sps:$4 sm:$0xff]   ;;  %166 = vmatprep.mubr.bf16.mxu0 %v275_v1  ;;  %v252_v2 = vld [vmem:[%s370_s1 + $0x70] ss:$8 sps:$4 sm:$0xff]   ;;  %v253_v3 = vld [vmem:[%s370_s1 + $0x64] ss:$8 sps:$4 sm:$0xff]  }
   0x2   :  { %134 = vmatprep.subr.bf16.mxu0 %v250_v0  ;;  %v255_v4 = vld [vmem:[%s370_s1 + $0x60] ss:$8 sps:$4 sm:$0xff]   ;;  %v256_v5 = vld [vmem:[%s370_s1 + $0x54] ss:$8 sps:$4 sm:$0xff]   ;;  %v258_v6 = vld [vmem:[%s370_s1 + $0x50] ss:$8 sps:$4 sm:$0xff]  }
   0x3   :  { %135 = vmatpush1.bf16.msra.mxu0 %v252_v2  ;;  %v259_v7 = vld [vmem:[%s370_s1 + $0x44] ss:$8 sps:$4 sm:$0xff]   ;;  %v261_v8 = vld [vmem:[%s370_s1 + $0x40] ss:$8 sps:$4 sm:$0xff]   ;;  %v262_v9 = vld [vmem:[%s370_s1 + $0x34] ss:$8 sps:$4 sm:$0xff]  }
   0x4   :  { %136 = vmatprep.subr.bf16.mxu0 %v253_v3  ;;  %v264_v10 = vld [vmem:[%s370_s1 + $0x30] ss:$8 sps:$4 sm:$0xff]   ;;  %v265_v11 = vld [vmem:[%s370_s1 + $0x24] ss:$8 sps:$4 sm:$0xff]   ;;  %v267_v12 = vld [vmem:[%s370_s1 + $0x20] ss:$8 sps:$4 sm:$0xff]  }
   0x5   :  { %v268_v13 = vld [vmem:[%s370_s1 + $0x14] ss:$8 sps:$4 sm:$0xff]   ;;  %v270_v14 = vld [vmem:[%s370_s1 + $0x10] ss:$8 sps:$4 sm:$0xff]   ;;  %v271_v15 = vld [vmem:[%s370_s1 + $0x4] ss:$8 sps:$4 sm:$0xff]  }
   0x6   :  { %v273_v16 = vld [vmem:[%s370_s1] ss:$8 sps:$4 sm:$0xff]   ;;  %v195_v19 = vshrl.u32 %v194_v18, 7 }
   0x7   :  { %137 = vmatpush1.bf16.msra.mxu0 %v255_v4  ;;  %v274_v17 = vld [vmem:[%s371_s0] sm:$0xff]  }
   0x8   :  { %138 = vmatprep.subr.bf16.mxu0 %v256_v5  ;;  %v196_v20 = vsub.s32 0, %v195_v19  ;;  %v192_v21 = vld [vmem:[%s372_s2] sm:$0x3]  ;;  %v200_v22 = vsub.s32 1, %v195_v19 }
   0x9   :  { %v208_v23 = vld [vmem:[%s373_s3] sm:$0x3] }
   0xa   :  { %v197_v24 = vrot.slane %v192_v21, %v196_v20  ;;  %v213_v25 = vrot.slane %v208_v23, %v196_v20  ;;  %v201_v26 = vrot.slane %v192_v21, %v200_v22  ;;  %v217_v29 = vrot.slane %v208_v23, %v200_v22 }
   0xb   :  { %139 = vmatpush1.bf16.msra.mxu0 %v258_v6 }
   0xc   :  { %140 = vmatprep.subr.bf16.mxu0 %v259_v7 }
   0xf   :  { %141 = vmatpush1.bf16.msra.mxu0 %v261_v8 }
  0x10   :  { %142 = vmatprep.subr.bf16.mxu0 %v262_v9 }
  0x13   :  { %143 = vmatpush1.bf16.msra.mxu0 %v264_v10 }
  0x14   :  { %144 = vmatprep.subr.bf16.mxu0 %v265_v11 }
  0x17   :  { %145 = vmatpush1.bf16.msra.mxu0 %v267_v12 }
  0x18   :  { %146 = vmatprep.subr.bf16.mxu0 %v268_v13 }
  0x1b   :  { %147 = vmatpush1.bf16.msra.mxu0 %v270_v14 }
  0x1c   :  { %148 = vmatprep.subr.bf16.mxu0 %v271_v15 }
  0x1f   :  { %149 = vmatpush1.bf16.msra.mxu0 %v273_v16 }
  0x22   :  { %167 = vmatmul.mubr.bf16.vlgmr.msra.gmra.mxu0 %v274_v17 }
  0xe2   :  { %v168_v27 = vpop.f32.mrf.mxu0 }
  0xe3   :  { %v204_v28 = vmul.f32 %v197_v24, %v168_v27 }
  0xe4   :  { %v170_v30 = vpop.f32.mrf.mxu0 }
  0xe5   :  { %v220_v31 = vadd.f32 %v213_v25, %v204_v28  ;;  %v205_v32 = vmul.f32 %v201_v26, %v170_v30 }
  0xe6   :  { %v172_v33 = vpop.f32.mrf.mxu0 }
  0xe7   :  { %224 = vst [vmem:[%s374_s4] sm:$0xff] %v220_v31  ;;  %v221_v34 = vadd.f32 %v217_v29, %v205_v32  ;;  %v206_v35 = vmul.f32 %v197_v24, %v172_v33 }
  0xe8   :  { %v174_v36 = vpop.f32.mrf.mxu0 }
  0xe9   :  { %225 = vst [vmem:[%s374_s4 + $0x8] sm:$0xff] %v221_v34  ;;  %v222_v37 = vadd.f32 %v213_v25, %v206_v35  ;;  %v207_v38 = vmul.f32 %v201_v26, %v174_v36 }
  0xeb   :  { %226 = vst [vmem:[%s374_s4 + $0x10] sm:$0xff] %v222_v37  ;;  %v223_v39 = vadd.f32 %v217_v29, %v207_v38 }
  0xed   :  { %227 = vst [vmem:[%s374_s4 + $0x18] sm:$0xff] %v223_v39 }

// kernel: multitask_resnet_forward.33
= control target key start
LH: loop header
LB: loop body
LE: loop exit
PB: predicated region body
PF: predicated region fallthrough
CT: control target
= control target key end

     0   :  { %s1775_s18 = smov 0   ;;  %s1777_s19 = smov 0   ;;  %s1978_s0 = inlined_call_operand.vmem [shape: bf16[16,2304], index: 0, kind: input, shape index: {}]   ;;  %s1979_s1 = inlined_call_operand.vmem [shape: bf16[2304,256], index: 1, kind: input, shape index: {}]   ;;  %s1980_s2 = inlined_call_operand.vmem [shape: f32[1,256], index: 2, kind: input, shape index: {}]   ;;  %s1981_s3 = inlined_call_operand.vmem [shape: f32[1,256], index: 3, kind: input, shape index: {}]   ;;  %s1982_s4 = inlined_call_operand.vmem [shape: f32[16,256], index: 4, kind: input, shape index: {}]   ;;  %s1983_s5 = inlined_call_operand.vmem [shape: f32[16,256], index: 5, kind: output, shape index: {}]  }
   0x1   :  { %s1779_s20 = smov 0   ;;  %s1781_s21 = smov 0  }
   0x2   :  { %s1783_s22 = smov 0  }
   0x3 LB: > { %s27_s23 = sadd.s32 1, %s1738_s21  ;;  %p50_p1 = scmp.ne.s32.totalorder %s1730_s19, %s1726_s18  ;;  %s1742_s22 = sphi %s1783_s22, %s15_s22   ;;  %s1738_s21 = sphi %s1781_s21, %s1987_s21   ;;  %s1734_s20 = sphi %s1779_s20, %s1986_s20   ;;  %s1730_s19 = sphi %s1777_s19, %s1985_s19   ;;  %s1726_s18 = sphi %s1775_s18, %s1984_s18  }
   0x4   : > { %p28_p0 = scmp.ge.s32.totalorder %s27_s23, 3  ;;  %p51_p2 = scmp.eq.s32.totalorder %s1742_s22, 0 }
   0x5   : > { %s43_s25 = sadd.s32 1, %s1730_s19  ;;  %p1393_p5 = scmp.ge.s32.totalorder %s1742_s22, 3 }
   0x6   : > { %s1989_s23 = smov (%p28_p0, %s27_s23), 0  ;;  %p52_p3 = por %p51_p2, %p50_p1 }
   0x7   : > { %s39_s24 = ssub.s32 %s1738_s21, %s1989_s23  ;;  %243 = sbr.rel (%p1393_p5) target bundleno = 20 (0x14), region = 28 }
   0x8   : > { %p41_p4 = scmp.eq.s32.totalorder %s39_s24, 0 }
   0xa   : > { %s1810_s26 = scalar_select %p41_p4, %s1730_s19, %s43_s25  }
   0xc   : > { %246 = sbr.rel (!%p52_p3) target bundleno = 20 (0x14), region = 32  ;;  %s248_s27 = sand.u32 (%p52_p3), 1, %s1730_s19  }
   0xd   : > { %s1506_s28 = smul.u32 (%p52_p3), 24, %s1738_s21 }
   0xe   : > { %s1508_s29 = smul.u32 (%p52_p3), 48, %s248_s27 }
   0xf   : > { %s256_s7 = scalar_lea.vmem (%p52_p3), %s1978_s0, %s1506_s28 }
  0x10   : > { %v269_v0 = vld [vmem:[%s256_s7] sm:$0xff] (%p52_p3)  ;;  %v271_v1 = vld [vmem:[%s256_s7 + $0x8] sm:$0xff] (%p52_p3)  ;;  %v273_v2 = vld [vmem:[%s256_s7 + $0x10] sm:$0xff] (%p52_p3)  ;;  %s250_s8 = scalar_lea.vmem (%p52_p3), [#allocation3], %s1508_s29 }
  0x11   : > { %270 = vst [vmem:[%s250_s8] sm:$0xff] %v269_v0  ;;  %272 = vst [vmem:[%s250_s8 + $0x8] sm:$0xff] %v271_v1  ;;  %v275_v3 = vld [vmem:[%s256_s7 + $0x48] sm:$0xff]  ;;  %v277_v4 = vld [vmem:[%s256_s7 + $0x50] sm:$0xff] }
  0x12   : > { %274 = vst [vmem:[%s250_s8 + $0x10] sm:$0xff] %v273_v2  ;;  %v279_v5 = vld [vmem:[%s256_s7 + $0x58] sm:$0xff]  ;;  %276 = vst [vmem:[%s250_s8 + $0x18] sm:$0xff] %v275_v3 }
  0x13   : > { %278 = vst [vmem:[%s250_s8 + $0x20] sm:$0xff] %v277_v4  ;;  %280 = vst [vmem:[%s250_s8 + $0x28] sm:$0xff] %v279_v5 }
  0x14 PF: > { %p1395_p6 = scmp.ge.s32.totalorder %s1742_s22, 1  ;;  %p300_p7 = scmp.lt.s32.totalorder %s1742_s22, 4 }
  0x16   : > { %p301_p8 = pnand %p1395_p6, %p300_p7 }
  0x17   : > { %s307_s9 = sand.u32 (!%p301_p8), 1, %s1726_s18   ;;  %s369_s10 = smul.u32 (!%p301_p8), 96, %s1734_s20 }
  0x18   : > { %304 = sbr.rel (%p301_p8) target bundleno = 388 (0x184), region = 59  ;;  %p1398_p10 = scmp.ne.s32.totalorder (!%p301_p8), %s1734_s20, 0 }
  0x19   : > { %s1509_s11 = smul.u32 (!%p301_p8), 48, %s307_s9  ;;  %p371_p9 = scmp.lt.s32.totalorder (!%p301_p8), %s369_s10, 287 }
  0x1b   : > { %s1827_s16 = scalar_lea.vmem (!%p301_p8), [#allocation3], %s1509_s11 }
  0x1d   : > { %s1991_s10 = smov (!%p371_p9, %s369_s10), 287  ;;  %418 = sbr.rel (%p1398_p10) target bundleno = 37 (0x25), region = 67 }
  0x1e   : > { %s1507_s12 = sshll.u32 %s1991_s10, 3 }
  0x1f   : > { %s1825_s15 = scalar_lea.vmem %s1979_s1, %s1507_s12 }
  0x22   : > { %v1744_v6 = vmov 0.0  }
  0x23   : > { %419 = vst [vmem:[#allocation2 + $0x10] sm:$0xff] %v1744_v6  ;;  %420 = vst [vmem:[#allocation2] sm:$0xff] %v1744_v6 }
  0x24   : > { %421 = vst [vmem:[#allocation2 + $0x18] sm:$0xff] %v1744_v6  ;;  %422 = vst [vmem:[#allocation2 + $0x8] sm:$0xff] %v1744_v6 }
  0x25 PF: > { %v1551_v7 = vld [vmem:[%s1825_s15 + $0x74] ss:$8 sps:$4 sm:$0xff]   ;;  %v1555_v9 = vld [vmem:[%s1825_s15 + $0x70] ss:$8 sps:$4 sm:$0xff]   ;;  %v1557_v11 = vld [vmem:[%s1825_s15 + $0x64] ss:$8 sps:$4 sm:$0xff]  }
  0x26   : > { %v1553_v8 = vld [vmem:[%s1825_s15 + $0x174] ss:$8 sps:$4 sm:$0xff]   ;;  %1039 = vmatprep.subr.bf16.mxu0 %v1551_v7  ;;  %v1556_v10 = vld [vmem:[%s1825_s15 + $0x170] ss:$8 sps:$4 sm:$0xff]   ;;  %v1559_v12 = vld [vmem:[%s1825_s15 + $0x164] ss:$8 sps:$4 sm:$0xff]  }
  0x27   : > { %1082 = vmatprep.subr.bf16.mxu1 %v1553_v8  ;;  %1040 = vmatpush1.bf16.msra.mxu0 %v1555_v9  ;;  %v1561_v13 = vld [vmem:[%s1825_s15 + $0x60] ss:$8 sps:$4 sm:$0xff]   ;;  %v1563_v15 = vld [vmem:[%s1825_s15 + $0x54] ss:$8 sps:$4 sm:$0xff]   ;;  %v1567_v17 = vld [vmem:[%s1825_s15 + $0x50] ss:$8 sps:$4 sm:$0xff]  }
  0x28   : > { %1083 = vmatpush1.bf16.msra.mxu1 %v1556_v10  ;;  %1041 = vmatprep.subr.bf16.mxu0 %v1557_v11  ;;  %v1562_v14 = vld [vmem:[%s1825_s15 + $0x160] ss:$8 sps:$4 sm:$0xff]   ;;  %v1565_v16 = vld [vmem:[%s1825_s15 + $0x154] ss:$8 sps:$4 sm:$0xff]   ;;  %v1568_v18 = vld [vmem:[%s1825_s15 + $0x150] ss:$8 sps:$4 sm:$0xff]  }
  0x29   : > { %1084 = vmatprep.subr.bf16.mxu1 %v1559_v12  ;;  %v1569_v19 = vld [vmem:[%s1825_s15 + $0x44] ss:$8 sps:$4 sm:$0xff]   ;;  %v1573_v21 = vld [vmem:[%s1825_s15 + $0x40] ss:$8 sps:$4 sm:$0xff]   ;;  %v1575_v23 = vld [vmem:[%s1825_s15 + $0x34] ss:$8 sps:$4 sm:$0xff]  }
  0x2a   : > { %v1571_v20 = vld [vmem:[%s1825_s15 + $0x144] ss:$8 sps:$4 sm:$0xff]   ;;  %v1574_v22 = vld [vmem:[%s1825_s15 + $0x140] ss:$8 sps:$4 sm:$0xff]   ;;  %v1577_v24 = vld [vmem:[%s1825_s15 + $0x134] ss:$8 sps:$4 sm:$0xff]  }
  0x2b   : > { %1042 = vmatpush1.bf16.msra.mxu0 %v1561_v13  ;;  %v1579_v25 = vld [vmem:[%s1825_s15 + $0x30] ss:$8 sps:$4 sm:$0xff]   ;;  %v1581_v27 = vld [vmem:[%s1825_s15 + $0x24] ss:$8 sps:$4 sm:$0xff]   ;;  %v1585_v29 = vld [vmem:[%s1825_s15 + $0x20] ss:$8 sps:$4 sm:$0xff]  }
  0x2c   : > { %1085 = vmatpush1.bf16.msra.mxu1 %v1562_v14  ;;  %1043 = vmatprep.subr.bf16.mxu0 %v1563_v15  ;;  %v1580_v26 = vld [vmem:[%s1825_s15 + $0x130] ss:$8 sps:$4 sm:$0xff]   ;;  %v1583_v28 = vld [vmem:[%s1825_s15 + $0x124] ss:$8 sps:$4 sm:$0xff]   ;;  %v1586_v30 = vld [vmem:[%s1825_s15 + $0x120] ss:$8 sps:$4 sm:$0xff]  }
  0x2d   : > { %1086 = vmatprep.subr.bf16.mxu1 %v1565_v16  ;;  %v1587_v31 = vld [vmem:[%s1825_s15 + $0x14] ss:$8 sps:$4 sm:$0xff]   ;;  %v1591_v33 = vld [vmem:[%s1825_s15 + $0x10] ss:$8 sps:$4 sm:$0xff]   ;;  %v1593_v35 = vld [vmem:[%s1825_s15 + $0x4] ss:$8 sps:$4 sm:$0xff]  }
  0x2e   : > { %v1589_v32 = vld [vmem:[%s1825_s15 + $0x114] ss:$8 sps:$4 sm:$0xff]   ;;  %v1592_v34 = vld [vmem:[%s1825_s15 + $0x110] ss:$8 sps:$4 sm:$0xff]   ;;  %v1595_v36 = vld [vmem:[%s1825_s15 + $0x104] ss:$8 sps:$4 sm:$0xff]  }
  0x2f   : > { %1044 = vmatpush1.bf16.msra.mxu0 %v1567_v17  ;;  %v1597_v37 = vld [vmem:[%s1825_s15] ss:$8 sps:$4 sm:$0xff]   ;;  %v1599_v39 = vld [vmem:[%s1825_s15 + $0xf4] ss:$8 sps:$4 sm:$0xff]   ;;  %v1603_v41 = vld [vmem:[%s1825_s15 + $0xf0] ss:$8 sps:$4 sm:$0xff]  }
  0x30   : > { %1087 = vmatpush1.bf16.msra.mxu1 %v1568_v18  ;;  %1045 = vmatprep.subr.bf16.mxu0 %v1569_v19  ;;  %v1598_v38 = vld [vmem:[%s1825_s15 + $0x100] ss:$8 sps:$4 sm:$0xff]   ;;  %v1601_v40 = vld [vmem:[%s1825_s15 + $0x1f4] ss:$8 sps:$4 sm:$0xff]   ;;  %v1604_v42 = vld [vmem:[%s1825_s15 + $0x1f0] ss:$8 sps:$4 sm:$0xff]  }
  0x31   : > { %1088 = vmatprep.subr.bf16.mxu1 %v1571_v20  ;;  %v1605_v43 = vld [vmem:[%s1825_s15 + $0xe4] ss:$8 sps:$4 sm:$0xff]   ;;  %v1609_v45 = vld [vmem:[%s1825_s15 + $0xe0] ss:$8 sps:$4 sm:$0xff]   ;;  %v1611_v47 = vld [vmem:[%s1825_s15 + $0xd4] ss:$8 sps:$4 sm:$0xff]  }
  0x32   : > { %v1607_v44 = vld [vmem:[%s1825_s15 + $0x1e4] ss:$8 sps:$4 sm:$0xff]   ;;  %v1610_v46 = vld [vmem:[%s1825_s15 + $0x1e0] ss:$8 sps:$4 sm:$0xff]   ;;  %v1613_v48 = vld [vmem:[%s1825_s15 + $0x1d4] ss:$8 sps:$4 sm:$0xff]  }
  0x33   : > { %1046 = vmatpush1.bf16.msra.mxu0 %v1573_v21  ;;  %v1615_v49 = vld [vmem:[%s1825_s15 + $0xd0] ss:$8 sps:$4 sm:$0xff]   ;;  %v1617_v51 = vld [vmem:[%s1825_s15 + $0xc4] ss:$8 sps:$4 sm:$0xff]   ;;  %v1621_v53 = vld [vmem:[%s1825_s15 + $0xc0] ss:$8 sps:$4 sm:$0xff]  }
  0x34   : > { %1089 = vmatpush1.bf16.msra.mxu1 %v1574_v22  ;;  %1047 = vmatprep.subr.bf16.mxu0 %v1575_v23  ;;  %v1616_v50 = vld [vmem:[%s1825_s15 + $0x1d0] ss:$8 sps:$4 sm:$0xff]   ;;  %v1619_v52 = vld [vmem:[%s1825_s15 + $0x1c4] ss:$8 sps:$4 sm:$0xff]   ;;  %v1622_v54 = vld [vmem:[%s1825_s15 + $0x1c0] ss:$8 sps:$4 sm:$0xff]  }
  0x35   : > { %1090 = vmatprep.subr.bf16.mxu1 %v1577_v24  ;;  %v1623_v55 = vld [vmem:[%s1825_s15 + $0xb4] ss:$8 sps:$4 sm:$0xff]   ;;  %v1627_v59 = vld [vmem:[%s1825_s15 + $0xb0] ss:$8 sps:$4 sm:$0xff]   ;;  %v1629_v61 = vld [vmem:[%s1825_s15 + $0xa4] ss:$8 sps:$4 sm:$0xff]  }
  0x36   : > { %v1649_v56 = vld [vmem:[%s1827_s16 + $0x4] ss:$24 sps:$4 sm:$0xff]   ;;  %v1628_v60 = vld [vmem:[%s1825_s15 + $0x1b0] ss:$8 sps:$4 sm:$0xff]   ;;  %v1633_v63 = vld [vmem:[%s1825_s15 + $0xa0] ss:$8 sps:$4 sm:$0xff]  }
  0x37   : > { %1048 = vmatpush1.bf16.msra.mxu0 %v1579_v25  ;;  %v1625_v57 = vld [vmem:[%s1825_s15 + $0x1b4] ss:$8 sps:$4 sm:$0xff]   ;;  %1071 = vmatprep.mubr.bf16.mxu0 %v1649_v56  ;;  %v1631_v62 = vld [vmem:[%s1825_s15 + $0x1a4] ss:$8 sps:$4 sm:$0xff]   ;;  %v1634_v0 = vld [vmem:[%s1825_s15 + $0x1a0] ss:$8 sps:$4 sm:$0xff]  }
  0x38   : > { %1091 = vmatpush1.bf16.msra.mxu1 %v1580_v26  ;;  %1049 = vmatprep.subr.bf16.mxu0 %v1581_v27  ;;  %v1652_v58 = vld [vmem:[%s1827_s16 + $0xc] ss:$24 sps:$4 sm:$0xff]   ;;  %v1639_v3 = vld [vmem:[%s1825_s15 + $0x90] ss:$8 sps:$4 sm:$0xff]   ;;  %v1645_v7 = vld [vmem:[%s1825_s15 + $0x80] ss:$8 sps:$4 sm:$0xff]  }
  0x39   : > { %1092 = vmatprep.subr.bf16.mxu1 %v1583_v28  ;;  %1114 = vmatprep.mubr.bf16.mxu1 %v1652_v58  ;;  %v1635_v1 = vld [vmem:[%s1825_s15 + $0x94] ss:$8 sps:$4 sm:$0xff]   ;;  %v1640_v4 = vld [vmem:[%s1825_s15 + $0x190] ss:$8 sps:$4 sm:$0xff]   ;;  %v1641_v5 = vld [vmem:[%s1825_s15 + $0x84] ss:$8 sps:$4 sm:$0xff]  }
  0x3a   : > { %v1637_v2 = vld [vmem:[%s1825_s15 + $0x194] ss:$8 sps:$4 sm:$0xff]   ;;  %v1643_v6 = vld [vmem:[%s1825_s15 + $0x184] ss:$8 sps:$4 sm:$0xff]   ;;  %v1646_v8 = vld [vmem:[%s1825_s15 + $0x180] ss:$8 sps:$4 sm:$0xff]  }
  0x3b   : > { %1050 = vmatpush1.bf16.msra.mxu0 %v1585_v29  ;;  %v1655_v9 = vld [vmem:[%s1825_s15 + $0x274] ss:$8 sps:$4 sm:$0xff]   ;;  %v1647_v10 = vld [vmem:[%s1827_s16] ss:$24 sps:$4 sm:$0xff]   ;;  %v1658_v13 = vld [vmem:[%s1825_s15 + $0x264] ss:$8 sps:$4 sm:$0xff]  }
  0x3c   : > { %1093 = vmatpush1.bf16.msra.mxu1 %v1586_v30  ;;  %1051 = vmatprep.subr.bf16.mxu0 %v1587_v31  ;;  %v1650_v11 = vld [vmem:[%s1827_s16 + $0x8] ss:$24 sps:$4 sm:$0xff]   ;;  %v1703_v14 = vld [vmem:[%s1827_s16 + $0x14] ss:$24 sps:$4 sm:$0xff]   ;;  %p1501_p11 = scmp.ne.s32.totalorder %s1734_s20, 2 }
  0x3d   : > { %1094 = vmatprep.subr.bf16.mxu1 %v1589_v32  ;;  %v1653_v12 = vld [vmem:[%s1825_s15 + $0x270] ss:$8 sps:$4 sm:$0xff]   ;;  %v1656_v15 = vld [vmem:[%s1825_s15 + $0x260] ss:$8 sps:$4 sm:$0xff]   ;;  %v1661_v16 = vld [vmem:[%s1825_s15 + $0x254] ss:$8 sps:$4 sm:$0xff]  }
  0x3e   : > { %v1659_v17 = vld [vmem:[%s1825_s15 + $0x250] ss:$8 sps:$4 sm:$0xff]   ;;  %v1664_v18 = vld [vmem:[%s1825_s15 + $0x244] ss:$8 sps:$4 sm:$0xff]   ;;  %v1662_v19 = vld [vmem:[%s1825_s15 + $0x240] ss:$8 sps:$4 sm:$0xff]  }
  0x3f   : > { %1052 = vmatpush1.bf16.msra.mxu0 %v1591_v33  ;;  %v1667_v20 = vld [vmem:[%s1825_s15 + $0x234] ss:$8 sps:$4 sm:$0xff]   ;;  %v1665_v21 = vld [vmem:[%s1825_s15 + $0x230] ss:$8 sps:$4 sm:$0xff]   ;;  %v1670_v22 = vld [vmem:[%s1825_s15 + $0x224] ss:$8 sps:$4 sm:$0xff]  }
  0x40   : > { %1095 = vmatpush1.bf16.msra.mxu1 %v1592_v34  ;;  %1053 = vmatprep.subr.bf16.mxu0 %v1593_v35  ;;  %v1668_v23 = vld [vmem:[%s1825_s15 + $0x220] ss:$8 sps:$4 sm:$0xff]   ;;  %v1673_v24 = vld [vmem:[%s1825_s15 + $0x214] ss:$8 sps:$4 sm:$0xff]   ;;  %v1671_v25 = vld [vmem:[%s1825_s15 + $0x210] ss:$8 sps:$4 sm:$0xff]  }
  0x41   : > { %1096 = vmatprep.subr.bf16.mxu1 %v1595_v36  ;;  %v1676_v26 = vld [vmem:[%s1825_s15 + $0x204] ss:$8 sps:$4 sm:$0xff]   ;;  %v1674_v27 = vld [vmem:[%s1825_s15 + $0x200] ss:$8 sps:$4 sm:$0xff]   ;;  %v1679_v28 = vld [vmem:[%s1825_s15 + $0x2f4] ss:$8 sps:$4 sm:$0xff]  }
  0x42   : > { %v1677_v29 = vld [vmem:[%s1825_s15 + $0x2f0] ss:$8 sps:$4 sm:$0xff]   ;;  %v1682_v30 = vld [vmem:[%s1825_s15 + $0x2e4] ss:$8 sps:$4 sm:$0xff]   ;;  %v1680_v31 = vld [vmem:[%s1825_s15 + $0x2e0] ss:$8 sps:$4 sm:$0xff]  }
  0x43   : > { %1054 = vmatpush1.bf16.msra.mxu0 %v1597_v37  ;;  %v1685_v32 = vld [vmem:[%s1825_s15 + $0x2d4] ss:$8 sps:$4 sm:$0xff]   ;;  %v1683_v33 = vld [vmem:[%s1825_s15 + $0x2d0] ss:$8 sps:$4 sm:$0xff]   ;;  %v1688_v34 = vld [vmem:[%s1825_s15 + $0x2c4] ss:$8 sps:$4 sm:$0xff]  }
  0x44   : > { %1097 = vmatpush1.bf16.msra.mxu1 %v1598_v38  ;;  %1055 = vmatprep.subr.bf16.mxu0 %v1599_v39  ;;  %v1686_v35 = vld [vmem:[%s1825_s15 + $0x2c0] ss:$8 sps:$4 sm:$0xff]   ;;  %v1691_v36 = vld [vmem:[%s1825_s15 + $0x2b4] ss:$8 sps:$4 sm:$0xff]   ;;  %v1689_v37 = vld [vmem:[%s1825_s15 + $0x2b0] ss:$8 sps:$4 sm:$0xff]  }
  0x45   : > { %1098 = vmatprep.subr.bf16.mxu1 %v1601_v40  ;;  %v1694_v38 = vld [vmem:[%s1825_s15 + $0x2a4] ss:$8 sps:$4 sm:$0xff]   ;;  %v1692_v39 = vld [vmem:[%s1825_s15 + $0x2a0] ss:$8 sps:$4 sm:$0xff]   ;;  %v1697_v40 = vld [vmem:[%s1825_s15 + $0x294] ss:$8 sps:$4 sm:$0xff]  }
  0x46   : > { %v424_v58 = vld [vmem:[#allocation2] sm:$0xff] }
  0x47   : > { %1056 = vmatpush2.bf16.msra.mxu0 %v1603_v41  ;;  %v1695_v41 = vld [vmem:[%s1825_s15 + $0x290] ss:$8 sps:$4 sm:$0xff]  }
  0x48   : > { %1099 = vmatpush2.bf16.msra.mxu1 %v1604_v42  ;;  %1057 = vmatprep.subr.bf16.mxu0 %v1605_v43  ;;  %v1700_v42 = vld [vmem:[%s1825_s15 + $0x284] ss:$8 sps:$4 sm:$0xff]   ;;  %v1698_v43 = vld [vmem:[%s1825_s15 + $0x280] ss:$8 sps:$4 sm:$0xff]  }
  0x49   : > { %1100 = vmatprep.subr.bf16.mxu1 %v1607_v44  ;;  %v1701_v44 = vld [vmem:[%s1827_s16 + $0x10] ss:$24 sps:$4 sm:$0xff]  }
  0x4b   : > { %1058 = vmatpush2.bf16.msra.mxu0 %v1609_v45 }
  0x4c   : > { %1101 = vmatpush2.bf16.msra.mxu1 %v1610_v46  ;;  %1059 = vmatprep.subr.bf16.mxu0 %v1611_v47 }
  0x4d   : > { %1102 = vmatprep.subr.bf16.mxu1 %v1613_v48 }
  0x4f   : > { %1060 = vmatpush2.bf16.msra.mxu0 %v1615_v49 }
  0x50   : > { %1103 = vmatpush2.bf16.msra.mxu1 %v1616_v50  ;;  %1061 = vmatprep.subr.bf16.mxu0 %v1617_v51 }
  0x51   : > { %1104 = vmatprep.subr.bf16.mxu1 %v1619_v52 }
  0x53   : > { %1062 = vmatpush2.bf16.msra.mxu0 %v1621_v53  ;;  %v423_v53 = vld [vmem:[#allocation2 + $0x10] sm:$0xff] }
  0x54   : > { %1105 = vmatpush2.bf16.msra.mxu1 %v1622_v54  ;;  %1063 = vmatprep.subr.bf16.mxu0 %v1623_v55 }
  0x55   : > { %1106 = vmatprep.subr.bf16.mxu1 %v1625_v57 }
  0x57   : > { %1064 = vmatpush2.bf16.msra.mxu0 %v1627_v59 }
  0x58   : > { %1107 = vmatpush2.bf16.msra.mxu1 %v1628_v60  ;;  %1065 = vmatprep.subr.bf16.mxu0 %v1629_v61 }
  0x59   : > { %1108 = vmatprep.subr.bf16.mxu1 %v1631_v62 }
  0x5b   : > { %1066 = vmatpush2.bf16.msra.mxu0 %v1633_v63  ;;  %v425_v63 = vld [vmem:[#allocation2 + $0x18] sm:$0xff] }
  0x5c   : > { %1109 = vmatpush2.bf16.msra.mxu1 %v1634_v0  ;;  %1067 = vmatprep.subr.bf16.mxu0 %v1635_v1 }
  0x5d   : > { %1110 = vmatprep.subr.bf16.mxu1 %v1637_v2 }
  0x5f   : > { %1068 = vmatpush2.bf16.msra.mxu0 %v1639_v3 }
  0x60   : > { %1111 = vmatpush2.bf16.msra.mxu1 %v1640_v4  ;;  %1069 = vmatprep.subr.bf16.mxu0 %v1641_v5  ;;  %v426_v4 = vld [vmem:[#allocation2 + $0x8] sm:$0xff] }
  0x61   : > { %1112 = vmatprep.subr.bf16.mxu1 %v1643_v6 }
  0x63   : > { %1070 = vmatpush2.bf16.msra.mxu0 %v1645_v7 }
  0x64   : > { %1113 = vmatpush2.bf16.msra.mxu1 %v1646_v8  ;;  %1125 = vmatprep.subr.bf16.mxu0 %v1655_v9 }
  0x66   : > { %1072 = vmatmul.mubr.bf16.vlgmr.msra.gmra.mxu0 %v1647_v10 }
  0x67   : > { %1115 = vmatmul.mubr.bf16.vlgmr.msra.gmra.mxu1 %v1650_v11  ;;  %1126 = vmatpush1.bf16.msra.mxu0 %v1653_v12 }
  0x68   : > { %1127 = vmatprep.subr.bf16.mxu0 %v1658_v13  ;;  %1157 = vmatprep.mubr.bf16.mxu0 %v1703_v14 }
  0x6b   : > { %1128 = vmatpush1.bf16.msra.mxu0 %v1656_v15 }
  0x6c   : > { %1129 = vmatprep.subr.bf16.mxu0 %v1661_v16 }
  0x6f   : > { %1130 = vmatpush1.bf16.msra.mxu0 %v1659_v17 }
  0x70   : > { %1131 = vmatprep.subr.bf16.mxu0 %v1664_v18 }
  0x73   : > { %1132 = vmatpush1.bf16.msra.mxu0 %v1662_v19 }
  0x74   : > { %1133 = vmatprep.subr.bf16.mxu0 %v1667_v20 }
  0x77   : > { %1134 = vmatpush1.bf16.msra.mxu0 %v1665_v21 }
  0x78   : > { %1135 = vmatprep.subr.bf16.mxu0 %v1670_v22 }
  0x7b   : > { %1136 = vmatpush1.bf16.msra.mxu0 %v1668_v23 }
  0x7c   : > { %1137 = vmatprep.subr.bf16.mxu0 %v1673_v24 }
  0x7f   : > { %1138 = vmatpush1.bf16.msra.mxu0 %v1671_v25 }
  0x80   : > { %1139 = vmatprep.subr.bf16.mxu0 %v1676_v26 }
  0x83   : > { %1140 = vmatpush1.bf16.msra.mxu0 %v1674_v27 }
  0x84   : > { %1141 = vmatprep.subr.bf16.mxu0 %v1679_v28 }
  0x87   : > { %1142 = vmatpush2.bf16.msra.mxu0 %v1677_v29 }
  0x88   : > { %1143 = vmatprep.subr.bf16.mxu0 %v1682_v30 }
  0x8b   : > { %1144 = vmatpush2.bf16.msra.mxu0 %v1680_v31 }
  0x8c   : > { %1145 = vmatprep.subr.bf16.mxu0 %v1685_v32 }
  0x8f   : > { %1146 = vmatpush2.bf16.msra.mxu0 %v1683_v33 }
  0x90   : > { %1147 = vmatprep.subr.bf16.mxu0 %v1688_v34 }
  0x93   : > { %1148 = vmatpush2.bf16.msra.mxu0 %v1686_v35 }
  0x94   : > { %1149 = vmatprep.subr.bf16.mxu0 %v1691_v36 }
  0x97   : > { %1150 = vmatpush2.bf16.msra.mxu0 %v1689_v37 }
  0x98   : > { %1151 = vmatprep.subr.bf16.mxu0 %v1694_v38 }
  0x9b   : > { %1152 = vmatpush2.bf16.msra.mxu0 %v1692_v39 }
  0x9c   : > { %1153 = vmatprep.subr.bf16.mxu0 %v1697_v40 }
  0x9f   : > { %1154 = vmatpush2.bf16.msra.mxu0 %v1695_v41 }
  0xa0   : > { %1155 = vmatprep.subr.bf16.mxu0 %v1700_v42 }
  0xa3   : > { %1156 = vmatpush2.bf16.msra.mxu0 %v1698_v43 }
  0xa6   : > { %1158 = vmatmul.mubr.bf16.vlgmr.msra.gmra.mxu0 %v1701_v44 }
 0x126   : > { %v1073_v45 = vpop.f32.mrf.mxu0 }
 0x127   : > { %v1116_v46 = vpop.f32.mrf.mxu1 }
 0x128   : > { %v1075_v47 = vpop.f32.mrf.mxu0  ;;  %v1117_v52 = vadd.f32 %v1116_v46, %v1073_v45 }
 0x129   : > { %v1118_v48 = vpop.f32.mrf.mxu1 }
 0x12a   : > { %v1077_v49 = vpop.f32.mrf.mxu0  ;;  %v1119_v55 = vadd.f32 %v1118_v48, %v1075_v47 }
 0x12b   : > { %v1120_v50 = vpop.f32.mrf.mxu1 }
 0x12c   : > { %v1079_v51 = vpop.f32.mrf.mxu0  ;;  %v1121_v60 = vadd.f32 %v1120_v50, %v1077_v49 }
 0x12d   : > { %v1122_v57 = vpop.f32.mrf.mxu1 }
 0x12e   : > { %v1123_v1 = vadd.f32 %v1122_v57, %v1079_v51 }
 0x166   : > { %v1159_v54 = vpop.f32.mrf.mxu0 }
 0x167   : > { %v1160_v56 = vadd.f32 %v1159_v54, %v1117_v52 }
 0x168   : > { %v1161_v59 = vpop.f32.mrf.mxu0 }
 0x169   : > { %v1168_v61 = vadd.f32 %v1160_v56, %v423_v53  ;;  %v1162_v62 = vadd.f32 %v1161_v59, %v1119_v55 }
 0x16a   : > { %v1163_v0 = vpop.f32.mrf.mxu0 }
 0x16b   : > { %1172 = vst [vmem:[#allocation2 + $0x10] sm:$0xff] %v1168_v61  ;;  %v1169_v2 = vadd.f32 %v1162_v62, %v424_v58  ;;  %v1164_v3 = vadd.f32 %v1163_v0, %v1121_v60 }
 0x16c   : > { %v1165_v5 = vpop.f32.mrf.mxu0 }
 0x16d   : > { %1173 = vst [vmem:[#allocation2] sm:$0xff] %v1169_v2  ;;  %v1170_v6 = vadd.f32 %v1164_v3, %v425_v63  ;;  %v1166_v7 = vadd.f32 %v1165_v5, %v1123_v1  ;;  %1179 = sbr.rel (%p1501_p11) target bundleno = 388 (0x184), region = 71 }
 0x16f   : > { %1174 = vst [vmem:[#allocation2 + $0x18] sm:$0xff] %v1170_v6  ;;  %v1171_v8 = vadd.f32 %v1166_v7, %v426_v4 }
 0x171   : > { %1175 = vst [vmem:[#allocation2 + $0x8] sm:$0xff] %v1171_v8 }
 0x172   : > { %v1186_v9 = vlaneseq  ;;  %v1184_v11 = vld [vmem:[%s1980_s2] sm:$0x3]  ;;  %v1180_v13 = vld [vmem:[#allocation2 + $0x10] sm:$0xff]  ;;  %v1217_v28 = vld [vmem:[%s1982_s4 + $0x8] sm:$0xff] }
 0x173   : > { %v1200_v12 = vld [vmem:[%s1981_s3] sm:$0x3]  ;;  %v1218_v29 = vld [vmem:[%s1982_s4 + $0x10] sm:$0xff]  ;;  %v1219_v30 = vld [vmem:[%s1982_s4 + $0x18] sm:$0xff] }
 0x174   : > { %v1187_v10 = vshrl.u32 %v1186_v9, 7  ;;  %v1181_v16 = vld [vmem:[#allocation2] sm:$0xff] }
 0x175   : > { %v1216_v24 = vld [vmem:[%s1982_s4] sm:$0xff] }
 0x176   : > { %v1188_v14 = vsub.s32 0, %v1187_v10  ;;  %v1192_v15 = vsub.s32 1, %v1187_v10  ;;  %v1182_v17 = vld [vmem:[#allocation2 + $0x18] sm:$0xff] }
 0x178   : > { %v1183_v18 = vld [vmem:[#allocation2 + $0x8] sm:$0xff]  ;;  %v1189_v19 = vrot.slane %v1184_v11, %v1188_v14  ;;  %v1205_v20 = vrot.slane %v1200_v12, %v1188_v14  ;;  %v1193_v21 = vrot.slane %v1184_v11, %v1192_v15  ;;  %v1209_v22 = vrot.slane %v1200_v12, %v1192_v15 }
 0x17a   : > { %v1196_v23 = vmul.f32 %v1189_v19, %v1180_v13  ;;  %v1197_v25 = vmul.f32 %v1193_v21, %v1181_v16  ;;  %v1198_v26 = vmul.f32 %v1189_v19, %v1182_v17  ;;  %v1199_v27 = vmul.f32 %v1193_v21, %v1183_v18 }
 0x17c   : > { %v1212_v31 = vadd.f32 %v1205_v20, %v1196_v23  ;;  %v1213_v32 = vadd.f32 %v1209_v22, %v1197_v25  ;;  %v1214_v33 = vadd.f32 %v1205_v20, %v1198_v26  ;;  %v1215_v34 = vadd.f32 %v1209_v22, %v1199_v27 }
 0x17e   : > { %v1220_v35 = vadd.f32 %v1216_v24, %v1212_v31  ;;  %v1221_v36 = vadd.f32 %v1217_v28, %v1213_v32  ;;  %v1222_v37 = vadd.f32 %v1218_v29, %v1214_v33  ;;  %v1223_v38 = vadd.f32 %v1219_v30, %v1215_v34 }
 0x180   : > { %v1224_v39 = vmax.f32 %v1220_v35, 0.0  ;;  %v1225_v40 = vmax.f32 %v1221_v36, 0.0  ;;  %v1226_v41 = vmax.f32 %v1222_v37, 0.0  ;;  %v1227_v42 = vmax.f32 %v1223_v38, 0.0 }
 0x182   : > { %1228 = vst [vmem:[%s1983_s5] sm:$0xff] %v1224_v39  ;;  %1229 = vst [vmem:[%s1983_s5 + $0x8] sm:$0xff] %v1225_v40 }
 0x183   : > { %1230 = vst [vmem:[%s1983_s5 + $0x10] sm:$0xff] %v1226_v41  ;;  %1231 = vst [vmem:[%s1983_s5 + $0x18] sm:$0xff] %v1227_v42 }
 0x184 PF: > { %s15_s22 = sadd.s32 1, %s1742_s22   ;;  %s1984_s18 = smov %s1730_s19 }
 0x185   : > { %p12_p12 = scmp.ge.s32.totalorder %s15_s22, 5   ;;  %s1985_s19 = smov %s1810_s26 }
 0x186   : > { %s1986_s20 = smov %s1738_s21  ;;  %s1987_s21 = smov %s1989_s23 }
 0x187   :  { %14 = sbr.rel (!%p12_p12) target bundleno = 3 (0x3), region = 118 }

// kernel: multitask_resnet_forward.34
= control target key start
LH: loop header
LB: loop body
LE: loop exit
PB: predicated region body
PF: predicated region fallthrough
CT: control target
= control target key end

     0   :  { %s1672_s15 = smov 0   ;;  %s1674_s16 = smov 0   ;;  %s1863_s0 = inlined_call_operand.vmem [shape: bf16[16,2304], index: 0, kind: input, shape index: {}]   ;;  %s1864_s1 = inlined_call_operand.vmem [shape: bf16[2304,256], index: 1, kind: input, shape index: {}]   ;;  %s1865_s2 = inlined_call_operand.vmem [shape: f32[1,256], index: 2, kind: input, shape index: {}]   ;;  %s1866_s3 = inlined_call_operand.vmem [shape: f32[1,256], index: 3, kind: input, shape index: {}]   ;;  %s1867_s4 = inlined_call_operand.vmem [shape: f32[16,256], index: 4, kind: output, shape index: {}]  }
   0x1   :  { %s1676_s17 = smov 0   ;;  %s1678_s18 = smov 0  }
   0x2   :  { %s1680_s19 = smov 0  }
   0x3 LB: > { %s26_s20 = sadd.s32 1, %s1640_s18  ;;  %p49_p1 = scmp.ne.s32.totalorder %s1632_s16, %s1628_s15  ;;  %s1644_s19 = sphi %s1680_s19, %s14_s19   ;;  %s1640_s18 = sphi %s1678_s18, %s1871_s18   ;;  %s1636_s17 = sphi %s1676_s17, %s1870_s17   ;;  %s1632_s16 = sphi %s1674_s16, %s1869_s16   ;;  %s1628_s15 = sphi %s1672_s15, %s1868_s15  }
   0x4   : > { %p27_p0 = scmp.ge.s32.totalorder %s26_s20, 3  ;;  %p50_p2 = scmp.eq.s32.totalorder %s1644_s19, 0 }
   0x5   : > { %s42_s22 = sadd.s32 1, %s1632_s16  ;;  %p1295_p5 = scmp.ge.s32.totalorder %s1644_s19, 3 }
   0x6   : > { %s1873_s20 = smov (%p27_p0, %s26_s20), 0  ;;  %p51_p3 = por %p50_p2, %p49_p1 }
   0x7   : > { %s38_s21 = ssub.s32 %s1640_s18, %s1873_s20  ;;  %199 = sbr.rel (%p1295_p5) target bundleno = 20 (0x14), region = 24 }
   0x8   : > { %p40_p4 = scmp.eq.s32.totalorder %s38_s21, 0 }
   0xa   : > { %s1707_s23 = scalar_select %p40_p4, %s1632_s16, %s42_s22  }
   0xc   : > { %202 = sbr.rel (!%p51_p3) target bundleno = 20 (0x14), region = 28  ;;  %s204_s24 = sand.u32 (%p51_p3), 1, %s1632_s16  }
   0xd   : > { %s1408_s25 = smul.u32 (%p51_p3), 24, %s1640_s18 }
   0xe   : > { %s1410_s26 = smul.u32 (%p51_p3), 48, %s204_s24 }
   0xf   : > { %s212_s29 = scalar_lea.vmem (%p51_p3), %s1863_s0, %s1408_s25 }
  0x10   : > { %v225_v0 = vld [vmem:[%s212_s29] sm:$0xff] (%p51_p3)  ;;  %v227_v1 = vld [vmem:[%s212_s29 + $0x8] sm:$0xff] (%p51_p3)  ;;  %v229_v2 = vld [vmem:[%s212_s29 + $0x10] sm:$0xff] (%p51_p3)  ;;  %s206_s30 = scalar_lea.vmem (%p51_p3), [#allocation3], %s1410_s26 }
  0x11   : > { %226 = vst [vmem:[%s206_s30] sm:$0xff] %v225_v0  ;;  %228 = vst [vmem:[%s206_s30 + $0x8] sm:$0xff] %v227_v1  ;;  %v231_v3 = vld [vmem:[%s212_s29 + $0x48] sm:$0xff]  ;;  %v233_v4 = vld [vmem:[%s212_s29 + $0x50] sm:$0xff] }
  0x12   : > { %230 = vst [vmem:[%s206_s30 + $0x10] sm:$0xff] %v229_v2  ;;  %v235_v5 = vld [vmem:[%s212_s29 + $0x58] sm:$0xff]  ;;  %232 = vst [vmem:[%s206_s30 + $0x18] sm:$0xff] %v231_v3 }
  0x13   : > { %234 = vst [vmem:[%s206_s30 + $0x20] sm:$0xff] %v233_v4  ;;  %236 = vst [vmem:[%s206_s30 + $0x28] sm:$0xff] %v235_v5 }
  0x14 PF: > { %p1297_p6 = scmp.ge.s32.totalorder %s1644_s19, 1  ;;  %p256_p7 = scmp.lt.s32.totalorder %s1644_s19, 4 }
  0x16   : > { %p257_p8 = pnand %p1297_p6, %p256_p7 }
  0x17   : > { %s263_s5 = sand.u32 (!%p257_p8), 1, %s1628_s15   ;;  %s313_s6 = smul.u32 (!%p257_p8), 96, %s1636_s17 }
  0x18   : > { %260 = sbr.rel (%p257_p8) target bundleno = 386 (0x182), region = 55  ;;  %p1300_p10 = scmp.ne.s32.totalorder (!%p257_p8), %s1636_s17, 0 }
  0x19   : > { %s1411_s7 = smul.u32 (!%p257_p8), 48, %s263_s5  ;;  %p315_p9 = scmp.lt.s32.totalorder (!%p257_p8), %s313_s6, 287 }
  0x1b   : > { %s1724_s12 = scalar_lea.vmem (!%p257_p8), [#allocation3], %s1411_s7 }
  0x1d   : > { %s1875_s6 = smov (!%p315_p9, %s313_s6), 287  ;;  %350 = sbr.rel (%p1300_p10) target bundleno = 37 (0x25), region = 63 }
  0x1e   : > { %s1409_s8 = sshll.u32 %s1875_s6, 3 }
  0x1f   : > { %s1722_s11 = scalar_lea.vmem %s1864_s1, %s1409_s8 }
  0x22   : > { %v1646_v6 = vmov 0.0  }
  0x23   : > { %351 = vst [vmem:[#allocation2 + $0x10] sm:$0xff] %v1646_v6  ;;  %352 = vst [vmem:[#allocation2] sm:$0xff] %v1646_v6 }
  0x24   : > { %353 = vst [vmem:[#allocation2 + $0x18] sm:$0xff] %v1646_v6  ;;  %354 = vst [vmem:[#allocation2 + $0x8] sm:$0xff] %v1646_v6 }
  0x25 PF: > { %v1453_v7 = vld [vmem:[%s1722_s11 + $0x74] ss:$8 sps:$4 sm:$0xff]   ;;  %v1457_v9 = vld [vmem:[%s1722_s11 + $0x70] ss:$8 sps:$4 sm:$0xff]   ;;  %v1459_v11 = vld [vmem:[%s1722_s11 + $0x64] ss:$8 sps:$4 sm:$0xff]  }
  0x26   : > { %v1455_v8 = vld [vmem:[%s1722_s11 + $0x174] ss:$8 sps:$4 sm:$0xff]   ;;  %971 = vmatprep.subr.bf16.mxu0 %v1453_v7  ;;  %v1458_v10 = vld [vmem:[%s1722_s11 + $0x170] ss:$8 sps:$4 sm:$0xff]   ;;  %v1461_v12 = vld [vmem:[%s1722_s11 + $0x164] ss:$8 sps:$4 sm:$0xff]  }
  0x27   : > { %1014 = vmatprep.subr.bf16.mxu1 %v1455_v8  ;;  %972 = vmatpush1.bf16.msra.mxu0 %v1457_v9  ;;  %v1463_v13 = vld [vmem:[%s1722_s11 + $0x60] ss:$8 sps:$4 sm:$0xff]   ;;  %v1465_v15 = vld [vmem:[%s1722_s11 + $0x54] ss:$8 sps:$4 sm:$0xff]   ;;  %v1469_v17 = vld [vmem:[%s1722_s11 + $0x50] ss:$8 sps:$4 sm:$0xff]  }
  0x28   : > { %1015 = vmatpush1.bf16.msra.mxu1 %v1458_v10  ;;  %973 = vmatprep.subr.bf16.mxu0 %v1459_v11  ;;  %v1464_v14 = vld [vmem:[%s1722_s11 + $0x160] ss:$8 sps:$4 sm:$0xff]   ;;  %v1467_v16 = vld [vmem:[%s1722_s11 + $0x154] ss:$8 sps:$4 sm:$0xff]   ;;  %v1470_v18 = vld [vmem:[%s1722_s11 + $0x150] ss:$8 sps:$4 sm:$0xff]  }
  0x29   : > { %1016 = vmatprep.subr.bf16.mxu1 %v1461_v12  ;;  %v1471_v19 = vld [vmem:[%s1722_s11 + $0x44] ss:$8 sps:$4 sm:$0xff]   ;;  %v1475_v21 = vld [vmem:[%s1722_s11 + $0x40] ss:$8 sps:$4 sm:$0xff]   ;;  %v1477_v23 = vld [vmem:[%s1722_s11 + $0x34] ss:$8 sps:$4 sm:$0xff]  }
  0x2a   : > { %v1473_v20 = vld [vmem:[%s1722_s11 + $0x144] ss:$8 sps:$4 sm:$0xff]   ;;  %v1476_v22 = vld [vmem:[%s1722_s11 + $0x140] ss:$8 sps:$4 sm:$0xff]   ;;  %v1479_v24 = vld [vmem:[%s1722_s11 + $0x134] ss:$8 sps:$4 sm:$0xff]  }
  0x2b   : > { %974 = vmatpush1.bf16.msra.mxu0 %v1463_v13  ;;  %v1481_v25 = vld [vmem:[%s1722_s11 + $0x30] ss:$8 sps:$4 sm:$0xff]   ;;  %v1483_v27 = vld [vmem:[%s1722_s11 + $0x24] ss:$8 sps:$4 sm:$0xff]   ;;  %v1487_v29 = vld [vmem:[%s1722_s11 + $0x20] ss:$8 sps:$4 sm:$0xff]  }
  0x2c   : > { %1017 = vmatpush1.bf16.msra.mxu1 %v1464_v14  ;;  %975 = vmatprep.subr.bf16.mxu0 %v1465_v15  ;;  %v1482_v26 = vld [vmem:[%s1722_s11 + $0x130] ss:$8 sps:$4 sm:$0xff]   ;;  %v1485_v28 = vld [vmem:[%s1722_s11 + $0x124] ss:$8 sps:$4 sm:$0xff]   ;;  %v1488_v30 = vld [vmem:[%s1722_s11 + $0x120] ss:$8 sps:$4 sm:$0xff]  }
  0x2d   : > { %1018 = vmatprep.subr.bf16.mxu1 %v1467_v16  ;;  %v1489_v31 = vld [vmem:[%s1722_s11 + $0x14] ss:$8 sps:$4 sm:$0xff]   ;;  %v1493_v33 = vld [vmem:[%s1722_s11 + $0x10] ss:$8 sps:$4 sm:$0xff]   ;;  %v1495_v35 = vld [vmem:[%s1722_s11 + $0x4] ss:$8 sps:$4 sm:$0xff]  }
  0x2e   : > { %v1491_v32 = vld [vmem:[%s1722_s11 + $0x114] ss:$8 sps:$4 sm:$0xff]   ;;  %v1494_v34 = vld [vmem:[%s1722_s11 + $0x110] ss:$8 sps:$4 sm:$0xff]   ;;  %v1497_v36 = vld [vmem:[%s1722_s11 + $0x104] ss:$8 sps:$4 sm:$0xff]  }
  0x2f   : > { %976 = vmatpush1.bf16.msra.mxu0 %v1469_v17  ;;  %v1499_v37 = vld [vmem:[%s1722_s11] ss:$8 sps:$4 sm:$0xff]   ;;  %v1501_v39 = vld [vmem:[%s1722_s11 + $0xf4] ss:$8 sps:$4 sm:$0xff]   ;;  %v1505_v41 = vld [vmem:[%s1722_s11 + $0xf0] ss:$8 sps:$4 sm:$0xff]  }
  0x30   : > { %1019 = vmatpush1.bf16.msra.mxu1 %v1470_v18  ;;  %977 = vmatprep.subr.bf16.mxu0 %v1471_v19  ;;  %v1500_v38 = vld [vmem:[%s1722_s11 + $0x100] ss:$8 sps:$4 sm:$0xff]   ;;  %v1503_v40 = vld [vmem:[%s1722_s11 + $0x1f4] ss:$8 sps:$4 sm:$0xff]   ;;  %v1506_v42 = vld [vmem:[%s1722_s11 + $0x1f0] ss:$8 sps:$4 sm:$0xff]  }
  0x31   : > { %1020 = vmatprep.subr.bf16.mxu1 %v1473_v20  ;;  %v1507_v43 = vld [vmem:[%s1722_s11 + $0xe4] ss:$8 sps:$4 sm:$0xff]   ;;  %v1511_v45 = vld [vmem:[%s1722_s11 + $0xe0] ss:$8 sps:$4 sm:$0xff]   ;;  %v1513_v47 = vld [vmem:[%s1722_s11 + $0xd4] ss:$8 sps:$4 sm:$0xff]  }
  0x32   : > { %v1509_v44 = vld [vmem:[%s1722_s11 + $0x1e4] ss:$8 sps:$4 sm:$0xff]   ;;  %v1512_v46 = vld [vmem:[%s1722_s11 + $0x1e0] ss:$8 sps:$4 sm:$0xff]   ;;  %v1515_v48 = vld [vmem:[%s1722_s11 + $0x1d4] ss:$8 sps:$4 sm:$0xff]  }
  0x33   : > { %978 = vmatpush1.bf16.msra.mxu0 %v1475_v21  ;;  %v1517_v49 = vld [vmem:[%s1722_s11 + $0xd0] ss:$8 sps:$4 sm:$0xff]   ;;  %v1519_v51 = vld [vmem:[%s1722_s11 + $0xc4] ss:$8 sps:$4 sm:$0xff]   ;;  %v1523_v53 = vld [vmem:[%s1722_s11 + $0xc0] ss:$8 sps:$4 sm:$0xff]  }
  0x34   : > { %1021 = vmatpush1.bf16.msra.mxu1 %v1476_v22  ;;  %979 = vmatprep.subr.bf16.mxu0 %v1477_v23  ;;  %v1518_v50 = vld [vmem:[%s1722_s11 + $0x1d0] ss:$8 sps:$4 sm:$0xff]   ;;  %v1521_v52 = vld [vmem:[%s1722_s11 + $0x1c4] ss:$8 sps:$4 sm:$0xff]   ;;  %v1524_v54 = vld [vmem:[%s1722_s11 + $0x1c0] ss:$8 sps:$4 sm:$0xff]  }
  0x35   : > { %1022 = vmatprep.subr.bf16.mxu1 %v1479_v24  ;;  %v1525_v55 = vld [vmem:[%s1722_s11 + $0xb4] ss:$8 sps:$4 sm:$0xff]   ;;  %v1529_v59 = vld [vmem:[%s1722_s11 + $0xb0] ss:$8 sps:$4 sm:$0xff]   ;;  %v1531_v61 = vld [vmem:[%s1722_s11 + $0xa4] ss:$8 sps:$4 sm:$0xff]  }
  0x36   : > { %v1551_v56 = vld [vmem:[%s1724_s12 + $0x4] ss:$24 sps:$4 sm:$0xff]   ;;  %v1530_v60 = vld [vmem:[%s1722_s11 + $0x1b0] ss:$8 sps:$4 sm:$0xff]   ;;  %v1535_v63 = vld [vmem:[%s1722_s11 + $0xa0] ss:$8 sps:$4 sm:$0xff]  }
  0x37   : > { %980 = vmatpush1.bf16.msra.mxu0 %v1481_v25  ;;  %v1527_v57 = vld [vmem:[%s1722_s11 + $0x1b4] ss:$8 sps:$4 sm:$0xff]   ;;  %1003 = vmatprep.mubr.bf16.mxu0 %v1551_v56  ;;  %v1533_v62 = vld [vmem:[%s1722_s11 + $0x1a4] ss:$8 sps:$4 sm:$0xff]   ;;  %v1536_v0 = vld [vmem:[%s1722_s11 + $0x1a0] ss:$8 sps:$4 sm:$0xff]  }
  0x38   : > { %1023 = vmatpush1.bf16.msra.mxu1 %v1482_v26  ;;  %981 = vmatprep.subr.bf16.mxu0 %v1483_v27  ;;  %v1554_v58 = vld [vmem:[%s1724_s12 + $0xc] ss:$24 sps:$4 sm:$0xff]   ;;  %v1541_v3 = vld [vmem:[%s1722_s11 + $0x90] ss:$8 sps:$4 sm:$0xff]   ;;  %v1547_v7 = vld [vmem:[%s1722_s11 + $0x80] ss:$8 sps:$4 sm:$0xff]  }
  0x39   : > { %1024 = vmatprep.subr.bf16.mxu1 %v1485_v28  ;;  %1046 = vmatprep.mubr.bf16.mxu1 %v1554_v58  ;;  %v1537_v1 = vld [vmem:[%s1722_s11 + $0x94] ss:$8 sps:$4 sm:$0xff]   ;;  %v1542_v4 = vld [vmem:[%s1722_s11 + $0x190] ss:$8 sps:$4 sm:$0xff]   ;;  %v1543_v5 = vld [vmem:[%s1722_s11 + $0x84] ss:$8 sps:$4 sm:$0xff]  }
  0x3a   : > { %v1539_v2 = vld [vmem:[%s1722_s11 + $0x194] ss:$8 sps:$4 sm:$0xff]   ;;  %v1545_v6 = vld [vmem:[%s1722_s11 + $0x184] ss:$8 sps:$4 sm:$0xff]   ;;  %v1548_v8 = vld [vmem:[%s1722_s11 + $0x180] ss:$8 sps:$4 sm:$0xff]  }
  0x3b   : > { %982 = vmatpush1.bf16.msra.mxu0 %v1487_v29  ;;  %v1557_v9 = vld [vmem:[%s1722_s11 + $0x274] ss:$8 sps:$4 sm:$0xff]   ;;  %v1549_v10 = vld [vmem:[%s1724_s12] ss:$24 sps:$4 sm:$0xff]   ;;  %v1560_v13 = vld [vmem:[%s1722_s11 + $0x264] ss:$8 sps:$4 sm:$0xff]  }
  0x3c   : > { %1025 = vmatpush1.bf16.msra.mxu1 %v1488_v30  ;;  %983 = vmatprep.subr.bf16.mxu0 %v1489_v31  ;;  %v1552_v11 = vld [vmem:[%s1724_s12 + $0x8] ss:$24 sps:$4 sm:$0xff]   ;;  %v1605_v14 = vld [vmem:[%s1724_s12 + $0x14] ss:$24 sps:$4 sm:$0xff]   ;;  %p1403_p11 = scmp.ne.s32.totalorder %s1636_s17, 2 }
  0x3d   : > { %1026 = vmatprep.subr.bf16.mxu1 %v1491_v32  ;;  %v1555_v12 = vld [vmem:[%s1722_s11 + $0x270] ss:$8 sps:$4 sm:$0xff]   ;;  %v1558_v15 = vld [vmem:[%s1722_s11 + $0x260] ss:$8 sps:$4 sm:$0xff]   ;;  %v1563_v16 = vld [vmem:[%s1722_s11 + $0x254] ss:$8 sps:$4 sm:$0xff]  }
  0x3e   : > { %v1561_v17 = vld [vmem:[%s1722_s11 + $0x250] ss:$8 sps:$4 sm:$0xff]   ;;  %v1566_v18 = vld [vmem:[%s1722_s11 + $0x244] ss:$8 sps:$4 sm:$0xff]   ;;  %v1564_v19 = vld [vmem:[%s1722_s11 + $0x240] ss:$8 sps:$4 sm:$0xff]  }
  0x3f   : > { %984 = vmatpush1.bf16.msra.mxu0 %v1493_v33  ;;  %v1569_v20 = vld [vmem:[%s1722_s11 + $0x234] ss:$8 sps:$4 sm:$0xff]   ;;  %v1567_v21 = vld [vmem:[%s1722_s11 + $0x230] ss:$8 sps:$4 sm:$0xff]   ;;  %v1572_v22 = vld [vmem:[%s1722_s11 + $0x224] ss:$8 sps:$4 sm:$0xff]  }
  0x40   : > { %1027 = vmatpush1.bf16.msra.mxu1 %v1494_v34  ;;  %985 = vmatprep.subr.bf16.mxu0 %v1495_v35  ;;  %v1570_v23 = vld [vmem:[%s1722_s11 + $0x220] ss:$8 sps:$4 sm:$0xff]   ;;  %v1575_v24 = vld [vmem:[%s1722_s11 + $0x214] ss:$8 sps:$4 sm:$0xff]   ;;  %v1573_v25 = vld [vmem:[%s1722_s11 + $0x210] ss:$8 sps:$4 sm:$0xff]  }
  0x41   : > { %1028 = vmatprep.subr.bf16.mxu1 %v1497_v36  ;;  %v1578_v26 = vld [vmem:[%s1722_s11 + $0x204] ss:$8 sps:$4 sm:$0xff]   ;;  %v1576_v27 = vld [vmem:[%s1722_s11 + $0x200] ss:$8 sps:$4 sm:$0xff]   ;;  %v1581_v28 = vld [vmem:[%s1722_s11 + $0x2f4] ss:$8 sps:$4 sm:$0xff]  }
  0x42   : > { %v1579_v29 = vld [vmem:[%s1722_s11 + $0x2f0] ss:$8 sps:$4 sm:$0xff]   ;;  %v1584_v30 = vld [vmem:[%s1722_s11 + $0x2e4] ss:$8 sps:$4 sm:$0xff]   ;;  %v1582_v31 = vld [vmem:[%s1722_s11 + $0x2e0] ss:$8 sps:$4 sm:$0xff]  }
  0x43   : > { %986 = vmatpush1.bf16.msra.mxu0 %v1499_v37  ;;  %v1587_v32 = vld [vmem:[%s1722_s11 + $0x2d4] ss:$8 sps:$4 sm:$0xff]   ;;  %v1585_v33 = vld [vmem:[%s1722_s11 + $0x2d0] ss:$8 sps:$4 sm:$0xff]   ;;  %v1590_v34 = vld [vmem:[%s1722_s11 + $0x2c4] ss:$8 sps:$4 sm:$0xff]  }
  0x44   : > { %1029 = vmatpush1.bf16.msra.mxu1 %v1500_v38  ;;  %987 = vmatprep.subr.bf16.mxu0 %v1501_v39  ;;  %v1588_v35 = vld [vmem:[%s1722_s11 + $0x2c0] ss:$8 sps:$4 sm:$0xff]   ;;  %v1593_v36 = vld [vmem:[%s1722_s11 + $0x2b4] ss:$8 sps:$4 sm:$0xff]   ;;  %v1591_v37 = vld [vmem:[%s1722_s11 + $0x2b0] ss:$8 sps:$4 sm:$0xff]  }
  0x45   : > { %1030 = vmatprep.subr.bf16.mxu1 %v1503_v40  ;;  %v1596_v38 = vld [vmem:[%s1722_s11 + $0x2a4] ss:$8 sps:$4 sm:$0xff]   ;;  %v1594_v39 = vld [vmem:[%s1722_s11 + $0x2a0] ss:$8 sps:$4 sm:$0xff]   ;;  %v1599_v40 = vld [vmem:[%s1722_s11 + $0x294] ss:$8 sps:$4 sm:$0xff]  }
  0x46   : > { %v356_v58 = vld [vmem:[#allocation2] sm:$0xff] }
  0x47   : > { %988 = vmatpush2.bf16.msra.mxu0 %v1505_v41  ;;  %v1597_v41 = vld [vmem:[%s1722_s11 + $0x290] ss:$8 sps:$4 sm:$0xff]  }
  0x48   : > { %1031 = vmatpush2.bf16.msra.mxu1 %v1506_v42  ;;  %989 = vmatprep.subr.bf16.mxu0 %v1507_v43  ;;  %v1602_v42 = vld [vmem:[%s1722_s11 + $0x284] ss:$8 sps:$4 sm:$0xff]   ;;  %v1600_v43 = vld [vmem:[%s1722_s11 + $0x280] ss:$8 sps:$4 sm:$0xff]  }
  0x49   : > { %1032 = vmatprep.subr.bf16.mxu1 %v1509_v44  ;;  %v1603_v44 = vld [vmem:[%s1724_s12 + $0x10] ss:$24 sps:$4 sm:$0xff]  }
  0x4b   : > { %990 = vmatpush2.bf16.msra.mxu0 %v1511_v45 }
  0x4c   : > { %1033 = vmatpush2.bf16.msra.mxu1 %v1512_v46  ;;  %991 = vmatprep.subr.bf16.mxu0 %v1513_v47 }
  0x4d   : > { %1034 = vmatprep.subr.bf16.mxu1 %v1515_v48 }
  0x4f   : > { %992 = vmatpush2.bf16.msra.mxu0 %v1517_v49 }
  0x50   : > { %1035 = vmatpush2.bf16.msra.mxu1 %v1518_v50  ;;  %993 = vmatprep.subr.bf16.mxu0 %v1519_v51 }
  0x51   : > { %1036 = vmatprep.subr.bf16.mxu1 %v1521_v52 }
  0x53   : > { %994 = vmatpush2.bf16.msra.mxu0 %v1523_v53  ;;  %v355_v53 = vld [vmem:[#allocation2 + $0x10] sm:$0xff] }
  0x54   : > { %1037 = vmatpush2.bf16.msra.mxu1 %v1524_v54  ;;  %995 = vmatprep.subr.bf16.mxu0 %v1525_v55 }
  0x55   : > { %1038 = vmatprep.subr.bf16.mxu1 %v1527_v57 }
  0x57   : > { %996 = vmatpush2.bf16.msra.mxu0 %v1529_v59 }
  0x58   : > { %1039 = vmatpush2.bf16.msra.mxu1 %v1530_v60  ;;  %997 = vmatprep.subr.bf16.mxu0 %v1531_v61 }
  0x59   : > { %1040 = vmatprep.subr.bf16.mxu1 %v1533_v62 }
  0x5b   : > { %998 = vmatpush2.bf16.msra.mxu0 %v1535_v63  ;;  %v357_v63 = vld [vmem:[#allocation2 + $0x18] sm:$0xff] }
  0x5c   : > { %1041 = vmatpush2.bf16.msra.mxu1 %v1536_v0  ;;  %999 = vmatprep.subr.bf16.mxu0 %v1537_v1 }
  0x5d   : > { %1042 = vmatprep.subr.bf16.mxu1 %v1539_v2 }
  0x5f   : > { %1000 = vmatpush2.bf16.msra.mxu0 %v1541_v3 }
  0x60   : > { %1043 = vmatpush2.bf16.msra.mxu1 %v1542_v4  ;;  %1001 = vmatprep.subr.bf16.mxu0 %v1543_v5  ;;  %v358_v4 = vld [vmem:[#allocation2 + $0x8] sm:$0xff] }
  0x61   : > { %1044 = vmatprep.subr.bf16.mxu1 %v1545_v6 }
  0x63   : > { %1002 = vmatpush2.bf16.msra.mxu0 %v1547_v7 }
  0x64   : > { %1045 = vmatpush2.bf16.msra.mxu1 %v1548_v8  ;;  %1057 = vmatprep.subr.bf16.mxu0 %v1557_v9 }
  0x66   : > { %1004 = vmatmul.mubr.bf16.vlgmr.msra.gmra.mxu0 %v1549_v10 }
  0x67   : > { %1047 = vmatmul.mubr.bf16.vlgmr.msra.gmra.mxu1 %v1552_v11  ;;  %1058 = vmatpush1.bf16.msra.mxu0 %v1555_v12 }
  0x68   : > { %1059 = vmatprep.subr.bf16.mxu0 %v1560_v13  ;;  %1089 = vmatprep.mubr.bf16.mxu0 %v1605_v14 }
  0x6b   : > { %1060 = vmatpush1.bf16.msra.mxu0 %v1558_v15 }
  0x6c   : > { %1061 = vmatprep.subr.bf16.mxu0 %v1563_v16 }
  0x6f   : > { %1062 = vmatpush1.bf16.msra.mxu0 %v1561_v17 }
  0x70   : > { %1063 = vmatprep.subr.bf16.mxu0 %v1566_v18 }
  0x73   : > { %1064 = vmatpush1.bf16.msra.mxu0 %v1564_v19 }
  0x74   : > { %1065 = vmatprep.subr.bf16.mxu0 %v1569_v20 }
  0x77   : > { %1066 = vmatpush1.bf16.msra.mxu0 %v1567_v21 }
  0x78   : > { %1067 = vmatprep.subr.bf16.mxu0 %v1572_v22 }
  0x7b   : > { %1068 = vmatpush1.bf16.msra.mxu0 %v1570_v23 }
  0x7c   : > { %1069 = vmatprep.subr.bf16.mxu0 %v1575_v24 }
  0x7f   : > { %1070 = vmatpush1.bf16.msra.mxu0 %v1573_v25 }
  0x80   : > { %1071 = vmatprep.subr.bf16.mxu0 %v1578_v26 }
  0x83   : > { %1072 = vmatpush1.bf16.msra.mxu0 %v1576_v27 }
  0x84   : > { %1073 = vmatprep.subr.bf16.mxu0 %v1581_v28 }
  0x87   : > { %1074 = vmatpush2.bf16.msra.mxu0 %v1579_v29 }
  0x88   : > { %1075 = vmatprep.subr.bf16.mxu0 %v1584_v30 }
  0x8b   : > { %1076 = vmatpush2.bf16.msra.mxu0 %v1582_v31 }
  0x8c   : > { %1077 = vmatprep.subr.bf16.mxu0 %v1587_v32 }
  0x8f   : > { %1078 = vmatpush2.bf16.msra.mxu0 %v1585_v33 }
  0x90   : > { %1079 = vmatprep.subr.bf16.mxu0 %v1590_v34 }
  0x93   : > { %1080 = vmatpush2.bf16.msra.mxu0 %v1588_v35 }
  0x94   : > { %1081 = vmatprep.subr.bf16.mxu0 %v1593_v36 }
  0x97   : > { %1082 = vmatpush2.bf16.msra.mxu0 %v1591_v37 }
  0x98   : > { %1083 = vmatprep.subr.bf16.mxu0 %v1596_v38 }
  0x9b   : > { %1084 = vmatpush2.bf16.msra.mxu0 %v1594_v39 }
  0x9c   : > { %1085 = vmatprep.subr.bf16.mxu0 %v1599_v40 }
  0x9f   : > { %1086 = vmatpush2.bf16.msra.mxu0 %v1597_v41 }
  0xa0   : > { %1087 = vmatprep.subr.bf16.mxu0 %v1602_v42 }
  0xa3   : > { %1088 = vmatpush2.bf16.msra.mxu0 %v1600_v43 }
  0xa6   : > { %1090 = vmatmul.mubr.bf16.vlgmr.msra.gmra.mxu0 %v1603_v44 }
 0x126   : > { %v1005_v45 = vpop.f32.mrf.mxu0 }
 0x127   : > { %v1048_v46 = vpop.f32.mrf.mxu1 }
 0x128   : > { %v1007_v47 = vpop.f32.mrf.mxu0  ;;  %v1049_v52 = vadd.f32 %v1048_v46, %v1005_v45 }
 0x129   : > { %v1050_v48 = vpop.f32.mrf.mxu1 }
 0x12a   : > { %v1009_v49 = vpop.f32.mrf.mxu0  ;;  %v1051_v55 = vadd.f32 %v1050_v48, %v1007_v47 }
 0x12b   : > { %v1052_v50 = vpop.f32.mrf.mxu1 }
 0x12c   : > { %v1011_v51 = vpop.f32.mrf.mxu0  ;;  %v1053_v60 = vadd.f32 %v1052_v50, %v1009_v49 }
 0x12d   : > { %v1054_v57 = vpop.f32.mrf.mxu1 }
 0x12e   : > { %v1055_v1 = vadd.f32 %v1054_v57, %v1011_v51 }
 0x166   : > { %v1091_v54 = vpop.f32.mrf.mxu0 }
 0x167   : > { %v1092_v56 = vadd.f32 %v1091_v54, %v1049_v52 }
 0x168   : > { %v1093_v59 = vpop.f32.mrf.mxu0 }
 0x169   : > { %v1100_v61 = vadd.f32 %v1092_v56, %v355_v53  ;;  %v1094_v62 = vadd.f32 %v1093_v59, %v1051_v55 }
 0x16a   : > { %v1095_v0 = vpop.f32.mrf.mxu0 }
 0x16b   : > { %1104 = vst [vmem:[#allocation2 + $0x10] sm:$0xff] %v1100_v61  ;;  %v1101_v2 = vadd.f32 %v1094_v62, %v356_v58  ;;  %v1096_v3 = vadd.f32 %v1095_v0, %v1053_v60 }
 0x16c   : > { %v1097_v5 = vpop.f32.mrf.mxu0 }
 0x16d   : > { %1105 = vst [vmem:[#allocation2] sm:$0xff] %v1101_v2  ;;  %v1102_v6 = vadd.f32 %v1096_v3, %v357_v63  ;;  %v1098_v7 = vadd.f32 %v1097_v5, %v1055_v1  ;;  %1111 = sbr.rel (%p1403_p11) target bundleno = 386 (0x182), region = 67 }
 0x16f   : > { %1106 = vst [vmem:[#allocation2 + $0x18] sm:$0xff] %v1102_v6  ;;  %v1103_v8 = vadd.f32 %v1098_v7, %v358_v4 }
 0x171   : > { %1107 = vst [vmem:[#allocation2 + $0x8] sm:$0xff] %v1103_v8 }
 0x172   : > { %v1118_v9 = vlaneseq  ;;  %v1116_v11 = vld [vmem:[%s1865_s2] sm:$0x3]  ;;  %v1112_v13 = vld [vmem:[#allocation2 + $0x10] sm:$0xff] }
 0x173   : > { %v1132_v12 = vld [vmem:[%s1866_s3] sm:$0x3] }
 0x174   : > { %v1119_v10 = vshrl.u32 %v1118_v9, 7  ;;  %v1113_v16 = vld [vmem:[#allocation2] sm:$0xff] }
 0x176   : > { %v1120_v14 = vsub.s32 0, %v1119_v10  ;;  %v1124_v15 = vsub.s32 1, %v1119_v10  ;;  %v1114_v17 = vld [vmem:[#allocation2 + $0x18] sm:$0xff] }
 0x178   : > { %v1115_v18 = vld [vmem:[#allocation2 + $0x8] sm:$0xff]  ;;  %v1121_v19 = vrot.slane %v1116_v11, %v1120_v14  ;;  %v1137_v20 = vrot.slane %v1132_v12, %v1120_v14  ;;  %v1125_v21 = vrot.slane %v1116_v11, %v1124_v15  ;;  %v1141_v22 = vrot.slane %v1132_v12, %v1124_v15 }
 0x17a   : > { %v1128_v23 = vmul.f32 %v1121_v19, %v1112_v13  ;;  %v1129_v24 = vmul.f32 %v1125_v21, %v1113_v16  ;;  %v1130_v25 = vmul.f32 %v1121_v19, %v1114_v17  ;;  %v1131_v26 = vmul.f32 %v1125_v21, %v1115_v18 }
 0x17c   : > { %v1144_v27 = vadd.f32 %v1137_v20, %v1128_v23  ;;  %v1145_v28 = vadd.f32 %v1141_v22, %v1129_v24  ;;  %v1146_v29 = vadd.f32 %v1137_v20, %v1130_v25  ;;  %v1147_v30 = vadd.f32 %v1141_v22, %v1131_v26 }
 0x17e   : > { %v1148_v31 = vmax.f32 %v1144_v27, 0.0  ;;  %v1149_v32 = vmax.f32 %v1145_v28, 0.0  ;;  %v1150_v33 = vmax.f32 %v1146_v29, 0.0  ;;  %v1151_v34 = vmax.f32 %v1147_v30, 0.0 }
 0x180   : > { %1152 = vst [vmem:[%s1867_s4] sm:$0xff] %v1148_v31  ;;  %1153 = vst [vmem:[%s1867_s4 + $0x8] sm:$0xff] %v1149_v32 }
 0x181   : > { %1154 = vst [vmem:[%s1867_s4 + $0x10] sm:$0xff] %v1150_v33  ;;  %1155 = vst [vmem:[%s1867_s4 + $0x18] sm:$0xff] %v1151_v34 }
 0x182 PF: > { %s14_s19 = sadd.s32 1, %s1644_s19   ;;  %s1868_s15 = smov %s1632_s16 }
 0x183   : > { %p11_p12 = scmp.ge.s32.totalorder %s14_s19, 5   ;;  %s1869_s16 = smov %s1707_s23 }
 0x184   : > { %s1870_s17 = smov %s1640_s18  ;;  %s1871_s18 = smov %s1873_s20 }
 0x185   :  { %13 = sbr.rel (!%p11_p12) target bundleno = 3 (0x3), region = 111 }

// kernel: multitask_resnet_forward.36
= control target key start
LH: loop header
LB: loop body
LE: loop exit
PB: predicated region body
PF: predicated region fallthrough
CT: control target
= control target key end

     0   :  { %s2671_s0 = inlined_call_operand.vmem [shape: bf16[16,2304], index: 0, kind: input, shape index: {}]   ;;  %s2672_s1 = inlined_call_operand.vmem [shape: bf16[2304,512], index: 1, kind: input, shape index: {}]   ;;  %s2673_s2 = inlined_call_operand.vmem [shape: f32[1,512], index: 2, kind: input, shape index: {}]   ;;  %s2674_s3 = inlined_call_operand.vmem [shape: f32[1,512], index: 3, kind: input, shape index: {}]   ;;  %s2675_s4 = inlined_call_operand.vmem [shape: f32[16,512], index: 4, kind: output, shape index: {}]  }
   0x1   :  { %2678 = sst [smem:[#allocation8_spill]] %s2671_s0 }
   0x2   :  { %2679 = sst [smem:[#allocation9_spill]] %s2672_s1 }
   0x3   :  { %s2178_s15 = smov 0   ;;  %s2180_s16 = smov 0  }
   0x4   :  { %s2182_s17 = smov 0   ;;  %s2184_s18 = smov 0  }
   0x5   :  { %s2186_s19 = smov 0   ;;  %s2188_s20 = smov 0  }
   0x6   :  { %s2190_s21 = smov 0   ;;  %s2192_s22 = smov 0  }
   0x7   :  { %s2194_s23 = smov 0   ;;  %s2196_s24 = smov 0  }
   0x8   :  { %s2198_s25 = smov 0  }
   0x9 LB: > { %s1694_s26 = sadd.s32 4294967295, %s2150_s25   ;;  %s26_s27 = sadd.s32 1, %s2142_s23  ;;  %s2150_s25 = sphi %s2198_s25, %s14_s25   ;;  %s2146_s24 = sphi %s2196_s24, %s2698_s24   ;;  %s2142_s23 = sphi %s2194_s23, %s2697_s23   ;;  %s2138_s22 = sphi %s2192_s22, %s2696_s22   ;;  %s2134_s21 = sphi %s2190_s21, %s2695_s21   ;;  %s2130_s20 = sphi %s2188_s20, %s2694_s20   ;;  %s2126_s19 = sphi %s2186_s19, %s2693_s19   ;;  %s2122_s18 = sphi %s2184_s18, %s2692_s18   ;;  %s2118_s17 = sphi %s2182_s17, %s2691_s17   ;;  %s2114_s16 = sphi %s2180_s16, %s2690_s16   ;;  %s2110_s15 = sphi %s2178_s15, %s2689_s15  }
   0xa   : > { %p27_p0 = scmp.ge.s32.totalorder %s26_s27, 3  ;;  %s29_s28 = sadd.s32 1, %s2146_s24 }
   0xb   : > { %s42_s29 = sadd.s32 1, %s2130_s20  ;;  %p49_p1 = scmp.ne.s32.totalorder %s2130_s20, %s2126_s19 }
   0xc   : > { %s2700_s27 = smov (%p27_p0, %s26_s27), 0  ;;  %s2702_s28 = smov (!%p27_p0, %s29_s28), %s2146_s24 }
   0xd   : > { %2680 = sst [smem:[#allocation6_spill]] %s2700_s27  ;;  %s38_s30 = ssub.s32 %s2142_s23, %s2700_s27 }
   0xe   : > { %p50_p2 = scmp.eq.s32.totalorder %s2150_s25, 0  ;;  %p31_p3 = scmp.ge.s32.totalorder %s2702_s28, 2 }
   0xf   : > { %p40_p4 = scmp.eq.s32.totalorder %s38_s30, 0  ;;  %s70_s6 = sadd.s32 1, %s2122_s18 }
  0x10   : > { %p2245_p5 = por %p50_p2, %p49_p1  ;;  %s2704_s28 = smov (%p31_p3, %s2702_s28), 0 }
  0x11   : > { %2682 = sst [smem:[#allocation7_spill]] %s2704_s28  ;;  %s66_s8 = ssub.s32 %s2146_s24, %s2704_s28 }
  0x12   : > { %s2253_s7 = scalar_select %p40_p4, %s2130_s20, %s42_s29  }
  0x13   : > { %p77_p6 = scmp.ne.s32.totalorder %s2122_s18, %s2118_s17  ;;  %s67_s9 = sor.u32 %s66_s8, %s38_s30 }
  0x14   : > { %p148_p7 = scmp.eq.s32.totalorder %s66_s8, 0  ;;  %p68_p8 = scmp.eq.s32.totalorder %s67_s9, 0 }
  0x15   : > { %p2259_p9 = por %p77_p6, %p50_p2  ;;  %s150_s11 = sadd.s32 1, %s2114_s16 }
  0x16   : > { %p160_p10 = scmp.ne.s32.totalorder %s2114_s16, %s2110_s15  ;;  %p161_p11 = scmp.eq.s32.totalorder %s1694_s26, 5 }
  0x17   : > { %s2267_s12 = scalar_select %p68_p8, %s2122_s18, %s70_s6  }
  0x18   : > { %s2270_s13 = scalar_select %p148_p7, %s2114_s16, %s150_s11  }
  0x19   : > { %p2272_p12 = por %p161_p11, %p160_p10  ;;  %p1697_p13 = scmp.ge.s32.totalorder %s2150_s25, 6 }
  0x1b   : > { %183 = sbr.rel (%p1697_p13) target bundleno = 102 (0x66), region = 16 }
  0x20   : > { %186 = sbr.rel (!%p2245_p5) target bundleno = 44 (0x2c), region = 20  ;;  %s188_s29 = sand.u32 (%p2245_p5), 1, %s2130_s20  }
  0x21   : > { %s1815_s30 = smul.u32 (%p2245_p5), 24, %s2142_s23  ;;  %s2685_s0 = sld [smem:[#allocation8_spill]] (%p2245_p5) }
  0x22   : > { %s1818_s8 = smul.u32 (%p2245_p5), 48, %s188_s29 }
  0x24   : > { %s190_s26 = scalar_lea.vmem (%p2245_p5), [#allocation3], %s1818_s8 }
  0x27   : > { %s196_s11 = scalar_lea.vmem %s2685_s0, %s1815_s30 }
  0x28   : > { %v209_v0 = vld [vmem:[%s196_s11] sm:$0xff]  ;;  %v211_v1 = vld [vmem:[%s196_s11 + $0x8] sm:$0xff]  ;;  %v213_v2 = vld [vmem:[%s196_s11 + $0x10] sm:$0xff] }
  0x29   : > { %210 = vst [vmem:[%s190_s26] sm:$0xff] %v209_v0  ;;  %212 = vst [vmem:[%s190_s26 + $0x8] sm:$0xff] %v211_v1  ;;  %v215_v3 = vld [vmem:[%s196_s11 + $0x48] sm:$0xff]  ;;  %v217_v4 = vld [vmem:[%s196_s11 + $0x50] sm:$0xff] }
  0x2a   : > { %214 = vst [vmem:[%s190_s26 + $0x10] sm:$0xff] %v213_v2  ;;  %v219_v5 = vld [vmem:[%s196_s11 + $0x58] sm:$0xff]  ;;  %216 = vst [vmem:[%s190_s26 + $0x18] sm:$0xff] %v215_v3 }
  0x2b   : > { %218 = vst [vmem:[%s190_s26 + $0x20] sm:$0xff] %v217_v4  ;;  %220 = vst [vmem:[%s190_s26 + $0x28] sm:$0xff] %v219_v5 }
  0x2c PF: > { %226 = sbr.rel (!%p2259_p9) target bundleno = 102 (0x66), region = 43  ;;  %s228_s5 = sand.u32 (%p2259_p9), 1, %s2122_s18  }
  0x2d   : > { %s1819_s29 = smul.u32 (%p2259_p9), 768, %s228_s5  ;;  %s1699_s30 = sshll.u32 (%p2259_p9), %s2146_s24, 1 }
  0x2e   : > { %s1816_s8 = smul.u32 (%p2259_p9), 384, %s2142_s23  ;;  %s2686_s1 = sld [smem:[#allocation9_spill]] (%p2259_p9) }
  0x2f   : > { %s2297_s10 = scalar_lea.vmem (%p2259_p9), [#allocation4], %s1819_s29 }
  0x30   : > { %s234_s6 = sadd.s32 (%p2259_p9), %s1816_s8, %s1699_s30 }
  0x31   : > { %s1701_s9 = sshll.u32 %s234_s6, 2 }
  0x34   : > { %s2292_s11 = scalar_lea.vmem %s2686_s1, %s1701_s9 }
  0x35   : > { %v455_v6 = vld [vmem:[%s2292_s11] sm:$0xff]  ;;  %v457_v7 = vld [vmem:[%s2292_s11 + $0x10] sm:$0xff] }
  0x36   : > { %v459_v8 = vld [vmem:[%s2292_s11 + $0x20] sm:$0xff]  ;;  %456 = vst [vmem:[%s2297_s10] sm:$0xff] %v455_v6  ;;  %458 = vst [vmem:[%s2297_s10 + $0x8] sm:$0xff] %v457_v7  ;;  %v461_v9 = vld [vmem:[%s2292_s11 + $0x30] sm:$0xff] }
  0x37   : > { %460 = vst [vmem:[%s2297_s10 + $0x10] sm:$0xff] %v459_v8  ;;  %v463_v10 = vld [vmem:[%s2292_s11 + $0x40] sm:$0xff]  ;;  %v465_v11 = vld [vmem:[%s2292_s11 + $0x50] sm:$0xff]  ;;  %462 = vst [vmem:[%s2297_s10 + $0x18] sm:$0xff] %v461_v9 }
  0x38   : > { %464 = vst [vmem:[%s2297_s10 + $0x20] sm:$0xff] %v463_v10  ;;  %466 = vst [vmem:[%s2297_s10 + $0x28] sm:$0xff] %v465_v11  ;;  %v467_v12 = vld [vmem:[%s2292_s11 + $0x60] sm:$0xff]  ;;  %v469_v13 = vld [vmem:[%s2292_s11 + $0x70] sm:$0xff] }
  0x39   : > { %v471_v14 = vld [vmem:[%s2292_s11 + $0x80] sm:$0xff]  ;;  %468 = vst [vmem:[%s2297_s10 + $0x30] sm:$0xff] %v467_v12  ;;  %470 = vst [vmem:[%s2297_s10 + $0x38] sm:$0xff] %v469_v13  ;;  %v473_v15 = vld [vmem:[%s2292_s11 + $0x90] sm:$0xff] }
  0x3a   : > { %472 = vst [vmem:[%s2297_s10 + $0x40] sm:$0xff] %v471_v14  ;;  %v475_v16 = vld [vmem:[%s2292_s11 + $0xa0] sm:$0xff]  ;;  %v477_v17 = vld [vmem:[%s2292_s11 + $0xb0] sm:$0xff]  ;;  %474 = vst [vmem:[%s2297_s10 + $0x48] sm:$0xff] %v473_v15 }
  0x3b   : > { %476 = vst [vmem:[%s2297_s10 + $0x50] sm:$0xff] %v475_v16  ;;  %478 = vst [vmem:[%s2297_s10 + $0x58] sm:$0xff] %v477_v17  ;;  %v479_v18 = vld [vmem:[%s2292_s11 + $0xc0] sm:$0xff]  ;;  %v481_v19 = vld [vmem:[%s2292_s11 + $0xd0] sm:$0xff] }
  0x3c   : > { %v483_v20 = vld [vmem:[%s2292_s11 + $0xe0] sm:$0xff]  ;;  %480 = vst [vmem:[%s2297_s10 + $0x60] sm:$0xff] %v479_v18  ;;  %482 = vst [vmem:[%s2297_s10 + $0x68] sm:$0xff] %v481_v19  ;;  %v485_v21 = vld [vmem:[%s2292_s11 + $0xf0] sm:$0xff] }
  0x3d   : > { %484 = vst [vmem:[%s2297_s10 + $0x70] sm:$0xff] %v483_v20  ;;  %v487_v22 = vld [vmem:[%s2292_s11 + $0x100] sm:$0xff]  ;;  %v489_v23 = vld [vmem:[%s2292_s11 + $0x110] sm:$0xff]  ;;  %486 = vst [vmem:[%s2297_s10 + $0x78] sm:$0xff] %v485_v21 }
  0x3e   : > { %488 = vst [vmem:[%s2297_s10 + $0x80] sm:$0xff] %v487_v22  ;;  %490 = vst [vmem:[%s2297_s10 + $0x88] sm:$0xff] %v489_v23  ;;  %v491_v24 = vld [vmem:[%s2292_s11 + $0x120] sm:$0xff]  ;;  %v493_v25 = vld [vmem:[%s2292_s11 + $0x130] sm:$0xff] }
  0x3f   : > { %v495_v26 = vld [vmem:[%s2292_s11 + $0x140] sm:$0xff]  ;;  %492 = vst [vmem:[%s2297_s10 + $0x90] sm:$0xff] %v491_v24  ;;  %494 = vst [vmem:[%s2297_s10 + $0x98] sm:$0xff] %v493_v25  ;;  %v497_v27 = vld [vmem:[%s2292_s11 + $0x150] sm:$0xff] }
  0x40   : > { %496 = vst [vmem:[%s2297_s10 + $0xa0] sm:$0xff] %v495_v26  ;;  %v499_v28 = vld [vmem:[%s2292_s11 + $0x160] sm:$0xff]  ;;  %v501_v29 = vld [vmem:[%s2292_s11 + $0x170] sm:$0xff]  ;;  %498 = vst [vmem:[%s2297_s10 + $0xa8] sm:$0xff] %v497_v27 }
  0x41   : > { %500 = vst [vmem:[%s2297_s10 + $0xb0] sm:$0xff] %v499_v28  ;;  %502 = vst [vmem:[%s2297_s10 + $0xb8] sm:$0xff] %v501_v29  ;;  %v503_v30 = vld [vmem:[%s2292_s11 + $0x180] sm:$0xff]  ;;  %v505_v31 = vld [vmem:[%s2292_s11 + $0x190] sm:$0xff] }
  0x42   : > { %v507_v32 = vld [vmem:[%s2292_s11 + $0x1a0] sm:$0xff]  ;;  %504 = vst [vmem:[%s2297_s10 + $0xc0] sm:$0xff] %v503_v30  ;;  %506 = vst [vmem:[%s2297_s10 + $0xc8] sm:$0xff] %v505_v31  ;;  %v509_v33 = vld [vmem:[%s2292_s11 + $0x1b0] sm:$0xff] }
  0x43   : > { %508 = vst [vmem:[%s2297_s10 + $0xd0] sm:$0xff] %v507_v32  ;;  %v511_v34 = vld [vmem:[%s2292_s11 + $0x1c0] sm:$0xff]  ;;  %v513_v35 = vld [vmem:[%s2292_s11 + $0x1d0] sm:$0xff]  ;;  %510 = vst [vmem:[%s2297_s10 + $0xd8] sm:$0xff] %v509_v33 }
  0x44   : > { %512 = vst [vmem:[%s2297_s10 + $0xe0] sm:$0xff] %v511_v34  ;;  %514 = vst [vmem:[%s2297_s10 + $0xe8] sm:$0xff] %v513_v35  ;;  %v515_v36 = vld [vmem:[%s2292_s11 + $0x1e0] sm:$0xff]  ;;  %v517_v37 = vld [vmem:[%s2292_s11 + $0x1f0] sm:$0xff] }
  0x45   : > { %v519_v38 = vld [vmem:[%s2292_s11 + $0x200] sm:$0xff]  ;;  %516 = vst [vmem:[%s2297_s10 + $0xf0] sm:$0xff] %v515_v36  ;;  %518 = vst [vmem:[%s2297_s10 + $0xf8] sm:$0xff] %v517_v37  ;;  %v521_v39 = vld [vmem:[%s2292_s11 + $0x210] sm:$0xff] }
  0x46   : > { %520 = vst [vmem:[%s2297_s10 + $0x100] sm:$0xff] %v519_v38  ;;  %v523_v40 = vld [vmem:[%s2292_s11 + $0x220] sm:$0xff]  ;;  %v525_v41 = vld [vmem:[%s2292_s11 + $0x230] sm:$0xff]  ;;  %522 = vst [vmem:[%s2297_s10 + $0x108] sm:$0xff] %v521_v39 }
  0x47   : > { %524 = vst [vmem:[%s2297_s10 + $0x110] sm:$0xff] %v523_v40  ;;  %526 = vst [vmem:[%s2297_s10 + $0x118] sm:$0xff] %v525_v41  ;;  %v527_v42 = vld [vmem:[%s2292_s11 + $0x240] sm:$0xff]  ;;  %v529_v43 = vld [vmem:[%s2292_s11 + $0x250] sm:$0xff] }
  0x48   : > { %v531_v44 = vld [vmem:[%s2292_s11 + $0x260] sm:$0xff]  ;;  %528 = vst [vmem:[%s2297_s10 + $0x120] sm:$0xff] %v527_v42  ;;  %530 = vst [vmem:[%s2297_s10 + $0x128] sm:$0xff] %v529_v43  ;;  %v533_v45 = vld [vmem:[%s2292_s11 + $0x270] sm:$0xff] }
  0x49   : > { %532 = vst [vmem:[%s2297_s10 + $0x130] sm:$0xff] %v531_v44  ;;  %v535_v46 = vld [vmem:[%s2292_s11 + $0x280] sm:$0xff]  ;;  %v537_v47 = vld [vmem:[%s2292_s11 + $0x290] sm:$0xff]  ;;  %534 = vst [vmem:[%s2297_s10 + $0x138] sm:$0xff] %v533_v45 }
  0x4a   : > { %536 = vst [vmem:[%s2297_s10 + $0x140] sm:$0xff] %v535_v46  ;;  %538 = vst [vmem:[%s2297_s10 + $0x148] sm:$0xff] %v537_v47  ;;  %v539_v48 = vld [vmem:[%s2292_s11 + $0x2a0] sm:$0xff]  ;;  %v541_v49 = vld [vmem:[%s2292_s11 + $0x2b0] sm:$0xff] }
  0x4b   : > { %v543_v50 = vld [vmem:[%s2292_s11 + $0x2c0] sm:$0xff]  ;;  %540 = vst [vmem:[%s2297_s10 + $0x150] sm:$0xff] %v539_v48  ;;  %542 = vst [vmem:[%s2297_s10 + $0x158] sm:$0xff] %v541_v49  ;;  %v545_v51 = vld [vmem:[%s2292_s11 + $0x2d0] sm:$0xff] }
  0x4c   : > { %544 = vst [vmem:[%s2297_s10 + $0x160] sm:$0xff] %v543_v50  ;;  %v547_v52 = vld [vmem:[%s2292_s11 + $0x2e0] sm:$0xff]  ;;  %v549_v53 = vld [vmem:[%s2292_s11 + $0x2f0] sm:$0xff]  ;;  %546 = vst [vmem:[%s2297_s10 + $0x168] sm:$0xff] %v545_v51 }
  0x4d   : > { %548 = vst [vmem:[%s2297_s10 + $0x170] sm:$0xff] %v547_v52  ;;  %550 = vst [vmem:[%s2297_s10 + $0x178] sm:$0xff] %v549_v53  ;;  %v551_v54 = vld [vmem:[%s2292_s11 + $0x300] sm:$0xff]  ;;  %v553_v55 = vld [vmem:[%s2292_s11 + $0x310] sm:$0xff] }
  0x4e   : > { %v555_v56 = vld [vmem:[%s2292_s11 + $0x320] sm:$0xff]  ;;  %552 = vst [vmem:[%s2297_s10 + $0x180] sm:$0xff] %v551_v54  ;;  %554 = vst [vmem:[%s2297_s10 + $0x188] sm:$0xff] %v553_v55  ;;  %v557_v57 = vld [vmem:[%s2292_s11 + $0x330] sm:$0xff] }
  0x4f   : > { %556 = vst [vmem:[%s2297_s10 + $0x190] sm:$0xff] %v555_v56  ;;  %v559_v58 = vld [vmem:[%s2292_s11 + $0x340] sm:$0xff]  ;;  %v561_v59 = vld [vmem:[%s2292_s11 + $0x350] sm:$0xff]  ;;  %558 = vst [vmem:[%s2297_s10 + $0x198] sm:$0xff] %v557_v57 }
  0x50   : > { %560 = vst [vmem:[%s2297_s10 + $0x1a0] sm:$0xff] %v559_v58  ;;  %562 = vst [vmem:[%s2297_s10 + $0x1a8] sm:$0xff] %v561_v59  ;;  %v563_v60 = vld [vmem:[%s2292_s11 + $0x360] sm:$0xff]  ;;  %v565_v61 = vld [vmem:[%s2292_s11 + $0x370] sm:$0xff] }
  0x51   : > { %v567_v62 = vld [vmem:[%s2292_s11 + $0x380] sm:$0xff]  ;;  %564 = vst [vmem:[%s2297_s10 + $0x1b0] sm:$0xff] %v563_v60  ;;  %566 = vst [vmem:[%s2297_s10 + $0x1b8] sm:$0xff] %v565_v61  ;;  %v569_v63 = vld [vmem:[%s2292_s11 + $0x390] sm:$0xff] }
  0x52   : > { %568 = vst [vmem:[%s2297_s10 + $0x1c0] sm:$0xff] %v567_v62  ;;  %v571_v0 = vld [vmem:[%s2292_s11 + $0x3a0] sm:$0xff]  ;;  %v573_v1 = vld [vmem:[%s2292_s11 + $0x3b0] sm:$0xff]  ;;  %570 = vst [vmem:[%s2297_s10 + $0x1c8] sm:$0xff] %v569_v63 }
  0x53   : > { %572 = vst [vmem:[%s2297_s10 + $0x1d0] sm:$0xff] %v571_v0  ;;  %574 = vst [vmem:[%s2297_s10 + $0x1d8] sm:$0xff] %v573_v1  ;;  %v575_v2 = vld [vmem:[%s2292_s11 + $0x3c0] sm:$0xff]  ;;  %v577_v3 = vld [vmem:[%s2292_s11 + $0x3d0] sm:$0xff] }
  0x54   : > { %v579_v4 = vld [vmem:[%s2292_s11 + $0x3e0] sm:$0xff]  ;;  %576 = vst [vmem:[%s2297_s10 + $0x1e0] sm:$0xff] %v575_v2  ;;  %578 = vst [vmem:[%s2297_s10 + $0x1e8] sm:$0xff] %v577_v3  ;;  %v581_v5 = vld [vmem:[%s2292_s11 + $0x3f0] sm:$0xff] }
  0x55   : > { %580 = vst [vmem:[%s2297_s10 + $0x1f0] sm:$0xff] %v579_v4  ;;  %v583_v6 = vld [vmem:[%s2292_s11 + $0x400] sm:$0xff]  ;;  %v585_v7 = vld [vmem:[%s2292_s11 + $0x410] sm:$0xff]  ;;  %582 = vst [vmem:[%s2297_s10 + $0x1f8] sm:$0xff] %v581_v5 }
  0x56   : > { %584 = vst [vmem:[%s2297_s10 + $0x200] sm:$0xff] %v583_v6  ;;  %586 = vst [vmem:[%s2297_s10 + $0x208] sm:$0xff] %v585_v7  ;;  %v587_v8 = vld [vmem:[%s2292_s11 + $0x420] sm:$0xff]  ;;  %v589_v9 = vld [vmem:[%s2292_s11 + $0x430] sm:$0xff] }
  0x57   : > { %v591_v10 = vld [vmem:[%s2292_s11 + $0x440] sm:$0xff]  ;;  %588 = vst [vmem:[%s2297_s10 + $0x210] sm:$0xff] %v587_v8  ;;  %590 = vst [vmem:[%s2297_s10 + $0x218] sm:$0xff] %v589_v9  ;;  %v593_v11 = vld [vmem:[%s2292_s11 + $0x450] sm:$0xff] }
  0x58   : > { %592 = vst [vmem:[%s2297_s10 + $0x220] sm:$0xff] %v591_v10  ;;  %v595_v12 = vld [vmem:[%s2292_s11 + $0x460] sm:$0xff]  ;;  %v597_v13 = vld [vmem:[%s2292_s11 + $0x470] sm:$0xff]  ;;  %594 = vst [vmem:[%s2297_s10 + $0x228] sm:$0xff] %v593_v11 }
  0x59   : > { %596 = vst [vmem:[%s2297_s10 + $0x230] sm:$0xff] %v595_v12  ;;  %598 = vst [vmem:[%s2297_s10 + $0x238] sm:$0xff] %v597_v13  ;;  %v599_v14 = vld [vmem:[%s2292_s11 + $0x480] sm:$0xff]  ;;  %v601_v15 = vld [vmem:[%s2292_s11 + $0x490] sm:$0xff] }
  0x5a   : > { %v603_v16 = vld [vmem:[%s2292_s11 + $0x4a0] sm:$0xff]  ;;  %600 = vst [vmem:[%s2297_s10 + $0x240] sm:$0xff] %v599_v14  ;;  %602 = vst [vmem:[%s2297_s10 + $0x248] sm:$0xff] %v601_v15  ;;  %v605_v17 = vld [vmem:[%s2292_s11 + $0x4b0] sm:$0xff] }
  0x5b   : > { %604 = vst [vmem:[%s2297_s10 + $0x250] sm:$0xff] %v603_v16  ;;  %v607_v18 = vld [vmem:[%s2292_s11 + $0x4c0] sm:$0xff]  ;;  %v609_v19 = vld [vmem:[%s2292_s11 + $0x4d0] sm:$0xff]  ;;  %606 = vst [vmem:[%s2297_s10 + $0x258] sm:$0xff] %v605_v17 }
  0x5c   : > { %608 = vst [vmem:[%s2297_s10 + $0x260] sm:$0xff] %v607_v18  ;;  %610 = vst [vmem:[%s2297_s10 + $0x268] sm:$0xff] %v609_v19  ;;  %v611_v20 = vld [vmem:[%s2292_s11 + $0x4e0] sm:$0xff]  ;;  %v613_v21 = vld [vmem:[%s2292_s11 + $0x4f0] sm:$0xff] }
  0x5d   : > { %v615_v22 = vld [vmem:[%s2292_s11 + $0x500] sm:$0xff]  ;;  %612 = vst [vmem:[%s2297_s10 + $0x270] sm:$0xff] %v611_v20  ;;  %614 = vst [vmem:[%s2297_s10 + $0x278] sm:$0xff] %v613_v21  ;;  %v617_v23 = vld [vmem:[%s2292_s11 + $0x510] sm:$0xff] }
  0x5e   : > { %616 = vst [vmem:[%s2297_s10 + $0x280] sm:$0xff] %v615_v22  ;;  %v619_v24 = vld [vmem:[%s2292_s11 + $0x520] sm:$0xff]  ;;  %v621_v25 = vld [vmem:[%s2292_s11 + $0x530] sm:$0xff]  ;;  %618 = vst [vmem:[%s2297_s10 + $0x288] sm:$0xff] %v617_v23 }
  0x5f   : > { %620 = vst [vmem:[%s2297_s10 + $0x290] sm:$0xff] %v619_v24  ;;  %622 = vst [vmem:[%s2297_s10 + $0x298] sm:$0xff] %v621_v25  ;;  %v623_v26 = vld [vmem:[%s2292_s11 + $0x540] sm:$0xff]  ;;  %v625_v27 = vld [vmem:[%s2292_s11 + $0x550] sm:$0xff] }
  0x60   : > { %v627_v28 = vld [vmem:[%s2292_s11 + $0x560] sm:$0xff]  ;;  %624 = vst [vmem:[%s2297_s10 + $0x2a0] sm:$0xff] %v623_v26  ;;  %626 = vst [vmem:[%s2297_s10 + $0x2a8] sm:$0xff] %v625_v27  ;;  %v629_v29 = vld [vmem:[%s2292_s11 + $0x570] sm:$0xff] }
  0x61   : > { %628 = vst [vmem:[%s2297_s10 + $0x2b0] sm:$0xff] %v627_v28  ;;  %v631_v30 = vld [vmem:[%s2292_s11 + $0x580] sm:$0xff]  ;;  %v633_v31 = vld [vmem:[%s2292_s11 + $0x590] sm:$0xff]  ;;  %630 = vst [vmem:[%s2297_s10 + $0x2b8] sm:$0xff] %v629_v29 }
  0x62   : > { %632 = vst [vmem:[%s2297_s10 + $0x2c0] sm:$0xff] %v631_v30  ;;  %634 = vst [vmem:[%s2297_s10 + $0x2c8] sm:$0xff] %v633_v31  ;;  %v635_v32 = vld [vmem:[%s2292_s11 + $0x5a0] sm:$0xff]  ;;  %v637_v33 = vld [vmem:[%s2292_s11 + $0x5b0] sm:$0xff] }
  0x63   : > { %v639_v34 = vld [vmem:[%s2292_s11 + $0x5c0] sm:$0xff]  ;;  %636 = vst [vmem:[%s2297_s10 + $0x2d0] sm:$0xff] %v635_v32  ;;  %638 = vst [vmem:[%s2297_s10 + $0x2d8] sm:$0xff] %v637_v33  ;;  %v641_v35 = vld [vmem:[%s2292_s11 + $0x5d0] sm:$0xff] }
  0x64   : > { %640 = vst [vmem:[%s2297_s10 + $0x2e0] sm:$0xff] %v639_v34  ;;  %v643_v36 = vld [vmem:[%s2292_s11 + $0x5e0] sm:$0xff]  ;;  %v645_v37 = vld [vmem:[%s2292_s11 + $0x5f0] sm:$0xff]  ;;  %642 = vst [vmem:[%s2297_s10 + $0x2e8] sm:$0xff] %v641_v35 }
  0x65   : > { %644 = vst [vmem:[%s2297_s10 + $0x2f0] sm:$0xff] %v643_v36  ;;  %646 = vst [vmem:[%s2297_s10 + $0x2f8] sm:$0xff] %v645_v37 }
  0x66 PF: > { %p1702_p0 = scmp.ge.s32.totalorder %s2150_s25, 1  ;;  %p667_p1 = scmp.lt.s32.totalorder %s2150_s25, 7 }
  0x68   : > { %p668_p2 = pnand %p1702_p0, %p667_p1 }
  0x69   : > { %s674_s0 = sand.u32 (!%p668_p2), 1, %s2126_s19   ;;  %s681_s28 = sand.u32 (!%p668_p2), 1, %s2118_s17  }
  0x6a   : > { %671 = sbr.rel (%p668_p2) target bundleno = 478 (0x1de), region = 89  ;;  %s714_s5 = sand.u32 (!%p668_p2), 1, %s2110_s15  }
  0x6b   : > { %s1820_s26 = smul.u32 (!%p668_p2), 48, %s674_s0  ;;  %s1703_s30 = sshll.u32 (!%p668_p2), %s714_s5, 5 }
  0x6c   : > { %s1821_s29 = smul.u32 (!%p668_p2), 768, %s681_s28  ;;  %s1704_s8 = sshll.u32 (!%p668_p2), %s2138_s22, 1 }
  0x6d   : > { %p722_p3 = scmp.lt.s32.totalorder (!%p668_p2), %s1704_s8, 3  ;;  %s2504_s19 = scalar_lea.vmem (!%p668_p2), [#allocation3], %s1820_s26 }
  0x6e   : > { %s2506_s17 = scalar_lea.vmem (!%p668_p2), [#allocation4], %s1821_s29  ;;  %s2508_s15 = scalar_lea.vmem (!%p668_p2), [#allocation5], %s1703_s30 }
  0x6f   : > { %s2706_s8 = smov (!%p722_p3, %s1704_s8), 3  ;;  %p1706_p4 = scmp.ne.s32.totalorder %s2134_s21, 0 }
  0x70   : > { %s724_s11 = scalar_lea.vmem %s2673_s2, %s2706_s8  ;;  %s729_s27 = scalar_lea.vmem %s2674_s3, %s2706_s8 }
  0x71   : > { %736 = sbr.rel (%p1706_p4) target bundleno = 121 (0x79), region = 101 }
  0x76   : > { %v2152_v38 = vmov 0.0  }
  0x77   : > { %737 = vst [vmem:[#allocation2 + $0x10] sm:$0xff] %v2152_v38  ;;  %738 = vst [vmem:[#allocation2] sm:$0xff] %v2152_v38 }
  0x78   : > { %739 = vst [vmem:[#allocation2 + $0x18] sm:$0xff] %v2152_v38  ;;  %740 = vst [vmem:[#allocation2 + $0x8] sm:$0xff] %v2152_v38 }
  0x79 PF: > { %v1911_v39 = vld [vmem:[%s2506_s17 + $0x74] ss:$8 sps:$4 sm:$0xff]   ;;  %v1915_v41 = vld [vmem:[%s2506_s17 + $0x70] ss:$8 sps:$4 sm:$0xff]   ;;  %v1917_v43 = vld [vmem:[%s2506_s17 + $0x64] ss:$8 sps:$4 sm:$0xff]  }
  0x7a   : > { %v1913_v40 = vld [vmem:[%s2506_s17 + $0x174] ss:$8 sps:$4 sm:$0xff]   ;;  %1357 = vmatprep.subr.bf16.mxu0 %v1911_v39  ;;  %v1916_v42 = vld [vmem:[%s2506_s17 + $0x170] ss:$8 sps:$4 sm:$0xff]   ;;  %v1919_v44 = vld [vmem:[%s2506_s17 + $0x164] ss:$8 sps:$4 sm:$0xff]  }
  0x7b   : > { %1400 = vmatprep.subr.bf16.mxu1 %v1913_v40  ;;  %1358 = vmatpush1.bf16.msra.mxu0 %v1915_v41  ;;  %v1921_v45 = vld [vmem:[%s2506_s17 + $0x60] ss:$8 sps:$4 sm:$0xff]   ;;  %v1923_v47 = vld [vmem:[%s2506_s17 + $0x54] ss:$8 sps:$4 sm:$0xff]   ;;  %v1927_v49 = vld [vmem:[%s2506_s17 + $0x50] ss:$8 sps:$4 sm:$0xff]  }
  0x7c   : > { %1401 = vmatpush1.bf16.msra.mxu1 %v1916_v42  ;;  %1359 = vmatprep.subr.bf16.mxu0 %v1917_v43  ;;  %v1922_v46 = vld [vmem:[%s2506_s17 + $0x160] ss:$8 sps:$4 sm:$0xff]   ;;  %v1925_v48 = vld [vmem:[%s2506_s17 + $0x154] ss:$8 sps:$4 sm:$0xff]   ;;  %v1928_v50 = vld [vmem:[%s2506_s17 + $0x150] ss:$8 sps:$4 sm:$0xff]  }
  0x7d   : > { %1402 = vmatprep.subr.bf16.mxu1 %v1919_v44  ;;  %v1929_v51 = vld [vmem:[%s2506_s17 + $0x44] ss:$8 sps:$4 sm:$0xff]   ;;  %v1933_v53 = vld [vmem:[%s2506_s17 + $0x40] ss:$8 sps:$4 sm:$0xff]   ;;  %v1935_v55 = vld [vmem:[%s2506_s17 + $0x34] ss:$8 sps:$4 sm:$0xff]  }
  0x7e   : > { %v1931_v52 = vld [vmem:[%s2506_s17 + $0x144] ss:$8 sps:$4 sm:$0xff]   ;;  %v1934_v54 = vld [vmem:[%s2506_s17 + $0x140] ss:$8 sps:$4 sm:$0xff]   ;;  %v1937_v56 = vld [vmem:[%s2506_s17 + $0x134] ss:$8 sps:$4 sm:$0xff]  }
  0x7f   : > { %1360 = vmatpush1.bf16.msra.mxu0 %v1921_v45  ;;  %v1939_v57 = vld [vmem:[%s2506_s17 + $0x30] ss:$8 sps:$4 sm:$0xff]   ;;  %v1941_v59 = vld [vmem:[%s2506_s17 + $0x24] ss:$8 sps:$4 sm:$0xff]   ;;  %v1945_v61 = vld [vmem:[%s2506_s17 + $0x20] ss:$8 sps:$4 sm:$0xff]  }
  0x80   : > { %1403 = vmatpush1.bf16.msra.mxu1 %v1922_v46  ;;  %1361 = vmatprep.subr.bf16.mxu0 %v1923_v47  ;;  %v1940_v58 = vld [vmem:[%s2506_s17 + $0x130] ss:$8 sps:$4 sm:$0xff]   ;;  %v1943_v60 = vld [vmem:[%s2506_s17 + $0x124] ss:$8 sps:$4 sm:$0xff]   ;;  %v1946_v62 = vld [vmem:[%s2506_s17 + $0x120] ss:$8 sps:$4 sm:$0xff]  }
  0x81   : > { %1404 = vmatprep.subr.bf16.mxu1 %v1925_v48  ;;  %v1947_v63 = vld [vmem:[%s2506_s17 + $0x14] ss:$8 sps:$4 sm:$0xff]   ;;  %v1951_v1 = vld [vmem:[%s2506_s17 + $0x10] ss:$8 sps:$4 sm:$0xff]   ;;  %v1953_v3 = vld [vmem:[%s2506_s17 + $0x4] ss:$8 sps:$4 sm:$0xff]  }
  0x82   : > { %v1949_v0 = vld [vmem:[%s2506_s17 + $0x114] ss:$8 sps:$4 sm:$0xff]   ;;  %v1952_v2 = vld [vmem:[%s2506_s17 + $0x110] ss:$8 sps:$4 sm:$0xff]   ;;  %v1955_v4 = vld [vmem:[%s2506_s17 + $0x104] ss:$8 sps:$4 sm:$0xff]  }
  0x83   : > { %1362 = vmatpush1.bf16.msra.mxu0 %v1927_v49  ;;  %v1957_v5 = vld [vmem:[%s2506_s17] ss:$8 sps:$4 sm:$0xff]   ;;  %v1959_v7 = vld [vmem:[%s2506_s17 + $0xf4] ss:$8 sps:$4 sm:$0xff]   ;;  %v1963_v9 = vld [vmem:[%s2506_s17 + $0xf0] ss:$8 sps:$4 sm:$0xff]  }
  0x84   : > { %1405 = vmatpush1.bf16.msra.mxu1 %v1928_v50  ;;  %1363 = vmatprep.subr.bf16.mxu0 %v1929_v51  ;;  %v1958_v6 = vld [vmem:[%s2506_s17 + $0x100] ss:$8 sps:$4 sm:$0xff]   ;;  %v1961_v8 = vld [vmem:[%s2506_s17 + $0x1f4] ss:$8 sps:$4 sm:$0xff]   ;;  %v1964_v10 = vld [vmem:[%s2506_s17 + $0x1f0] ss:$8 sps:$4 sm:$0xff]  }
  0x85   : > { %1406 = vmatprep.subr.bf16.mxu1 %v1931_v52  ;;  %v1965_v11 = vld [vmem:[%s2506_s17 + $0xe4] ss:$8 sps:$4 sm:$0xff]   ;;  %v1969_v13 = vld [vmem:[%s2506_s17 + $0xe0] ss:$8 sps:$4 sm:$0xff]   ;;  %v1971_v15 = vld [vmem:[%s2506_s17 + $0xd4] ss:$8 sps:$4 sm:$0xff]  }
  0x86   : > { %v1967_v12 = vld [vmem:[%s2506_s17 + $0x1e4] ss:$8 sps:$4 sm:$0xff]   ;;  %v1970_v14 = vld [vmem:[%s2506_s17 + $0x1e0] ss:$8 sps:$4 sm:$0xff]   ;;  %v1973_v16 = vld [vmem:[%s2506_s17 + $0x1d4] ss:$8 sps:$4 sm:$0xff]  }
  0x87   : > { %1364 = vmatpush1.bf16.msra.mxu0 %v1933_v53  ;;  %v1975_v17 = vld [vmem:[%s2506_s17 + $0xd0] ss:$8 sps:$4 sm:$0xff]   ;;  %v1977_v19 = vld [vmem:[%s2506_s17 + $0xc4] ss:$8 sps:$4 sm:$0xff]   ;;  %v1981_v21 = vld [vmem:[%s2506_s17 + $0xc0] ss:$8 sps:$4 sm:$0xff]  }
  0x88   : > { %1407 = vmatpush1.bf16.msra.mxu1 %v1934_v54  ;;  %1365 = vmatprep.subr.bf16.mxu0 %v1935_v55  ;;  %v1976_v18 = vld [vmem:[%s2506_s17 + $0x1d0] ss:$8 sps:$4 sm:$0xff]   ;;  %v1979_v20 = vld [vmem:[%s2506_s17 + $0x1c4] ss:$8 sps:$4 sm:$0xff]   ;;  %v1982_v22 = vld [vmem:[%s2506_s17 + $0x1c0] ss:$8 sps:$4 sm:$0xff]  }
  0x89   : > { %1408 = vmatprep.subr.bf16.mxu1 %v1937_v56  ;;  %v1983_v23 = vld [vmem:[%s2506_s17 + $0xb4] ss:$8 sps:$4 sm:$0xff]   ;;  %v1987_v27 = vld [vmem:[%s2506_s17 + $0xb0] ss:$8 sps:$4 sm:$0xff]   ;;  %v1989_v29 = vld [vmem:[%s2506_s17 + $0xa4] ss:$8 sps:$4 sm:$0xff]  }
  0x8a   : > { %v2009_v24 = vld [vmem:[%s2504_s19 + $0x4] ss:$24 sps:$4 sm:$0xff]   ;;  %v1988_v28 = vld [vmem:[%s2506_s17 + $0x1b0] ss:$8 sps:$4 sm:$0xff]   ;;  %v1993_v31 = vld [vmem:[%s2506_s17 + $0xa0] ss:$8 sps:$4 sm:$0xff]  }
  0x8b   : > { %1366 = vmatpush1.bf16.msra.mxu0 %v1939_v57  ;;  %v1985_v25 = vld [vmem:[%s2506_s17 + $0x1b4] ss:$8 sps:$4 sm:$0xff]   ;;  %1389 = vmatprep.mubr.bf16.mxu0 %v2009_v24  ;;  %v1991_v30 = vld [vmem:[%s2506_s17 + $0x1a4] ss:$8 sps:$4 sm:$0xff]   ;;  %v1994_v32 = vld [vmem:[%s2506_s17 + $0x1a0] ss:$8 sps:$4 sm:$0xff]  }
  0x8c   : > { %1409 = vmatpush1.bf16.msra.mxu1 %v1940_v58  ;;  %1367 = vmatprep.subr.bf16.mxu0 %v1941_v59  ;;  %v2012_v26 = vld [vmem:[%s2504_s19 + $0xc] ss:$24 sps:$4 sm:$0xff]   ;;  %v1999_v35 = vld [vmem:[%s2506_s17 + $0x90] ss:$8 sps:$4 sm:$0xff]   ;;  %v2005_v39 = vld [vmem:[%s2506_s17 + $0x80] ss:$8 sps:$4 sm:$0xff]  }
  0x8d   : > { %1410 = vmatprep.subr.bf16.mxu1 %v1943_v60  ;;  %1432 = vmatprep.mubr.bf16.mxu1 %v2012_v26  ;;  %v1995_v33 = vld [vmem:[%s2506_s17 + $0x94] ss:$8 sps:$4 sm:$0xff]   ;;  %v2000_v36 = vld [vmem:[%s2506_s17 + $0x190] ss:$8 sps:$4 sm:$0xff]   ;;  %v2001_v37 = vld [vmem:[%s2506_s17 + $0x84] ss:$8 sps:$4 sm:$0xff]  }
  0x8e   : > { %v1997_v34 = vld [vmem:[%s2506_s17 + $0x194] ss:$8 sps:$4 sm:$0xff]   ;;  %v2003_v38 = vld [vmem:[%s2506_s17 + $0x184] ss:$8 sps:$4 sm:$0xff]   ;;  %v2006_v40 = vld [vmem:[%s2506_s17 + $0x180] ss:$8 sps:$4 sm:$0xff]  }
  0x8f   : > { %1368 = vmatpush1.bf16.msra.mxu0 %v1945_v61  ;;  %v2015_v41 = vld [vmem:[%s2506_s17 + $0x274] ss:$8 sps:$4 sm:$0xff]   ;;  %v2007_v42 = vld [vmem:[%s2504_s19] ss:$24 sps:$4 sm:$0xff]   ;;  %v2018_v45 = vld [vmem:[%s2506_s17 + $0x264] ss:$8 sps:$4 sm:$0xff]  }
  0x90   : > { %1411 = vmatpush1.bf16.msra.mxu1 %v1946_v62  ;;  %1369 = vmatprep.subr.bf16.mxu0 %v1947_v63  ;;  %v2010_v43 = vld [vmem:[%s2504_s19 + $0x8] ss:$24 sps:$4 sm:$0xff]   ;;  %v2063_v46 = vld [vmem:[%s2504_s19 + $0x14] ss:$24 sps:$4 sm:$0xff]   ;;  %p1809_p5 = scmp.ne.s32.totalorder %s2134_s21, 2 }
  0x91   : > { %1412 = vmatprep.subr.bf16.mxu1 %v1949_v0  ;;  %v2013_v44 = vld [vmem:[%s2506_s17 + $0x270] ss:$8 sps:$4 sm:$0xff]   ;;  %v2016_v47 = vld [vmem:[%s2506_s17 + $0x260] ss:$8 sps:$4 sm:$0xff]   ;;  %v2021_v48 = vld [vmem:[%s2506_s17 + $0x254] ss:$8 sps:$4 sm:$0xff]  }
  0x92   : > { %v2019_v49 = vld [vmem:[%s2506_s17 + $0x250] ss:$8 sps:$4 sm:$0xff]   ;;  %v2024_v50 = vld [vmem:[%s2506_s17 + $0x244] ss:$8 sps:$4 sm:$0xff]   ;;  %v2022_v51 = vld [vmem:[%s2506_s17 + $0x240] ss:$8 sps:$4 sm:$0xff]  }
  0x93   : > { %1370 = vmatpush1.bf16.msra.mxu0 %v1951_v1  ;;  %v2027_v52 = vld [vmem:[%s2506_s17 + $0x234] ss:$8 sps:$4 sm:$0xff]   ;;  %v2025_v53 = vld [vmem:[%s2506_s17 + $0x230] ss:$8 sps:$4 sm:$0xff]   ;;  %v2030_v54 = vld [vmem:[%s2506_s17 + $0x224] ss:$8 sps:$4 sm:$0xff]  }
  0x94   : > { %1413 = vmatpush1.bf16.msra.mxu1 %v1952_v2  ;;  %1371 = vmatprep.subr.bf16.mxu0 %v1953_v3  ;;  %v2028_v55 = vld [vmem:[%s2506_s17 + $0x220] ss:$8 sps:$4 sm:$0xff]   ;;  %v2033_v56 = vld [vmem:[%s2506_s17 + $0x214] ss:$8 sps:$4 sm:$0xff]   ;;  %v2031_v57 = vld [vmem:[%s2506_s17 + $0x210] ss:$8 sps:$4 sm:$0xff]  }
  0x95   : > { %1414 = vmatprep.subr.bf16.mxu1 %v1955_v4  ;;  %v2036_v58 = vld [vmem:[%s2506_s17 + $0x204] ss:$8 sps:$4 sm:$0xff]   ;;  %v2034_v59 = vld [vmem:[%s2506_s17 + $0x200] ss:$8 sps:$4 sm:$0xff]   ;;  %v2039_v60 = vld [vmem:[%s2506_s17 + $0x2f4] ss:$8 sps:$4 sm:$0xff]  }
  0x96   : > { %v2037_v61 = vld [vmem:[%s2506_s17 + $0x2f0] ss:$8 sps:$4 sm:$0xff]   ;;  %v2042_v62 = vld [vmem:[%s2506_s17 + $0x2e4] ss:$8 sps:$4 sm:$0xff]   ;;  %v2040_v63 = vld [vmem:[%s2506_s17 + $0x2e0] ss:$8 sps:$4 sm:$0xff]  }
  0x97   : > { %1372 = vmatpush1.bf16.msra.mxu0 %v1957_v5  ;;  %v2045_v0 = vld [vmem:[%s2506_s17 + $0x2d4] ss:$8 sps:$4 sm:$0xff]   ;;  %v2043_v1 = vld [vmem:[%s2506_s17 + $0x2d0] ss:$8 sps:$4 sm:$0xff]   ;;  %v2048_v2 = vld [vmem:[%s2506_s17 + $0x2c4] ss:$8 sps:$4 sm:$0xff]  }
  0x98   : > { %1415 = vmatpush1.bf16.msra.mxu1 %v1958_v6  ;;  %1373 = vmatprep.subr.bf16.mxu0 %v1959_v7  ;;  %v2046_v3 = vld [vmem:[%s2506_s17 + $0x2c0] ss:$8 sps:$4 sm:$0xff]   ;;  %v2051_v4 = vld [vmem:[%s2506_s17 + $0x2b4] ss:$8 sps:$4 sm:$0xff]   ;;  %v2049_v5 = vld [vmem:[%s2506_s17 + $0x2b0] ss:$8 sps:$4 sm:$0xff]  }
  0x99   : > { %1416 = vmatprep.subr.bf16.mxu1 %v1961_v8  ;;  %v2054_v6 = vld [vmem:[%s2506_s17 + $0x2a4] ss:$8 sps:$4 sm:$0xff]   ;;  %v2052_v7 = vld [vmem:[%s2506_s17 + $0x2a0] ss:$8 sps:$4 sm:$0xff]   ;;  %v2057_v8 = vld [vmem:[%s2506_s17 + $0x294] ss:$8 sps:$4 sm:$0xff]  }
  0x9a   : > { %v742_v26 = vld [vmem:[#allocation2] sm:$0xff] }
  0x9b   : > { %1374 = vmatpush2.bf16.msra.mxu0 %v1963_v9  ;;  %v2055_v9 = vld [vmem:[%s2506_s17 + $0x290] ss:$8 sps:$4 sm:$0xff]  }
  0x9c   : > { %1417 = vmatpush2.bf16.msra.mxu1 %v1964_v10  ;;  %1375 = vmatprep.subr.bf16.mxu0 %v1965_v11  ;;  %v2060_v10 = vld [vmem:[%s2506_s17 + $0x284] ss:$8 sps:$4 sm:$0xff]   ;;  %v2058_v11 = vld [vmem:[%s2506_s17 + $0x280] ss:$8 sps:$4 sm:$0xff]  }
  0x9d   : > { %1418 = vmatprep.subr.bf16.mxu1 %v1967_v12  ;;  %v2061_v12 = vld [vmem:[%s2504_s19 + $0x10] ss:$24 sps:$4 sm:$0xff]  }
  0x9f   : > { %1376 = vmatpush2.bf16.msra.mxu0 %v1969_v13 }
  0xa0   : > { %1419 = vmatpush2.bf16.msra.mxu1 %v1970_v14  ;;  %1377 = vmatprep.subr.bf16.mxu0 %v1971_v15 }
  0xa1   : > { %1420 = vmatprep.subr.bf16.mxu1 %v1973_v16 }
  0xa3   : > { %1378 = vmatpush2.bf16.msra.mxu0 %v1975_v17 }
  0xa4   : > { %1421 = vmatpush2.bf16.msra.mxu1 %v1976_v18  ;;  %1379 = vmatprep.subr.bf16.mxu0 %v1977_v19 }
  0xa5   : > { %1422 = vmatprep.subr.bf16.mxu1 %v1979_v20 }
  0xa7   : > { %1380 = vmatpush2.bf16.msra.mxu0 %v1981_v21  ;;  %v741_v21 = vld [vmem:[#allocation2 + $0x10] sm:$0xff] }
  0xa8   : > { %1423 = vmatpush2.bf16.msra.mxu1 %v1982_v22  ;;  %1381 = vmatprep.subr.bf16.mxu0 %v1983_v23 }
  0xa9   : > { %1424 = vmatprep.subr.bf16.mxu1 %v1985_v25 }
  0xab   : > { %1382 = vmatpush2.bf16.msra.mxu0 %v1987_v27 }
  0xac   : > { %1425 = vmatpush2.bf16.msra.mxu1 %v1988_v28  ;;  %1383 = vmatprep.subr.bf16.mxu0 %v1989_v29 }
  0xad   : > { %1426 = vmatprep.subr.bf16.mxu1 %v1991_v30 }
  0xaf   : > { %1384 = vmatpush2.bf16.msra.mxu0 %v1993_v31  ;;  %v743_v31 = vld [vmem:[#allocation2 + $0x18] sm:$0xff] }
  0xb0   : > { %1427 = vmatpush2.bf16.msra.mxu1 %v1994_v32  ;;  %1385 = vmatprep.subr.bf16.mxu0 %v1995_v33 }
  0xb1   : > { %1428 = vmatprep.subr.bf16.mxu1 %v1997_v34 }
  0xb3   : > { %1386 = vmatpush2.bf16.msra.mxu0 %v1999_v35 }
  0xb4   : > { %1429 = vmatpush2.bf16.msra.mxu1 %v2000_v36  ;;  %1387 = vmatprep.subr.bf16.mxu0 %v2001_v37  ;;  %v744_v36 = vld [vmem:[#allocation2 + $0x8] sm:$0xff] }
  0xb5   : > { %1430 = vmatprep.subr.bf16.mxu1 %v2003_v38 }
  0xb7   : > { %1388 = vmatpush2.bf16.msra.mxu0 %v2005_v39 }
  0xb8   : > { %1431 = vmatpush2.bf16.msra.mxu1 %v2006_v40  ;;  %1443 = vmatprep.subr.bf16.mxu0 %v2015_v41 }
  0xba   : > { %1390 = vmatmul.mubr.bf16.vlgmr.msra.gmra.mxu0 %v2007_v42 }
  0xbb   : > { %1433 = vmatmul.mubr.bf16.vlgmr.msra.gmra.mxu1 %v2010_v43  ;;  %1444 = vmatpush1.bf16.msra.mxu0 %v2013_v44 }
  0xbc   : > { %1445 = vmatprep.subr.bf16.mxu0 %v2018_v45  ;;  %1475 = vmatprep.mubr.bf16.mxu0 %v2063_v46 }
  0xbf   : > { %1446 = vmatpush1.bf16.msra.mxu0 %v2016_v47 }
  0xc0   : > { %1447 = vmatprep.subr.bf16.mxu0 %v2021_v48 }
  0xc3   : > { %1448 = vmatpush1.bf16.msra.mxu0 %v2019_v49 }
  0xc4   : > { %1449 = vmatprep.subr.bf16.mxu0 %v2024_v50 }
  0xc7   : > { %1450 = vmatpush1.bf16.msra.mxu0 %v2022_v51 }
  0xc8   : > { %1451 = vmatprep.subr.bf16.mxu0 %v2027_v52 }
  0xcb   : > { %1452 = vmatpush1.bf16.msra.mxu0 %v2025_v53 }
  0xcc   : > { %1453 = vmatprep.subr.bf16.mxu0 %v2030_v54 }
  0xcf   : > { %1454 = vmatpush1.bf16.msra.mxu0 %v2028_v55 }
  0xd0   : > { %1455 = vmatprep.subr.bf16.mxu0 %v2033_v56 }
  0xd3   : > { %1456 = vmatpush1.bf16.msra.mxu0 %v2031_v57 }
  0xd4   : > { %1457 = vmatprep.subr.bf16.mxu0 %v2036_v58 }
  0xd7   : > { %1458 = vmatpush1.bf16.msra.mxu0 %v2034_v59 }
  0xd8   : > { %1459 = vmatprep.subr.bf16.mxu0 %v2039_v60 }
  0xdb   : > { %1460 = vmatpush2.bf16.msra.mxu0 %v2037_v61 }
  0xdc   : > { %1461 = vmatprep.subr.bf16.mxu0 %v2042_v62 }
  0xdf   : > { %1462 = vmatpush2.bf16.msra.mxu0 %v2040_v63 }
  0xe0   : > { %1463 = vmatprep.subr.bf16.mxu0 %v2045_v0 }
  0xe3   : > { %1464 = vmatpush2.bf16.msra.mxu0 %v2043_v1 }
  0xe4   : > { %1465 = vmatprep.subr.bf16.mxu0 %v2048_v2 }
  0xe7   : > { %1466 = vmatpush2.bf16.msra.mxu0 %v2046_v3 }
  0xe8   : > { %1467 = vmatprep.subr.bf16.mxu0 %v2051_v4 }
  0xeb   : > { %1468 = vmatpush2.bf16.msra.mxu0 %v2049_v5 }
  0xec   : > { %1469 = vmatprep.subr.bf16.mxu0 %v2054_v6 }
  0xef   : > { %1470 = vmatpush2.bf16.msra.mxu0 %v2052_v7 }
  0xf0   : > { %1471 = vmatprep.subr.bf16.mxu0 %v2057_v8 }
  0xf3   : > { %1472 = vmatpush2.bf16.msra.mxu0 %v2055_v9 }
  0xf4   : > { %1473 = vmatprep.subr.bf16.mxu0 %v2060_v10 }
  0xf7   : > { %1474 = vmatpush2.bf16.msra.mxu0 %v2058_v11 }
  0xfa   : > { %1476 = vmatmul.mubr.bf16.vlgmr.msra.gmra.mxu0 %v2061_v12 }
 0x17a   : > { %v1391_v13 = vpop.f32.mrf.mxu0 }
 0x17b   : > { %v1434_v14 = vpop.f32.mrf.mxu1 }
 0x17c   : > { %v1393_v15 = vpop.f32.mrf.mxu0  ;;  %v1435_v20 = vadd.f32 %v1434_v14, %v1391_v13 }
 0x17d   : > { %v1436_v16 = vpop.f32.mrf.mxu1 }
 0x17e   : > { %v1395_v17 = vpop.f32.mrf.mxu0  ;;  %v1437_v23 = vadd.f32 %v1436_v16, %v1393_v15 }
 0x17f   : > { %v1438_v18 = vpop.f32.mrf.mxu1 }
 0x180   : > { %v1397_v19 = vpop.f32.mrf.mxu0  ;;  %v1439_v28 = vadd.f32 %v1438_v18, %v1395_v17 }
 0x181   : > { %v1440_v25 = vpop.f32.mrf.mxu1 }
 0x182   : > { %v1441_v33 = vadd.f32 %v1440_v25, %v1397_v19 }
 0x1ba   : > { %v1477_v22 = vpop.f32.mrf.mxu0 }
 0x1bb   : > { %v1478_v24 = vadd.f32 %v1477_v22, %v1435_v20 }
 0x1bc   : > { %v1479_v27 = vpop.f32.mrf.mxu0 }
 0x1bd   : > { %v1486_v29 = vadd.f32 %v1478_v24, %v741_v21  ;;  %v1480_v30 = vadd.f32 %v1479_v27, %v1437_v23 }
 0x1be   : > { %v1481_v32 = vpop.f32.mrf.mxu0 }
 0x1bf   : > { %1490 = vst [vmem:[#allocation2 + $0x10] sm:$0xff] %v1486_v29  ;;  %v1487_v34 = vadd.f32 %v1480_v30, %v742_v26  ;;  %v1482_v35 = vadd.f32 %v1481_v32, %v1439_v28 }
 0x1c0   : > { %v1483_v37 = vpop.f32.mrf.mxu0 }
 0x1c1   : > { %1491 = vst [vmem:[#allocation2] sm:$0xff] %v1487_v34  ;;  %v1488_v38 = vadd.f32 %v1482_v35, %v743_v31  ;;  %v1484_v39 = vadd.f32 %v1483_v37, %v1441_v33  ;;  %1497 = sbr.rel (%p1809_p5) target bundleno = 470 (0x1d6), region = 105 }
 0x1c3   : > { %1492 = vst [vmem:[#allocation2 + $0x18] sm:$0xff] %v1488_v38  ;;  %v1489_v40 = vadd.f32 %v1484_v39, %v744_v36 }
 0x1c5   : > { %1493 = vst [vmem:[#allocation2 + $0x8] sm:$0xff] %v1489_v40 }
 0x1c6   : > { %v1504_v41 = vlaneseq  ;;  %v1502_v43 = vld [vmem:[%s724_s11] sm:$0x3]  ;;  %v1498_v45 = vld [vmem:[#allocation2 + $0x10] sm:$0xff] }
 0x1c7   : > { %v1518_v44 = vld [vmem:[%s729_s27] sm:$0x3] }
 0x1c8   : > { %v1505_v42 = vshrl.u32 %v1504_v41, 7  ;;  %v1499_v48 = vld [vmem:[#allocation2] sm:$0xff] }
 0x1ca   : > { %v1506_v46 = vsub.s32 0, %v1505_v42  ;;  %v1510_v47 = vsub.s32 1, %v1505_v42  ;;  %v1500_v49 = vld [vmem:[#allocation2 + $0x18] sm:$0xff] }
 0x1cc   : > { %v1501_v50 = vld [vmem:[#allocation2 + $0x8] sm:$0xff]  ;;  %v1507_v51 = vrot.slane %v1502_v43, %v1506_v46  ;;  %v1523_v52 = vrot.slane %v1518_v44, %v1506_v46  ;;  %v1511_v53 = vrot.slane %v1502_v43, %v1510_v47  ;;  %v1527_v54 = vrot.slane %v1518_v44, %v1510_v47 }
 0x1ce   : > { %v1514_v55 = vmul.f32 %v1507_v51, %v1498_v45  ;;  %v1515_v56 = vmul.f32 %v1511_v53, %v1499_v48  ;;  %v1516_v57 = vmul.f32 %v1507_v51, %v1500_v49  ;;  %v1517_v58 = vmul.f32 %v1511_v53, %v1501_v50 }
 0x1d0   : > { %v1530_v59 = vadd.f32 %v1523_v52, %v1514_v55  ;;  %v1531_v60 = vadd.f32 %v1527_v54, %v1515_v56  ;;  %v1532_v61 = vadd.f32 %v1523_v52, %v1516_v57  ;;  %v1533_v62 = vadd.f32 %v1527_v54, %v1517_v58 }
 0x1d2   : > { %v1534_v63 = vmax.f32 %v1530_v59, 0.0  ;;  %v1535_v0 = vmax.f32 %v1531_v60, 0.0  ;;  %v1536_v1 = vmax.f32 %v1532_v61, 0.0  ;;  %v1537_v2 = vmax.f32 %v1533_v62, 0.0 }
 0x1d4   : > { %1538 = vst [vmem:[%s2508_s15] sm:$0xff] %v1534_v63  ;;  %1539 = vst [vmem:[%s2508_s15 + $0x8] sm:$0xff] %v1535_v0 }
 0x1d5   : > { %1540 = vst [vmem:[%s2508_s15 + $0x10] sm:$0xff] %v1536_v1  ;;  %1541 = vst [vmem:[%s2508_s15 + $0x18] sm:$0xff] %v1537_v2 }
 0x1d6 PF: > { %1548 = sbr.rel (!%p2272_p12) target bundleno = 478 (0x1de), region = 109  ;;  %s1817_s21 = sshll.u32 (%p2272_p12), %s2138_s22, 4 }
 0x1d7   : > { %s1554_s29 = scalar_lea.vmem (%p2272_p12), %s2675_s4, %s1817_s21 }
 0x1db   : > { %v1567_v3 = vld [vmem:[%s2508_s15] sm:$0xff]  ;;  %v1569_v4 = vld [vmem:[%s2508_s15 + $0x8] sm:$0xff] }
 0x1dc   : > { %v1571_v5 = vld [vmem:[%s2508_s15 + $0x10] sm:$0xff]  ;;  %v1573_v6 = vld [vmem:[%s2508_s15 + $0x18] sm:$0xff]  ;;  %1568 = vst [vmem:[%s1554_s29] sm:$0xff] %v1567_v3  ;;  %1570 = vst [vmem:[%s1554_s29 + $0x8] sm:$0xff] %v1569_v4 }
 0x1dd   : > { %1572 = vst [vmem:[%s1554_s29 + $0x20] sm:$0xff] %v1571_v5  ;;  %1574 = vst [vmem:[%s1554_s29 + $0x28] sm:$0xff] %v1573_v6 }
 0x1de PF: > { %s14_s25 = sadd.s32 1, %s2150_s25   ;;  %s2687_s14 = sld [smem:[#allocation6_spill]] }
 0x1df   : > { %p11_p6 = scmp.ge.s32.totalorder %s14_s25, 8   ;;  %s2688_s30 = sld [smem:[#allocation7_spill]] }
 0x1e0   : > { %s2689_s15 = smov %s2114_s16  ;;  %s2690_s16 = smov %s2270_s13 }
 0x1e1   : > { %s2691_s17 = smov %s2122_s18  ;;  %s2692_s18 = smov %s2267_s12 }
 0x1e2   : > { %s2693_s19 = smov %s2130_s20  ;;  %s2694_s20 = smov %s2253_s7 }
 0x1e3   : > { %s2695_s21 = smov %s2142_s23  ;;  %s2696_s22 = smov %s2146_s24 }
 0x1e4   : > { %s2697_s23 = smov %s2687_s14  ;;  %13 = sbr.rel (!%p11_p6) target bundleno = 9 (0x9), region = 177 }
 0x1e5   : > { %s2698_s24 = smov %s2688_s30 }

// kernel: multitask_resnet_forward.37
= control target key start
LH: loop header
LB: loop body
LE: loop exit
PB: predicated region body
PF: predicated region fallthrough
CT: control target
= control target key end

     0   :  { %s1130_s15 = smov 0   ;;  %s1132_s16 = smov 0   ;;  %s1321_s0 = inlined_call_operand.vmem [shape: bf16[16,256], index: 0, kind: input, shape index: {}]   ;;  %s1322_s1 = inlined_call_operand.vmem [shape: bf16[256,512], index: 1, kind: input, shape index: {}]   ;;  %s1323_s2 = inlined_call_operand.vmem [shape: f32[1,512], index: 2, kind: input, shape index: {}]   ;;  %s1324_s3 = inlined_call_operand.vmem [shape: f32[1,512], index: 3, kind: input, shape index: {}]   ;;  %s1325_s4 = inlined_call_operand.vmem [shape: f32[16,512], index: 4, kind: output, shape index: {}]  }
   0x1   :  { %s1134_s17 = smov 0   ;;  %s1136_s18 = smov 0  }
   0x2   :  { %s1138_s19 = smov 0  }
   0x3 LB: > { %s29_s20 = sadd.s32 1, %s1099_s18  ;;  %s920_s21 = sadd.s32 4294967295, %s1103_s19   ;;  %s1103_s19 = sphi %s1138_s19, %s14_s19   ;;  %s1099_s18 = sphi %s1136_s18, %s1330_s18   ;;  %s1095_s17 = sphi %s1134_s17, %s1329_s17   ;;  %s1091_s16 = sphi %s1132_s16, %s1328_s16   ;;  %s1087_s15 = sphi %s1130_s15, %s1327_s15  }
   0x4   : > { %p31_p0 = scmp.ge.s32.totalorder %s29_s20, 2  ;;  %p77_p1 = scmp.ne.s32.totalorder %s1091_s16, %s1087_s15 }
   0x5   : > { %p78_p2 = scmp.eq.s32.totalorder %s1103_s19, 0  ;;  %p161_p4 = scmp.eq.s32.totalorder %s920_s21, 1 }
   0x6   : > { %s1332_s20 = smov (%p31_p0, %s29_s20), 0  ;;  %s70_s23 = sadd.s32 1, %s1091_s16 }
   0x7   : > { %p79_p3 = por %p78_p2, %p77_p1  ;;  %s66_s22 = ssub.s32 %s1099_s18, %s1332_s20 }
   0x8   : > { %p68_p5 = scmp.eq.s32.totalorder %s66_s22, 0  ;;  %p1165_p6 = por %p161_p4, %p77_p1 }
   0x9   : > { %p924_p7 = scmp.ge.s32.totalorder %s1103_s19, 2 }
   0xa   : > { %s1170_s25 = scalar_select %p68_p5, %s1091_s16, %s70_s23  }
   0xb   : > { %198 = sbr.rel (%p924_p7) target bundleno = 36 (0x24), region = 20 }
  0x10   : > { %201 = sbr.rel (!%p79_p3) target bundleno = 36 (0x24), region = 24  ;;  %s203_s26 = sand.u32 (%p79_p3), 1, %s1091_s16  }
  0x11   : > { %s972_s27 = sshll.u32 (%p79_p3), %s1099_s18, 3  ;;  %s925_s28 = sshll.u32 (%p79_p3), %s203_s26, 8 }
  0x12   : > { %s1178_s5 = scalar_lea.vmem (%p79_p3), %s1322_s1, %s972_s27  ;;  %s1183_s6 = scalar_lea.vmem (%p79_p3), [#allocation3], %s925_s28 }
  0x13   : > { %v302_v0 = vld [vmem:[%s1178_s5] sm:$0xff] (%p79_p3)  ;;  %v304_v1 = vld [vmem:[%s1178_s5 + $0x10] sm:$0xff] (%p79_p3) }
  0x14   : > { %v306_v2 = vld [vmem:[%s1178_s5 + $0x20] sm:$0xff] (%p79_p3)  ;;  %303 = vst [vmem:[%s1183_s6] sm:$0xff] (%p79_p3), %v302_v0  ;;  %305 = vst [vmem:[%s1183_s6 + $0x8] sm:$0xff] (%p79_p3), %v304_v1  ;;  %v308_v3 = vld [vmem:[%s1178_s5 + $0x30] sm:$0xff] (%p79_p3) }
  0x15   : > { %307 = vst [vmem:[%s1183_s6 + $0x10] sm:$0xff] %v306_v2  ;;  %v310_v4 = vld [vmem:[%s1178_s5 + $0x40] sm:$0xff]  ;;  %v312_v5 = vld [vmem:[%s1178_s5 + $0x50] sm:$0xff]  ;;  %309 = vst [vmem:[%s1183_s6 + $0x18] sm:$0xff] %v308_v3 }
  0x16   : > { %311 = vst [vmem:[%s1183_s6 + $0x20] sm:$0xff] %v310_v4  ;;  %313 = vst [vmem:[%s1183_s6 + $0x28] sm:$0xff] %v312_v5  ;;  %v314_v6 = vld [vmem:[%s1178_s5 + $0x60] sm:$0xff]  ;;  %v316_v7 = vld [vmem:[%s1178_s5 + $0x70] sm:$0xff] }
  0x17   : > { %v318_v8 = vld [vmem:[%s1178_s5 + $0x80] sm:$0xff]  ;;  %315 = vst [vmem:[%s1183_s6 + $0x30] sm:$0xff] %v314_v6  ;;  %317 = vst [vmem:[%s1183_s6 + $0x38] sm:$0xff] %v316_v7  ;;  %v320_v9 = vld [vmem:[%s1178_s5 + $0x90] sm:$0xff] }
  0x18   : > { %319 = vst [vmem:[%s1183_s6 + $0x40] sm:$0xff] %v318_v8  ;;  %v322_v10 = vld [vmem:[%s1178_s5 + $0xa0] sm:$0xff]  ;;  %v324_v11 = vld [vmem:[%s1178_s5 + $0xb0] sm:$0xff]  ;;  %321 = vst [vmem:[%s1183_s6 + $0x48] sm:$0xff] %v320_v9 }
  0x19   : > { %323 = vst [vmem:[%s1183_s6 + $0x50] sm:$0xff] %v322_v10  ;;  %325 = vst [vmem:[%s1183_s6 + $0x58] sm:$0xff] %v324_v11  ;;  %v326_v12 = vld [vmem:[%s1178_s5 + $0xc0] sm:$0xff]  ;;  %v328_v13 = vld [vmem:[%s1178_s5 + $0xd0] sm:$0xff] }
  0x1a   : > { %v330_v14 = vld [vmem:[%s1178_s5 + $0xe0] sm:$0xff]  ;;  %327 = vst [vmem:[%s1183_s6 + $0x60] sm:$0xff] %v326_v12  ;;  %329 = vst [vmem:[%s1183_s6 + $0x68] sm:$0xff] %v328_v13  ;;  %v332_v15 = vld [vmem:[%s1178_s5 + $0xf0] sm:$0xff] }
  0x1b   : > { %331 = vst [vmem:[%s1183_s6 + $0x70] sm:$0xff] %v330_v14  ;;  %v334_v16 = vld [vmem:[%s1178_s5 + $0x100] sm:$0xff]  ;;  %v336_v17 = vld [vmem:[%s1178_s5 + $0x110] sm:$0xff]  ;;  %333 = vst [vmem:[%s1183_s6 + $0x78] sm:$0xff] %v332_v15 }
  0x1c   : > { %335 = vst [vmem:[%s1183_s6 + $0x80] sm:$0xff] %v334_v16  ;;  %337 = vst [vmem:[%s1183_s6 + $0x88] sm:$0xff] %v336_v17  ;;  %v338_v18 = vld [vmem:[%s1178_s5 + $0x120] sm:$0xff]  ;;  %v340_v19 = vld [vmem:[%s1178_s5 + $0x130] sm:$0xff] }
  0x1d   : > { %v342_v20 = vld [vmem:[%s1178_s5 + $0x140] sm:$0xff]  ;;  %339 = vst [vmem:[%s1183_s6 + $0x90] sm:$0xff] %v338_v18  ;;  %341 = vst [vmem:[%s1183_s6 + $0x98] sm:$0xff] %v340_v19  ;;  %v344_v21 = vld [vmem:[%s1178_s5 + $0x150] sm:$0xff] }
  0x1e   : > { %343 = vst [vmem:[%s1183_s6 + $0xa0] sm:$0xff] %v342_v20  ;;  %v346_v22 = vld [vmem:[%s1178_s5 + $0x160] sm:$0xff]  ;;  %v348_v23 = vld [vmem:[%s1178_s5 + $0x170] sm:$0xff]  ;;  %345 = vst [vmem:[%s1183_s6 + $0xa8] sm:$0xff] %v344_v21 }
  0x1f   : > { %347 = vst [vmem:[%s1183_s6 + $0xb0] sm:$0xff] %v346_v22  ;;  %349 = vst [vmem:[%s1183_s6 + $0xb8] sm:$0xff] %v348_v23  ;;  %v350_v24 = vld [vmem:[%s1178_s5 + $0x180] sm:$0xff]  ;;  %v352_v25 = vld [vmem:[%s1178_s5 + $0x190] sm:$0xff] }
  0x20   : > { %v354_v26 = vld [vmem:[%s1178_s5 + $0x1a0] sm:$0xff]  ;;  %351 = vst [vmem:[%s1183_s6 + $0xc0] sm:$0xff] %v350_v24  ;;  %353 = vst [vmem:[%s1183_s6 + $0xc8] sm:$0xff] %v352_v25  ;;  %v356_v27 = vld [vmem:[%s1178_s5 + $0x1b0] sm:$0xff] }
  0x21   : > { %355 = vst [vmem:[%s1183_s6 + $0xd0] sm:$0xff] %v354_v26  ;;  %v358_v28 = vld [vmem:[%s1178_s5 + $0x1c0] sm:$0xff]  ;;  %v360_v29 = vld [vmem:[%s1178_s5 + $0x1d0] sm:$0xff]  ;;  %357 = vst [vmem:[%s1183_s6 + $0xd8] sm:$0xff] %v356_v27 }
  0x22   : > { %359 = vst [vmem:[%s1183_s6 + $0xe0] sm:$0xff] %v358_v28  ;;  %361 = vst [vmem:[%s1183_s6 + $0xe8] sm:$0xff] %v360_v29  ;;  %v362_v30 = vld [vmem:[%s1178_s5 + $0x1e0] sm:$0xff]  ;;  %v364_v31 = vld [vmem:[%s1178_s5 + $0x1f0] sm:$0xff] }
  0x23   : > { %363 = vst [vmem:[%s1183_s6 + $0xf0] sm:$0xff] %v362_v30  ;;  %365 = vst [vmem:[%s1183_s6 + $0xf8] sm:$0xff] %v364_v31 }
  0x24 PF: > { %p928_p8 = scmp.ge.s32.totalorder %s1103_s19, 1  ;;  %p386_p9 = scmp.lt.s32.totalorder %s1103_s19, 3 }
  0x26   : > { %p387_p10 = pnand %p928_p8, %p386_p9 }
  0x27   : > { %s393_s7 = sand.u32 (!%p387_p10), 1, %s1087_s15   ;;  %s931_s14 = sshll.u32 (!%p387_p10), %s1095_s17, 1 }
  0x28   : > { %390 = sbr.rel (%p387_p10) target bundleno = 322 (0x142), region = 70  ;;  %s929_s8 = sshll.u32 (!%p387_p10), %s393_s7, 8 }
  0x29   : > { %s1254_s11 = scalar_lea.vmem (!%p387_p10), [#allocation3], %s929_s8  ;;  %p450_p11 = scmp.lt.s32.totalorder (!%p387_p10), %s931_s14, 3 }
  0x2a   : > { %s930_s29 = sshll.u32 (!%p387_p10), %s393_s7, 5 }
  0x2b   : > { %s434_s30 = scalar_lea.vmem (!%p387_p10), [#allocation4], %s930_s29 }
  0x2d   : > { %v1064_v32 = vld [vmem:[%s1321_s0 + $0x4] ss:$8 sps:$4 sm:$0xff]   ;;  %v1014_v33 = vld [vmem:[%s1254_s11 + $0x74] ss:$8 sps:$4 sm:$0xff]   ;;  %v1016_v34 = vld [vmem:[%s1254_s11 + $0x70] ss:$8 sps:$4 sm:$0xff]   ;;  %v737_v2 = vlaneseq }
  0x2e   : > { %709 = vmatprep.mubr.bf16.mxu0 %v1064_v32  ;;  %677 = vmatprep.subr.bf16.mxu0 %v1014_v33  ;;  %v1017_v35 = vld [vmem:[%s1254_s11 + $0x64] ss:$8 sps:$4 sm:$0xff]   ;;  %v1019_v36 = vld [vmem:[%s1254_s11 + $0x60] ss:$8 sps:$4 sm:$0xff]   ;;  %v1020_v37 = vld [vmem:[%s1254_s11 + $0x54] ss:$8 sps:$4 sm:$0xff]  }
  0x2f   : > { %678 = vmatpush1.bf16.msra.mxu0 %v1016_v34  ;;  %v1022_v38 = vld [vmem:[%s1254_s11 + $0x50] ss:$8 sps:$4 sm:$0xff]   ;;  %v1023_v39 = vld [vmem:[%s1254_s11 + $0x44] ss:$8 sps:$4 sm:$0xff]   ;;  %v1025_v40 = vld [vmem:[%s1254_s11 + $0x40] ss:$8 sps:$4 sm:$0xff]  }
  0x30   : > { %679 = vmatprep.subr.bf16.mxu0 %v1017_v35  ;;  %v1026_v41 = vld [vmem:[%s1254_s11 + $0x34] ss:$8 sps:$4 sm:$0xff]   ;;  %v1028_v42 = vld [vmem:[%s1254_s11 + $0x30] ss:$8 sps:$4 sm:$0xff]   ;;  %v1029_v43 = vld [vmem:[%s1254_s11 + $0x24] ss:$8 sps:$4 sm:$0xff]  }
  0x31   : > { %v1031_v44 = vld [vmem:[%s1254_s11 + $0x20] ss:$8 sps:$4 sm:$0xff]   ;;  %v1032_v45 = vld [vmem:[%s1254_s11 + $0x14] ss:$8 sps:$4 sm:$0xff]   ;;  %v1034_v46 = vld [vmem:[%s1254_s11 + $0x10] ss:$8 sps:$4 sm:$0xff]  }
  0x32   : > { %v1035_v47 = vld [vmem:[%s1254_s11 + $0x4] ss:$8 sps:$4 sm:$0xff]   ;;  %v1037_v48 = vld [vmem:[%s1254_s11] ss:$8 sps:$4 sm:$0xff]   ;;  %v1038_v49 = vld [vmem:[%s1254_s11 + $0xf4] ss:$8 sps:$4 sm:$0xff]  }
  0x33   : > { %680 = vmatpush1.bf16.msra.mxu0 %v1019_v36  ;;  %v1040_v50 = vld [vmem:[%s1254_s11 + $0xf0] ss:$8 sps:$4 sm:$0xff]   ;;  %v1041_v51 = vld [vmem:[%s1254_s11 + $0xe4] ss:$8 sps:$4 sm:$0xff]   ;;  %v1043_v52 = vld [vmem:[%s1254_s11 + $0xe0] ss:$8 sps:$4 sm:$0xff]  }
  0x34   : > { %681 = vmatprep.subr.bf16.mxu0 %v1020_v37  ;;  %v1044_v53 = vld [vmem:[%s1254_s11 + $0xd4] ss:$8 sps:$4 sm:$0xff]   ;;  %v1046_v54 = vld [vmem:[%s1254_s11 + $0xd0] ss:$8 sps:$4 sm:$0xff]   ;;  %v1047_v55 = vld [vmem:[%s1254_s11 + $0xc4] ss:$8 sps:$4 sm:$0xff]  }
  0x35   : > { %v1049_v56 = vld [vmem:[%s1254_s11 + $0xc0] ss:$8 sps:$4 sm:$0xff]   ;;  %v1050_v57 = vld [vmem:[%s1254_s11 + $0xb4] ss:$8 sps:$4 sm:$0xff]   ;;  %v1052_v58 = vld [vmem:[%s1254_s11 + $0xb0] ss:$8 sps:$4 sm:$0xff]  }
  0x36   : > { %v1053_v59 = vld [vmem:[%s1254_s11 + $0xa4] ss:$8 sps:$4 sm:$0xff]   ;;  %v1055_v60 = vld [vmem:[%s1254_s11 + $0xa0] ss:$8 sps:$4 sm:$0xff]   ;;  %v1056_v61 = vld [vmem:[%s1254_s11 + $0x94] ss:$8 sps:$4 sm:$0xff]  }
  0x37   : > { %682 = vmatpush1.bf16.msra.mxu0 %v1022_v38  ;;  %v1058_v62 = vld [vmem:[%s1254_s11 + $0x90] ss:$8 sps:$4 sm:$0xff]   ;;  %v1059_v63 = vld [vmem:[%s1254_s11 + $0x84] ss:$8 sps:$4 sm:$0xff]   ;;  %v1061_v0 = vld [vmem:[%s1254_s11 + $0x80] ss:$8 sps:$4 sm:$0xff]  }
  0x38   : > { %683 = vmatprep.subr.bf16.mxu0 %v1023_v39  ;;  %v1062_v1 = vld [vmem:[%s1321_s0] ss:$8 sps:$4 sm:$0xff]   ;;  %s1334_s14 = smov (!%p450_p11, %s931_s14), 3  ;;  %v738_v3 = vshrl.u32 %v737_v2, 7  ;;  %s973_s15 = sshll.u32 (%p1165_p6), %s1095_s17, 4 }
  0x39   : > { %s452_s23 = scalar_lea.vmem %s1323_s2, %s1334_s14  ;;  %s457_s28 = scalar_lea.vmem %s1324_s3, %s1334_s14 }
  0x3a   : > { %v739_v4 = vsub.s32 0, %v738_v3  ;;  %v735_v5 = vld [vmem:[%s452_s23] sm:$0x3]  ;;  %v743_v6 = vsub.s32 1, %v738_v3  ;;  %s783_s7 = scalar_lea.vmem (%p1165_p6), %s1325_s4, %s973_s15 }
  0x3b   : > { %684 = vmatpush1.bf16.msra.mxu0 %v1025_v40  ;;  %v751_v7 = vld [vmem:[%s457_s28] sm:$0x3] }
  0x3c   : > { %685 = vmatprep.subr.bf16.mxu0 %v1026_v41  ;;  %v740_v8 = vrot.slane %v735_v5, %v739_v4  ;;  %v756_v9 = vrot.slane %v751_v7, %v739_v4  ;;  %v744_v10 = vrot.slane %v735_v5, %v743_v6  ;;  %v760_v13 = vrot.slane %v751_v7, %v743_v6 }
  0x3f   : > { %686 = vmatpush1.bf16.msra.mxu0 %v1028_v42 }
  0x40   : > { %687 = vmatprep.subr.bf16.mxu0 %v1029_v43 }
  0x43   : > { %688 = vmatpush1.bf16.msra.mxu0 %v1031_v44 }
  0x44   : > { %689 = vmatprep.subr.bf16.mxu0 %v1032_v45 }
  0x47   : > { %690 = vmatpush1.bf16.msra.mxu0 %v1034_v46 }
  0x48   : > { %691 = vmatprep.subr.bf16.mxu0 %v1035_v47 }
  0x4b   : > { %692 = vmatpush1.bf16.msra.mxu0 %v1037_v48 }
  0x4c   : > { %693 = vmatprep.subr.bf16.mxu0 %v1038_v49 }
  0x4f   : > { %694 = vmatpush2.bf16.msra.mxu0 %v1040_v50 }
  0x50   : > { %695 = vmatprep.subr.bf16.mxu0 %v1041_v51 }
  0x53   : > { %696 = vmatpush2.bf16.msra.mxu0 %v1043_v52 }
  0x54   : > { %697 = vmatprep.subr.bf16.mxu0 %v1044_v53 }
  0x57   : > { %698 = vmatpush2.bf16.msra.mxu0 %v1046_v54 }
  0x58   : > { %699 = vmatprep.subr.bf16.mxu0 %v1047_v55 }
  0x5b   : > { %700 = vmatpush2.bf16.msra.mxu0 %v1049_v56 }
  0x5c   : > { %701 = vmatprep.subr.bf16.mxu0 %v1050_v57 }
  0x5f   : > { %702 = vmatpush2.bf16.msra.mxu0 %v1052_v58 }
  0x60   : > { %703 = vmatprep.subr.bf16.mxu0 %v1053_v59 }
  0x63   : > { %704 = vmatpush2.bf16.msra.mxu0 %v1055_v60 }
  0x64   : > { %705 = vmatprep.subr.bf16.mxu0 %v1056_v61 }
  0x67   : > { %706 = vmatpush2.bf16.msra.mxu0 %v1058_v62 }
  0x68   : > { %707 = vmatprep.subr.bf16.mxu0 %v1059_v63 }
  0x6b   : > { %708 = vmatpush2.bf16.msra.mxu0 %v1061_v0 }
  0x6e   : > { %710 = vmatmul.mubr.bf16.vlgmr.msra.gmra.mxu0 %v1062_v1 }
 0x12e   : > { %v711_v11 = vpop.f32.mrf.mxu0 }
 0x12f   : > { %v747_v12 = vmul.f32 %v740_v8, %v711_v11 }
 0x130   : > { %v713_v14 = vpop.f32.mrf.mxu0 }
 0x131   : > { %v763_v15 = vadd.f32 %v756_v9, %v747_v12  ;;  %v748_v16 = vmul.f32 %v744_v10, %v713_v14 }
 0x132   : > { %v715_v17 = vpop.f32.mrf.mxu0 }
 0x133   : > { %767 = vst [vmem:[%s434_s30] sm:$0xff] %v763_v15  ;;  %v764_v18 = vadd.f32 %v760_v13, %v748_v16  ;;  %v749_v19 = vmul.f32 %v740_v8, %v715_v17 }
 0x134   : > { %v717_v20 = vpop.f32.mrf.mxu0 }
 0x135   : > { %768 = vst [vmem:[%s434_s30 + $0x8] sm:$0xff] %v764_v18  ;;  %v765_v21 = vadd.f32 %v756_v9, %v749_v19  ;;  %v750_v22 = vmul.f32 %v744_v10, %v717_v20  ;;  %777 = sbr.rel (!%p1165_p6) target bundleno = 322 (0x142), region = 86 }
 0x137   : > { %769 = vst [vmem:[%s434_s30 + $0x10] sm:$0xff] %v765_v21  ;;  %v766_v23 = vadd.f32 %v760_v13, %v750_v22 }
 0x139   : > { %770 = vst [vmem:[%s434_s30 + $0x18] sm:$0xff] %v766_v23 }
 0x13a   : > { %v796_v24 = vld [vmem:[%s434_s30] sm:$0xff] }
 0x13b   : > { %797 = vst [vmem:[%s783_s7] sm:$0xff] %v796_v24 }
 0x13c   : > { %v798_v25 = vld [vmem:[%s434_s30 + $0x8] sm:$0xff] }
 0x13d   : > { %799 = vst [vmem:[%s783_s7 + $0x8] sm:$0xff] %v798_v25 }
 0x13e   : > { %v800_v26 = vld [vmem:[%s434_s30 + $0x10] sm:$0xff] }
 0x13f   : > { %801 = vst [vmem:[%s783_s7 + $0x20] sm:$0xff] %v800_v26 }
 0x140   : > { %v802_v27 = vld [vmem:[%s434_s30 + $0x18] sm:$0xff] }
 0x141   : > { %803 = vst [vmem:[%s783_s7 + $0x28] sm:$0xff] %v802_v27 }
 0x142 PF: > { %s14_s19 = sadd.s32 1, %s1103_s19   ;;  %s1327_s15 = smov %s1091_s16 }
 0x143   : > { %p11_p12 = scmp.ge.s32.totalorder %s14_s19, 4   ;;  %s1328_s16 = smov %s1170_s25 }
 0x144   : > { %s1329_s17 = smov %s1099_s18  ;;  %s1330_s18 = smov %s1332_s20 }
 0x145   :  { %13 = sbr.rel (!%p11_p12) target bundleno = 3 (0x3), region = 149 }

// kernel: multitask_resnet_forward.38
= control target key start
LH: loop header
LB: loop body
LE: loop exit
PB: predicated region body
PF: predicated region fallthrough
CT: control target
= control target key end

     0   :  { %s2813_s0 = inlined_call_operand.vmem [shape: bf16[16,4608], index: 0, kind: input, shape index: {}]   ;;  %s2814_s1 = inlined_call_operand.vmem [shape: bf16[4608,512], index: 1, kind: input, shape index: {}]   ;;  %s2815_s2 = inlined_call_operand.vmem [shape: f32[1,512], index: 2, kind: input, shape index: {}]   ;;  %s2816_s3 = inlined_call_operand.vmem [shape: f32[1,512], index: 3, kind: input, shape index: {}]   ;;  %s2817_s4 = inlined_call_operand.vmem [shape: f32[16,512], index: 4, kind: input, shape index: {}]   ;;  %s2818_s5 = inlined_call_operand.vmem [shape: f32[16,512], index: 5, kind: output, shape index: {}]  }
   0x1   :  { %2821 = sst [smem:[#allocation10_spill]] %s2813_s0 }
   0x2   :  { %2822 = sst [smem:[#allocation11_spill]] %s2814_s1 }
   0x3   :  { %s2297_s18 = smov 0   ;;  %s2299_s19 = smov 0  }
   0x4   :  { %s2301_s20 = smov 0   ;;  %s2303_s21 = smov 0  }
   0x5   :  { %s2305_s22 = smov 0   ;;  %s2307_s23 = smov 0  }
   0x6   :  { %s2309_s24 = smov 0   ;;  %s2311_s25 = smov 0  }
   0x7   :  { %s2313_s26 = smov 0   ;;  %s2315_s27 = smov 0  }
   0x8   :  { %s2317_s28 = smov 0  }
   0x9 LB: > { %s1803_s29 = sadd.s32 4294967295, %s2264_s28   ;;  %s27_s30 = sadd.s32 1, %s2256_s26  ;;  %s2264_s28 = sphi %s2317_s28, %s15_s28   ;;  %s2260_s27 = sphi %s2315_s27, %s2844_s27   ;;  %s2256_s26 = sphi %s2313_s26, %s2843_s26   ;;  %s2252_s25 = sphi %s2311_s25, %s2842_s25   ;;  %s2248_s24 = sphi %s2309_s24, %s2841_s24   ;;  %s2244_s23 = sphi %s2307_s23, %s2840_s23   ;;  %s2240_s22 = sphi %s2305_s22, %s2839_s22   ;;  %s2236_s21 = sphi %s2303_s21, %s2838_s21   ;;  %s2232_s20 = sphi %s2301_s20, %s2837_s20   ;;  %s2228_s19 = sphi %s2299_s19, %s2836_s19   ;;  %s2224_s18 = sphi %s2297_s18, %s2835_s18  }
   0xa   : > { %p28_p0 = scmp.ge.s32.totalorder %s27_s30, 6  ;;  %s30_s6 = sadd.s32 1, %s2260_s27 }
   0xb   : > { %s43_s7 = sadd.s32 1, %s2244_s23  ;;  %p50_p1 = scmp.ne.s32.totalorder %s2244_s23, %s2240_s22 }
   0xc   : > { %s2846_s30 = smov (%p28_p0, %s27_s30), 0  ;;  %s2848_s6 = smov (!%p28_p0, %s30_s6), %s2260_s27 }
   0xd   : > { %2823 = sst [smem:[#allocation7_spill]] %s2846_s30  ;;  %s39_s8 = ssub.s32 %s2256_s26, %s2846_s30 }
   0xe   : > { %p51_p2 = scmp.eq.s32.totalorder %s2264_s28, 0  ;;  %p32_p3 = scmp.ge.s32.totalorder %s2848_s6, 2 }
   0xf   : > { %p41_p4 = scmp.eq.s32.totalorder %s39_s8, 0  ;;  %s71_s10 = sadd.s32 1, %s2236_s21 }
  0x10   : > { %p2366_p5 = por %p51_p2, %p50_p1  ;;  %s2850_s6 = smov (%p32_p3, %s2848_s6), 0 }
  0x11   : > { %2825 = sst [smem:[#allocation8_spill]] %s2850_s6  ;;  %s67_s12 = ssub.s32 %s2260_s27, %s2850_s6 }
  0x12   : > { %s2374_s11 = scalar_select %p41_p4, %s2244_s23, %s43_s7  }
  0x13   : > { %p78_p6 = scmp.ne.s32.totalorder %s2236_s21, %s2232_s20  ;;  %s68_s13 = sor.u32 %s67_s12, %s39_s8 }
  0x14   : > { %2826 = sst [smem:[#allocation9_spill]] %s2374_s11  ;;  %p149_p7 = scmp.eq.s32.totalorder %s67_s12, 0 }
  0x15   : > { %p69_p8 = scmp.eq.s32.totalorder %s68_s13, 0  ;;  %p2382_p9 = por %p78_p6, %p51_p2 }
  0x16   : > { %s151_s15 = sadd.s32 1, %s2228_s19  ;;  %p158_p10 = scmp.ne.s32.totalorder %s2228_s19, %s2224_s18 }
  0x17   : > { %s2390_s16 = scalar_select %p69_p8, %s2236_s21, %s71_s10  }
  0x18   : > { %s2393_s17 = scalar_select %p149_p7, %s2228_s19, %s151_s15  }
  0x19   : > { %p2397_p11 = por %p158_p10, %p51_p2  ;;  %p190_p12 = scmp.eq.s32.totalorder %s1803_s29, 11 }
  0x1a   : > { %p1806_p0 = scmp.ge.s32.totalorder %s2264_s28, 12 }
  0x1b   : > { %p2401_p13 = por %p190_p12, %p158_p10 }
  0x1c   : > { %212 = sbr.rel (%p1806_p0) target bundleno = 109 (0x6d), region = 16 }
  0x21   : > { %215 = sbr.rel (!%p2366_p5) target bundleno = 45 (0x2d), region = 20  ;;  %s217_s10 = sand.u32 (%p2366_p5), 1, %s2244_s23  }
  0x22   : > { %s1928_s12 = smul.u32 (%p2366_p5), 24, %s2256_s26  ;;  %s2830_s0 = sld [smem:[#allocation10_spill]] (%p2366_p5) }
  0x23   : > { %s1932_s13 = smul.u32 (%p2366_p5), 48, %s217_s10 }
  0x25   : > { %s219_s29 = scalar_lea.vmem (%p2366_p5), [#allocation3], %s1932_s13 }
  0x28   : > { %s225_s30 = scalar_lea.vmem %s2830_s0, %s1928_s12 }
  0x29   : > { %v238_v0 = vld [vmem:[%s225_s30] sm:$0xff]  ;;  %v240_v1 = vld [vmem:[%s225_s30 + $0x8] sm:$0xff]  ;;  %v242_v2 = vld [vmem:[%s225_s30 + $0x10] sm:$0xff] }
  0x2a   : > { %239 = vst [vmem:[%s219_s29] sm:$0xff] %v238_v0  ;;  %241 = vst [vmem:[%s219_s29 + $0x8] sm:$0xff] %v240_v1  ;;  %v244_v3 = vld [vmem:[%s225_s30 + $0x90] sm:$0xff]  ;;  %v246_v4 = vld [vmem:[%s225_s30 + $0x98] sm:$0xff] }
  0x2b   : > { %243 = vst [vmem:[%s219_s29 + $0x10] sm:$0xff] %v242_v2  ;;  %v248_v5 = vld [vmem:[%s225_s30 + $0xa0] sm:$0xff]  ;;  %245 = vst [vmem:[%s219_s29 + $0x18] sm:$0xff] %v244_v3 }
  0x2c   : > { %247 = vst [vmem:[%s219_s29 + $0x20] sm:$0xff] %v246_v4  ;;  %249 = vst [vmem:[%s219_s29 + $0x28] sm:$0xff] %v248_v5 }
  0x2d PF: > { %255 = sbr.rel (!%p2382_p9) target bundleno = 103 (0x67), region = 43  ;;  %s257_s6 = sand.u32 (%p2382_p9), 1, %s2236_s21  }
  0x2e   : > { %s1933_s9 = smul.u32 (%p2382_p9), 768, %s257_s6  ;;  %s1808_s10 = sshll.u32 (%p2382_p9), %s2260_s27, 1 }
  0x2f   : > { %s1929_s12 = smul.u32 (%p2382_p9), 384, %s2256_s26  ;;  %s2831_s1 = sld [smem:[#allocation11_spill]] (%p2382_p9) }
  0x30   : > { %s2426_s14 = scalar_lea.vmem (%p2382_p9), [#allocation4], %s1933_s9 }
  0x31   : > { %s263_s13 = sadd.s32 (%p2382_p9), %s1929_s12, %s1808_s10 }
  0x32   : > { %s1810_s15 = sshll.u32 %s263_s13, 2 }
  0x35   : > { %s2421_s30 = scalar_lea.vmem %s2831_s1, %s1810_s15 }
  0x36   : > { %v484_v6 = vld [vmem:[%s2421_s30] sm:$0xff]  ;;  %v486_v7 = vld [vmem:[%s2421_s30 + $0x10] sm:$0xff] }
  0x37   : > { %v488_v8 = vld [vmem:[%s2421_s30 + $0x20] sm:$0xff]  ;;  %485 = vst [vmem:[%s2426_s14] sm:$0xff] %v484_v6  ;;  %487 = vst [vmem:[%s2426_s14 + $0x8] sm:$0xff] %v486_v7  ;;  %v490_v9 = vld [vmem:[%s2421_s30 + $0x30] sm:$0xff] }
  0x38   : > { %489 = vst [vmem:[%s2426_s14 + $0x10] sm:$0xff] %v488_v8  ;;  %v492_v10 = vld [vmem:[%s2421_s30 + $0x40] sm:$0xff]  ;;  %v494_v11 = vld [vmem:[%s2421_s30 + $0x50] sm:$0xff]  ;;  %491 = vst [vmem:[%s2426_s14 + $0x18] sm:$0xff] %v490_v9 }
  0x39   : > { %493 = vst [vmem:[%s2426_s14 + $0x20] sm:$0xff] %v492_v10  ;;  %495 = vst [vmem:[%s2426_s14 + $0x28] sm:$0xff] %v494_v11  ;;  %v496_v12 = vld [vmem:[%s2421_s30 + $0x60] sm:$0xff]  ;;  %v498_v13 = vld [vmem:[%s2421_s30 + $0x70] sm:$0xff] }
  0x3a   : > { %v500_v14 = vld [vmem:[%s2421_s30 + $0x80] sm:$0xff]  ;;  %497 = vst [vmem:[%s2426_s14 + $0x30] sm:$0xff] %v496_v12  ;;  %499 = vst [vmem:[%s2426_s14 + $0x38] sm:$0xff] %v498_v13  ;;  %v502_v15 = vld [vmem:[%s2421_s30 + $0x90] sm:$0xff] }
  0x3b   : > { %501 = vst [vmem:[%s2426_s14 + $0x40] sm:$0xff] %v500_v14  ;;  %v504_v16 = vld [vmem:[%s2421_s30 + $0xa0] sm:$0xff]  ;;  %v506_v17 = vld [vmem:[%s2421_s30 + $0xb0] sm:$0xff]  ;;  %503 = vst [vmem:[%s2426_s14 + $0x48] sm:$0xff] %v502_v15 }
  0x3c   : > { %505 = vst [vmem:[%s2426_s14 + $0x50] sm:$0xff] %v504_v16  ;;  %507 = vst [vmem:[%s2426_s14 + $0x58] sm:$0xff] %v506_v17  ;;  %v508_v18 = vld [vmem:[%s2421_s30 + $0xc0] sm:$0xff]  ;;  %v510_v19 = vld [vmem:[%s2421_s30 + $0xd0] sm:$0xff] }
  0x3d   : > { %v512_v20 = vld [vmem:[%s2421_s30 + $0xe0] sm:$0xff]  ;;  %509 = vst [vmem:[%s2426_s14 + $0x60] sm:$0xff] %v508_v18  ;;  %511 = vst [vmem:[%s2426_s14 + $0x68] sm:$0xff] %v510_v19  ;;  %v514_v21 = vld [vmem:[%s2421_s30 + $0xf0] sm:$0xff] }
  0x3e   : > { %513 = vst [vmem:[%s2426_s14 + $0x70] sm:$0xff] %v512_v20  ;;  %v516_v22 = vld [vmem:[%s2421_s30 + $0x100] sm:$0xff]  ;;  %v518_v23 = vld [vmem:[%s2421_s30 + $0x110] sm:$0xff]  ;;  %515 = vst [vmem:[%s2426_s14 + $0x78] sm:$0xff] %v514_v21 }
  0x3f   : > { %517 = vst [vmem:[%s2426_s14 + $0x80] sm:$0xff] %v516_v22  ;;  %519 = vst [vmem:[%s2426_s14 + $0x88] sm:$0xff] %v518_v23  ;;  %v520_v24 = vld [vmem:[%s2421_s30 + $0x120] sm:$0xff]  ;;  %v522_v25 = vld [vmem:[%s2421_s30 + $0x130] sm:$0xff] }
  0x40   : > { %v524_v26 = vld [vmem:[%s2421_s30 + $0x140] sm:$0xff]  ;;  %521 = vst [vmem:[%s2426_s14 + $0x90] sm:$0xff] %v520_v24  ;;  %523 = vst [vmem:[%s2426_s14 + $0x98] sm:$0xff] %v522_v25  ;;  %v526_v27 = vld [vmem:[%s2421_s30 + $0x150] sm:$0xff] }
  0x41   : > { %525 = vst [vmem:[%s2426_s14 + $0xa0] sm:$0xff] %v524_v26  ;;  %v528_v28 = vld [vmem:[%s2421_s30 + $0x160] sm:$0xff]  ;;  %v530_v29 = vld [vmem:[%s2421_s30 + $0x170] sm:$0xff]  ;;  %527 = vst [vmem:[%s2426_s14 + $0xa8] sm:$0xff] %v526_v27 }
  0x42   : > { %529 = vst [vmem:[%s2426_s14 + $0xb0] sm:$0xff] %v528_v28  ;;  %531 = vst [vmem:[%s2426_s14 + $0xb8] sm:$0xff] %v530_v29  ;;  %v532_v30 = vld [vmem:[%s2421_s30 + $0x180] sm:$0xff]  ;;  %v534_v31 = vld [vmem:[%s2421_s30 + $0x190] sm:$0xff] }
  0x43   : > { %v536_v32 = vld [vmem:[%s2421_s30 + $0x1a0] sm:$0xff]  ;;  %533 = vst [vmem:[%s2426_s14 + $0xc0] sm:$0xff] %v532_v30  ;;  %535 = vst [vmem:[%s2426_s14 + $0xc8] sm:$0xff] %v534_v31  ;;  %v538_v33 = vld [vmem:[%s2421_s30 + $0x1b0] sm:$0xff] }
  0x44   : > { %537 = vst [vmem:[%s2426_s14 + $0xd0] sm:$0xff] %v536_v32  ;;  %v540_v34 = vld [vmem:[%s2421_s30 + $0x1c0] sm:$0xff]  ;;  %v542_v35 = vld [vmem:[%s2421_s30 + $0x1d0] sm:$0xff]  ;;  %539 = vst [vmem:[%s2426_s14 + $0xd8] sm:$0xff] %v538_v33 }
  0x45   : > { %541 = vst [vmem:[%s2426_s14 + $0xe0] sm:$0xff] %v540_v34  ;;  %543 = vst [vmem:[%s2426_s14 + $0xe8] sm:$0xff] %v542_v35  ;;  %v544_v36 = vld [vmem:[%s2421_s30 + $0x1e0] sm:$0xff]  ;;  %v546_v37 = vld [vmem:[%s2421_s30 + $0x1f0] sm:$0xff] }
  0x46   : > { %v548_v38 = vld [vmem:[%s2421_s30 + $0x200] sm:$0xff]  ;;  %545 = vst [vmem:[%s2426_s14 + $0xf0] sm:$0xff] %v544_v36  ;;  %547 = vst [vmem:[%s2426_s14 + $0xf8] sm:$0xff] %v546_v37  ;;  %v550_v39 = vld [vmem:[%s2421_s30 + $0x210] sm:$0xff] }
  0x47   : > { %549 = vst [vmem:[%s2426_s14 + $0x100] sm:$0xff] %v548_v38  ;;  %v552_v40 = vld [vmem:[%s2421_s30 + $0x220] sm:$0xff]  ;;  %v554_v41 = vld [vmem:[%s2421_s30 + $0x230] sm:$0xff]  ;;  %551 = vst [vmem:[%s2426_s14 + $0x108] sm:$0xff] %v550_v39 }
  0x48   : > { %553 = vst [vmem:[%s2426_s14 + $0x110] sm:$0xff] %v552_v40  ;;  %555 = vst [vmem:[%s2426_s14 + $0x118] sm:$0xff] %v554_v41  ;;  %v556_v42 = vld [vmem:[%s2421_s30 + $0x240] sm:$0xff]  ;;  %v558_v43 = vld [vmem:[%s2421_s30 + $0x250] sm:$0xff] }
  0x49   : > { %v560_v44 = vld [vmem:[%s2421_s30 + $0x260] sm:$0xff]  ;;  %557 = vst [vmem:[%s2426_s14 + $0x120] sm:$0xff] %v556_v42  ;;  %559 = vst [vmem:[%s2426_s14 + $0x128] sm:$0xff] %v558_v43  ;;  %v562_v45 = vld [vmem:[%s2421_s30 + $0x270] sm:$0xff] }
  0x4a   : > { %561 = vst [vmem:[%s2426_s14 + $0x130] sm:$0xff] %v560_v44  ;;  %v564_v46 = vld [vmem:[%s2421_s30 + $0x280] sm:$0xff]  ;;  %v566_v47 = vld [vmem:[%s2421_s30 + $0x290] sm:$0xff]  ;;  %563 = vst [vmem:[%s2426_s14 + $0x138] sm:$0xff] %v562_v45 }
  0x4b   : > { %565 = vst [vmem:[%s2426_s14 + $0x140] sm:$0xff] %v564_v46  ;;  %567 = vst [vmem:[%s2426_s14 + $0x148] sm:$0xff] %v566_v47  ;;  %v568_v48 = vld [vmem:[%s2421_s30 + $0x2a0] sm:$0xff]  ;;  %v570_v49 = vld [vmem:[%s2421_s30 + $0x2b0] sm:$0xff] }
  0x4c   : > { %v572_v50 = vld [vmem:[%s2421_s30 + $0x2c0] sm:$0xff]  ;;  %569 = vst [vmem:[%s2426_s14 + $0x150] sm:$0xff] %v568_v48  ;;  %571 = vst [vmem:[%s2426_s14 + $0x158] sm:$0xff] %v570_v49  ;;  %v574_v51 = vld [vmem:[%s2421_s30 + $0x2d0] sm:$0xff] }
  0x4d   : > { %573 = vst [vmem:[%s2426_s14 + $0x160] sm:$0xff] %v572_v50  ;;  %v576_v52 = vld [vmem:[%s2421_s30 + $0x2e0] sm:$0xff]  ;;  %v578_v53 = vld [vmem:[%s2421_s30 + $0x2f0] sm:$0xff]  ;;  %575 = vst [vmem:[%s2426_s14 + $0x168] sm:$0xff] %v574_v51 }
  0x4e   : > { %577 = vst [vmem:[%s2426_s14 + $0x170] sm:$0xff] %v576_v52  ;;  %579 = vst [vmem:[%s2426_s14 + $0x178] sm:$0xff] %v578_v53  ;;  %v580_v54 = vld [vmem:[%s2421_s30 + $0x300] sm:$0xff]  ;;  %v582_v55 = vld [vmem:[%s2421_s30 + $0x310] sm:$0xff] }
  0x4f   : > { %v584_v56 = vld [vmem:[%s2421_s30 + $0x320] sm:$0xff]  ;;  %581 = vst [vmem:[%s2426_s14 + $0x180] sm:$0xff] %v580_v54  ;;  %583 = vst [vmem:[%s2426_s14 + $0x188] sm:$0xff] %v582_v55  ;;  %v586_v57 = vld [vmem:[%s2421_s30 + $0x330] sm:$0xff] }
  0x50   : > { %585 = vst [vmem:[%s2426_s14 + $0x190] sm:$0xff] %v584_v56  ;;  %v588_v58 = vld [vmem:[%s2421_s30 + $0x340] sm:$0xff]  ;;  %v590_v59 = vld [vmem:[%s2421_s30 + $0x350] sm:$0xff]  ;;  %587 = vst [vmem:[%s2426_s14 + $0x198] sm:$0xff] %v586_v57 }
  0x51   : > { %589 = vst [vmem:[%s2426_s14 + $0x1a0] sm:$0xff] %v588_v58  ;;  %591 = vst [vmem:[%s2426_s14 + $0x1a8] sm:$0xff] %v590_v59  ;;  %v592_v60 = vld [vmem:[%s2421_s30 + $0x360] sm:$0xff]  ;;  %v594_v61 = vld [vmem:[%s2421_s30 + $0x370] sm:$0xff] }
  0x52   : > { %v596_v62 = vld [vmem:[%s2421_s30 + $0x380] sm:$0xff]  ;;  %593 = vst [vmem:[%s2426_s14 + $0x1b0] sm:$0xff] %v592_v60  ;;  %595 = vst [vmem:[%s2426_s14 + $0x1b8] sm:$0xff] %v594_v61  ;;  %v598_v63 = vld [vmem:[%s2421_s30 + $0x390] sm:$0xff] }
  0x53   : > { %597 = vst [vmem:[%s2426_s14 + $0x1c0] sm:$0xff] %v596_v62  ;;  %v600_v0 = vld [vmem:[%s2421_s30 + $0x3a0] sm:$0xff]  ;;  %v602_v1 = vld [vmem:[%s2421_s30 + $0x3b0] sm:$0xff]  ;;  %599 = vst [vmem:[%s2426_s14 + $0x1c8] sm:$0xff] %v598_v63 }
  0x54   : > { %601 = vst [vmem:[%s2426_s14 + $0x1d0] sm:$0xff] %v600_v0  ;;  %603 = vst [vmem:[%s2426_s14 + $0x1d8] sm:$0xff] %v602_v1  ;;  %v604_v2 = vld [vmem:[%s2421_s30 + $0x3c0] sm:$0xff]  ;;  %v606_v3 = vld [vmem:[%s2421_s30 + $0x3d0] sm:$0xff] }
  0x55   : > { %v608_v4 = vld [vmem:[%s2421_s30 + $0x3e0] sm:$0xff]  ;;  %605 = vst [vmem:[%s2426_s14 + $0x1e0] sm:$0xff] %v604_v2  ;;  %607 = vst [vmem:[%s2426_s14 + $0x1e8] sm:$0xff] %v606_v3  ;;  %v610_v5 = vld [vmem:[%s2421_s30 + $0x3f0] sm:$0xff] }
  0x56   : > { %609 = vst [vmem:[%s2426_s14 + $0x1f0] sm:$0xff] %v608_v4  ;;  %v612_v6 = vld [vmem:[%s2421_s30 + $0x400] sm:$0xff]  ;;  %v614_v7 = vld [vmem:[%s2421_s30 + $0x410] sm:$0xff]  ;;  %611 = vst [vmem:[%s2426_s14 + $0x1f8] sm:$0xff] %v610_v5 }
  0x57   : > { %613 = vst [vmem:[%s2426_s14 + $0x200] sm:$0xff] %v612_v6  ;;  %615 = vst [vmem:[%s2426_s14 + $0x208] sm:$0xff] %v614_v7  ;;  %v616_v8 = vld [vmem:[%s2421_s30 + $0x420] sm:$0xff]  ;;  %v618_v9 = vld [vmem:[%s2421_s30 + $0x430] sm:$0xff] }
  0x58   : > { %v620_v10 = vld [vmem:[%s2421_s30 + $0x440] sm:$0xff]  ;;  %617 = vst [vmem:[%s2426_s14 + $0x210] sm:$0xff] %v616_v8  ;;  %619 = vst [vmem:[%s2426_s14 + $0x218] sm:$0xff] %v618_v9  ;;  %v622_v11 = vld [vmem:[%s2421_s30 + $0x450] sm:$0xff] }
  0x59   : > { %621 = vst [vmem:[%s2426_s14 + $0x220] sm:$0xff] %v620_v10  ;;  %v624_v12 = vld [vmem:[%s2421_s30 + $0x460] sm:$0xff]  ;;  %v626_v13 = vld [vmem:[%s2421_s30 + $0x470] sm:$0xff]  ;;  %623 = vst [vmem:[%s2426_s14 + $0x228] sm:$0xff] %v622_v11 }
  0x5a   : > { %625 = vst [vmem:[%s2426_s14 + $0x230] sm:$0xff] %v624_v12  ;;  %627 = vst [vmem:[%s2426_s14 + $0x238] sm:$0xff] %v626_v13  ;;  %v628_v14 = vld [vmem:[%s2421_s30 + $0x480] sm:$0xff]  ;;  %v630_v15 = vld [vmem:[%s2421_s30 + $0x490] sm:$0xff] }
  0x5b   : > { %v632_v16 = vld [vmem:[%s2421_s30 + $0x4a0] sm:$0xff]  ;;  %629 = vst [vmem:[%s2426_s14 + $0x240] sm:$0xff] %v628_v14  ;;  %631 = vst [vmem:[%s2426_s14 + $0x248] sm:$0xff] %v630_v15  ;;  %v634_v17 = vld [vmem:[%s2421_s30 + $0x4b0] sm:$0xff] }
  0x5c   : > { %633 = vst [vmem:[%s2426_s14 + $0x250] sm:$0xff] %v632_v16  ;;  %v636_v18 = vld [vmem:[%s2421_s30 + $0x4c0] sm:$0xff]  ;;  %v638_v19 = vld [vmem:[%s2421_s30 + $0x4d0] sm:$0xff]  ;;  %635 = vst [vmem:[%s2426_s14 + $0x258] sm:$0xff] %v634_v17 }
  0x5d   : > { %637 = vst [vmem:[%s2426_s14 + $0x260] sm:$0xff] %v636_v18  ;;  %639 = vst [vmem:[%s2426_s14 + $0x268] sm:$0xff] %v638_v19  ;;  %v640_v20 = vld [vmem:[%s2421_s30 + $0x4e0] sm:$0xff]  ;;  %v642_v21 = vld [vmem:[%s2421_s30 + $0x4f0] sm:$0xff] }
  0x5e   : > { %v644_v22 = vld [vmem:[%s2421_s30 + $0x500] sm:$0xff]  ;;  %641 = vst [vmem:[%s2426_s14 + $0x270] sm:$0xff] %v640_v20  ;;  %643 = vst [vmem:[%s2426_s14 + $0x278] sm:$0xff] %v642_v21  ;;  %v646_v23 = vld [vmem:[%s2421_s30 + $0x510] sm:$0xff] }
  0x5f   : > { %645 = vst [vmem:[%s2426_s14 + $0x280] sm:$0xff] %v644_v22  ;;  %v648_v24 = vld [vmem:[%s2421_s30 + $0x520] sm:$0xff]  ;;  %v650_v25 = vld [vmem:[%s2421_s30 + $0x530] sm:$0xff]  ;;  %647 = vst [vmem:[%s2426_s14 + $0x288] sm:$0xff] %v646_v23 }
  0x60   : > { %649 = vst [vmem:[%s2426_s14 + $0x290] sm:$0xff] %v648_v24  ;;  %651 = vst [vmem:[%s2426_s14 + $0x298] sm:$0xff] %v650_v25  ;;  %v652_v26 = vld [vmem:[%s2421_s30 + $0x540] sm:$0xff]  ;;  %v654_v27 = vld [vmem:[%s2421_s30 + $0x550] sm:$0xff] }
  0x61   : > { %v656_v28 = vld [vmem:[%s2421_s30 + $0x560] sm:$0xff]  ;;  %653 = vst [vmem:[%s2426_s14 + $0x2a0] sm:$0xff] %v652_v26  ;;  %655 = vst [vmem:[%s2426_s14 + $0x2a8] sm:$0xff] %v654_v27  ;;  %v658_v29 = vld [vmem:[%s2421_s30 + $0x570] sm:$0xff] }
  0x62   : > { %657 = vst [vmem:[%s2426_s14 + $0x2b0] sm:$0xff] %v656_v28  ;;  %v660_v30 = vld [vmem:[%s2421_s30 + $0x580] sm:$0xff]  ;;  %v662_v31 = vld [vmem:[%s2421_s30 + $0x590] sm:$0xff]  ;;  %659 = vst [vmem:[%s2426_s14 + $0x2b8] sm:$0xff] %v658_v29 }
  0x63   : > { %661 = vst [vmem:[%s2426_s14 + $0x2c0] sm:$0xff] %v660_v30  ;;  %663 = vst [vmem:[%s2426_s14 + $0x2c8] sm:$0xff] %v662_v31  ;;  %v664_v32 = vld [vmem:[%s2421_s30 + $0x5a0] sm:$0xff]  ;;  %v666_v33 = vld [vmem:[%s2421_s30 + $0x5b0] sm:$0xff] }
  0x64   : > { %v668_v34 = vld [vmem:[%s2421_s30 + $0x5c0] sm:$0xff]  ;;  %665 = vst [vmem:[%s2426_s14 + $0x2d0] sm:$0xff] %v664_v32  ;;  %667 = vst [vmem:[%s2426_s14 + $0x2d8] sm:$0xff] %v666_v33  ;;  %v670_v35 = vld [vmem:[%s2421_s30 + $0x5d0] sm:$0xff] }
  0x65   : > { %669 = vst [vmem:[%s2426_s14 + $0x2e0] sm:$0xff] %v668_v34  ;;  %v672_v36 = vld [vmem:[%s2421_s30 + $0x5e0] sm:$0xff]  ;;  %v674_v37 = vld [vmem:[%s2421_s30 + $0x5f0] sm:$0xff]  ;;  %671 = vst [vmem:[%s2426_s14 + $0x2e8] sm:$0xff] %v670_v35 }
  0x66   : > { %673 = vst [vmem:[%s2426_s14 + $0x2f0] sm:$0xff] %v672_v36  ;;  %675 = vst [vmem:[%s2426_s14 + $0x2f8] sm:$0xff] %v674_v37 }
  0x67 PF: > { %697 = sbr.rel (!%p2397_p11) target bundleno = 109 (0x6d), region = 89  ;;  %s699_s0 = sand.u32 (%p2397_p11), 1, %s2228_s19  }
  0x68   : > { %s1930_s11 = sshll.u32 (%p2397_p11), %s2260_s27, 4  ;;  %s1811_s29 = sshll.u32 (%p2397_p11), %s699_s0, 5 }
  0x69   : > { %s707_s10 = scalar_lea.vmem (%p2397_p11), %s2817_s4, %s1930_s11  ;;  %s701_s12 = scalar_lea.vmem (%p2397_p11), [#allocation5], %s1811_s29 }
  0x6a   : > { %v720_v38 = vld [vmem:[%s707_s10] sm:$0xff] (%p2397_p11)  ;;  %v722_v39 = vld [vmem:[%s707_s10 + $0x8] sm:$0xff] (%p2397_p11) }
  0x6b   : > { %v724_v40 = vld [vmem:[%s707_s10 + $0x20] sm:$0xff] (%p2397_p11)  ;;  %721 = vst [vmem:[%s701_s12] sm:$0xff] (%p2397_p11), %v720_v38  ;;  %723 = vst [vmem:[%s701_s12 + $0x8] sm:$0xff] (%p2397_p11), %v722_v39  ;;  %v726_v41 = vld [vmem:[%s707_s10 + $0x28] sm:$0xff] (%p2397_p11) }
  0x6c   : > { %725 = vst [vmem:[%s701_s12 + $0x10] sm:$0xff] %v724_v40  ;;  %727 = vst [vmem:[%s701_s12 + $0x18] sm:$0xff] %v726_v41 }
  0x6d PF: > { %p1814_p1 = scmp.ge.s32.totalorder %s2264_s28, 1  ;;  %p732_p2 = scmp.lt.s32.totalorder %s2264_s28, 13 }
  0x6f   : > { %p733_p3 = pnand %p1814_p1, %p732_p2 }
  0x70   : > { %s739_s7 = sand.u32 (!%p733_p3), 1, %s2240_s22   ;;  %s746_s13 = sand.u32 (!%p733_p3), 1, %s2232_s20  }
  0x71   : > { %736 = sbr.rel (%p733_p3) target bundleno = 489 (0x1e9), region = 112  ;;  %s753_s30 = sand.u32 (!%p733_p3), 1, %s2224_s18  }
  0x72   : > { %s1934_s15 = smul.u32 (!%p733_p3), 48, %s739_s7  ;;  %s1815_s0 = sshll.u32 (!%p733_p3), %s753_s30, 5 }
  0x73   : > { %s1935_s14 = smul.u32 (!%p733_p3), 768, %s746_s13  ;;  %s1817_s11 = sshll.u32 (!%p733_p3), %s2252_s25, 1 }
  0x74   : > { %p800_p4 = scmp.lt.s32.totalorder (!%p733_p3), %s1817_s11, 3  ;;  %s2640_s22 = scalar_lea.vmem (!%p733_p3), [#allocation3], %s1934_s15 }
  0x75   : > { %s2642_s20 = scalar_lea.vmem (!%p733_p3), [#allocation4], %s1935_s14  ;;  %s2644_s18 = scalar_lea.vmem (!%p733_p3), [#allocation5], %s1815_s0 }
  0x76   : > { %s2852_s11 = smov (!%p800_p4, %s1817_s11), 3  ;;  %s2646_s7 = scalar_lea.vmem [#allocation6], %s1815_s0 }
  0x77   : > { %s802_s9 = scalar_lea.vmem %s2815_s2, %s2852_s11  ;;  %s807_s1 = scalar_lea.vmem %s2816_s3, %s2852_s11 }
  0x78   : > { %p1819_p5 = scmp.ne.s32.totalorder %s2248_s24, 0 }
  0x7a   : > { %816 = sbr.rel (%p1819_p5) target bundleno = 130 (0x82), region = 128 }
  0x7f   : > { %v2266_v42 = vmov 0.0  }
  0x80   : > { %817 = vst [vmem:[#allocation2 + $0x10] sm:$0xff] %v2266_v42  ;;  %818 = vst [vmem:[#allocation2] sm:$0xff] %v2266_v42 }
  0x81   : > { %819 = vst [vmem:[#allocation2 + $0x18] sm:$0xff] %v2266_v42  ;;  %820 = vst [vmem:[#allocation2 + $0x8] sm:$0xff] %v2266_v42 }
  0x82 PF: > { %v2025_v43 = vld [vmem:[%s2642_s20 + $0x74] ss:$8 sps:$4 sm:$0xff]   ;;  %v2029_v45 = vld [vmem:[%s2642_s20 + $0x70] ss:$8 sps:$4 sm:$0xff]   ;;  %v2031_v47 = vld [vmem:[%s2642_s20 + $0x64] ss:$8 sps:$4 sm:$0xff]  }
  0x83   : > { %v2027_v44 = vld [vmem:[%s2642_s20 + $0x174] ss:$8 sps:$4 sm:$0xff]   ;;  %1437 = vmatprep.subr.bf16.mxu0 %v2025_v43  ;;  %v2030_v46 = vld [vmem:[%s2642_s20 + $0x170] ss:$8 sps:$4 sm:$0xff]   ;;  %v2033_v48 = vld [vmem:[%s2642_s20 + $0x164] ss:$8 sps:$4 sm:$0xff]  }
  0x84   : > { %1480 = vmatprep.subr.bf16.mxu1 %v2027_v44  ;;  %1438 = vmatpush1.bf16.msra.mxu0 %v2029_v45  ;;  %v2035_v49 = vld [vmem:[%s2642_s20 + $0x60] ss:$8 sps:$4 sm:$0xff]   ;;  %v2037_v51 = vld [vmem:[%s2642_s20 + $0x54] ss:$8 sps:$4 sm:$0xff]   ;;  %v2041_v53 = vld [vmem:[%s2642_s20 + $0x50] ss:$8 sps:$4 sm:$0xff]  }
  0x85   : > { %1481 = vmatpush1.bf16.msra.mxu1 %v2030_v46  ;;  %1439 = vmatprep.subr.bf16.mxu0 %v2031_v47  ;;  %v2036_v50 = vld [vmem:[%s2642_s20 + $0x160] ss:$8 sps:$4 sm:$0xff]   ;;  %v2039_v52 = vld [vmem:[%s2642_s20 + $0x154] ss:$8 sps:$4 sm:$0xff]   ;;  %v2042_v54 = vld [vmem:[%s2642_s20 + $0x150] ss:$8 sps:$4 sm:$0xff]  }
  0x86   : > { %1482 = vmatprep.subr.bf16.mxu1 %v2033_v48  ;;  %v2043_v55 = vld [vmem:[%s2642_s20 + $0x44] ss:$8 sps:$4 sm:$0xff]   ;;  %v2047_v57 = vld [vmem:[%s2642_s20 + $0x40] ss:$8 sps:$4 sm:$0xff]   ;;  %v2049_v59 = vld [vmem:[%s2642_s20 + $0x34] ss:$8 sps:$4 sm:$0xff]  }
  0x87   : > { %v2045_v56 = vld [vmem:[%s2642_s20 + $0x144] ss:$8 sps:$4 sm:$0xff]   ;;  %v2048_v58 = vld [vmem:[%s2642_s20 + $0x140] ss:$8 sps:$4 sm:$0xff]   ;;  %v2051_v60 = vld [vmem:[%s2642_s20 + $0x134] ss:$8 sps:$4 sm:$0xff]  }
  0x88   : > { %1440 = vmatpush1.bf16.msra.mxu0 %v2035_v49  ;;  %v2053_v61 = vld [vmem:[%s2642_s20 + $0x30] ss:$8 sps:$4 sm:$0xff]   ;;  %v2055_v63 = vld [vmem:[%s2642_s20 + $0x24] ss:$8 sps:$4 sm:$0xff]   ;;  %v2059_v1 = vld [vmem:[%s2642_s20 + $0x20] ss:$8 sps:$4 sm:$0xff]  }
  0x89   : > { %1483 = vmatpush1.bf16.msra.mxu1 %v2036_v50  ;;  %1441 = vmatprep.subr.bf16.mxu0 %v2037_v51  ;;  %v2054_v62 = vld [vmem:[%s2642_s20 + $0x130] ss:$8 sps:$4 sm:$0xff]   ;;  %v2057_v0 = vld [vmem:[%s2642_s20 + $0x124] ss:$8 sps:$4 sm:$0xff]   ;;  %v2060_v2 = vld [vmem:[%s2642_s20 + $0x120] ss:$8 sps:$4 sm:$0xff]  }
  0x8a   : > { %1484 = vmatprep.subr.bf16.mxu1 %v2039_v52  ;;  %v2061_v3 = vld [vmem:[%s2642_s20 + $0x14] ss:$8 sps:$4 sm:$0xff]   ;;  %v2065_v5 = vld [vmem:[%s2642_s20 + $0x10] ss:$8 sps:$4 sm:$0xff]   ;;  %v2067_v7 = vld [vmem:[%s2642_s20 + $0x4] ss:$8 sps:$4 sm:$0xff]  }
  0x8b   : > { %v2063_v4 = vld [vmem:[%s2642_s20 + $0x114] ss:$8 sps:$4 sm:$0xff]   ;;  %v2066_v6 = vld [vmem:[%s2642_s20 + $0x110] ss:$8 sps:$4 sm:$0xff]   ;;  %v2069_v8 = vld [vmem:[%s2642_s20 + $0x104] ss:$8 sps:$4 sm:$0xff]  }
  0x8c   : > { %1442 = vmatpush1.bf16.msra.mxu0 %v2041_v53  ;;  %v2071_v9 = vld [vmem:[%s2642_s20] ss:$8 sps:$4 sm:$0xff]   ;;  %v2073_v11 = vld [vmem:[%s2642_s20 + $0xf4] ss:$8 sps:$4 sm:$0xff]   ;;  %v2077_v13 = vld [vmem:[%s2642_s20 + $0xf0] ss:$8 sps:$4 sm:$0xff]  }
  0x8d   : > { %1485 = vmatpush1.bf16.msra.mxu1 %v2042_v54  ;;  %1443 = vmatprep.subr.bf16.mxu0 %v2043_v55  ;;  %v2072_v10 = vld [vmem:[%s2642_s20 + $0x100] ss:$8 sps:$4 sm:$0xff]   ;;  %v2075_v12 = vld [vmem:[%s2642_s20 + $0x1f4] ss:$8 sps:$4 sm:$0xff]   ;;  %v2078_v14 = vld [vmem:[%s2642_s20 + $0x1f0] ss:$8 sps:$4 sm:$0xff]  }
  0x8e   : > { %1486 = vmatprep.subr.bf16.mxu1 %v2045_v56  ;;  %v2079_v15 = vld [vmem:[%s2642_s20 + $0xe4] ss:$8 sps:$4 sm:$0xff]   ;;  %v2083_v17 = vld [vmem:[%s2642_s20 + $0xe0] ss:$8 sps:$4 sm:$0xff]   ;;  %v2085_v19 = vld [vmem:[%s2642_s20 + $0xd4] ss:$8 sps:$4 sm:$0xff]  }
  0x8f   : > { %v2081_v16 = vld [vmem:[%s2642_s20 + $0x1e4] ss:$8 sps:$4 sm:$0xff]   ;;  %v2084_v18 = vld [vmem:[%s2642_s20 + $0x1e0] ss:$8 sps:$4 sm:$0xff]   ;;  %v2087_v20 = vld [vmem:[%s2642_s20 + $0x1d4] ss:$8 sps:$4 sm:$0xff]  }
  0x90   : > { %1444 = vmatpush1.bf16.msra.mxu0 %v2047_v57  ;;  %v2089_v21 = vld [vmem:[%s2642_s20 + $0xd0] ss:$8 sps:$4 sm:$0xff]   ;;  %v2091_v23 = vld [vmem:[%s2642_s20 + $0xc4] ss:$8 sps:$4 sm:$0xff]   ;;  %v2095_v25 = vld [vmem:[%s2642_s20 + $0xc0] ss:$8 sps:$4 sm:$0xff]  }
  0x91   : > { %1487 = vmatpush1.bf16.msra.mxu1 %v2048_v58  ;;  %1445 = vmatprep.subr.bf16.mxu0 %v2049_v59  ;;  %v2090_v22 = vld [vmem:[%s2642_s20 + $0x1d0] ss:$8 sps:$4 sm:$0xff]   ;;  %v2093_v24 = vld [vmem:[%s2642_s20 + $0x1c4] ss:$8 sps:$4 sm:$0xff]   ;;  %v2096_v26 = vld [vmem:[%s2642_s20 + $0x1c0] ss:$8 sps:$4 sm:$0xff]  }
  0x92   : > { %1488 = vmatprep.subr.bf16.mxu1 %v2051_v60  ;;  %v2097_v27 = vld [vmem:[%s2642_s20 + $0xb4] ss:$8 sps:$4 sm:$0xff]   ;;  %v2101_v31 = vld [vmem:[%s2642_s20 + $0xb0] ss:$8 sps:$4 sm:$0xff]   ;;  %v2103_v33 = vld [vmem:[%s2642_s20 + $0xa4] ss:$8 sps:$4 sm:$0xff]  }
  0x93   : > { %v2123_v28 = vld [vmem:[%s2640_s22 + $0x4] ss:$24 sps:$4 sm:$0xff]   ;;  %v2102_v32 = vld [vmem:[%s2642_s20 + $0x1b0] ss:$8 sps:$4 sm:$0xff]   ;;  %v2107_v35 = vld [vmem:[%s2642_s20 + $0xa0] ss:$8 sps:$4 sm:$0xff]  }
  0x94   : > { %1446 = vmatpush1.bf16.msra.mxu0 %v2053_v61  ;;  %v2099_v29 = vld [vmem:[%s2642_s20 + $0x1b4] ss:$8 sps:$4 sm:$0xff]   ;;  %1469 = vmatprep.mubr.bf16.mxu0 %v2123_v28  ;;  %v2105_v34 = vld [vmem:[%s2642_s20 + $0x1a4] ss:$8 sps:$4 sm:$0xff]   ;;  %v2108_v36 = vld [vmem:[%s2642_s20 + $0x1a0] ss:$8 sps:$4 sm:$0xff]  }
  0x95   : > { %1489 = vmatpush1.bf16.msra.mxu1 %v2054_v62  ;;  %1447 = vmatprep.subr.bf16.mxu0 %v2055_v63  ;;  %v2126_v30 = vld [vmem:[%s2640_s22 + $0xc] ss:$24 sps:$4 sm:$0xff]   ;;  %v2113_v39 = vld [vmem:[%s2642_s20 + $0x90] ss:$8 sps:$4 sm:$0xff]   ;;  %v2119_v43 = vld [vmem:[%s2642_s20 + $0x80] ss:$8 sps:$4 sm:$0xff]  }
  0x96   : > { %1490 = vmatprep.subr.bf16.mxu1 %v2057_v0  ;;  %1512 = vmatprep.mubr.bf16.mxu1 %v2126_v30  ;;  %v2109_v37 = vld [vmem:[%s2642_s20 + $0x94] ss:$8 sps:$4 sm:$0xff]   ;;  %v2114_v40 = vld [vmem:[%s2642_s20 + $0x190] ss:$8 sps:$4 sm:$0xff]   ;;  %v2115_v41 = vld [vmem:[%s2642_s20 + $0x84] ss:$8 sps:$4 sm:$0xff]  }
  0x97   : > { %v2111_v38 = vld [vmem:[%s2642_s20 + $0x194] ss:$8 sps:$4 sm:$0xff]   ;;  %v2117_v42 = vld [vmem:[%s2642_s20 + $0x184] ss:$8 sps:$4 sm:$0xff]   ;;  %v2120_v44 = vld [vmem:[%s2642_s20 + $0x180] ss:$8 sps:$4 sm:$0xff]  }
  0x98   : > { %1448 = vmatpush1.bf16.msra.mxu0 %v2059_v1  ;;  %v2129_v45 = vld [vmem:[%s2642_s20 + $0x274] ss:$8 sps:$4 sm:$0xff]   ;;  %v2121_v46 = vld [vmem:[%s2640_s22] ss:$24 sps:$4 sm:$0xff]   ;;  %v2132_v49 = vld [vmem:[%s2642_s20 + $0x264] ss:$8 sps:$4 sm:$0xff]  }
  0x99   : > { %1491 = vmatpush1.bf16.msra.mxu1 %v2060_v2  ;;  %1449 = vmatprep.subr.bf16.mxu0 %v2061_v3  ;;  %v2124_v47 = vld [vmem:[%s2640_s22 + $0x8] ss:$24 sps:$4 sm:$0xff]   ;;  %v2177_v50 = vld [vmem:[%s2640_s22 + $0x14] ss:$24 sps:$4 sm:$0xff]   ;;  %p1922_p6 = scmp.ne.s32.totalorder %s2248_s24, 5 }
  0x9a   : > { %1492 = vmatprep.subr.bf16.mxu1 %v2063_v4  ;;  %v2127_v48 = vld [vmem:[%s2642_s20 + $0x270] ss:$8 sps:$4 sm:$0xff]   ;;  %v2130_v51 = vld [vmem:[%s2642_s20 + $0x260] ss:$8 sps:$4 sm:$0xff]   ;;  %v2135_v52 = vld [vmem:[%s2642_s20 + $0x254] ss:$8 sps:$4 sm:$0xff]  }
  0x9b   : > { %v2133_v53 = vld [vmem:[%s2642_s20 + $0x250] ss:$8 sps:$4 sm:$0xff]   ;;  %v2138_v54 = vld [vmem:[%s2642_s20 + $0x244] ss:$8 sps:$4 sm:$0xff]   ;;  %v2136_v55 = vld [vmem:[%s2642_s20 + $0x240] ss:$8 sps:$4 sm:$0xff]  }
  0x9c   : > { %1450 = vmatpush1.bf16.msra.mxu0 %v2065_v5  ;;  %v2141_v56 = vld [vmem:[%s2642_s20 + $0x234] ss:$8 sps:$4 sm:$0xff]   ;;  %v2139_v57 = vld [vmem:[%s2642_s20 + $0x230] ss:$8 sps:$4 sm:$0xff]   ;;  %v2144_v58 = vld [vmem:[%s2642_s20 + $0x224] ss:$8 sps:$4 sm:$0xff]  }
  0x9d   : > { %1493 = vmatpush1.bf16.msra.mxu1 %v2066_v6  ;;  %1451 = vmatprep.subr.bf16.mxu0 %v2067_v7  ;;  %v2142_v59 = vld [vmem:[%s2642_s20 + $0x220] ss:$8 sps:$4 sm:$0xff]   ;;  %v2147_v60 = vld [vmem:[%s2642_s20 + $0x214] ss:$8 sps:$4 sm:$0xff]   ;;  %v2145_v61 = vld [vmem:[%s2642_s20 + $0x210] ss:$8 sps:$4 sm:$0xff]  }
  0x9e   : > { %1494 = vmatprep.subr.bf16.mxu1 %v2069_v8  ;;  %v2150_v62 = vld [vmem:[%s2642_s20 + $0x204] ss:$8 sps:$4 sm:$0xff]   ;;  %v2148_v63 = vld [vmem:[%s2642_s20 + $0x200] ss:$8 sps:$4 sm:$0xff]   ;;  %v2153_v0 = vld [vmem:[%s2642_s20 + $0x2f4] ss:$8 sps:$4 sm:$0xff]  }
  0x9f   : > { %v2151_v1 = vld [vmem:[%s2642_s20 + $0x2f0] ss:$8 sps:$4 sm:$0xff]   ;;  %v2156_v2 = vld [vmem:[%s2642_s20 + $0x2e4] ss:$8 sps:$4 sm:$0xff]   ;;  %v2154_v3 = vld [vmem:[%s2642_s20 + $0x2e0] ss:$8 sps:$4 sm:$0xff]  }
  0xa0   : > { %1452 = vmatpush1.bf16.msra.mxu0 %v2071_v9  ;;  %v2159_v4 = vld [vmem:[%s2642_s20 + $0x2d4] ss:$8 sps:$4 sm:$0xff]   ;;  %v2157_v5 = vld [vmem:[%s2642_s20 + $0x2d0] ss:$8 sps:$4 sm:$0xff]   ;;  %v2162_v6 = vld [vmem:[%s2642_s20 + $0x2c4] ss:$8 sps:$4 sm:$0xff]  }
  0xa1   : > { %1495 = vmatpush1.bf16.msra.mxu1 %v2072_v10  ;;  %1453 = vmatprep.subr.bf16.mxu0 %v2073_v11  ;;  %v2160_v7 = vld [vmem:[%s2642_s20 + $0x2c0] ss:$8 sps:$4 sm:$0xff]   ;;  %v2165_v8 = vld [vmem:[%s2642_s20 + $0x2b4] ss:$8 sps:$4 sm:$0xff]   ;;  %v2163_v9 = vld [vmem:[%s2642_s20 + $0x2b0] ss:$8 sps:$4 sm:$0xff]  }
  0xa2   : > { %1496 = vmatprep.subr.bf16.mxu1 %v2075_v12  ;;  %v2168_v10 = vld [vmem:[%s2642_s20 + $0x2a4] ss:$8 sps:$4 sm:$0xff]   ;;  %v2166_v11 = vld [vmem:[%s2642_s20 + $0x2a0] ss:$8 sps:$4 sm:$0xff]   ;;  %v2171_v12 = vld [vmem:[%s2642_s20 + $0x294] ss:$8 sps:$4 sm:$0xff]  }
  0xa3   : > { %v822_v30 = vld [vmem:[#allocation2] sm:$0xff] }
  0xa4   : > { %1454 = vmatpush2.bf16.msra.mxu0 %v2077_v13  ;;  %v2169_v13 = vld [vmem:[%s2642_s20 + $0x290] ss:$8 sps:$4 sm:$0xff]  }
  0xa5   : > { %1497 = vmatpush2.bf16.msra.mxu1 %v2078_v14  ;;  %1455 = vmatprep.subr.bf16.mxu0 %v2079_v15  ;;  %v2174_v14 = vld [vmem:[%s2642_s20 + $0x284] ss:$8 sps:$4 sm:$0xff]   ;;  %v2172_v15 = vld [vmem:[%s2642_s20 + $0x280] ss:$8 sps:$4 sm:$0xff]  }
  0xa6   : > { %1498 = vmatprep.subr.bf16.mxu1 %v2081_v16  ;;  %v2175_v16 = vld [vmem:[%s2640_s22 + $0x10] ss:$24 sps:$4 sm:$0xff]  }
  0xa8   : > { %1456 = vmatpush2.bf16.msra.mxu0 %v2083_v17 }
  0xa9   : > { %1499 = vmatpush2.bf16.msra.mxu1 %v2084_v18  ;;  %1457 = vmatprep.subr.bf16.mxu0 %v2085_v19 }
  0xaa   : > { %1500 = vmatprep.subr.bf16.mxu1 %v2087_v20 }
  0xac   : > { %1458 = vmatpush2.bf16.msra.mxu0 %v2089_v21 }
  0xad   : > { %1501 = vmatpush2.bf16.msra.mxu1 %v2090_v22  ;;  %1459 = vmatprep.subr.bf16.mxu0 %v2091_v23 }
  0xae   : > { %1502 = vmatprep.subr.bf16.mxu1 %v2093_v24 }
  0xb0   : > { %1460 = vmatpush2.bf16.msra.mxu0 %v2095_v25  ;;  %v821_v25 = vld [vmem:[#allocation2 + $0x10] sm:$0xff] }
  0xb1   : > { %1503 = vmatpush2.bf16.msra.mxu1 %v2096_v26  ;;  %1461 = vmatprep.subr.bf16.mxu0 %v2097_v27 }
  0xb2   : > { %1504 = vmatprep.subr.bf16.mxu1 %v2099_v29 }
  0xb4   : > { %1462 = vmatpush2.bf16.msra.mxu0 %v2101_v31 }
  0xb5   : > { %1505 = vmatpush2.bf16.msra.mxu1 %v2102_v32  ;;  %1463 = vmatprep.subr.bf16.mxu0 %v2103_v33 }
  0xb6   : > { %1506 = vmatprep.subr.bf16.mxu1 %v2105_v34 }
  0xb8   : > { %1464 = vmatpush2.bf16.msra.mxu0 %v2107_v35  ;;  %v823_v35 = vld [vmem:[#allocation2 + $0x18] sm:$0xff] }
  0xb9   : > { %1507 = vmatpush2.bf16.msra.mxu1 %v2108_v36  ;;  %1465 = vmatprep.subr.bf16.mxu0 %v2109_v37 }
  0xba   : > { %1508 = vmatprep.subr.bf16.mxu1 %v2111_v38 }
  0xbc   : > { %1466 = vmatpush2.bf16.msra.mxu0 %v2113_v39 }
  0xbd   : > { %1509 = vmatpush2.bf16.msra.mxu1 %v2114_v40  ;;  %1467 = vmatprep.subr.bf16.mxu0 %v2115_v41  ;;  %v824_v40 = vld [vmem:[#allocation2 + $0x8] sm:$0xff] }
  0xbe   : > { %1510 = vmatprep.subr.bf16.mxu1 %v2117_v42 }
  0xc0   : > { %1468 = vmatpush2.bf16.msra.mxu0 %v2119_v43 }
  0xc1   : > { %1511 = vmatpush2.bf16.msra.mxu1 %v2120_v44  ;;  %1523 = vmatprep.subr.bf16.mxu0 %v2129_v45 }
  0xc3   : > { %1470 = vmatmul.mubr.bf16.vlgmr.msra.gmra.mxu0 %v2121_v46 }
  0xc4   : > { %1513 = vmatmul.mubr.bf16.vlgmr.msra.gmra.mxu1 %v2124_v47  ;;  %1524 = vmatpush1.bf16.msra.mxu0 %v2127_v48 }
  0xc5   : > { %1525 = vmatprep.subr.bf16.mxu0 %v2132_v49  ;;  %1555 = vmatprep.mubr.bf16.mxu0 %v2177_v50 }
  0xc8   : > { %1526 = vmatpush1.bf16.msra.mxu0 %v2130_v51 }
  0xc9   : > { %1527 = vmatprep.subr.bf16.mxu0 %v2135_v52 }
  0xcc   : > { %1528 = vmatpush1.bf16.msra.mxu0 %v2133_v53 }
  0xcd   : > { %1529 = vmatprep.subr.bf16.mxu0 %v2138_v54 }
  0xd0   : > { %1530 = vmatpush1.bf16.msra.mxu0 %v2136_v55 }
  0xd1   : > { %1531 = vmatprep.subr.bf16.mxu0 %v2141_v56 }
  0xd4   : > { %1532 = vmatpush1.bf16.msra.mxu0 %v2139_v57 }
  0xd5   : > { %1533 = vmatprep.subr.bf16.mxu0 %v2144_v58 }
  0xd8   : > { %1534 = vmatpush1.bf16.msra.mxu0 %v2142_v59 }
  0xd9   : > { %1535 = vmatprep.subr.bf16.mxu0 %v2147_v60 }
  0xdc   : > { %1536 = vmatpush1.bf16.msra.mxu0 %v2145_v61 }
  0xdd   : > { %1537 = vmatprep.subr.bf16.mxu0 %v2150_v62 }
  0xe0   : > { %1538 = vmatpush1.bf16.msra.mxu0 %v2148_v63 }
  0xe1   : > { %1539 = vmatprep.subr.bf16.mxu0 %v2153_v0 }
  0xe4   : > { %1540 = vmatpush2.bf16.msra.mxu0 %v2151_v1 }
  0xe5   : > { %1541 = vmatprep.subr.bf16.mxu0 %v2156_v2 }
  0xe8   : > { %1542 = vmatpush2.bf16.msra.mxu0 %v2154_v3 }
  0xe9   : > { %1543 = vmatprep.subr.bf16.mxu0 %v2159_v4 }
  0xec   : > { %1544 = vmatpush2.bf16.msra.mxu0 %v2157_v5 }
  0xed   : > { %1545 = vmatprep.subr.bf16.mxu0 %v2162_v6 }
  0xf0   : > { %1546 = vmatpush2.bf16.msra.mxu0 %v2160_v7 }
  0xf1   : > { %1547 = vmatprep.subr.bf16.mxu0 %v2165_v8 }
  0xf4   : > { %1548 = vmatpush2.bf16.msra.mxu0 %v2163_v9 }
  0xf5   : > { %1549 = vmatprep.subr.bf16.mxu0 %v2168_v10 }
  0xf8   : > { %1550 = vmatpush2.bf16.msra.mxu0 %v2166_v11 }
  0xf9   : > { %1551 = vmatprep.subr.bf16.mxu0 %v2171_v12 }
  0xfc   : > { %1552 = vmatpush2.bf16.msra.mxu0 %v2169_v13 }
  0xfd   : > { %1553 = vmatprep.subr.bf16.mxu0 %v2174_v14 }
 0x100   : > { %1554 = vmatpush2.bf16.msra.mxu0 %v2172_v15 }
 0x103   : > { %1556 = vmatmul.mubr.bf16.vlgmr.msra.gmra.mxu0 %v2175_v16 }
 0x183   : > { %v1471_v17 = vpop.f32.mrf.mxu0 }
 0x184   : > { %v1514_v18 = vpop.f32.mrf.mxu1 }
 0x185   : > { %v1473_v19 = vpop.f32.mrf.mxu0  ;;  %v1515_v24 = vadd.f32 %v1514_v18, %v1471_v17 }
 0x186   : > { %v1516_v20 = vpop.f32.mrf.mxu1 }
 0x187   : > { %v1475_v21 = vpop.f32.mrf.mxu0  ;;  %v1517_v27 = vadd.f32 %v1516_v20, %v1473_v19 }
 0x188   : > { %v1518_v22 = vpop.f32.mrf.mxu1 }
 0x189   : > { %v1477_v23 = vpop.f32.mrf.mxu0  ;;  %v1519_v32 = vadd.f32 %v1518_v22, %v1475_v21 }
 0x18a   : > { %v1520_v29 = vpop.f32.mrf.mxu1 }
 0x18b   : > { %v1521_v37 = vadd.f32 %v1520_v29, %v1477_v23 }
 0x1c3   : > { %v1557_v26 = vpop.f32.mrf.mxu0 }
 0x1c4   : > { %v1558_v28 = vadd.f32 %v1557_v26, %v1515_v24 }
 0x1c5   : > { %v1559_v31 = vpop.f32.mrf.mxu0 }
 0x1c6   : > { %v1566_v33 = vadd.f32 %v1558_v28, %v821_v25  ;;  %v1560_v34 = vadd.f32 %v1559_v31, %v1517_v27 }
 0x1c7   : > { %v1561_v36 = vpop.f32.mrf.mxu0 }
 0x1c8   : > { %1570 = vst [vmem:[#allocation2 + $0x10] sm:$0xff] %v1566_v33  ;;  %v1567_v38 = vadd.f32 %v1560_v34, %v822_v30  ;;  %v1562_v39 = vadd.f32 %v1561_v36, %v1519_v32 }
 0x1c9   : > { %v1563_v41 = vpop.f32.mrf.mxu0 }
 0x1ca   : > { %1571 = vst [vmem:[#allocation2] sm:$0xff] %v1567_v38  ;;  %v1568_v42 = vadd.f32 %v1562_v39, %v823_v35  ;;  %v1564_v43 = vadd.f32 %v1563_v41, %v1521_v37  ;;  %1577 = sbr.rel (%p1922_p6) target bundleno = 481 (0x1e1), region = 132 }
 0x1cc   : > { %1572 = vst [vmem:[#allocation2 + $0x18] sm:$0xff] %v1568_v42  ;;  %v1569_v44 = vadd.f32 %v1564_v43, %v824_v40 }
 0x1ce   : > { %1573 = vst [vmem:[#allocation2 + $0x8] sm:$0xff] %v1569_v44 }
 0x1cf   : > { %v1584_v45 = vlaneseq  ;;  %v1582_v47 = vld [vmem:[%s802_s9] sm:$0x3]  ;;  %v1578_v49 = vld [vmem:[#allocation2 + $0x10] sm:$0xff]  ;;  %v1615_v0 = vld [vmem:[%s2644_s18 + $0x8] sm:$0xff] }
 0x1d0   : > { %v1598_v48 = vld [vmem:[%s807_s1] sm:$0x3]  ;;  %v1616_v1 = vld [vmem:[%s2644_s18 + $0x10] sm:$0xff]  ;;  %v1617_v2 = vld [vmem:[%s2644_s18 + $0x18] sm:$0xff] }
 0x1d1   : > { %v1585_v46 = vshrl.u32 %v1584_v45, 7  ;;  %v1579_v52 = vld [vmem:[#allocation2] sm:$0xff] }
 0x1d2   : > { %v1614_v60 = vld [vmem:[%s2644_s18] sm:$0xff] }
 0x1d3   : > { %v1586_v50 = vsub.s32 0, %v1585_v46  ;;  %v1590_v51 = vsub.s32 1, %v1585_v46  ;;  %v1580_v53 = vld [vmem:[#allocation2 + $0x18] sm:$0xff] }
 0x1d5   : > { %v1581_v54 = vld [vmem:[#allocation2 + $0x8] sm:$0xff]  ;;  %v1587_v55 = vrot.slane %v1582_v47, %v1586_v50  ;;  %v1603_v56 = vrot.slane %v1598_v48, %v1586_v50  ;;  %v1591_v57 = vrot.slane %v1582_v47, %v1590_v51  ;;  %v1607_v58 = vrot.slane %v1598_v48, %v1590_v51 }
 0x1d7   : > { %v1594_v59 = vmul.f32 %v1587_v55, %v1578_v49  ;;  %v1595_v61 = vmul.f32 %v1591_v57, %v1579_v52  ;;  %v1596_v62 = vmul.f32 %v1587_v55, %v1580_v53  ;;  %v1597_v63 = vmul.f32 %v1591_v57, %v1581_v54 }
 0x1d9   : > { %v1610_v3 = vadd.f32 %v1603_v56, %v1594_v59  ;;  %v1611_v4 = vadd.f32 %v1607_v58, %v1595_v61  ;;  %v1612_v5 = vadd.f32 %v1603_v56, %v1596_v62  ;;  %v1613_v6 = vadd.f32 %v1607_v58, %v1597_v63 }
 0x1db   : > { %v1618_v7 = vadd.f32 %v1614_v60, %v1610_v3  ;;  %v1619_v8 = vadd.f32 %v1615_v0, %v1611_v4  ;;  %v1620_v9 = vadd.f32 %v1616_v1, %v1612_v5  ;;  %v1621_v10 = vadd.f32 %v1617_v2, %v1613_v6 }
 0x1dd   : > { %v1622_v11 = vmax.f32 %v1618_v7, 0.0  ;;  %v1623_v12 = vmax.f32 %v1619_v8, 0.0  ;;  %v1624_v13 = vmax.f32 %v1620_v9, 0.0  ;;  %v1625_v14 = vmax.f32 %v1621_v10, 0.0 }
 0x1df   : > { %1626 = vst [vmem:[%s2646_s7] sm:$0xff] %v1622_v11  ;;  %1627 = vst [vmem:[%s2646_s7 + $0x8] sm:$0xff] %v1623_v12 }
 0x1e0   : > { %1628 = vst [vmem:[%s2646_s7 + $0x10] sm:$0xff] %v1624_v13  ;;  %1629 = vst [vmem:[%s2646_s7 + $0x18] sm:$0xff] %v1625_v14 }
 0x1e1 PF: > { %1636 = sbr.rel (!%p2401_p13) target bundleno = 489 (0x1e9), region = 136  ;;  %s1931_s1 = sshll.u32 (%p2401_p13), %s2252_s25, 4 }
 0x1e2   : > { %s1642_s11 = scalar_lea.vmem (%p2401_p13), %s2818_s5, %s1931_s1 }
 0x1e6   : > { %v1655_v15 = vld [vmem:[%s2646_s7] sm:$0xff]  ;;  %v1657_v16 = vld [vmem:[%s2646_s7 + $0x8] sm:$0xff] }
 0x1e7   : > { %v1659_v17 = vld [vmem:[%s2646_s7 + $0x10] sm:$0xff]  ;;  %v1661_v18 = vld [vmem:[%s2646_s7 + $0x18] sm:$0xff]  ;;  %1656 = vst [vmem:[%s1642_s11] sm:$0xff] %v1655_v15  ;;  %1658 = vst [vmem:[%s1642_s11 + $0x8] sm:$0xff] %v1657_v16 }
 0x1e8   : > { %1660 = vst [vmem:[%s1642_s11 + $0x20] sm:$0xff] %v1659_v17  ;;  %1662 = vst [vmem:[%s1642_s11 + $0x28] sm:$0xff] %v1661_v18 }
 0x1e9 PF: > { %s15_s28 = sadd.s32 1, %s2264_s28   ;;  %s2832_s25 = sld [smem:[#allocation9_spill]] }
 0x1ea   : > { %p12_p7 = scmp.ge.s32.totalorder %s15_s28, 14   ;;  %s2833_s8 = sld [smem:[#allocation7_spill]] }
 0x1eb   : > { %s2834_s29 = sld [smem:[#allocation8_spill]]  ;;  %s2835_s18 = smov %s2228_s19 }
 0x1ec   : > { %s2836_s19 = smov %s2393_s17  ;;  %s2837_s20 = smov %s2236_s21 }
 0x1ed   : > { %s2838_s21 = smov %s2390_s16  ;;  %s2839_s22 = smov %s2244_s23 }
 0x1ee   : > { %s2841_s24 = smov %s2256_s26  ;;  %14 = sbr.rel (!%p12_p7) target bundleno = 9 (0x9), region = 212 }
 0x1ef   : > { %s2840_s23 = smov %s2832_s25  ;;  %s2842_s25 = smov %s2260_s27 }
 0x1f0   : > { %s2843_s26 = smov %s2833_s8 }
 0x1f1   : > { %s2844_s27 = smov %s2834_s29 }

// kernel: multitask_resnet_forward.39
= control target key start
LH: loop header
LB: loop body
LE: loop exit
PB: predicated region body
PF: predicated region fallthrough
CT: control target
= control target key end

     0   :  { %s2671_s0 = inlined_call_operand.vmem [shape: bf16[16,4608], index: 0, kind: input, shape index: {}]   ;;  %s2672_s1 = inlined_call_operand.vmem [shape: bf16[4608,512], index: 1, kind: input, shape index: {}]   ;;  %s2673_s2 = inlined_call_operand.vmem [shape: f32[1,512], index: 2, kind: input, shape index: {}]   ;;  %s2674_s3 = inlined_call_operand.vmem [shape: f32[1,512], index: 3, kind: input, shape index: {}]   ;;  %s2675_s4 = inlined_call_operand.vmem [shape: f32[16,512], index: 4, kind: output, shape index: {}]  }
   0x1   :  { %2678 = sst [smem:[#allocation8_spill]] %s2671_s0 }
   0x2   :  { %2679 = sst [smem:[#allocation9_spill]] %s2672_s1 }
   0x3   :  { %s2178_s15 = smov 0   ;;  %s2180_s16 = smov 0  }
   0x4   :  { %s2182_s17 = smov 0   ;;  %s2184_s18 = smov 0  }
   0x5   :  { %s2186_s19 = smov 0   ;;  %s2188_s20 = smov 0  }
   0x6   :  { %s2190_s21 = smov 0   ;;  %s2192_s22 = smov 0  }
   0x7   :  { %s2194_s23 = smov 0   ;;  %s2196_s24 = smov 0  }
   0x8   :  { %s2198_s25 = smov 0  }
   0x9 LB: > { %s1694_s26 = sadd.s32 4294967295, %s2150_s25   ;;  %s26_s27 = sadd.s32 1, %s2142_s23  ;;  %s2150_s25 = sphi %s2198_s25, %s14_s25   ;;  %s2146_s24 = sphi %s2196_s24, %s2698_s24   ;;  %s2142_s23 = sphi %s2194_s23, %s2697_s23   ;;  %s2138_s22 = sphi %s2192_s22, %s2696_s22   ;;  %s2134_s21 = sphi %s2190_s21, %s2695_s21   ;;  %s2130_s20 = sphi %s2188_s20, %s2694_s20   ;;  %s2126_s19 = sphi %s2186_s19, %s2693_s19   ;;  %s2122_s18 = sphi %s2184_s18, %s2692_s18   ;;  %s2118_s17 = sphi %s2182_s17, %s2691_s17   ;;  %s2114_s16 = sphi %s2180_s16, %s2690_s16   ;;  %s2110_s15 = sphi %s2178_s15, %s2689_s15  }
   0xa   : > { %p27_p0 = scmp.ge.s32.totalorder %s26_s27, 6  ;;  %s29_s28 = sadd.s32 1, %s2146_s24 }
   0xb   : > { %s42_s29 = sadd.s32 1, %s2130_s20  ;;  %p49_p1 = scmp.ne.s32.totalorder %s2130_s20, %s2126_s19 }
   0xc   : > { %s2700_s27 = smov (%p27_p0, %s26_s27), 0  ;;  %s2702_s28 = smov (!%p27_p0, %s29_s28), %s2146_s24 }
   0xd   : > { %2680 = sst [smem:[#allocation6_spill]] %s2700_s27  ;;  %s38_s30 = ssub.s32 %s2142_s23, %s2700_s27 }
   0xe   : > { %p50_p2 = scmp.eq.s32.totalorder %s2150_s25, 0  ;;  %p31_p3 = scmp.ge.s32.totalorder %s2702_s28, 2 }
   0xf   : > { %p40_p4 = scmp.eq.s32.totalorder %s38_s30, 0  ;;  %s70_s6 = sadd.s32 1, %s2122_s18 }
  0x10   : > { %p2245_p5 = por %p50_p2, %p49_p1  ;;  %s2704_s28 = smov (%p31_p3, %s2702_s28), 0 }
  0x11   : > { %2682 = sst [smem:[#allocation7_spill]] %s2704_s28  ;;  %s66_s8 = ssub.s32 %s2146_s24, %s2704_s28 }
  0x12   : > { %s2253_s7 = scalar_select %p40_p4, %s2130_s20, %s42_s29  }
  0x13   : > { %p77_p6 = scmp.ne.s32.totalorder %s2122_s18, %s2118_s17  ;;  %s67_s9 = sor.u32 %s66_s8, %s38_s30 }
  0x14   : > { %p148_p7 = scmp.eq.s32.totalorder %s66_s8, 0  ;;  %p68_p8 = scmp.eq.s32.totalorder %s67_s9, 0 }
  0x15   : > { %p2259_p9 = por %p77_p6, %p50_p2  ;;  %s150_s11 = sadd.s32 1, %s2114_s16 }
  0x16   : > { %p160_p10 = scmp.ne.s32.totalorder %s2114_s16, %s2110_s15  ;;  %p161_p11 = scmp.eq.s32.totalorder %s1694_s26, 11 }
  0x17   : > { %s2267_s12 = scalar_select %p68_p8, %s2122_s18, %s70_s6  }
  0x18   : > { %s2270_s13 = scalar_select %p148_p7, %s2114_s16, %s150_s11  }
  0x19   : > { %p2272_p12 = por %p161_p11, %p160_p10  ;;  %p1697_p13 = scmp.ge.s32.totalorder %s2150_s25, 12 }
  0x1b   : > { %183 = sbr.rel (%p1697_p13) target bundleno = 102 (0x66), region = 16 }
  0x20   : > { %186 = sbr.rel (!%p2245_p5) target bundleno = 44 (0x2c), region = 20  ;;  %s188_s29 = sand.u32 (%p2245_p5), 1, %s2130_s20  }
  0x21   : > { %s1815_s30 = smul.u32 (%p2245_p5), 24, %s2142_s23  ;;  %s2685_s0 = sld [smem:[#allocation8_spill]] (%p2245_p5) }
  0x22   : > { %s1818_s8 = smul.u32 (%p2245_p5), 48, %s188_s29 }
  0x24   : > { %s190_s26 = scalar_lea.vmem (%p2245_p5), [#allocation3], %s1818_s8 }
  0x27   : > { %s196_s11 = scalar_lea.vmem %s2685_s0, %s1815_s30 }
  0x28   : > { %v209_v0 = vld [vmem:[%s196_s11] sm:$0xff]  ;;  %v211_v1 = vld [vmem:[%s196_s11 + $0x8] sm:$0xff]  ;;  %v213_v2 = vld [vmem:[%s196_s11 + $0x10] sm:$0xff] }
  0x29   : > { %210 = vst [vmem:[%s190_s26] sm:$0xff] %v209_v0  ;;  %212 = vst [vmem:[%s190_s26 + $0x8] sm:$0xff] %v211_v1  ;;  %v215_v3 = vld [vmem:[%s196_s11 + $0x90] sm:$0xff]  ;;  %v217_v4 = vld [vmem:[%s196_s11 + $0x98] sm:$0xff] }
  0x2a   : > { %214 = vst [vmem:[%s190_s26 + $0x10] sm:$0xff] %v213_v2  ;;  %v219_v5 = vld [vmem:[%s196_s11 + $0xa0] sm:$0xff]  ;;  %216 = vst [vmem:[%s190_s26 + $0x18] sm:$0xff] %v215_v3 }
  0x2b   : > { %218 = vst [vmem:[%s190_s26 + $0x20] sm:$0xff] %v217_v4  ;;  %220 = vst [vmem:[%s190_s26 + $0x28] sm:$0xff] %v219_v5 }
  0x2c PF: > { %226 = sbr.rel (!%p2259_p9) target bundleno = 102 (0x66), region = 43  ;;  %s228_s5 = sand.u32 (%p2259_p9), 1, %s2122_s18  }
  0x2d   : > { %s1819_s29 = smul.u32 (%p2259_p9), 768, %s228_s5  ;;  %s1699_s30 = sshll.u32 (%p2259_p9), %s2146_s24, 1 }
  0x2e   : > { %s1816_s8 = smul.u32 (%p2259_p9), 384, %s2142_s23  ;;  %s2686_s1 = sld [smem:[#allocation9_spill]] (%p2259_p9) }
  0x2f   : > { %s2297_s10 = scalar_lea.vmem (%p2259_p9), [#allocation4], %s1819_s29 }
  0x30   : > { %s234_s6 = sadd.s32 (%p2259_p9), %s1816_s8, %s1699_s30 }
  0x31   : > { %s1701_s9 = sshll.u32 %s234_s6, 2 }
  0x34   : > { %s2292_s11 = scalar_lea.vmem %s2686_s1, %s1701_s9 }
  0x35   : > { %v455_v6 = vld [vmem:[%s2292_s11] sm:$0xff]  ;;  %v457_v7 = vld [vmem:[%s2292_s11 + $0x10] sm:$0xff] }
  0x36   : > { %v459_v8 = vld [vmem:[%s2292_s11 + $0x20] sm:$0xff]  ;;  %456 = vst [vmem:[%s2297_s10] sm:$0xff] %v455_v6  ;;  %458 = vst [vmem:[%s2297_s10 + $0x8] sm:$0xff] %v457_v7  ;;  %v461_v9 = vld [vmem:[%s2292_s11 + $0x30] sm:$0xff] }
  0x37   : > { %460 = vst [vmem:[%s2297_s10 + $0x10] sm:$0xff] %v459_v8  ;;  %v463_v10 = vld [vmem:[%s2292_s11 + $0x40] sm:$0xff]  ;;  %v465_v11 = vld [vmem:[%s2292_s11 + $0x50] sm:$0xff]  ;;  %462 = vst [vmem:[%s2297_s10 + $0x18] sm:$0xff] %v461_v9 }
  0x38   : > { %464 = vst [vmem:[%s2297_s10 + $0x20] sm:$0xff] %v463_v10  ;;  %466 = vst [vmem:[%s2297_s10 + $0x28] sm:$0xff] %v465_v11  ;;  %v467_v12 = vld [vmem:[%s2292_s11 + $0x60] sm:$0xff]  ;;  %v469_v13 = vld [vmem:[%s2292_s11 + $0x70] sm:$0xff] }
  0x39   : > { %v471_v14 = vld [vmem:[%s2292_s11 + $0x80] sm:$0xff]  ;;  %468 = vst [vmem:[%s2297_s10 + $0x30] sm:$0xff] %v467_v12  ;;  %470 = vst [vmem:[%s2297_s10 + $0x38] sm:$0xff] %v469_v13  ;;  %v473_v15 = vld [vmem:[%s2292_s11 + $0x90] sm:$0xff] }
  0x3a   : > { %472 = vst [vmem:[%s2297_s10 + $0x40] sm:$0xff] %v471_v14  ;;  %v475_v16 = vld [vmem:[%s2292_s11 + $0xa0] sm:$0xff]  ;;  %v477_v17 = vld [vmem:[%s2292_s11 + $0xb0] sm:$0xff]  ;;  %474 = vst [vmem:[%s2297_s10 + $0x48] sm:$0xff] %v473_v15 }
  0x3b   : > { %476 = vst [vmem:[%s2297_s10 + $0x50] sm:$0xff] %v475_v16  ;;  %478 = vst [vmem:[%s2297_s10 + $0x58] sm:$0xff] %v477_v17  ;;  %v479_v18 = vld [vmem:[%s2292_s11 + $0xc0] sm:$0xff]  ;;  %v481_v19 = vld [vmem:[%s2292_s11 + $0xd0] sm:$0xff] }
  0x3c   : > { %v483_v20 = vld [vmem:[%s2292_s11 + $0xe0] sm:$0xff]  ;;  %480 = vst [vmem:[%s2297_s10 + $0x60] sm:$0xff] %v479_v18  ;;  %482 = vst [vmem:[%s2297_s10 + $0x68] sm:$0xff] %v481_v19  ;;  %v485_v21 = vld [vmem:[%s2292_s11 + $0xf0] sm:$0xff] }
  0x3d   : > { %484 = vst [vmem:[%s2297_s10 + $0x70] sm:$0xff] %v483_v20  ;;  %v487_v22 = vld [vmem:[%s2292_s11 + $0x100] sm:$0xff]  ;;  %v489_v23 = vld [vmem:[%s2292_s11 + $0x110] sm:$0xff]  ;;  %486 = vst [vmem:[%s2297_s10 + $0x78] sm:$0xff] %v485_v21 }
  0x3e   : > { %488 = vst [vmem:[%s2297_s10 + $0x80] sm:$0xff] %v487_v22  ;;  %490 = vst [vmem:[%s2297_s10 + $0x88] sm:$0xff] %v489_v23  ;;  %v491_v24 = vld [vmem:[%s2292_s11 + $0x120] sm:$0xff]  ;;  %v493_v25 = vld [vmem:[%s2292_s11 + $0x130] sm:$0xff] }
  0x3f   : > { %v495_v26 = vld [vmem:[%s2292_s11 + $0x140] sm:$0xff]  ;;  %492 = vst [vmem:[%s2297_s10 + $0x90] sm:$0xff] %v491_v24  ;;  %494 = vst [vmem:[%s2297_s10 + $0x98] sm:$0xff] %v493_v25  ;;  %v497_v27 = vld [vmem:[%s2292_s11 + $0x150] sm:$0xff] }
  0x40   : > { %496 = vst [vmem:[%s2297_s10 + $0xa0] sm:$0xff] %v495_v26  ;;  %v499_v28 = vld [vmem:[%s2292_s11 + $0x160] sm:$0xff]  ;;  %v501_v29 = vld [vmem:[%s2292_s11 + $0x170] sm:$0xff]  ;;  %498 = vst [vmem:[%s2297_s10 + $0xa8] sm:$0xff] %v497_v27 }
  0x41   : > { %500 = vst [vmem:[%s2297_s10 + $0xb0] sm:$0xff] %v499_v28  ;;  %502 = vst [vmem:[%s2297_s10 + $0xb8] sm:$0xff] %v501_v29  ;;  %v503_v30 = vld [vmem:[%s2292_s11 + $0x180] sm:$0xff]  ;;  %v505_v31 = vld [vmem:[%s2292_s11 + $0x190] sm:$0xff] }
  0x42   : > { %v507_v32 = vld [vmem:[%s2292_s11 + $0x1a0] sm:$0xff]  ;;  %504 = vst [vmem:[%s2297_s10 + $0xc0] sm:$0xff] %v503_v30  ;;  %506 = vst [vmem:[%s2297_s10 + $0xc8] sm:$0xff] %v505_v31  ;;  %v509_v33 = vld [vmem:[%s2292_s11 + $0x1b0] sm:$0xff] }
  0x43   : > { %508 = vst [vmem:[%s2297_s10 + $0xd0] sm:$0xff] %v507_v32  ;;  %v511_v34 = vld [vmem:[%s2292_s11 + $0x1c0] sm:$0xff]  ;;  %v513_v35 = vld [vmem:[%s2292_s11 + $0x1d0] sm:$0xff]  ;;  %510 = vst [vmem:[%s2297_s10 + $0xd8] sm:$0xff] %v509_v33 }
  0x44   : > { %512 = vst [vmem:[%s2297_s10 + $0xe0] sm:$0xff] %v511_v34  ;;  %514 = vst [vmem:[%s2297_s10 + $0xe8] sm:$0xff] %v513_v35  ;;  %v515_v36 = vld [vmem:[%s2292_s11 + $0x1e0] sm:$0xff]  ;;  %v517_v37 = vld [vmem:[%s2292_s11 + $0x1f0] sm:$0xff] }
  0x45   : > { %v519_v38 = vld [vmem:[%s2292_s11 + $0x200] sm:$0xff]  ;;  %516 = vst [vmem:[%s2297_s10 + $0xf0] sm:$0xff] %v515_v36  ;;  %518 = vst [vmem:[%s2297_s10 + $0xf8] sm:$0xff] %v517_v37  ;;  %v521_v39 = vld [vmem:[%s2292_s11 + $0x210] sm:$0xff] }
  0x46   : > { %520 = vst [vmem:[%s2297_s10 + $0x100] sm:$0xff] %v519_v38  ;;  %v523_v40 = vld [vmem:[%s2292_s11 + $0x220] sm:$0xff]  ;;  %v525_v41 = vld [vmem:[%s2292_s11 + $0x230] sm:$0xff]  ;;  %522 = vst [vmem:[%s2297_s10 + $0x108] sm:$0xff] %v521_v39 }
  0x47   : > { %524 = vst [vmem:[%s2297_s10 + $0x110] sm:$0xff] %v523_v40  ;;  %526 = vst [vmem:[%s2297_s10 + $0x118] sm:$0xff] %v525_v41  ;;  %v527_v42 = vld [vmem:[%s2292_s11 + $0x240] sm:$0xff]  ;;  %v529_v43 = vld [vmem:[%s2292_s11 + $0x250] sm:$0xff] }
  0x48   : > { %v531_v44 = vld [vmem:[%s2292_s11 + $0x260] sm:$0xff]  ;;  %528 = vst [vmem:[%s2297_s10 + $0x120] sm:$0xff] %v527_v42  ;;  %530 = vst [vmem:[%s2297_s10 + $0x128] sm:$0xff] %v529_v43  ;;  %v533_v45 = vld [vmem:[%s2292_s11 + $0x270] sm:$0xff] }
  0x49   : > { %532 = vst [vmem:[%s2297_s10 + $0x130] sm:$0xff] %v531_v44  ;;  %v535_v46 = vld [vmem:[%s2292_s11 + $0x280] sm:$0xff]  ;;  %v537_v47 = vld [vmem:[%s2292_s11 + $0x290] sm:$0xff]  ;;  %534 = vst [vmem:[%s2297_s10 + $0x138] sm:$0xff] %v533_v45 }
  0x4a   : > { %536 = vst [vmem:[%s2297_s10 + $0x140] sm:$0xff] %v535_v46  ;;  %538 = vst [vmem:[%s2297_s10 + $0x148] sm:$0xff] %v537_v47  ;;  %v539_v48 = vld [vmem:[%s2292_s11 + $0x2a0] sm:$0xff]  ;;  %v541_v49 = vld [vmem:[%s2292_s11 + $0x2b0] sm:$0xff] }
  0x4b   : > { %v543_v50 = vld [vmem:[%s2292_s11 + $0x2c0] sm:$0xff]  ;;  %540 = vst [vmem:[%s2297_s10 + $0x150] sm:$0xff] %v539_v48  ;;  %542 = vst [vmem:[%s2297_s10 + $0x158] sm:$0xff] %v541_v49  ;;  %v545_v51 = vld [vmem:[%s2292_s11 + $0x2d0] sm:$0xff] }
  0x4c   : > { %544 = vst [vmem:[%s2297_s10 + $0x160] sm:$0xff] %v543_v50  ;;  %v547_v52 = vld [vmem:[%s2292_s11 + $0x2e0] sm:$0xff]  ;;  %v549_v53 = vld [vmem:[%s2292_s11 + $0x2f0] sm:$0xff]  ;;  %546 = vst [vmem:[%s2297_s10 + $0x168] sm:$0xff] %v545_v51 }
  0x4d   : > { %548 = vst [vmem:[%s2297_s10 + $0x170] sm:$0xff] %v547_v52  ;;  %550 = vst [vmem:[%s2297_s10 + $0x178] sm:$0xff] %v549_v53  ;;  %v551_v54 = vld [vmem:[%s2292_s11 + $0x300] sm:$0xff]  ;;  %v553_v55 = vld [vmem:[%s2292_s11 + $0x310] sm:$0xff] }
  0x4e   : > { %v555_v56 = vld [vmem:[%s2292_s11 + $0x320] sm:$0xff]  ;;  %552 = vst [vmem:[%s2297_s10 + $0x180] sm:$0xff] %v551_v54  ;;  %554 = vst [vmem:[%s2297_s10 + $0x188] sm:$0xff] %v553_v55  ;;  %v557_v57 = vld [vmem:[%s2292_s11 + $0x330] sm:$0xff] }
  0x4f   : > { %556 = vst [vmem:[%s2297_s10 + $0x190] sm:$0xff] %v555_v56  ;;  %v559_v58 = vld [vmem:[%s2292_s11 + $0x340] sm:$0xff]  ;;  %v561_v59 = vld [vmem:[%s2292_s11 + $0x350] sm:$0xff]  ;;  %558 = vst [vmem:[%s2297_s10 + $0x198] sm:$0xff] %v557_v57 }
  0x50   : > { %560 = vst [vmem:[%s2297_s10 + $0x1a0] sm:$0xff] %v559_v58  ;;  %562 = vst [vmem:[%s2297_s10 + $0x1a8] sm:$0xff] %v561_v59  ;;  %v563_v60 = vld [vmem:[%s2292_s11 + $0x360] sm:$0xff]  ;;  %v565_v61 = vld [vmem:[%s2292_s11 + $0x370] sm:$0xff] }
  0x51   : > { %v567_v62 = vld [vmem:[%s2292_s11 + $0x380] sm:$0xff]  ;;  %564 = vst [vmem:[%s2297_s10 + $0x1b0] sm:$0xff] %v563_v60  ;;  %566 = vst [vmem:[%s2297_s10 + $0x1b8] sm:$0xff] %v565_v61  ;;  %v569_v63 = vld [vmem:[%s2292_s11 + $0x390] sm:$0xff] }
  0x52   : > { %568 = vst [vmem:[%s2297_s10 + $0x1c0] sm:$0xff] %v567_v62  ;;  %v571_v0 = vld [vmem:[%s2292_s11 + $0x3a0] sm:$0xff]  ;;  %v573_v1 = vld [vmem:[%s2292_s11 + $0x3b0] sm:$0xff]  ;;  %570 = vst [vmem:[%s2297_s10 + $0x1c8] sm:$0xff] %v569_v63 }
  0x53   : > { %572 = vst [vmem:[%s2297_s10 + $0x1d0] sm:$0xff] %v571_v0  ;;  %574 = vst [vmem:[%s2297_s10 + $0x1d8] sm:$0xff] %v573_v1  ;;  %v575_v2 = vld [vmem:[%s2292_s11 + $0x3c0] sm:$0xff]  ;;  %v577_v3 = vld [vmem:[%s2292_s11 + $0x3d0] sm:$0xff] }
  0x54   : > { %v579_v4 = vld [vmem:[%s2292_s11 + $0x3e0] sm:$0xff]  ;;  %576 = vst [vmem:[%s2297_s10 + $0x1e0] sm:$0xff] %v575_v2  ;;  %578 = vst [vmem:[%s2297_s10 + $0x1e8] sm:$0xff] %v577_v3  ;;  %v581_v5 = vld [vmem:[%s2292_s11 + $0x3f0] sm:$0xff] }
  0x55   : > { %580 = vst [vmem:[%s2297_s10 + $0x1f0] sm:$0xff] %v579_v4  ;;  %v583_v6 = vld [vmem:[%s2292_s11 + $0x400] sm:$0xff]  ;;  %v585_v7 = vld [vmem:[%s2292_s11 + $0x410] sm:$0xff]  ;;  %582 = vst [vmem:[%s2297_s10 + $0x1f8] sm:$0xff] %v581_v5 }
  0x56   : > { %584 = vst [vmem:[%s2297_s10 + $0x200] sm:$0xff] %v583_v6  ;;  %586 = vst [vmem:[%s2297_s10 + $0x208] sm:$0xff] %v585_v7  ;;  %v587_v8 = vld [vmem:[%s2292_s11 + $0x420] sm:$0xff]  ;;  %v589_v9 = vld [vmem:[%s2292_s11 + $0x430] sm:$0xff] }
  0x57   : > { %v591_v10 = vld [vmem:[%s2292_s11 + $0x440] sm:$0xff]  ;;  %588 = vst [vmem:[%s2297_s10 + $0x210] sm:$0xff] %v587_v8  ;;  %590 = vst [vmem:[%s2297_s10 + $0x218] sm:$0xff] %v589_v9  ;;  %v593_v11 = vld [vmem:[%s2292_s11 + $0x450] sm:$0xff] }
  0x58   : > { %592 = vst [vmem:[%s2297_s10 + $0x220] sm:$0xff] %v591_v10  ;;  %v595_v12 = vld [vmem:[%s2292_s11 + $0x460] sm:$0xff]  ;;  %v597_v13 = vld [vmem:[%s2292_s11 + $0x470] sm:$0xff]  ;;  %594 = vst [vmem:[%s2297_s10 + $0x228] sm:$0xff] %v593_v11 }
  0x59   : > { %596 = vst [vmem:[%s2297_s10 + $0x230] sm:$0xff] %v595_v12  ;;  %598 = vst [vmem:[%s2297_s10 + $0x238] sm:$0xff] %v597_v13  ;;  %v599_v14 = vld [vmem:[%s2292_s11 + $0x480] sm:$0xff]  ;;  %v601_v15 = vld [vmem:[%s2292_s11 + $0x490] sm:$0xff] }
  0x5a   : > { %v603_v16 = vld [vmem:[%s2292_s11 + $0x4a0] sm:$0xff]  ;;  %600 = vst [vmem:[%s2297_s10 + $0x240] sm:$0xff] %v599_v14  ;;  %602 = vst [vmem:[%s2297_s10 + $0x248] sm:$0xff] %v601_v15  ;;  %v605_v17 = vld [vmem:[%s2292_s11 + $0x4b0] sm:$0xff] }
  0x5b   : > { %604 = vst [vmem:[%s2297_s10 + $0x250] sm:$0xff] %v603_v16  ;;  %v607_v18 = vld [vmem:[%s2292_s11 + $0x4c0] sm:$0xff]  ;;  %v609_v19 = vld [vmem:[%s2292_s11 + $0x4d0] sm:$0xff]  ;;  %606 = vst [vmem:[%s2297_s10 + $0x258] sm:$0xff] %v605_v17 }
  0x5c   : > { %608 = vst [vmem:[%s2297_s10 + $0x260] sm:$0xff] %v607_v18  ;;  %610 = vst [vmem:[%s2297_s10 + $0x268] sm:$0xff] %v609_v19  ;;  %v611_v20 = vld [vmem:[%s2292_s11 + $0x4e0] sm:$0xff]  ;;  %v613_v21 = vld [vmem:[%s2292_s11 + $0x4f0] sm:$0xff] }
  0x5d   : > { %v615_v22 = vld [vmem:[%s2292_s11 + $0x500] sm:$0xff]  ;;  %612 = vst [vmem:[%s2297_s10 + $0x270] sm:$0xff] %v611_v20  ;;  %614 = vst [vmem:[%s2297_s10 + $0x278] sm:$0xff] %v613_v21  ;;  %v617_v23 = vld [vmem:[%s2292_s11 + $0x510] sm:$0xff] }
  0x5e   : > { %616 = vst [vmem:[%s2297_s10 + $0x280] sm:$0xff] %v615_v22  ;;  %v619_v24 = vld [vmem:[%s2292_s11 + $0x520] sm:$0xff]  ;;  %v621_v25 = vld [vmem:[%s2292_s11 + $0x530] sm:$0xff]  ;;  %618 = vst [vmem:[%s2297_s10 + $0x288] sm:$0xff] %v617_v23 }
  0x5f   : > { %620 = vst [vmem:[%s2297_s10 + $0x290] sm:$0xff] %v619_v24  ;;  %622 = vst [vmem:[%s2297_s10 + $0x298] sm:$0xff] %v621_v25  ;;  %v623_v26 = vld [vmem:[%s2292_s11 + $0x540] sm:$0xff]  ;;  %v625_v27 = vld [vmem:[%s2292_s11 + $0x550] sm:$0xff] }
  0x60   : > { %v627_v28 = vld [vmem:[%s2292_s11 + $0x560] sm:$0xff]  ;;  %624 = vst [vmem:[%s2297_s10 + $0x2a0] sm:$0xff] %v623_v26  ;;  %626 = vst [vmem:[%s2297_s10 + $0x2a8] sm:$0xff] %v625_v27  ;;  %v629_v29 = vld [vmem:[%s2292_s11 + $0x570] sm:$0xff] }
  0x61   : > { %628 = vst [vmem:[%s2297_s10 + $0x2b0] sm:$0xff] %v627_v28  ;;  %v631_v30 = vld [vmem:[%s2292_s11 + $0x580] sm:$0xff]  ;;  %v633_v31 = vld [vmem:[%s2292_s11 + $0x590] sm:$0xff]  ;;  %630 = vst [vmem:[%s2297_s10 + $0x2b8] sm:$0xff] %v629_v29 }
  0x62   : > { %632 = vst [vmem:[%s2297_s10 + $0x2c0] sm:$0xff] %v631_v30  ;;  %634 = vst [vmem:[%s2297_s10 + $0x2c8] sm:$0xff] %v633_v31  ;;  %v635_v32 = vld [vmem:[%s2292_s11 + $0x5a0] sm:$0xff]  ;;  %v637_v33 = vld [vmem:[%s2292_s11 + $0x5b0] sm:$0xff] }
  0x63   : > { %v639_v34 = vld [vmem:[%s2292_s11 + $0x5c0] sm:$0xff]  ;;  %636 = vst [vmem:[%s2297_s10 + $0x2d0] sm:$0xff] %v635_v32  ;;  %638 = vst [vmem:[%s2297_s10 + $0x2d8] sm:$0xff] %v637_v33  ;;  %v641_v35 = vld [vmem:[%s2292_s11 + $0x5d0] sm:$0xff] }
  0x64   : > { %640 = vst [vmem:[%s2297_s10 + $0x2e0] sm:$0xff] %v639_v34  ;;  %v643_v36 = vld [vmem:[%s2292_s11 + $0x5e0] sm:$0xff]  ;;  %v645_v37 = vld [vmem:[%s2292_s11 + $0x5f0] sm:$0xff]  ;;  %642 = vst [vmem:[%s2297_s10 + $0x2e8] sm:$0xff] %v641_v35 }
  0x65   : > { %644 = vst [vmem:[%s2297_s10 + $0x2f0] sm:$0xff] %v643_v36  ;;  %646 = vst [vmem:[%s2297_s10 + $0x2f8] sm:$0xff] %v645_v37 }
  0x66 PF: > { %p1702_p0 = scmp.ge.s32.totalorder %s2150_s25, 1  ;;  %p667_p1 = scmp.lt.s32.totalorder %s2150_s25, 13 }
  0x68   : > { %p668_p2 = pnand %p1702_p0, %p667_p1 }
  0x69   : > { %s674_s0 = sand.u32 (!%p668_p2), 1, %s2126_s19   ;;  %s681_s28 = sand.u32 (!%p668_p2), 1, %s2118_s17  }
  0x6a   : > { %671 = sbr.rel (%p668_p2) target bundleno = 478 (0x1de), region = 89  ;;  %s714_s5 = sand.u32 (!%p668_p2), 1, %s2110_s15  }
  0x6b   : > { %s1820_s26 = smul.u32 (!%p668_p2), 48, %s674_s0  ;;  %s1703_s30 = sshll.u32 (!%p668_p2), %s714_s5, 5 }
  0x6c   : > { %s1821_s29 = smul.u32 (!%p668_p2), 768, %s681_s28  ;;  %s1704_s8 = sshll.u32 (!%p668_p2), %s2138_s22, 1 }
  0x6d   : > { %p722_p3 = scmp.lt.s32.totalorder (!%p668_p2), %s1704_s8, 3  ;;  %s2504_s19 = scalar_lea.vmem (!%p668_p2), [#allocation3], %s1820_s26 }
  0x6e   : > { %s2506_s17 = scalar_lea.vmem (!%p668_p2), [#allocation4], %s1821_s29  ;;  %s2508_s15 = scalar_lea.vmem (!%p668_p2), [#allocation5], %s1703_s30 }
  0x6f   : > { %s2706_s8 = smov (!%p722_p3, %s1704_s8), 3  ;;  %p1706_p4 = scmp.ne.s32.totalorder %s2134_s21, 0 }
  0x70   : > { %s724_s11 = scalar_lea.vmem %s2673_s2, %s2706_s8  ;;  %s729_s27 = scalar_lea.vmem %s2674_s3, %s2706_s8 }
  0x71   : > { %736 = sbr.rel (%p1706_p4) target bundleno = 121 (0x79), region = 101 }
  0x76   : > { %v2152_v38 = vmov 0.0  }
  0x77   : > { %737 = vst [vmem:[#allocation2 + $0x10] sm:$0xff] %v2152_v38  ;;  %738 = vst [vmem:[#allocation2] sm:$0xff] %v2152_v38 }
  0x78   : > { %739 = vst [vmem:[#allocation2 + $0x18] sm:$0xff] %v2152_v38  ;;  %740 = vst [vmem:[#allocation2 + $0x8] sm:$0xff] %v2152_v38 }
  0x79 PF: > { %v1911_v39 = vld [vmem:[%s2506_s17 + $0x74] ss:$8 sps:$4 sm:$0xff]   ;;  %v1915_v41 = vld [vmem:[%s2506_s17 + $0x70] ss:$8 sps:$4 sm:$0xff]   ;;  %v1917_v43 = vld [vmem:[%s2506_s17 + $0x64] ss:$8 sps:$4 sm:$0xff]  }
  0x7a   : > { %v1913_v40 = vld [vmem:[%s2506_s17 + $0x174] ss:$8 sps:$4 sm:$0xff]   ;;  %1357 = vmatprep.subr.bf16.mxu0 %v1911_v39  ;;  %v1916_v42 = vld [vmem:[%s2506_s17 + $0x170] ss:$8 sps:$4 sm:$0xff]   ;;  %v1919_v44 = vld [vmem:[%s2506_s17 + $0x164] ss:$8 sps:$4 sm:$0xff]  }
  0x7b   : > { %1400 = vmatprep.subr.bf16.mxu1 %v1913_v40  ;;  %1358 = vmatpush1.bf16.msra.mxu0 %v1915_v41  ;;  %v1921_v45 = vld [vmem:[%s2506_s17 + $0x60] ss:$8 sps:$4 sm:$0xff]   ;;  %v1923_v47 = vld [vmem:[%s2506_s17 + $0x54] ss:$8 sps:$4 sm:$0xff]   ;;  %v1927_v49 = vld [vmem:[%s2506_s17 + $0x50] ss:$8 sps:$4 sm:$0xff]  }
  0x7c   : > { %1401 = vmatpush1.bf16.msra.mxu1 %v1916_v42  ;;  %1359 = vmatprep.subr.bf16.mxu0 %v1917_v43  ;;  %v1922_v46 = vld [vmem:[%s2506_s17 + $0x160] ss:$8 sps:$4 sm:$0xff]   ;;  %v1925_v48 = vld [vmem:[%s2506_s17 + $0x154] ss:$8 sps:$4 sm:$0xff]   ;;  %v1928_v50 = vld [vmem:[%s2506_s17 + $0x150] ss:$8 sps:$4 sm:$0xff]  }
  0x7d   : > { %1402 = vmatprep.subr.bf16.mxu1 %v1919_v44  ;;  %v1929_v51 = vld [vmem:[%s2506_s17 + $0x44] ss:$8 sps:$4 sm:$0xff]   ;;  %v1933_v53 = vld [vmem:[%s2506_s17 + $0x40] ss:$8 sps:$4 sm:$0xff]   ;;  %v1935_v55 = vld [vmem:[%s2506_s17 + $0x34] ss:$8 sps:$4 sm:$0xff]  }
  0x7e   : > { %v1931_v52 = vld [vmem:[%s2506_s17 + $0x144] ss:$8 sps:$4 sm:$0xff]   ;;  %v1934_v54 = vld [vmem:[%s2506_s17 + $0x140] ss:$8 sps:$4 sm:$0xff]   ;;  %v1937_v56 = vld [vmem:[%s2506_s17 + $0x134] ss:$8 sps:$4 sm:$0xff]  }
  0x7f   : > { %1360 = vmatpush1.bf16.msra.mxu0 %v1921_v45  ;;  %v1939_v57 = vld [vmem:[%s2506_s17 + $0x30] ss:$8 sps:$4 sm:$0xff]   ;;  %v1941_v59 = vld [vmem:[%s2506_s17 + $0x24] ss:$8 sps:$4 sm:$0xff]   ;;  %v1945_v61 = vld [vmem:[%s2506_s17 + $0x20] ss:$8 sps:$4 sm:$0xff]  }
  0x80   : > { %1403 = vmatpush1.bf16.msra.mxu1 %v1922_v46  ;;  %1361 = vmatprep.subr.bf16.mxu0 %v1923_v47  ;;  %v1940_v58 = vld [vmem:[%s2506_s17 + $0x130] ss:$8 sps:$4 sm:$0xff]   ;;  %v1943_v60 = vld [vmem:[%s2506_s17 + $0x124] ss:$8 sps:$4 sm:$0xff]   ;;  %v1946_v62 = vld [vmem:[%s2506_s17 + $0x120] ss:$8 sps:$4 sm:$0xff]  }
  0x81   : > { %1404 = vmatprep.subr.bf16.mxu1 %v1925_v48  ;;  %v1947_v63 = vld [vmem:[%s2506_s17 + $0x14] ss:$8 sps:$4 sm:$0xff]   ;;  %v1951_v1 = vld [vmem:[%s2506_s17 + $0x10] ss:$8 sps:$4 sm:$0xff]   ;;  %v1953_v3 = vld [vmem:[%s2506_s17 + $0x4] ss:$8 sps:$4 sm:$0xff]  }
  0x82   : > { %v1949_v0 = vld [vmem:[%s2506_s17 + $0x114] ss:$8 sps:$4 sm:$0xff]   ;;  %v1952_v2 = vld [vmem:[%s2506_s17 + $0x110] ss:$8 sps:$4 sm:$0xff]   ;;  %v1955_v4 = vld [vmem:[%s2506_s17 + $0x104] ss:$8 sps:$4 sm:$0xff]  }
  0x83   : > { %1362 = vmatpush1.bf16.msra.mxu0 %v1927_v49  ;;  %v1957_v5 = vld [vmem:[%s2506_s17] ss:$8 sps:$4 sm:$0xff]   ;;  %v1959_v7 = vld [vmem:[%s2506_s17 + $0xf4] ss:$8 sps:$4 sm:$0xff]   ;;  %v1963_v9 = vld [vmem:[%s2506_s17 + $0xf0] ss:$8 sps:$4 sm:$0xff]  }
  0x84   : > { %1405 = vmatpush1.bf16.msra.mxu1 %v1928_v50  ;;  %1363 = vmatprep.subr.bf16.mxu0 %v1929_v51  ;;  %v1958_v6 = vld [vmem:[%s2506_s17 + $0x100] ss:$8 sps:$4 sm:$0xff]   ;;  %v1961_v8 = vld [vmem:[%s2506_s17 + $0x1f4] ss:$8 sps:$4 sm:$0xff]   ;;  %v1964_v10 = vld [vmem:[%s2506_s17 + $0x1f0] ss:$8 sps:$4 sm:$0xff]  }
  0x85   : > { %1406 = vmatprep.subr.bf16.mxu1 %v1931_v52  ;;  %v1965_v11 = vld [vmem:[%s2506_s17 + $0xe4] ss:$8 sps:$4 sm:$0xff]   ;;  %v1969_v13 = vld [vmem:[%s2506_s17 + $0xe0] ss:$8 sps:$4 sm:$0xff]   ;;  %v1971_v15 = vld [vmem:[%s2506_s17 + $0xd4] ss:$8 sps:$4 sm:$0xff]  }
  0x86   : > { %v1967_v12 = vld [vmem:[%s2506_s17 + $0x1e4] ss:$8 sps:$4 sm:$0xff]   ;;  %v1970_v14 = vld [vmem:[%s2506_s17 + $0x1e0] ss:$8 sps:$4 sm:$0xff]   ;;  %v1973_v16 = vld [vmem:[%s2506_s17 + $0x1d4] ss:$8 sps:$4 sm:$0xff]  }
  0x87   : > { %1364 = vmatpush1.bf16.msra.mxu0 %v1933_v53  ;;  %v1975_v17 = vld [vmem:[%s2506_s17 + $0xd0] ss:$8 sps:$4 sm:$0xff]   ;;  %v1977_v19 = vld [vmem:[%s2506_s17 + $0xc4] ss:$8 sps:$4 sm:$0xff]   ;;  %v1981_v21 = vld [vmem:[%s2506_s17 + $0xc0] ss:$8 sps:$4 sm:$0xff]  }
  0x88   : > { %1407 = vmatpush1.bf16.msra.mxu1 %v1934_v54  ;;  %1365 = vmatprep.subr.bf16.mxu0 %v1935_v55  ;;  %v1976_v18 = vld [vmem:[%s2506_s17 + $0x1d0] ss:$8 sps:$4 sm:$0xff]   ;;  %v1979_v20 = vld [vmem:[%s2506_s17 + $0x1c4] ss:$8 sps:$4 sm:$0xff]   ;;  %v1982_v22 = vld [vmem:[%s2506_s17 + $0x1c0] ss:$8 sps:$4 sm:$0xff]  }
  0x89   : > { %1408 = vmatprep.subr.bf16.mxu1 %v1937_v56  ;;  %v1983_v23 = vld [vmem:[%s2506_s17 + $0xb4] ss:$8 sps:$4 sm:$0xff]   ;;  %v1987_v27 = vld [vmem:[%s2506_s17 + $0xb0] ss:$8 sps:$4 sm:$0xff]   ;;  %v1989_v29 = vld [vmem:[%s2506_s17 + $0xa4] ss:$8 sps:$4 sm:$0xff]  }
  0x8a   : > { %v2009_v24 = vld [vmem:[%s2504_s19 + $0x4] ss:$24 sps:$4 sm:$0xff]   ;;  %v1988_v28 = vld [vmem:[%s2506_s17 + $0x1b0] ss:$8 sps:$4 sm:$0xff]   ;;  %v1993_v31 = vld [vmem:[%s2506_s17 + $0xa0] ss:$8 sps:$4 sm:$0xff]  }
  0x8b   : > { %1366 = vmatpush1.bf16.msra.mxu0 %v1939_v57  ;;  %v1985_v25 = vld [vmem:[%s2506_s17 + $0x1b4] ss:$8 sps:$4 sm:$0xff]   ;;  %1389 = vmatprep.mubr.bf16.mxu0 %v2009_v24  ;;  %v1991_v30 = vld [vmem:[%s2506_s17 + $0x1a4] ss:$8 sps:$4 sm:$0xff]   ;;  %v1994_v32 = vld [vmem:[%s2506_s17 + $0x1a0] ss:$8 sps:$4 sm:$0xff]  }
  0x8c   : > { %1409 = vmatpush1.bf16.msra.mxu1 %v1940_v58  ;;  %1367 = vmatprep.subr.bf16.mxu0 %v1941_v59  ;;  %v2012_v26 = vld [vmem:[%s2504_s19 + $0xc] ss:$24 sps:$4 sm:$0xff]   ;;  %v1999_v35 = vld [vmem:[%s2506_s17 + $0x90] ss:$8 sps:$4 sm:$0xff]   ;;  %v2005_v39 = vld [vmem:[%s2506_s17 + $0x80] ss:$8 sps:$4 sm:$0xff]  }
  0x8d   : > { %1410 = vmatprep.subr.bf16.mxu1 %v1943_v60  ;;  %1432 = vmatprep.mubr.bf16.mxu1 %v2012_v26  ;;  %v1995_v33 = vld [vmem:[%s2506_s17 + $0x94] ss:$8 sps:$4 sm:$0xff]   ;;  %v2000_v36 = vld [vmem:[%s2506_s17 + $0x190] ss:$8 sps:$4 sm:$0xff]   ;;  %v2001_v37 = vld [vmem:[%s2506_s17 + $0x84] ss:$8 sps:$4 sm:$0xff]  }
  0x8e   : > { %v1997_v34 = vld [vmem:[%s2506_s17 + $0x194] ss:$8 sps:$4 sm:$0xff]   ;;  %v2003_v38 = vld [vmem:[%s2506_s17 + $0x184] ss:$8 sps:$4 sm:$0xff]   ;;  %v2006_v40 = vld [vmem:[%s2506_s17 + $0x180] ss:$8 sps:$4 sm:$0xff]  }
  0x8f   : > { %1368 = vmatpush1.bf16.msra.mxu0 %v1945_v61  ;;  %v2015_v41 = vld [vmem:[%s2506_s17 + $0x274] ss:$8 sps:$4 sm:$0xff]   ;;  %v2007_v42 = vld [vmem:[%s2504_s19] ss:$24 sps:$4 sm:$0xff]   ;;  %v2018_v45 = vld [vmem:[%s2506_s17 + $0x264] ss:$8 sps:$4 sm:$0xff]  }
  0x90   : > { %1411 = vmatpush1.bf16.msra.mxu1 %v1946_v62  ;;  %1369 = vmatprep.subr.bf16.mxu0 %v1947_v63  ;;  %v2010_v43 = vld [vmem:[%s2504_s19 + $0x8] ss:$24 sps:$4 sm:$0xff]   ;;  %v2063_v46 = vld [vmem:[%s2504_s19 + $0x14] ss:$24 sps:$4 sm:$0xff]   ;;  %p1809_p5 = scmp.ne.s32.totalorder %s2134_s21, 5 }
  0x91   : > { %1412 = vmatprep.subr.bf16.mxu1 %v1949_v0  ;;  %v2013_v44 = vld [vmem:[%s2506_s17 + $0x270] ss:$8 sps:$4 sm:$0xff]   ;;  %v2016_v47 = vld [vmem:[%s2506_s17 + $0x260] ss:$8 sps:$4 sm:$0xff]   ;;  %v2021_v48 = vld [vmem:[%s2506_s17 + $0x254] ss:$8 sps:$4 sm:$0xff]  }
  0x92   : > { %v2019_v49 = vld [vmem:[%s2506_s17 + $0x250] ss:$8 sps:$4 sm:$0xff]   ;;  %v2024_v50 = vld [vmem:[%s2506_s17 + $0x244] ss:$8 sps:$4 sm:$0xff]   ;;  %v2022_v51 = vld [vmem:[%s2506_s17 + $0x240] ss:$8 sps:$4 sm:$0xff]  }
  0x93   : > { %1370 = vmatpush1.bf16.msra.mxu0 %v1951_v1  ;;  %v2027_v52 = vld [vmem:[%s2506_s17 + $0x234] ss:$8 sps:$4 sm:$0xff]   ;;  %v2025_v53 = vld [vmem:[%s2506_s17 + $0x230] ss:$8 sps:$4 sm:$0xff]   ;;  %v2030_v54 = vld [vmem:[%s2506_s17 + $0x224] ss:$8 sps:$4 sm:$0xff]  }
  0x94   : > { %1413 = vmatpush1.bf16.msra.mxu1 %v1952_v2  ;;  %1371 = vmatprep.subr.bf16.mxu0 %v1953_v3  ;;  %v2028_v55 = vld [vmem:[%s2506_s17 + $0x220] ss:$8 sps:$4 sm:$0xff]   ;;  %v2033_v56 = vld [vmem:[%s2506_s17 + $0x214] ss:$8 sps:$4 sm:$0xff]   ;;  %v2031_v57 = vld [vmem:[%s2506_s17 + $0x210] ss:$8 sps:$4 sm:$0xff]  }
  0x95   : > { %1414 = vmatprep.subr.bf16.mxu1 %v1955_v4  ;;  %v2036_v58 = vld [vmem:[%s2506_s17 + $0x204] ss:$8 sps:$4 sm:$0xff]   ;;  %v2034_v59 = vld [vmem:[%s2506_s17 + $0x200] ss:$8 sps:$4 sm:$0xff]   ;;  %v2039_v60 = vld [vmem:[%s2506_s17 + $0x2f4] ss:$8 sps:$4 sm:$0xff]  }
  0x96   : > { %v2037_v61 = vld [vmem:[%s2506_s17 + $0x2f0] ss:$8 sps:$4 sm:$0xff]   ;;  %v2042_v62 = vld [vmem:[%s2506_s17 + $0x2e4] ss:$8 sps:$4 sm:$0xff]   ;;  %v2040_v63 = vld [vmem:[%s2506_s17 + $0x2e0] ss:$8 sps:$4 sm:$0xff]  }
  0x97   : > { %1372 = vmatpush1.bf16.msra.mxu0 %v1957_v5  ;;  %v2045_v0 = vld [vmem:[%s2506_s17 + $0x2d4] ss:$8 sps:$4 sm:$0xff]   ;;  %v2043_v1 = vld [vmem:[%s2506_s17 + $0x2d0] ss:$8 sps:$4 sm:$0xff]   ;;  %v2048_v2 = vld [vmem:[%s2506_s17 + $0x2c4] ss:$8 sps:$4 sm:$0xff]  }
  0x98   : > { %1415 = vmatpush1.bf16.msra.mxu1 %v1958_v6  ;;  %1373 = vmatprep.subr.bf16.mxu0 %v1959_v7  ;;  %v2046_v3 = vld [vmem:[%s2506_s17 + $0x2c0] ss:$8 sps:$4 sm:$0xff]   ;;  %v2051_v4 = vld [vmem:[%s2506_s17 + $0x2b4] ss:$8 sps:$4 sm:$0xff]   ;;  %v2049_v5 = vld [vmem:[%s2506_s17 + $0x2b0] ss:$8 sps:$4 sm:$0xff]  }
  0x99   : > { %1416 = vmatprep.subr.bf16.mxu1 %v1961_v8  ;;  %v2054_v6 = vld [vmem:[%s2506_s17 + $0x2a4] ss:$8 sps:$4 sm:$0xff]   ;;  %v2052_v7 = vld [vmem:[%s2506_s17 + $0x2a0] ss:$8 sps:$4 sm:$0xff]   ;;  %v2057_v8 = vld [vmem:[%s2506_s17 + $0x294] ss:$8 sps:$4 sm:$0xff]  }
  0x9a   : > { %v742_v26 = vld [vmem:[#allocation2] sm:$0xff] }
  0x9b   : > { %1374 = vmatpush2.bf16.msra.mxu0 %v1963_v9  ;;  %v2055_v9 = vld [vmem:[%s2506_s17 + $0x290] ss:$8 sps:$4 sm:$0xff]  }
  0x9c   : > { %1417 = vmatpush2.bf16.msra.mxu1 %v1964_v10  ;;  %1375 = vmatprep.subr.bf16.mxu0 %v1965_v11  ;;  %v2060_v10 = vld [vmem:[%s2506_s17 + $0x284] ss:$8 sps:$4 sm:$0xff]   ;;  %v2058_v11 = vld [vmem:[%s2506_s17 + $0x280] ss:$8 sps:$4 sm:$0xff]  }
  0x9d   : > { %1418 = vmatprep.subr.bf16.mxu1 %v1967_v12  ;;  %v2061_v12 = vld [vmem:[%s2504_s19 + $0x10] ss:$24 sps:$4 sm:$0xff]  }
  0x9f   : > { %1376 = vmatpush2.bf16.msra.mxu0 %v1969_v13 }
  0xa0   : > { %1419 = vmatpush2.bf16.msra.mxu1 %v1970_v14  ;;  %1377 = vmatprep.subr.bf16.mxu0 %v1971_v15 }
  0xa1   : > { %1420 = vmatprep.subr.bf16.mxu1 %v1973_v16 }
  0xa3   : > { %1378 = vmatpush2.bf16.msra.mxu0 %v1975_v17 }
  0xa4   : > { %1421 = vmatpush2.bf16.msra.mxu1 %v1976_v18  ;;  %1379 = vmatprep.subr.bf16.mxu0 %v1977_v19 }
  0xa5   : > { %1422 = vmatprep.subr.bf16.mxu1 %v1979_v20 }
  0xa7   : > { %1380 = vmatpush2.bf16.msra.mxu0 %v1981_v21  ;;  %v741_v21 = vld [vmem:[#allocation2 + $0x10] sm:$0xff] }
  0xa8   : > { %1423 = vmatpush2.bf16.msra.mxu1 %v1982_v22  ;;  %1381 = vmatprep.subr.bf16.mxu0 %v1983_v23 }
  0xa9   : > { %1424 = vmatprep.subr.bf16.mxu1 %v1985_v25 }
  0xab   : > { %1382 = vmatpush2.bf16.msra.mxu0 %v1987_v27 }
  0xac   : > { %1425 = vmatpush2.bf16.msra.mxu1 %v1988_v28  ;;  %1383 = vmatprep.subr.bf16.mxu0 %v1989_v29 }
  0xad   : > { %1426 = vmatprep.subr.bf16.mxu1 %v1991_v30 }
  0xaf   : > { %1384 = vmatpush2.bf16.msra.mxu0 %v1993_v31  ;;  %v743_v31 = vld [vmem:[#allocation2 + $0x18] sm:$0xff] }
  0xb0   : > { %1427 = vmatpush2.bf16.msra.mxu1 %v1994_v32  ;;  %1385 = vmatprep.subr.bf16.mxu0 %v1995_v33 }
  0xb1   : > { %1428 = vmatprep.subr.bf16.mxu1 %v1997_v34 }
  0xb3   : > { %1386 = vmatpush2.bf16.msra.mxu0 %v1999_v35 }
  0xb4   : > { %1429 = vmatpush2.bf16.msra.mxu1 %v2000_v36  ;;  %1387 = vmatprep.subr.bf16.mxu0 %v2001_v37  ;;  %v744_v36 = vld [vmem:[#allocation2 + $0x8] sm:$0xff] }
  0xb5   : > { %1430 = vmatprep.subr.bf16.mxu1 %v2003_v38 }
  0xb7   : > { %1388 = vmatpush2.bf16.msra.mxu0 %v2005_v39 }
  0xb8   : > { %1431 = vmatpush2.bf16.msra.mxu1 %v2006_v40  ;;  %1443 = vmatprep.subr.bf16.mxu0 %v2015_v41 }
  0xba   : > { %1390 = vmatmul.mubr.bf16.vlgmr.msra.gmra.mxu0 %v2007_v42 }
  0xbb   : > { %1433 = vmatmul.mubr.bf16.vlgmr.msra.gmra.mxu1 %v2010_v43  ;;  %1444 = vmatpush1.bf16.msra.mxu0 %v2013_v44 }
  0xbc   : > { %1445 = vmatprep.subr.bf16.mxu0 %v2018_v45  ;;  %1475 = vmatprep.mubr.bf16.mxu0 %v2063_v46 }
  0xbf   : > { %1446 = vmatpush1.bf16.msra.mxu0 %v2016_v47 }
  0xc0   : > { %1447 = vmatprep.subr.bf16.mxu0 %v2021_v48 }
  0xc3   : > { %1448 = vmatpush1.bf16.msra.mxu0 %v2019_v49 }
  0xc4   : > { %1449 = vmatprep.subr.bf16.mxu0 %v2024_v50 }
  0xc7   : > { %1450 = vmatpush1.bf16.msra.mxu0 %v2022_v51 }
  0xc8   : > { %1451 = vmatprep.subr.bf16.mxu0 %v2027_v52 }
  0xcb   : > { %1452 = vmatpush1.bf16.msra.mxu0 %v2025_v53 }
  0xcc   : > { %1453 = vmatprep.subr.bf16.mxu0 %v2030_v54 }
  0xcf   : > { %1454 = vmatpush1.bf16.msra.mxu0 %v2028_v55 }
  0xd0   : > { %1455 = vmatprep.subr.bf16.mxu0 %v2033_v56 }
  0xd3   : > { %1456 = vmatpush1.bf16.msra.mxu0 %v2031_v57 }
  0xd4   : > { %1457 = vmatprep.subr.bf16.mxu0 %v2036_v58 }
  0xd7   : > { %1458 = vmatpush1.bf16.msra.mxu0 %v2034_v59 }
  0xd8   : > { %1459 = vmatprep.subr.bf16.mxu0 %v2039_v60 }
  0xdb   : > { %1460 = vmatpush2.bf16.msra.mxu0 %v2037_v61 }
  0xdc   : > { %1461 = vmatprep.subr.bf16.mxu0 %v2042_v62 }
  0xdf   : > { %1462 = vmatpush2.bf16.msra.mxu0 %v2040_v63 }
  0xe0   : > { %1463 = vmatprep.subr.bf16.mxu0 %v2045_v0 }
  0xe3   : > { %1464 = vmatpush2.bf16.msra.mxu0 %v2043_v1 }
  0xe4   : > { %1465 = vmatprep.subr.bf16.mxu0 %v2048_v2 }
  0xe7   : > { %1466 = vmatpush2.bf16.msra.mxu0 %v2046_v3 }
  0xe8   : > { %1467 = vmatprep.subr.bf16.mxu0 %v2051_v4 }
  0xeb   : > { %1468 = vmatpush2.bf16.msra.mxu0 %v2049_v5 }
  0xec   : > { %1469 = vmatprep.subr.bf16.mxu0 %v2054_v6 }
  0xef   : > { %1470 = vmatpush2.bf16.msra.mxu0 %v2052_v7 }
  0xf0   : > { %1471 = vmatprep.subr.bf16.mxu0 %v2057_v8 }
  0xf3   : > { %1472 = vmatpush2.bf16.msra.mxu0 %v2055_v9 }
  0xf4   : > { %1473 = vmatprep.subr.bf16.mxu0 %v2060_v10 }
  0xf7   : > { %1474 = vmatpush2.bf16.msra.mxu0 %v2058_v11 }
  0xfa   : > { %1476 = vmatmul.mubr.bf16.vlgmr.msra.gmra.mxu0 %v2061_v12 }
 0x17a   : > { %v1391_v13 = vpop.f32.mrf.mxu0 }
 0x17b   : > { %v1434_v14 = vpop.f32.mrf.mxu1 }
 0x17c   : > { %v1393_v15 = vpop.f32.mrf.mxu0  ;;  %v1435_v20 = vadd.f32 %v1434_v14, %v1391_v13 }
 0x17d   : > { %v1436_v16 = vpop.f32.mrf.mxu1 }
 0x17e   : > { %v1395_v17 = vpop.f32.mrf.mxu0  ;;  %v1437_v23 = vadd.f32 %v1436_v16, %v1393_v15 }
 0x17f   : > { %v1438_v18 = vpop.f32.mrf.mxu1 }
 0x180   : > { %v1397_v19 = vpop.f32.mrf.mxu0  ;;  %v1439_v28 = vadd.f32 %v1438_v18, %v1395_v17 }
 0x181   : > { %v1440_v25 = vpop.f32.mrf.mxu1 }
 0x182   : > { %v1441_v33 = vadd.f32 %v1440_v25, %v1397_v19 }
 0x1ba   : > { %v1477_v22 = vpop.f32.mrf.mxu0 }
 0x1bb   : > { %v1478_v24 = vadd.f32 %v1477_v22, %v1435_v20 }
 0x1bc   : > { %v1479_v27 = vpop.f32.mrf.mxu0 }
 0x1bd   : > { %v1486_v29 = vadd.f32 %v1478_v24, %v741_v21  ;;  %v1480_v30 = vadd.f32 %v1479_v27, %v1437_v23 }
 0x1be   : > { %v1481_v32 = vpop.f32.mrf.mxu0 }
 0x1bf   : > { %1490 = vst [vmem:[#allocation2 + $0x10] sm:$0xff] %v1486_v29  ;;  %v1487_v34 = vadd.f32 %v1480_v30, %v742_v26  ;;  %v1482_v35 = vadd.f32 %v1481_v32, %v1439_v28 }
 0x1c0   : > { %v1483_v37 = vpop.f32.mrf.mxu0 }
 0x1c1   : > { %1491 = vst [vmem:[#allocation2] sm:$0xff] %v1487_v34  ;;  %v1488_v38 = vadd.f32 %v1482_v35, %v743_v31  ;;  %v1484_v39 = vadd.f32 %v1483_v37, %v1441_v33  ;;  %1497 = sbr.rel (%p1809_p5) target bundleno = 470 (0x1d6), region = 105 }
 0x1c3   : > { %1492 = vst [vmem:[#allocation2 + $0x18] sm:$0xff] %v1488_v38  ;;  %v1489_v40 = vadd.f32 %v1484_v39, %v744_v36 }
 0x1c5   : > { %1493 = vst [vmem:[#allocation2 + $0x8] sm:$0xff] %v1489_v40 }
 0x1c6   : > { %v1504_v41 = vlaneseq  ;;  %v1502_v43 = vld [vmem:[%s724_s11] sm:$0x3]  ;;  %v1498_v45 = vld [vmem:[#allocation2 + $0x10] sm:$0xff] }
 0x1c7   : > { %v1518_v44 = vld [vmem:[%s729_s27] sm:$0x3] }
 0x1c8   : > { %v1505_v42 = vshrl.u32 %v1504_v41, 7  ;;  %v1499_v48 = vld [vmem:[#allocation2] sm:$0xff] }
 0x1ca   : > { %v1506_v46 = vsub.s32 0, %v1505_v42  ;;  %v1510_v47 = vsub.s32 1, %v1505_v42  ;;  %v1500_v49 = vld [vmem:[#allocation2 + $0x18] sm:$0xff] }
 0x1cc   : > { %v1501_v50 = vld [vmem:[#allocation2 + $0x8] sm:$0xff]  ;;  %v1507_v51 = vrot.slane %v1502_v43, %v1506_v46  ;;  %v1523_v52 = vrot.slane %v1518_v44, %v1506_v46  ;;  %v1511_v53 = vrot.slane %v1502_v43, %v1510_v47  ;;  %v1527_v54 = vrot.slane %v1518_v44, %v1510_v47 }
 0x1ce   : > { %v1514_v55 = vmul.f32 %v1507_v51, %v1498_v45  ;;  %v1515_v56 = vmul.f32 %v1511_v53, %v1499_v48  ;;  %v1516_v57 = vmul.f32 %v1507_v51, %v1500_v49  ;;  %v1517_v58 = vmul.f32 %v1511_v53, %v1501_v50 }
 0x1d0   : > { %v1530_v59 = vadd.f32 %v1523_v52, %v1514_v55  ;;  %v1531_v60 = vadd.f32 %v1527_v54, %v1515_v56  ;;  %v1532_v61 = vadd.f32 %v1523_v52, %v1516_v57  ;;  %v1533_v62 = vadd.f32 %v1527_v54, %v1517_v58 }
 0x1d2   : > { %v1534_v63 = vmax.f32 %v1530_v59, 0.0  ;;  %v1535_v0 = vmax.f32 %v1531_v60, 0.0  ;;  %v1536_v1 = vmax.f32 %v1532_v61, 0.0  ;;  %v1537_v2 = vmax.f32 %v1533_v62, 0.0 }
 0x1d4   : > { %1538 = vst [vmem:[%s2508_s15] sm:$0xff] %v1534_v63  ;;  %1539 = vst [vmem:[%s2508_s15 + $0x8] sm:$0xff] %v1535_v0 }
 0x1d5   : > { %1540 = vst [vmem:[%s2508_s15 + $0x10] sm:$0xff] %v1536_v1  ;;  %1541 = vst [vmem:[%s2508_s15 + $0x18] sm:$0xff] %v1537_v2 }
 0x1d6 PF: > { %1548 = sbr.rel (!%p2272_p12) target bundleno = 478 (0x1de), region = 109  ;;  %s1817_s21 = sshll.u32 (%p2272_p12), %s2138_s22, 4 }
 0x1d7   : > { %s1554_s29 = scalar_lea.vmem (%p2272_p12), %s2675_s4, %s1817_s21 }
 0x1db   : > { %v1567_v3 = vld [vmem:[%s2508_s15] sm:$0xff]  ;;  %v1569_v4 = vld [vmem:[%s2508_s15 + $0x8] sm:$0xff] }
 0x1dc   : > { %v1571_v5 = vld [vmem:[%s2508_s15 + $0x10] sm:$0xff]  ;;  %v1573_v6 = vld [vmem:[%s2508_s15 + $0x18] sm:$0xff]  ;;  %1568 = vst [vmem:[%s1554_s29] sm:$0xff] %v1567_v3  ;;  %1570 = vst [vmem:[%s1554_s29 + $0x8] sm:$0xff] %v1569_v4 }
 0x1dd   : > { %1572 = vst [vmem:[%s1554_s29 + $0x20] sm:$0xff] %v1571_v5  ;;  %1574 = vst [vmem:[%s1554_s29 + $0x28] sm:$0xff] %v1573_v6 }
 0x1de PF: > { %s14_s25 = sadd.s32 1, %s2150_s25   ;;  %s2687_s14 = sld [smem:[#allocation6_spill]] }
 0x1df   : > { %p11_p6 = scmp.ge.s32.totalorder %s14_s25, 14   ;;  %s2688_s30 = sld [smem:[#allocation7_spill]] }
 0x1e0   : > { %s2689_s15 = smov %s2114_s16  ;;  %s2690_s16 = smov %s2270_s13 }
 0x1e1   : > { %s2691_s17 = smov %s2122_s18  ;;  %s2692_s18 = smov %s2267_s12 }
 0x1e2   : > { %s2693_s19 = smov %s2130_s20  ;;  %s2694_s20 = smov %s2253_s7 }
 0x1e3   : > { %s2695_s21 = smov %s2142_s23  ;;  %s2696_s22 = smov %s2146_s24 }
 0x1e4   : > { %s2697_s23 = smov %s2687_s14  ;;  %13 = sbr.rel (!%p11_p6) target bundleno = 9 (0x9), region = 177 }
 0x1e5   : > { %s2698_s24 = smov %s2688_s30 }

// kernel: multitask_resnet_forward.41
= control target key start
LH: loop header
LB: loop body
LE: loop exit
PB: predicated region body
PF: predicated region fallthrough
CT: control target
= control target key end

     0   :  { %s686_s1 = inlined_call_operand.vmem [shape: bf16[512,128], index: 1, kind: input, shape index: {}]   ;;  %s687_s0 = inlined_call_operand.vmem [shape: bf16[16,512], index: 0, kind: input, shape index: {}]   ;;  %s688_s2 = inlined_call_operand.vmem [shape: f32[1,128], index: 2, kind: input, shape index: {}]   ;;  %s689_s3 = inlined_call_operand.vmem [shape: f32[1,128], index: 3, kind: input, shape index: {}]   ;;  %s690_s4 = inlined_call_operand.vmem [shape: f32[16,128], index: 4, kind: output, shape index: {}]  }
   0x1   :  { %v503_v0 = vld [vmem:[%s686_s1 + $0x78] sm:$0xff]   ;;  %v507_v4 = vld [vmem:[%s686_s1 + $0x70] sm:$0xff]   ;;  %v511_v8 = vld [vmem:[%s686_s1 + $0x68] sm:$0xff]  }
   0x2   :  { %v504_v1 = vld [vmem:[%s686_s1 + $0xf8] sm:$0xff]   ;;  %459 = vmatprep.subr.bf16.mxu0 %v503_v0  ;;  %v508_v5 = vld [vmem:[%s686_s1 + $0xf0] sm:$0xff]   ;;  %v512_v9 = vld [vmem:[%s686_s1 + $0xe8] sm:$0xff]  }
   0x3   :  { %v505_v2 = vld [vmem:[%s686_s1 + $0x38] sm:$0xff]   ;;  %481 = vmatprep.subr.bf16.mxu1 %v504_v1  ;;  %v509_v6 = vld [vmem:[%s686_s1 + $0x30] sm:$0xff]   ;;  %v513_v10 = vld [vmem:[%s686_s1 + $0x28] sm:$0xff]  }
   0x4   :  { %v506_v3 = vld [vmem:[%s686_s1 + $0xb8] sm:$0xff]   ;;  %460 = vmatpush3.bf16.msra.mxu0 %v505_v2  ;;  %v510_v7 = vld [vmem:[%s686_s1 + $0xb0] sm:$0xff]   ;;  %v514_v11 = vld [vmem:[%s686_s1 + $0xa8] sm:$0xff]  }
   0x5   :  { %482 = vmatpush3.bf16.msra.mxu1 %v506_v3  ;;  %461 = vmatprep.subr.bf16.mxu0 %v507_v4  ;;  %v515_v12 = vld [vmem:[%s686_s1 + $0x60] sm:$0xff]   ;;  %v519_v16 = vld [vmem:[%s686_s1 + $0x58] sm:$0xff]   ;;  %v523_v20 = vld [vmem:[%s686_s1 + $0x50] sm:$0xff]  }
   0x6   :  { %483 = vmatprep.subr.bf16.mxu1 %v508_v5  ;;  %v516_v13 = vld [vmem:[%s686_s1 + $0xe0] sm:$0xff]   ;;  %v520_v17 = vld [vmem:[%s686_s1 + $0xd8] sm:$0xff]   ;;  %v524_v21 = vld [vmem:[%s686_s1 + $0xd0] sm:$0xff]  }
   0x7   :  { %v517_v14 = vld [vmem:[%s686_s1 + $0x20] sm:$0xff]   ;;  %v521_v18 = vld [vmem:[%s686_s1 + $0x18] sm:$0xff]   ;;  %v525_v22 = vld [vmem:[%s686_s1 + $0x10] sm:$0xff]  }
   0x8   :  { %462 = vmatpush3.bf16.msra.mxu0 %v509_v6  ;;  %v518_v15 = vld [vmem:[%s686_s1 + $0xa0] sm:$0xff]   ;;  %v522_v19 = vld [vmem:[%s686_s1 + $0x98] sm:$0xff]   ;;  %v526_v23 = vld [vmem:[%s686_s1 + $0x90] sm:$0xff]  }
   0x9   :  { %484 = vmatpush3.bf16.msra.mxu1 %v510_v7  ;;  %463 = vmatprep.subr.bf16.mxu0 %v511_v8  ;;  %v527_v24 = vld [vmem:[%s686_s1 + $0x48] sm:$0xff]   ;;  %v531_v28 = vld [vmem:[%s686_s1 + $0x40] sm:$0xff]  }
   0xa   :  { %485 = vmatprep.subr.bf16.mxu1 %v512_v9  ;;  %v528_v25 = vld [vmem:[%s686_s1 + $0xc8] sm:$0xff]   ;;  %v532_v29 = vld [vmem:[%s686_s1 + $0xc0] sm:$0xff]  }
   0xb   :  { %v529_v26 = vld [vmem:[%s686_s1 + $0x8] sm:$0xff]   ;;  %v533_v30 = vld [vmem:[%s686_s1] sm:$0xff]  }
   0xc   :  { %464 = vmatpush3.bf16.msra.mxu0 %v513_v10  ;;  %v530_v27 = vld [vmem:[%s686_s1 + $0x88] sm:$0xff]   ;;  %v534_v31 = vld [vmem:[%s686_s1 + $0x80] sm:$0xff]  }
   0xd   :  { %486 = vmatpush3.bf16.msra.mxu1 %v514_v11  ;;  %465 = vmatprep.subr.bf16.mxu0 %v515_v12  ;;  %v535_v32 = vld [vmem:[%s687_s0] ss:$16 sps:$4 sm:$0xff]   ;;  %v537_v33 = vld [vmem:[%s687_s0 + $0x4] ss:$16 sps:$4 sm:$0xff]   ;;  %v538_v34 = vld [vmem:[%s687_s0 + $0x8] ss:$16 sps:$4 sm:$0xff]  }
   0xe   :  { %487 = vmatprep.subr.bf16.mxu1 %v516_v13  ;;  %v540_v35 = vld [vmem:[%s687_s0 + $0xc] ss:$16 sps:$4 sm:$0xff]   ;;  %338 = vmatprep.mubr.bf16.mxu0 %v537_v33  ;;  %v457_v43 = vld [vmem:[%s688_s2] ss:$0 sm:$0xff] }
   0xf   :  { %379 = vmatprep.mubr.bf16.mxu1 %v540_v35  ;;  %v458_v47 = vld [vmem:[%s689_s3] ss:$0 sm:$0xff] }
  0x10   :  { %466 = vmatpush3.bf16.msra.mxu0 %v517_v14 }
  0x11   :  { %488 = vmatpush3.bf16.msra.mxu1 %v518_v15  ;;  %467 = vmatprep.subr.bf16.mxu0 %v519_v16 }
  0x12   :  { %489 = vmatprep.subr.bf16.mxu1 %v520_v17 }
  0x14   :  { %468 = vmatpush3.bf16.msra.mxu0 %v521_v18 }
  0x15   :  { %490 = vmatpush3.bf16.msra.mxu1 %v522_v19  ;;  %469 = vmatprep.subr.bf16.mxu0 %v523_v20 }
  0x16   :  { %491 = vmatprep.subr.bf16.mxu1 %v524_v21 }
  0x18   :  { %470 = vmatpush3.bf16.msra.mxu0 %v525_v22 }
  0x19   :  { %492 = vmatpush3.bf16.msra.mxu1 %v526_v23  ;;  %471 = vmatprep.subr.bf16.mxu0 %v527_v24 }
  0x1a   :  { %493 = vmatprep.subr.bf16.mxu1 %v528_v25 }
  0x1c   :  { %472 = vmatpush3.bf16.msra.mxu0 %v529_v26 }
  0x1d   :  { %494 = vmatpush3.bf16.msra.mxu1 %v530_v27  ;;  %473 = vmatprep.subr.bf16.mxu0 %v531_v28 }
  0x1e   :  { %495 = vmatprep.subr.bf16.mxu1 %v532_v29 }
  0x20   :  { %474 = vmatpush3.bf16.msra.mxu0 %v533_v30 }
  0x21   :  { %496 = vmatpush3.bf16.msra.mxu1 %v534_v31 }
  0x23   :  { %339 = vmatmul.mubr.bf16.vlgmr.msra.gmra.mxu0 %v535_v32 }
  0x24   :  { %380 = vmatmul.mubr.bf16.vlgmr.msra.gmra.mxu1 %v538_v34 }
  0xe3   :  { %v475_v36 = vpop.f32.mrf.mxu0 }
  0xe4   :  { %v497_v37 = vpop.f32.mrf.mxu1 }
  0xe5   :  { %v476_v38 = vpop.f32.mrf.mxu0 }
  0xe6   :  { %v477_v39 = vadd.f32 %v476_v38, %v475_v36  ;;  %v498_v40 = vpop.f32.mrf.mxu1 }
  0xe7   :  { %v499_v41 = vadd.f32 %v498_v40, %v497_v37  ;;  %v478_v42 = vpop.f32.mrf.mxu0 }
  0xe8   :  { %v500_v44 = vpop.f32.mrf.mxu1 }
  0xe9   :  { %v382_v45 = vadd.f32 %v499_v41, %v477_v39  ;;  %v479_v46 = vpop.f32.mrf.mxu0 }
  0xea   :  { %v480_v48 = vadd.f32 %v479_v46, %v478_v42  ;;  %v501_v49 = vpop.f32.mrf.mxu1 }
  0xeb   :  { %v404_v50 = vmul.f32 %v457_v43, %v382_v45  ;;  %v502_v51 = vadd.f32 %v501_v49, %v500_v44 }
  0xed   :  { %v413_v52 = vadd.f32 %v458_v47, %v404_v50  ;;  %v385_v53 = vadd.f32 %v502_v51, %v480_v48 }
  0xef   :  { %415 = vst [vmem:[%s690_s4] sm:$0xff] %v413_v52  ;;  %v405_v54 = vmul.f32 %v457_v43, %v385_v53 }
  0xf1   :  { %v414_v55 = vadd.f32 %v458_v47, %v405_v54 }
  0xf3   :  { %416 = vst [vmem:[%s690_s4 + $0x8] sm:$0xff] %v414_v55 }

</bundles_post_ra>
